<compile_context>
chip_gen: v6e
topology: v6e:2x2x1
jax: 0.10.0
libtpu: 0.0.40
codegen_flags: <defaults>
</compile_context>

<pallas_src>
import functools

import jax
import jax.numpy as jnp
from jax import lax
from jax.experimental import pallas as pl
from jax.experimental.pallas import tpu as pltpu


# ---------------------------------------------------------------------------
# Pallas kernels
# ---------------------------------------------------------------------------

def _front_kernel(x_ref, w1_ref, b1_ref, o_ref, rs_ref, pool_ref, *, oh, ow):
    """Fused AvgPool2d(5,3) + pad + 1x1 conv (BN folded) + ReLU + pad.

    x_ref   : (NB, H, W, Cin) f32          w1_ref : (Cin, C1) f32 (BN scale folded)
    b1_ref  : (1, C1) f32                  o_ref  : (NB, oh+4, OWP_PAD, C1) bf16
    rs_ref  : (NB, oh, W, Cin) f32 scratch (row-phase partial sums)
    pool_ref: (NB, oh, ow, Cin) f32 scratch (pooled activations)
    """
    nb, _, _, cin = x_ref.shape
    c1 = w1_ref.shape[1]
    ohp = o_ref.shape[1]
    owp_pad = o_ref.shape[2]

    # --- AvgPool2d(5, 3): separable two-phase reduction, vectorized over (NB, *, Cin).
    # Row phase: rs[:, oi] = sum of the 5 input rows starting at 3*oi.
    for oi in range(oh):
        r0 = 3 * oi
        rs_ref[:, oi, :, :] = (x_ref[:, r0, :, :] + x_ref[:, r0 + 1, :, :]
                               + x_ref[:, r0 + 2, :, :] + x_ref[:, r0 + 3, :, :]
                               + x_ref[:, r0 + 4, :, :])
    # Column phase: pool[:, :, oj] = sum of the 5 row-sum columns starting at 3*oj.
    for oj in range(ow):
        c0 = 3 * oj
        pool_ref[:, :, oj, :] = (rs_ref[:, :, c0, :] + rs_ref[:, :, c0 + 1, :]
                                 + rs_ref[:, :, c0 + 2, :] + rs_ref[:, :, c0 + 3, :]
                                 + rs_ref[:, :, c0 + 4, :])
    pooled = pool_ref[...] * (1.0 / 25.0)                        # (NB, oh, ow, Cin)

    # --- 1x1 conv (BN scale folded into w1) + bias + ReLU: one (M, Cin)@(Cin, C1) matmul.
    b1 = b1_ref[...]                                             # (1, C1)
    y = jnp.dot(pooled.reshape(nb * oh * ow, cin), w1_ref[...],
                preferred_element_type=jnp.float32)
    y = jnp.maximum(y + b1, 0.0)                                 # (NB*oh*ow, C1)

    # --- conv2-ready padded activation:
    #   ring r,c in [1, oh+2] x [1, ow+2] -> conv1 zero-pad border -> value relu(bias1)
    #   outermost ring / width padding    -> conv2 zero-pad        -> 0
    #   interior [2, 2+oh) x [2, 2+ow)    -> y
    relu_b1 = jnp.maximum(b1, 0.0).reshape(1, 1, c1)
    r = lax.broadcasted_iota(jnp.int32, (ohp, owp_pad, c1), 0)
    c = lax.broadcasted_iota(jnp.int32, (ohp, owp_pad, c1), 1)
    ring = (r >= 1) & (r <= oh + 2) & (c >= 1) & (c <= ow + 2)
    border = jnp.where(ring, relu_b1, 0.0)                       # (ohp, owp_pad, C1)
    o_ref[...] = jnp.broadcast_to(border[None], (nb, ohp, owp_pad, c1)).astype(o_ref.dtype)
    o_ref[:, 2:2 + oh, 2:2 + ow, :] = y.reshape(nb, oh, ow, c1).astype(o_ref.dtype)


def _back_kernel(y_ref, w2_ref, b2_ref, wfc_ref, o_ref, p_ref, *, oh, ow):
    """Fused im2col + 5x5 conv (BN folded, bf16 long-K matmul) + bias + ReLU + GAP +
    partial FC for one C2-channel block and one batch block.

    y_ref : (NBB, oh+4, OWP_PAD, C1) bf16   w2_ref : (25*C1, C2_BLK) bf16 (BN folded)
    b2_ref: (1, C2_BLK) f32                 wfc_ref: (C2_BLK, OUTP) f32
    o_ref : (1, NBB, OUTP) f32              p_ref  : (NBB*oh*ow, 25*C1) bf16 scratch
    """
    nbb = y_ref.shape[0]
    c1 = y_ref.shape[-1]
    spatial = oh * ow
    m = nbb * spatial

    # im2col straight from the compact padded activation resident in VMEM.  Rebuilt
    # every grid step (cheap) so every step stays independent and both grid axes can
    # be "parallel" (sharded across the two v7x TensorCores).
    for ki in range(5):
        for kj in range(5):
            t = 5 * ki + kj
            patch = y_ref[:, ki:ki + oh, kj:kj + ow, :]          # (NBB, oh, ow, C1)
            p_ref[:, t * c1:(t + 1) * c1] = patch.reshape(m, c1)

    # 5x5 conv for this channel block: one long-K bf16 matmul, f32 accumulation.
    z = jnp.dot(p_ref[...], w2_ref[...], preferred_element_type=jnp.float32)
    z = jnp.maximum(z + b2_ref[...], 0.0)                        # (M, C2_BLK)

    # Global average pool + this channel block's partial FC contribution.
    pooled = jnp.mean(z.reshape(nbb, spatial, z.shape[1]), axis=1)   # (NBB, C2_BLK)
    o_ref[0] = jnp.dot(pooled, wfc_ref[...], preferred_element_type=jnp.float32)


# ---------------------------------------------------------------------------
# pallas_call wrappers
# ---------------------------------------------------------------------------

def _largest_divisor_leq(n, cap):
    for d in range(min(n, cap), 0, -1):
        if n % d == 0:
            return d
    return 1


def front_pass(x_nhwc, w1f, b1):
    n, h, w, cin = x_nhwc.shape
    oh = (h - 5) // 3 + 1
    ow = (w - 5) // 3 + 1
    c1 = w1f.shape[1]
    ohp = oh + 4
    owp_pad = -(-(ow + 4) // 16) * 16      # pad width to a full packed bf16 sublane tile

    # Fatter grid steps (amortize per-step overhead, larger-M 1x1 matmul) while keeping
    # the per-step input block comfortably inside scoped VMEM.
    cap = 8
    while cap > 1 and cap * h * w * cin * 4 > 4 * 1024 * 1024:
        cap //= 2
    nb = _largest_divisor_leq(n, cap)

    flops = 2 * n * oh * ow * cin * c1 + 10 * n * oh * ow * cin
    bytes_accessed = (x_nhwc.size * 4 + w1f.size * 4 + b1.size * 4
                      + n * ohp * owp_pad * c1 * 2)

    return pl.pallas_call(
        functools.partial(_front_kernel, oh=oh, ow=ow),
        out_shape=jax.ShapeDtypeStruct((n, ohp, owp_pad, c1), jnp.bfloat16),
        grid=(n // nb,),
        in_specs=[
            pl.BlockSpec((nb, h, w, cin), lambda i: (i, 0, 0, 0)),
            pl.BlockSpec((cin, c1), lambda i: (0, 0)),
            pl.BlockSpec((1, c1), lambda i: (0, 0)),
        ],
        out_specs=pl.BlockSpec((nb, ohp, owp_pad, c1), lambda i: (i, 0, 0, 0)),
        scratch_shapes=[
            pltpu.VMEM((nb, oh, w, cin), jnp.float32),
            pltpu.VMEM((nb, oh, ow, cin), jnp.float32),
        ],
        compiler_params=pltpu.CompilerParams(
            dimension_semantics=("parallel",),
            vmem_limit_bytes=32 * 1024 * 1024),
        cost_estimate=pl.CostEstimate(flops=flops, transcendentals=0,
                                      bytes_accessed=bytes_accessed),
    )(x_nhwc, w1f, b1)


def back_pass(y1p, w2f, b2, wfc, oh, ow, *, c2_block=256):
    n, ohp, owp_pad, c1 = y1p.shape
    kdim, c2 = w2f.shape                    # (25*C1, 768)
    outp = wfc.shape[1]
    spatial = oh * ow

    c2_block = min(c2_block, c2)
    assert c2 % c2_block == 0 and c2_block % 128 == 0
    nc2 = c2 // c2_block

    # Batch (M-row) blocking: whole batch for small N; multiples of 8 otherwise so the
    # per-step output block keeps a dense sublane layout.
    if n <= 8:
        nbb = n
    else:
        nbb = next((d for d in (32, 24, 16, 8) if n % d == 0), n)
    nmb = n // nbb

    flops = 2 * n * spatial * kdim * c2 + 2 * n * c2 * outp
    bytes_accessed = (y1p.size * 2 * nc2 + w2f.size * 2 * nmb + b2.size * 4
                      + wfc.size * 4 + nc2 * n * outp * 4)

    partials = pl.pallas_call(
        functools.partial(_back_kernel, oh=oh, ow=ow),
        out_shape=jax.ShapeDtypeStruct((nc2, n, outp), jnp.float32),
        grid=(nc2, nmb),
        in_specs=[
            pl.BlockSpec((nbb, ohp, owp_pad, c1), lambda j, i: (i, 0, 0, 0)),
            pl.BlockSpec((kdim, c2_block), lambda j, i: (0, j)),
            pl.BlockSpec((1, c2_block), lambda j, i: (0, j)),
            pl.BlockSpec((c2_block, outp), lambda j, i: (j, 0)),
        ],
        out_specs=pl.BlockSpec((1, nbb, outp), lambda j, i: (j, i, 0)),
        scratch_shapes=[pltpu.VMEM((nbb * spatial, kdim), jnp.bfloat16)],
        compiler_params=pltpu.CompilerParams(
            dimension_semantics=("parallel", "parallel"),
            vmem_limit_bytes=32 * 1024 * 1024),
        cost_estimate=pl.CostEstimate(flops=flops, transcendentals=0,
                                      bytes_accessed=bytes_accessed),
    )(y1p, w2f, b2, wfc)
    return partials.sum(axis=0)


# ---------------------------------------------------------------------------
# AuxClassifier forward
# ---------------------------------------------------------------------------

def aux_classifier_forward(x_nchw, params):
    x = jnp.transpose(x_nchw, (0, 2, 3, 1)).astype(jnp.float32)   # NCHW -> NHWC
    _, h, w, _ = x.shape
    oh = (h - 5) // 3 + 1
    ow = (w - 5) // 3 + 1

    # Fold inference-mode BN scale into the conv weights (bias stays in the epilogue).
    w1f = params["w1"] * params["scale1"]                                       # (Cin, 128)
    c2 = params["w2"].shape[-1]
    w2f = (params["w2"] * params["scale2"][0]).reshape(-1, c2).astype(jnp.bfloat16)

    # Kernel 1: avgpool + 1x1 conv + ReLU -> conv2-ready padded bf16 activation.
    y1p = front_pass(x, w1f, params["bias1"])            # (N, oh+4, OWP_PAD, 128) bf16

    # Kernel 2: fused im2col + 5x5 conv (long-K bf16 matmul) + bias + ReLU + GAP + FC.
    out = back_pass(y1p, w2f, params["bias2"], params["wfc"], oh, ow)
    return out + params["bfc"]


# ---------------------------------------------------------------------------
# Deterministic parameter init (synthetic; shapes from the module's __init__)
# ---------------------------------------------------------------------------

def init_params(key, inp, outp, eps=1e-3):
    ks = jax.random.split(key, 12)
    w1 = jax.random.normal(ks[0], (inp, 128), jnp.float32) * (2.0 / inp) ** 0.5
    g1 = jax.random.uniform(ks[1], (128,), jnp.float32, 0.5, 1.5)
    b1 = jax.random.normal(ks[2], (128,), jnp.float32) * 0.1
    m1 = jax.random.normal(ks[3], (128,), jnp.float32) * 0.1
    v1 = jax.random.uniform(ks[4], (128,), jnp.float32, 0.5, 1.5)
    w2 = jax.random.normal(ks[5], (5, 5, 128, 768), jnp.float32) * (2.0 / (5 * 5 * 128)) ** 0.5
    g2 = jax.random.uniform(ks[6], (768,), jnp.float32, 0.5, 1.5)
    b2 = jax.random.normal(ks[7], (768,), jnp.float32) * 0.1
    m2 = jax.random.normal(ks[8], (768,), jnp.float32) * 0.1
    v2 = jax.random.uniform(ks[9], (768,), jnp.float32, 0.5, 1.5)
    wfc = jax.random.normal(ks[10], (768, outp), jnp.float32) * (1.0 / 768) ** 0.5
    bfc = jax.random.normal(ks[11], (outp,), jnp.float32) * 0.1
    # Fold inference-mode BatchNorm into per-channel scale/bias.
    scale1 = g1 / jnp.sqrt(v1 + eps)
    bias1 = b1 - m1 * scale1
    scale2 = g2 / jnp.sqrt(v2 + eps)
    bias2 = b2 - m2 * scale2
    return dict(
        w1=w1, scale1=scale1[None, :], bias1=bias1[None, :],
        w2=w2, scale2=scale2[None, :], bias2=bias2[None, :],
        wfc=wfc, bfc=bfc[None, :],
    )


# ---------------------------------------------------------------------------
# Pure-JAX reference (NCHW, mirrors the PyTorch forward) for a sanity check
# ---------------------------------------------------------------------------

def reference_forward(x_nchw, params):
    hp = lax.Precision.HIGHEST
    x = x_nchw.astype(jnp.float32)
    p = lax.reduce_window(x, 0.0, lax.add, (1, 1, 5, 5), (1, 1, 3, 3), "VALID") / 25.0
    w1_oihw = jnp.transpose(params["w1"], (1, 0))[:, :, None, None]
    y = lax.conv_general_dilated(p, w1_oihw, (1, 1), ((1, 1), (1, 1)),
                                 dimension_numbers=("NCHW", "OIHW", "NCHW"), precision=hp)
    y = y * params["scale1"][0][None, :, None, None] + params["bias1"][0][None, :, None, None]
    y = jnp.maximum(y, 0.0)
    w2_oihw = jnp.transpose(params["w2"], (3, 2, 0, 1))
    z = lax.conv_general_dilated(y, w2_oihw, (1, 1), ((1, 1), (1, 1)),
                                 dimension_numbers=("NCHW", "OIHW", "NCHW"), precision=hp)
    z = z * params["scale2"][0][None, :, None, None] + params["bias2"][0][None, :, None, None]
    z = jnp.maximum(z, 0.0)
    pooled = jnp.mean(z, axis=(2, 3))
    return jnp.dot(pooled, params["wfc"], precision=hp) + params["bfc"]


if __name__ == "__main__":
    N, INP, H, W, OUTP = 2, 4, 16, 16, 10
    key = jax.random.PRNGKey(0)
    k_x, k_p = jax.random.split(key)
    x = jax.random.normal(k_x, (N, INP, H, W), jnp.float32)
    params = init_params(k_p, INP, OUTP)

    out = jax.jit(aux_classifier_forward)(x, params)
    out = jax.block_until_ready(out)
    assert out.shape == (N, OUTP), out.shape

    ref = reference_forward(x, params)
    max_err = float(jnp.max(jnp.abs(out - ref)))
    if not bool(jnp.allclose(out, ref, atol=2e-2, rtol=2e-2)):
        raise AssertionError(f"Pallas output mismatch vs reference, max abs err = {max_err}")

    print("KERNEL_OK")
</pallas_src>

<mosaic_0001>
module attributes {stable_mosaic.version = 11 : i64} {
  func.func @_front_kernel(%arg0: i32, %arg1: memref<2x16x16x4xf32, #tpu.memory_space<vmem>>, %arg2: memref<4x128xf32, #tpu.memory_space<vmem>>, %arg3: memref<1x128xf32, #tpu.memory_space<vmem>>, %arg4: memref<2x8x16x128xbf16, #tpu.memory_space<vmem>>, %arg5: memref<2x4x16x4xf32, #tpu.memory_space<vmem>>, %arg6: memref<2x4x4x4xf32, #tpu.memory_space<vmem>>) attributes {dimension_semantics = [#tpu.dimension_semantics<parallel>], iteration_bounds = array<i64: 1>, scalar_prefetch = 0 : i64, scratch_operands = 2 : i64, tpu.core_type = #tpu.core_type<tc>, window_params = [{transform_indices = @transform_0, window_bounds = array<i64: 2, 16, 16, 4>}, {pipeline_mode = #tpu.pipeline_mode<synchronous>, transform_indices = @transform_1, window_bounds = array<i64: 4, 128>}, {pipeline_mode = #tpu.pipeline_mode<synchronous>, transform_indices = @transform_2, window_bounds = array<i64: 1, 128>}, {transform_indices = @transform_3, window_bounds = array<i64: 2, 8, 16, 128>}]} {
    %c0 = arith.constant 0 : index
    %c0_0 = arith.constant 0 : index
    %c0_1 = arith.constant 0 : index
    %c0_2 = arith.constant 0 : index
    %0 = vector.load %arg1[%c0, %c0_0, %c0_1, %c0_2] : memref<2x16x16x4xf32, #tpu.memory_space<vmem>>, vector<2x1x16x4xf32>
    %1 = vector.shape_cast %0 : vector<2x1x16x4xf32> to vector<2x16x4xf32>
    %c0_3 = arith.constant 0 : index
    %c1 = arith.constant 1 : index
    %c0_4 = arith.constant 0 : index
    %c0_5 = arith.constant 0 : index
    %2 = vector.load %arg1[%c0_3, %c1, %c0_4, %c0_5] : memref<2x16x16x4xf32, #tpu.memory_space<vmem>>, vector<2x1x16x4xf32>
    %3 = vector.shape_cast %2 : vector<2x1x16x4xf32> to vector<2x16x4xf32>
    %4 = arith.addf %1, %3 : vector<2x16x4xf32>
    %c0_6 = arith.constant 0 : index
    %c2 = arith.constant 2 : index
    %c0_7 = arith.constant 0 : index
    %c0_8 = arith.constant 0 : index
    %5 = vector.load %arg1[%c0_6, %c2, %c0_7, %c0_8] : memref<2x16x16x4xf32, #tpu.memory_space<vmem>>, vector<2x1x16x4xf32>
    %6 = vector.shape_cast %5 : vector<2x1x16x4xf32> to vector<2x16x4xf32>
    %7 = arith.addf %4, %6 : vector<2x16x4xf32>
    %c0_9 = arith.constant 0 : index
    %c3 = arith.constant 3 : index
    %c0_10 = arith.constant 0 : index
    %c0_11 = arith.constant 0 : index
    %8 = vector.load %arg1[%c0_9, %c3, %c0_10, %c0_11] : memref<2x16x16x4xf32, #tpu.memory_space<vmem>>, vector<2x1x16x4xf32>
    %9 = vector.shape_cast %8 : vector<2x1x16x4xf32> to vector<2x16x4xf32>
    %10 = arith.addf %7, %9 : vector<2x16x4xf32>
    %c0_12 = arith.constant 0 : index
    %c4 = arith.constant 4 : index
    %c0_13 = arith.constant 0 : index
    %c0_14 = arith.constant 0 : index
    %11 = vector.load %arg1[%c0_12, %c4, %c0_13, %c0_14] : memref<2x16x16x4xf32, #tpu.memory_space<vmem>>, vector<2x1x16x4xf32>
    %12 = vector.shape_cast %11 : vector<2x1x16x4xf32> to vector<2x16x4xf32>
    %13 = arith.addf %10, %12 : vector<2x16x4xf32>
    %c0_15 = arith.constant 0 : index
    %c0_16 = arith.constant 0 : index
    %c0_17 = arith.constant 0 : index
    %c0_18 = arith.constant 0 : index
    %14 = vector.load %arg5[%c0_15, %c0_16, %c0_17, %c0_18] : memref<2x4x16x4xf32, #tpu.memory_space<vmem>>, vector<2x1x16x4xf32>
    %15 = vector.shape_cast %14 : vector<2x1x16x4xf32> to vector<2x16x4xf32>
    %16 = vector.shape_cast %13 : vector<2x16x4xf32> to vector<2x1x16x4xf32>
    tpu.vector_store %arg5[%c0_15, %c0_16, %c0_17, %c0_18], %16 {strides = array<i32>} : memref<2x4x16x4xf32, #tpu.memory_space<vmem>>, vector<2x1x16x4xf32>,
    %c0_19 = arith.constant 0 : index
    %c3_20 = arith.constant 3 : index
    %c0_21 = arith.constant 0 : index
    %c0_22 = arith.constant 0 : index
    %17 = vector.load %arg1[%c0_19, %c3_20, %c0_21, %c0_22] : memref<2x16x16x4xf32, #tpu.memory_space<vmem>>, vector<2x1x16x4xf32>
    %18 = vector.shape_cast %17 : vector<2x1x16x4xf32> to vector<2x16x4xf32>
    %c0_23 = arith.constant 0 : index
    %c4_24 = arith.constant 4 : index
    %c0_25 = arith.constant 0 : index
    %c0_26 = arith.constant 0 : index
    %19 = vector.load %arg1[%c0_23, %c4_24, %c0_25, %c0_26] : memref<2x16x16x4xf32, #tpu.memory_space<vmem>>, vector<2x1x16x4xf32>
    %20 = vector.shape_cast %19 : vector<2x1x16x4xf32> to vector<2x16x4xf32>
    %21 = arith.addf %18, %20 : vector<2x16x4xf32>
    %c0_27 = arith.constant 0 : index
    %c5 = arith.constant 5 : index
    %c0_28 = arith.constant 0 : index
    %c0_29 = arith.constant 0 : index
    %22 = vector.load %arg1[%c0_27, %c5, %c0_28, %c0_29] : memref<2x16x16x4xf32, #tpu.memory_space<vmem>>, vector<2x1x16x4xf32>
    %23 = vector.shape_cast %22 : vector<2x1x16x4xf32> to vector<2x16x4xf32>
    %24 = arith.addf %21, %23 : vector<2x16x4xf32>
    %c0_30 = arith.constant 0 : index
    %c6 = arith.constant 6 : index
    %c0_31 = arith.constant 0 : index
    %c0_32 = arith.constant 0 : index
    %25 = vector.load %arg1[%c0_30, %c6, %c0_31, %c0_32] : memref<2x16x16x4xf32, #tpu.memory_space<vmem>>, vector<2x1x16x4xf32>
    %26 = vector.shape_cast %25 : vector<2x1x16x4xf32> to vector<2x16x4xf32>
    %27 = arith.addf %24, %26 : vector<2x16x4xf32>
    %c0_33 = arith.constant 0 : index
    %c7 = arith.constant 7 : index
    %c0_34 = arith.constant 0 : index
    %c0_35 = arith.constant 0 : index
    %28 = vector.load %arg1[%c0_33, %c7, %c0_34, %c0_35] : memref<2x16x16x4xf32, #tpu.memory_space<vmem>>, vector<2x1x16x4xf32>
    %29 = vector.shape_cast %28 : vector<2x1x16x4xf32> to vector<2x16x4xf32>
    %30 = arith.addf %27, %29 : vector<2x16x4xf32>
    %c0_36 = arith.constant 0 : index
    %c1_37 = arith.constant 1 : index
    %c0_38 = arith.constant 0 : index
    %c0_39 = arith.constant 0 : index
    %31 = vector.load %arg5[%c0_36, %c1_37, %c0_38, %c0_39] : memref<2x4x16x4xf32, #tpu.memory_space<vmem>>, vector<2x1x16x4xf32>
    %32 = vector.shape_cast %31 : vector<2x1x16x4xf32> to vector<2x16x4xf32>
    %33 = vector.shape_cast %30 : vector<2x16x4xf32> to vector<2x1x16x4xf32>
    tpu.vector_store %arg5[%c0_36, %c1_37, %c0_38, %c0_39], %33 {strides = array<i32>} : memref<2x4x16x4xf32, #tpu.memory_space<vmem>>, vector<2x1x16x4xf32>,
    %c0_40 = arith.constant 0 : index
    %c6_41 = arith.constant 6 : index
    %c0_42 = arith.constant 0 : index
    %c0_43 = arith.constant 0 : index
    %34 = vector.load %arg1[%c0_40, %c6_41, %c0_42, %c0_43] : memref<2x16x16x4xf32, #tpu.memory_space<vmem>>, vector<2x1x16x4xf32>
    %35 = vector.shape_cast %34 : vector<2x1x16x4xf32> to vector<2x16x4xf32>
    %c0_44 = arith.constant 0 : index
    %c7_45 = arith.constant 7 : index
    %c0_46 = arith.constant 0 : index
    %c0_47 = arith.constant 0 : index
    %36 = vector.load %arg1[%c0_44, %c7_45, %c0_46, %c0_47] : memref<2x16x16x4xf32, #tpu.memory_space<vmem>>, vector<2x1x16x4xf32>
    %37 = vector.shape_cast %36 : vector<2x1x16x4xf32> to vector<2x16x4xf32>
    %38 = arith.addf %35, %37 : vector<2x16x4xf32>
    %c0_48 = arith.constant 0 : index
    %c8 = arith.constant 8 : index
    %c0_49 = arith.constant 0 : index
    %c0_50 = arith.constant 0 : index
    %39 = vector.load %arg1[%c0_48, %c8, %c0_49, %c0_50] : memref<2x16x16x4xf32, #tpu.memory_space<vmem>>, vector<2x1x16x4xf32>
    %40 = vector.shape_cast %39 : vector<2x1x16x4xf32> to vector<2x16x4xf32>
    %41 = arith.addf %38, %40 : vector<2x16x4xf32>
    %c0_51 = arith.constant 0 : index
    %c9 = arith.constant 9 : index
    %c0_52 = arith.constant 0 : index
    %c0_53 = arith.constant 0 : index
    %42 = vector.load %arg1[%c0_51, %c9, %c0_52, %c0_53] : memref<2x16x16x4xf32, #tpu.memory_space<vmem>>, vector<2x1x16x4xf32>
    %43 = vector.shape_cast %42 : vector<2x1x16x4xf32> to vector<2x16x4xf32>
    %44 = arith.addf %41, %43 : vector<2x16x4xf32>
    %c0_54 = arith.constant 0 : index
    %c10 = arith.constant 10 : index
    %c0_55 = arith.constant 0 : index
    %c0_56 = arith.constant 0 : index
    %45 = vector.load %arg1[%c0_54, %c10, %c0_55, %c0_56] : memref<2x16x16x4xf32, #tpu.memory_space<vmem>>, vector<2x1x16x4xf32>
    %46 = vector.shape_cast %45 : vector<2x1x16x4xf32> to vector<2x16x4xf32>
    %47 = arith.addf %44, %46 : vector<2x16x4xf32>
    %c0_57 = arith.constant 0 : index
    %c2_58 = arith.constant 2 : index
    %c0_59 = arith.constant 0 : index
    %c0_60 = arith.constant 0 : index
    %48 = vector.load %arg5[%c0_57, %c2_58, %c0_59, %c0_60] : memref<2x4x16x4xf32, #tpu.memory_space<vmem>>, vector<2x1x16x4xf32>
    %49 = vector.shape_cast %48 : vector<2x1x16x4xf32> to vector<2x16x4xf32>
    %50 = vector.shape_cast %47 : vector<2x16x4xf32> to vector<2x1x16x4xf32>
    tpu.vector_store %arg5[%c0_57, %c2_58, %c0_59, %c0_60], %50 {strides = array<i32>} : memref<2x4x16x4xf32, #tpu.memory_space<vmem>>, vector<2x1x16x4xf32>,
    %c0_61 = arith.constant 0 : index
    %c9_62 = arith.constant 9 : index
    %c0_63 = arith.constant 0 : index
    %c0_64 = arith.constant 0 : index
    %51 = vector.load %arg1[%c0_61, %c9_62, %c0_63, %c0_64] : memref<2x16x16x4xf32, #tpu.memory_space<vmem>>, vector<2x1x16x4xf32>
    %52 = vector.shape_cast %51 : vector<2x1x16x4xf32> to vector<2x16x4xf32>
    %c0_65 = arith.constant 0 : index
    %c10_66 = arith.constant 10 : index
    %c0_67 = arith.constant 0 : index
    %c0_68 = arith.constant 0 : index
    %53 = vector.load %arg1[%c0_65, %c10_66, %c0_67, %c0_68] : memref<2x16x16x4xf32, #tpu.memory_space<vmem>>, vector<2x1x16x4xf32>
    %54 = vector.shape_cast %53 : vector<2x1x16x4xf32> to vector<2x16x4xf32>
    %55 = arith.addf %52, %54 : vector<2x16x4xf32>
    %c0_69 = arith.constant 0 : index
    %c11 = arith.constant 11 : index
    %c0_70 = arith.constant 0 : index
    %c0_71 = arith.constant 0 : index
    %56 = vector.load %arg1[%c0_69, %c11, %c0_70, %c0_71] : memref<2x16x16x4xf32, #tpu.memory_space<vmem>>, vector<2x1x16x4xf32>
    %57 = vector.shape_cast %56 : vector<2x1x16x4xf32> to vector<2x16x4xf32>
    %58 = arith.addf %55, %57 : vector<2x16x4xf32>
    %c0_72 = arith.constant 0 : index
    %c12 = arith.constant 12 : index
    %c0_73 = arith.constant 0 : index
    %c0_74 = arith.constant 0 : index
    %59 = vector.load %arg1[%c0_72, %c12, %c0_73, %c0_74] : memref<2x16x16x4xf32, #tpu.memory_space<vmem>>, vector<2x1x16x4xf32>
    %60 = vector.shape_cast %59 : vector<2x1x16x4xf32> to vector<2x16x4xf32>
    %61 = arith.addf %58, %60 : vector<2x16x4xf32>
    %c0_75 = arith.constant 0 : index
    %c13 = arith.constant 13 : index
    %c0_76 = arith.constant 0 : index
    %c0_77 = arith.constant 0 : index
    %62 = vector.load %arg1[%c0_75, %c13, %c0_76, %c0_77] : memref<2x16x16x4xf32, #tpu.memory_space<vmem>>, vector<2x1x16x4xf32>
    %63 = vector.shape_cast %62 : vector<2x1x16x4xf32> to vector<2x16x4xf32>
    %64 = arith.addf %61, %63 : vector<2x16x4xf32>
    %c0_78 = arith.constant 0 : index
    %c3_79 = arith.constant 3 : index
    %c0_80 = arith.constant 0 : index
    %c0_81 = arith.constant 0 : index
    %65 = vector.load %arg5[%c0_78, %c3_79, %c0_80, %c0_81] : memref<2x4x16x4xf32, #tpu.memory_space<vmem>>, vector<2x1x16x4xf32>
    %66 = vector.shape_cast %65 : vector<2x1x16x4xf32> to vector<2x16x4xf32>
    %67 = vector.shape_cast %64 : vector<2x16x4xf32> to vector<2x1x16x4xf32>
    tpu.vector_store %arg5[%c0_78, %c3_79, %c0_80, %c0_81], %67 {strides = array<i32>} : memref<2x4x16x4xf32, #tpu.memory_space<vmem>>, vector<2x1x16x4xf32>,
    %c0_82 = arith.constant 0 : index
    %c0_83 = arith.constant 0 : index
    %c0_84 = arith.constant 0 : index
    %c0_85 = arith.constant 0 : index
    %68 = vector.load %arg5[%c0_82, %c0_83, %c0_84, %c0_85] : memref<2x4x16x4xf32, #tpu.memory_space<vmem>>, vector<2x4x1x4xf32>
    %69 = vector.shape_cast %68 : vector<2x4x1x4xf32> to vector<2x4x4xf32>
    %c0_86 = arith.constant 0 : index
    %c0_87 = arith.constant 0 : index
    %c1_88 = arith.constant 1 : index
    %c0_89 = arith.constant 0 : index
    %70 = vector.load %arg5[%c0_86, %c0_87, %c1_88, %c0_89] : memref<2x4x16x4xf32, #tpu.memory_space<vmem>>, vector<2x4x1x4xf32>
    %71 = vector.shape_cast %70 : vector<2x4x1x4xf32> to vector<2x4x4xf32>
    %72 = arith.addf %69, %71 : vector<2x4x4xf32>
    %c0_90 = arith.constant 0 : index
    %c0_91 = arith.constant 0 : index
    %c2_92 = arith.constant 2 : index
    %c0_93 = arith.constant 0 : index
    %73 = vector.load %arg5[%c0_90, %c0_91, %c2_92, %c0_93] : memref<2x4x16x4xf32, #tpu.memory_space<vmem>>, vector<2x4x1x4xf32>
    %74 = vector.shape_cast %73 : vector<2x4x1x4xf32> to vector<2x4x4xf32>
    %75 = arith.addf %72, %74 : vector<2x4x4xf32>
    %c0_94 = arith.constant 0 : index
    %c0_95 = arith.constant 0 : index
    %c3_96 = arith.constant 3 : index
    %c0_97 = arith.constant 0 : index
    %76 = vector.load %arg5[%c0_94, %c0_95, %c3_96, %c0_97] : memref<2x4x16x4xf32, #tpu.memory_space<vmem>>, vector<2x4x1x4xf32>
    %77 = vector.shape_cast %76 : vector<2x4x1x4xf32> to vector<2x4x4xf32>
    %78 = arith.addf %75, %77 : vector<2x4x4xf32>
    %c0_98 = arith.constant 0 : index
    %c0_99 = arith.constant 0 : index
    %c4_100 = arith.constant 4 : index
    %c0_101 = arith.constant 0 : index
    %79 = vector.load %arg5[%c0_98, %c0_99, %c4_100, %c0_101] : memref<2x4x16x4xf32, #tpu.memory_space<vmem>>, vector<2x4x1x4xf32>
    %80 = vector.shape_cast %79 : vector<2x4x1x4xf32> to vector<2x4x4xf32>
    %81 = arith.addf %78, %80 : vector<2x4x4xf32>
    %c0_102 = arith.constant 0 : index
    %c0_103 = arith.constant 0 : index
    %c0_104 = arith.constant 0 : index
    %c0_105 = arith.constant 0 : index
    %82 = vector.load %arg6[%c0_102, %c0_103, %c0_104, %c0_105] : memref<2x4x4x4xf32, #tpu.memory_space<vmem>>, vector<2x4x1x4xf32>
    %83 = vector.shape_cast %82 : vector<2x4x1x4xf32> to vector<2x4x4xf32>
    %84 = vector.shape_cast %81 : vector<2x4x4xf32> to vector<2x4x1x4xf32>
    tpu.vector_store %arg6[%c0_102, %c0_103, %c0_104, %c0_105], %84 {strides = array<i32>} : memref<2x4x4x4xf32, #tpu.memory_space<vmem>>, vector<2x4x1x4xf32>,
    %c0_106 = arith.constant 0 : index
    %c0_107 = arith.constant 0 : index
    %c3_108 = arith.constant 3 : index
    %c0_109 = arith.constant 0 : index
    %85 = vector.load %arg5[%c0_106, %c0_107, %c3_108, %c0_109] : memref<2x4x16x4xf32, #tpu.memory_space<vmem>>, vector<2x4x1x4xf32>
    %86 = vector.shape_cast %85 : vector<2x4x1x4xf32> to vector<2x4x4xf32>
    %c0_110 = arith.constant 0 : index
    %c0_111 = arith.constant 0 : index
    %c4_112 = arith.constant 4 : index
    %c0_113 = arith.constant 0 : index
    %87 = vector.load %arg5[%c0_110, %c0_111, %c4_112, %c0_113] : memref<2x4x16x4xf32, #tpu.memory_space<vmem>>, vector<2x4x1x4xf32>
    %88 = vector.shape_cast %87 : vector<2x4x1x4xf32> to vector<2x4x4xf32>
    %89 = arith.addf %86, %88 : vector<2x4x4xf32>
    %c0_114 = arith.constant 0 : index
    %c0_115 = arith.constant 0 : index
    %c5_116 = arith.constant 5 : index
    %c0_117 = arith.constant 0 : index
    %90 = vector.load %arg5[%c0_114, %c0_115, %c5_116, %c0_117] : memref<2x4x16x4xf32, #tpu.memory_space<vmem>>, vector<2x4x1x4xf32>
    %91 = vector.shape_cast %90 : vector<2x4x1x4xf32> to vector<2x4x4xf32>
    %92 = arith.addf %89, %91 : vector<2x4x4xf32>
    %c0_118 = arith.constant 0 : index
    %c0_119 = arith.constant 0 : index
    %c6_120 = arith.constant 6 : index
    %c0_121 = arith.constant 0 : index
    %93 = vector.load %arg5[%c0_118, %c0_119, %c6_120, %c0_121] : memref<2x4x16x4xf32, #tpu.memory_space<vmem>>, vector<2x4x1x4xf32>
    %94 = vector.shape_cast %93 : vector<2x4x1x4xf32> to vector<2x4x4xf32>
    %95 = arith.addf %92, %94 : vector<2x4x4xf32>
    %c0_122 = arith.constant 0 : index
    %c0_123 = arith.constant 0 : index
    %c7_124 = arith.constant 7 : index
    %c0_125 = arith.constant 0 : index
    %96 = vector.load %arg5[%c0_122, %c0_123, %c7_124, %c0_125] : memref<2x4x16x4xf32, #tpu.memory_space<vmem>>, vector<2x4x1x4xf32>
    %97 = vector.shape_cast %96 : vector<2x4x1x4xf32> to vector<2x4x4xf32>
    %98 = arith.addf %95, %97 : vector<2x4x4xf32>
    %c0_126 = arith.constant 0 : index
    %c0_127 = arith.constant 0 : index
    %c1_128 = arith.constant 1 : index
    %c0_129 = arith.constant 0 : index
    %99 = vector.load %arg6[%c0_126, %c0_127, %c1_128, %c0_129] : memref<2x4x4x4xf32, #tpu.memory_space<vmem>>, vector<2x4x1x4xf32>
    %100 = vector.shape_cast %99 : vector<2x4x1x4xf32> to vector<2x4x4xf32>
    %101 = vector.shape_cast %98 : vector<2x4x4xf32> to vector<2x4x1x4xf32>
    tpu.vector_store %arg6[%c0_126, %c0_127, %c1_128, %c0_129], %101 {strides = array<i32>} : memref<2x4x4x4xf32, #tpu.memory_space<vmem>>, vector<2x4x1x4xf32>,
    %c0_130 = arith.constant 0 : index
    %c0_131 = arith.constant 0 : index
    %c6_132 = arith.constant 6 : index
    %c0_133 = arith.constant 0 : index
    %102 = vector.load %arg5[%c0_130, %c0_131, %c6_132, %c0_133] : memref<2x4x16x4xf32, #tpu.memory_space<vmem>>, vector<2x4x1x4xf32>
    %103 = vector.shape_cast %102 : vector<2x4x1x4xf32> to vector<2x4x4xf32>
    %c0_134 = arith.constant 0 : index
    %c0_135 = arith.constant 0 : index
    %c7_136 = arith.constant 7 : index
    %c0_137 = arith.constant 0 : index
    %104 = vector.load %arg5[%c0_134, %c0_135, %c7_136, %c0_137] : memref<2x4x16x4xf32, #tpu.memory_space<vmem>>, vector<2x4x1x4xf32>
    %105 = vector.shape_cast %104 : vector<2x4x1x4xf32> to vector<2x4x4xf32>
    %106 = arith.addf %103, %105 : vector<2x4x4xf32>
    %c0_138 = arith.constant 0 : index
    %c0_139 = arith.constant 0 : index
    %c8_140 = arith.constant 8 : index
    %c0_141 = arith.constant 0 : index
    %107 = vector.load %arg5[%c0_138, %c0_139, %c8_140, %c0_141] : memref<2x4x16x4xf32, #tpu.memory_space<vmem>>, vector<2x4x1x4xf32>
    %108 = vector.shape_cast %107 : vector<2x4x1x4xf32> to vector<2x4x4xf32>
    %109 = arith.addf %106, %108 : vector<2x4x4xf32>
    %c0_142 = arith.constant 0 : index
    %c0_143 = arith.constant 0 : index
    %c9_144 = arith.constant 9 : index
    %c0_145 = arith.constant 0 : index
    %110 = vector.load %arg5[%c0_142, %c0_143, %c9_144, %c0_145] : memref<2x4x16x4xf32, #tpu.memory_space<vmem>>, vector<2x4x1x4xf32>
    %111 = vector.shape_cast %110 : vector<2x4x1x4xf32> to vector<2x4x4xf32>
    %112 = arith.addf %109, %111 : vector<2x4x4xf32>
    %c0_146 = arith.constant 0 : index
    %c0_147 = arith.constant 0 : index
    %c10_148 = arith.constant 10 : index
    %c0_149 = arith.constant 0 : index
    %113 = vector.load %arg5[%c0_146, %c0_147, %c10_148, %c0_149] : memref<2x4x16x4xf32, #tpu.memory_space<vmem>>, vector<2x4x1x4xf32>
    %114 = vector.shape_cast %113 : vector<2x4x1x4xf32> to vector<2x4x4xf32>
    %115 = arith.addf %112, %114 : vector<2x4x4xf32>
    %c0_150 = arith.constant 0 : index
    %c0_151 = arith.constant 0 : index
    %c2_152 = arith.constant 2 : index
    %c0_153 = arith.constant 0 : index
    %116 = vector.load %arg6[%c0_150, %c0_151, %c2_152, %c0_153] : memref<2x4x4x4xf32, #tpu.memory_space<vmem>>, vector<2x4x1x4xf32>
    %117 = vector.shape_cast %116 : vector<2x4x1x4xf32> to vector<2x4x4xf32>
    %118 = vector.shape_cast %115 : vector<2x4x4xf32> to vector<2x4x1x4xf32>
    tpu.vector_store %arg6[%c0_150, %c0_151, %c2_152, %c0_153], %118 {strides = array<i32>} : memref<2x4x4x4xf32, #tpu.memory_space<vmem>>, vector<2x4x1x4xf32>,
    %c0_154 = arith.constant 0 : index
    %c0_155 = arith.constant 0 : index
    %c9_156 = arith.constant 9 : index
    %c0_157 = arith.constant 0 : index
    %119 = vector.load %arg5[%c0_154, %c0_155, %c9_156, %c0_157] : memref<2x4x16x4xf32, #tpu.memory_space<vmem>>, vector<2x4x1x4xf32>
    %120 = vector.shape_cast %119 : vector<2x4x1x4xf32> to vector<2x4x4xf32>
    %c0_158 = arith.constant 0 : index
    %c0_159 = arith.constant 0 : index
    %c10_160 = arith.constant 10 : index
    %c0_161 = arith.constant 0 : index
    %121 = vector.load %arg5[%c0_158, %c0_159, %c10_160, %c0_161] : memref<2x4x16x4xf32, #tpu.memory_space<vmem>>, vector<2x4x1x4xf32>
    %122 = vector.shape_cast %121 : vector<2x4x1x4xf32> to vector<2x4x4xf32>
    %123 = arith.addf %120, %122 : vector<2x4x4xf32>
    %c0_162 = arith.constant 0 : index
    %c0_163 = arith.constant 0 : index
    %c11_164 = arith.constant 11 : index
    %c0_165 = arith.constant 0 : index
    %124 = vector.load %arg5[%c0_162, %c0_163, %c11_164, %c0_165] : memref<2x4x16x4xf32, #tpu.memory_space<vmem>>, vector<2x4x1x4xf32>
    %125 = vector.shape_cast %124 : vector<2x4x1x4xf32> to vector<2x4x4xf32>
    %126 = arith.addf %123, %125 : vector<2x4x4xf32>
    %c0_166 = arith.constant 0 : index
    %c0_167 = arith.constant 0 : index
    %c12_168 = arith.constant 12 : index
    %c0_169 = arith.constant 0 : index
    %127 = vector.load %arg5[%c0_166, %c0_167, %c12_168, %c0_169] : memref<2x4x16x4xf32, #tpu.memory_space<vmem>>, vector<2x4x1x4xf32>
    %128 = vector.shape_cast %127 : vector<2x4x1x4xf32> to vector<2x4x4xf32>
    %129 = arith.addf %126, %128 : vector<2x4x4xf32>
    %c0_170 = arith.constant 0 : index
    %c0_171 = arith.constant 0 : index
    %c13_172 = arith.constant 13 : index
    %c0_173 = arith.constant 0 : index
    %130 = vector.load %arg5[%c0_170, %c0_171, %c13_172, %c0_173] : memref<2x4x16x4xf32, #tpu.memory_space<vmem>>, vector<2x4x1x4xf32>
    %131 = vector.shape_cast %130 : vector<2x4x1x4xf32> to vector<2x4x4xf32>
    %132 = arith.addf %129, %131 : vector<2x4x4xf32>
    %c0_174 = arith.constant 0 : index
    %c0_175 = arith.constant 0 : index
    %c3_176 = arith.constant 3 : index
    %c0_177 = arith.constant 0 : index
    %133 = vector.load %arg6[%c0_174, %c0_175, %c3_176, %c0_177] : memref<2x4x4x4xf32, #tpu.memory_space<vmem>>, vector<2x4x1x4xf32>
    %134 = vector.shape_cast %133 : vector<2x4x1x4xf32> to vector<2x4x4xf32>
    %135 = vector.shape_cast %132 : vector<2x4x4xf32> to vector<2x4x1x4xf32>
    tpu.vector_store %arg6[%c0_174, %c0_175, %c3_176, %c0_177], %135 {strides = array<i32>} : memref<2x4x4x4xf32, #tpu.memory_space<vmem>>, vector<2x4x1x4xf32>,
    %c0_178 = arith.constant 0 : index
    %c0_179 = arith.constant 0 : index
    %c0_180 = arith.constant 0 : index
    %c0_181 = arith.constant 0 : index
    %136 = vector.load %arg6[%c0_178, %c0_179, %c0_180, %c0_181] : memref<2x4x4x4xf32, #tpu.memory_space<vmem>>, vector<2x4x4x4xf32>
    %cst = arith.constant 4.000000e-02 : f32
    %137 = vector.broadcast %cst : f32 to vector<2x4x4x4xf32>
    %138 = arith.mulf %136, %137 : vector<2x4x4x4xf32>
    %c0_182 = arith.constant 0 : index
    %c0_183 = arith.constant 0 : index
    %139 = vector.load %arg3[%c0_182, %c0_183] : memref<1x128xf32, #tpu.memory_space<vmem>>, vector<1x128xf32>
    %140 = vector.shape_cast %138 : vector<2x4x4x4xf32> to vector<32x4xf32>
    %c0_184 = arith.constant 0 : index
    %c0_185 = arith.constant 0 : index
    %141 = vector.load %arg2[%c0_184, %c0_185] : memref<4x128xf32, #tpu.memory_space<vmem>>, vector<4x128xf32>
    %cst_186 = arith.constant dense<0.000000e+00> : vector<32x128xf32>
    %142 = tpu.matmul %140, %141, %cst_186 {dimension_numbers = #tpu.dot_dimension_numbers<[1], [0], [0], [1], [0, 0, 1, 1], [], []>} : vector<32x4xf32>, vector<4x128xf32>, vector<32x128xf32> -> vector<32x128xf32>
    %143 = vector.broadcast %139 : vector<1x128xf32> to vector<32x128xf32>
    %144 = arith.addf %142, %143 : vector<32x128xf32>
    %cst_187 = arith.constant 0.000000e+00 : f32
    %145 = vector.broadcast %cst_187 : f32 to vector<32x128xf32>
    %146 = arith.maximumf %144, %145 : vector<32x128xf32>
    %cst_188 = arith.constant 0.000000e+00 : f32
    %147 = vector.broadcast %cst_188 : f32 to vector<1x128xf32>
    %148 = arith.maximumf %139, %147 : vector<1x128xf32>
    %149 = vector.shape_cast %148 : vector<1x128xf32> to vector<1x1x128xf32>
    %150 = tpu.iota {dimensions = array<i32: 0>} : vector<8x16x128xi32>
    %151 = tpu.iota {dimensions = array<i32: 1>} : vector<8x16x128xi32>
    %c1_i32 = arith.constant 1 : i32
    %152 = vector.broadcast %c1_i32 : i32 to vector<8x16x128xi32>
    %153 = arith.cmpi sge, %150, %152 : vector<8x16x128xi32>
    %c6_i32 = arith.constant 6 : i32
    %154 = vector.broadcast %c6_i32 : i32 to vector<8x16x128xi32>
    %155 = arith.cmpi sle, %150, %154 : vector<8x16x128xi32>
    %156 = arith.andi %153, %155 : vector<8x16x128xi1>
    %c1_i32_189 = arith.constant 1 : i32
    %157 = vector.broadcast %c1_i32_189 : i32 to vector<8x16x128xi32>
    %158 = arith.cmpi sge, %151, %157 : vector<8x16x128xi32>
    %159 = arith.andi %156, %158 : vector<8x16x128xi1>
    %c6_i32_190 = arith.constant 6 : i32
    %160 = vector.broadcast %c6_i32_190 : i32 to vector<8x16x128xi32>
    %161 = arith.cmpi sle, %151, %160 : vector<8x16x128xi32>
    %162 = arith.andi %159, %161 : vector<8x16x128xi1>
    %cst_191 = arith.constant 0.000000e+00 : f32
    %163 = vector.shape_cast %149 : vector<1x1x128xf32> to vector<1x1x128xf32>
    %164 = vector.broadcast %163 : vector<1x1x128xf32> to vector<8x16x128xf32>
    %165 = vector.broadcast %cst_191 : f32 to vector<8x16x128xf32>
    %166 = arith.select %162, %164, %165 : vector<8x16x128xi1>, vector<8x16x128xf32>
    %167 = vector.shape_cast %166 : vector<8x16x128xf32> to vector<1x8x16x128xf32>
    %168 = vector.shape_cast %167 : vector<1x8x16x128xf32> to vector<1x8x16x128xf32>
    %169 = vector.broadcast %168 : vector<1x8x16x128xf32> to vector<2x8x16x128xf32>
    %170 = arith.truncf %169 : vector<2x8x16x128xf32> to vector<2x8x16x128xbf16>
    %c0_192 = arith.constant 0 : index
    %c0_193 = arith.constant 0 : index
    %c0_194 = arith.constant 0 : index
    %c0_195 = arith.constant 0 : index
    %171 = vector.load %arg4[%c0_192, %c0_193, %c0_194, %c0_195] : memref<2x8x16x128xbf16, #tpu.memory_space<vmem>>, vector<2x8x16x128xbf16>
    tpu.vector_store %arg4[%c0_192, %c0_193, %c0_194, %c0_195], %170 {strides = array<i32>} : memref<2x8x16x128xbf16, #tpu.memory_space<vmem>>, vector<2x8x16x128xbf16>,
    %172 = vector.shape_cast %146 : vector<32x128xf32> to vector<2x4x4x128xf32>
    %173 = arith.truncf %172 : vector<2x4x4x128xf32> to vector<2x4x4x128xbf16>
    %c0_196 = arith.constant 0 : index
    %c2_197 = arith.constant 2 : index
    %c2_198 = arith.constant 2 : index
    %c0_199 = arith.constant 0 : index
    %174 = vector.load %arg4[%c0_196, %c2_197, %c2_198, %c0_199] : memref<2x8x16x128xbf16, #tpu.memory_space<vmem>>, vector<2x4x4x128xbf16>
    tpu.vector_store %arg4[%c0_196, %c2_197, %c2_198, %c0_199], %173 {strides = array<i32>} : memref<2x8x16x128xbf16, #tpu.memory_space<vmem>>, vector<2x4x4x128xbf16>,
    return
  }
  func.func @transform_0(%arg0: i32) -> (i32, i32, i32, i32) {
    %c0_i32 = arith.constant 0 : i32
    %c0_i32_0 = arith.constant 0 : i32
    %c0_i32_1 = arith.constant 0 : i32
    %c0_i32_2 = arith.constant 0 : i32
    return %arg0, %c0_i32, %c0_i32_0, %c0_i32_1 : i32, i32, i32, i32
  }
  func.func @transform_1(%arg0: i32) -> (i32, i32) {
    %c0_i32 = arith.constant 0 : i32
    %c0_i32_0 = arith.constant 0 : i32
    %c0_i32_1 = arith.constant 0 : i32
    return %c0_i32, %c0_i32_0 : i32, i32
  }
  func.func @transform_2(%arg0: i32) -> (i32, i32) {
    %c0_i32 = arith.constant 0 : i32
    %c0_i32_0 = arith.constant 0 : i32
    %c0_i32_1 = arith.constant 0 : i32
    return %c0_i32, %c0_i32_0 : i32, i32
  }
  func.func @transform_3(%arg0: i32) -> (i32, i32, i32, i32) {
    %c0_i32 = arith.constant 0 : i32
    %c0_i32_0 = arith.constant 0 : i32
    %c0_i32_1 = arith.constant 0 : i32
    %c0_i32_2 = arith.constant 0 : i32
    return %arg0, %c0_i32, %c0_i32_0, %c0_i32_1 : i32, i32, i32, i32
  }
}

module attributes {stable_mosaic.version = 11 : i64} {
  func.func @_back_kernel(%arg0: i32, %arg1: i32, %arg2: memref<2x8x16x128xbf16, #tpu.memory_space<vmem>>, %arg3: memref<3200x256xbf16, #tpu.memory_space<vmem>>, %arg4: memref<1x256xf32, #tpu.memory_space<vmem>>, %arg5: memref<256x10xf32, #tpu.memory_space<vmem>>, %arg6: memref<1x2x10xf32, #tpu.memory_space<vmem>>, %arg7: memref<32x3200xbf16, #tpu.memory_space<vmem>>) attributes {dimension_semantics = [#tpu.dimension_semantics<parallel>, #tpu.dimension_semantics<parallel>], iteration_bounds = array<i64: 3, 1>, scalar_prefetch = 0 : i64, scratch_operands = 1 : i64, tpu.core_type = #tpu.core_type<tc>, window_params = [{transform_indices = @transform_0, window_bounds = array<i64: 2, 8, 16, 128>}, {transform_indices = @transform_1, window_bounds = array<i64: 3200, 256>}, {transform_indices = @transform_2, window_bounds = array<i64: 1, 256>}, {transform_indices = @transform_3, window_bounds = array<i64: 256, 10>}, {transform_indices = @transform_4, window_bounds = array<i64: 1, 2, 10>}]} {
    %c0 = arith.constant 0 : index
    %c0_0 = arith.constant 0 : index
    %c0_1 = arith.constant 0 : index
    %c0_2 = arith.constant 0 : index
    %0 = vector.load %arg2[%c0, %c0_0, %c0_1, %c0_2] : memref<2x8x16x128xbf16, #tpu.memory_space<vmem>>, vector<2x4x4x128xbf16>
    %1 = vector.shape_cast %0 : vector<2x4x4x128xbf16> to vector<32x128xbf16>
    %c0_3 = arith.constant 0 : index
    %c0_4 = arith.constant 0 : index
    %2 = vector.load %arg7[%c0_3, %c0_4] : memref<32x3200xbf16, #tpu.memory_space<vmem>>, vector<32x128xbf16>
    tpu.vector_store %arg7[%c0_3, %c0_4], %1 {strides = array<i32>} : memref<32x3200xbf16, #tpu.memory_space<vmem>>, vector<32x128xbf16>,
    %c0_5 = arith.constant 0 : index
    %c0_6 = arith.constant 0 : index
    %c1 = arith.constant 1 : index
    %c0_7 = arith.constant 0 : index
    %3 = vector.load %arg2[%c0_5, %c0_6, %c1, %c0_7] : memref<2x8x16x128xbf16, #tpu.memory_space<vmem>>, vector<2x4x4x128xbf16>
    %4 = vector.shape_cast %3 : vector<2x4x4x128xbf16> to vector<32x128xbf16>
    %c0_8 = arith.constant 0 : index
    %c128 = arith.constant 128 : index
    %5 = vector.load %arg7[%c0_8, %c128] : memref<32x3200xbf16, #tpu.memory_space<vmem>>, vector<32x128xbf16>
    tpu.vector_store %arg7[%c0_8, %c128], %4 {strides = array<i32>} : memref<32x3200xbf16, #tpu.memory_space<vmem>>, vector<32x128xbf16>,
    %c0_9 = arith.constant 0 : index
    %c0_10 = arith.constant 0 : index
    %c2 = arith.constant 2 : index
    %c0_11 = arith.constant 0 : index
    %6 = vector.load %arg2[%c0_9, %c0_10, %c2, %c0_11] : memref<2x8x16x128xbf16, #tpu.memory_space<vmem>>, vector<2x4x4x128xbf16>
    %7 = vector.shape_cast %6 : vector<2x4x4x128xbf16> to vector<32x128xbf16>
    %c0_12 = arith.constant 0 : index
    %c256 = arith.constant 256 : index
    %8 = vector.load %arg7[%c0_12, %c256] : memref<32x3200xbf16, #tpu.memory_space<vmem>>, vector<32x128xbf16>
    tpu.vector_store %arg7[%c0_12, %c256], %7 {strides = array<i32>} : memref<32x3200xbf16, #tpu.memory_space<vmem>>, vector<32x128xbf16>,
    %c0_13 = arith.constant 0 : index
    %c0_14 = arith.constant 0 : index
    %c3 = arith.constant 3 : index
    %c0_15 = arith.constant 0 : index
    %9 = vector.load %arg2[%c0_13, %c0_14, %c3, %c0_15] : memref<2x8x16x128xbf16, #tpu.memory_space<vmem>>, vector<2x4x4x128xbf16>
    %10 = vector.shape_cast %9 : vector<2x4x4x128xbf16> to vector<32x128xbf16>
    %c0_16 = arith.constant 0 : index
    %c384 = arith.constant 384 : index
    %11 = vector.load %arg7[%c0_16, %c384] : memref<32x3200xbf16, #tpu.memory_space<vmem>>, vector<32x128xbf16>
    tpu.vector_store %arg7[%c0_16, %c384], %10 {strides = array<i32>} : memref<32x3200xbf16, #tpu.memory_space<vmem>>, vector<32x128xbf16>,
    %c0_17 = arith.constant 0 : index
    %c0_18 = arith.constant 0 : index
    %c4 = arith.constant 4 : index
    %c0_19 = arith.constant 0 : index
    %12 = vector.load %arg2[%c0_17, %c0_18, %c4, %c0_19] : memref<2x8x16x128xbf16, #tpu.memory_space<vmem>>, vector<2x4x4x128xbf16>
    %13 = vector.shape_cast %12 : vector<2x4x4x128xbf16> to vector<32x128xbf16>
    %c0_20 = arith.constant 0 : index
    %c512 = arith.constant 512 : index
    %14 = vector.load %arg7[%c0_20, %c512] : memref<32x3200xbf16, #tpu.memory_space<vmem>>, vector<32x128xbf16>
    tpu.vector_store %arg7[%c0_20, %c512], %13 {strides = array<i32>} : memref<32x3200xbf16, #tpu.memory_space<vmem>>, vector<32x128xbf16>,
    %c0_21 = arith.constant 0 : index
    %c1_22 = arith.constant 1 : index
    %c0_23 = arith.constant 0 : index
    %c0_24 = arith.constant 0 : index
    %15 = vector.load %arg2[%c0_21, %c1_22, %c0_23, %c0_24] : memref<2x8x16x128xbf16, #tpu.memory_space<vmem>>, vector<2x4x4x128xbf16>
    %16 = vector.shape_cast %15 : vector<2x4x4x128xbf16> to vector<32x128xbf16>
    %c0_25 = arith.constant 0 : index
    %c640 = arith.constant 640 : index
    %17 = vector.load %arg7[%c0_25, %c640] : memref<32x3200xbf16, #tpu.memory_space<vmem>>, vector<32x128xbf16>
    tpu.vector_store %arg7[%c0_25, %c640], %16 {strides = array<i32>} : memref<32x3200xbf16, #tpu.memory_space<vmem>>, vector<32x128xbf16>,
    %c0_26 = arith.constant 0 : index
    %c1_27 = arith.constant 1 : index
    %c1_28 = arith.constant 1 : index
    %c0_29 = arith.constant 0 : index
    %18 = vector.load %arg2[%c0_26, %c1_27, %c1_28, %c0_29] : memref<2x8x16x128xbf16, #tpu.memory_space<vmem>>, vector<2x4x4x128xbf16>
    %19 = vector.shape_cast %18 : vector<2x4x4x128xbf16> to vector<32x128xbf16>
    %c0_30 = arith.constant 0 : index
    %c768 = arith.constant 768 : index
    %20 = vector.load %arg7[%c0_30, %c768] : memref<32x3200xbf16, #tpu.memory_space<vmem>>, vector<32x128xbf16>
    tpu.vector_store %arg7[%c0_30, %c768], %19 {strides = array<i32>} : memref<32x3200xbf16, #tpu.memory_space<vmem>>, vector<32x128xbf16>,
    %c0_31 = arith.constant 0 : index
    %c1_32 = arith.constant 1 : index
    %c2_33 = arith.constant 2 : index
    %c0_34 = arith.constant 0 : index
    %21 = vector.load %arg2[%c0_31, %c1_32, %c2_33, %c0_34] : memref<2x8x16x128xbf16, #tpu.memory_space<vmem>>, vector<2x4x4x128xbf16>
    %22 = vector.shape_cast %21 : vector<2x4x4x128xbf16> to vector<32x128xbf16>
    %c0_35 = arith.constant 0 : index
    %c896 = arith.constant 896 : index
    %23 = vector.load %arg7[%c0_35, %c896] : memref<32x3200xbf16, #tpu.memory_space<vmem>>, vector<32x128xbf16>
    tpu.vector_store %arg7[%c0_35, %c896], %22 {strides = array<i32>} : memref<32x3200xbf16, #tpu.memory_space<vmem>>, vector<32x128xbf16>,
    %c0_36 = arith.constant 0 : index
    %c1_37 = arith.constant 1 : index
    %c3_38 = arith.constant 3 : index
    %c0_39 = arith.constant 0 : index
    %24 = vector.load %arg2[%c0_36, %c1_37, %c3_38, %c0_39] : memref<2x8x16x128xbf16, #tpu.memory_space<vmem>>, vector<2x4x4x128xbf16>
    %25 = vector.shape_cast %24 : vector<2x4x4x128xbf16> to vector<32x128xbf16>
    %c0_40 = arith.constant 0 : index
    %c1024 = arith.constant 1024 : index
    %26 = vector.load %arg7[%c0_40, %c1024] : memref<32x3200xbf16, #tpu.memory_space<vmem>>, vector<32x128xbf16>
    tpu.vector_store %arg7[%c0_40, %c1024], %25 {strides = array<i32>} : memref<32x3200xbf16, #tpu.memory_space<vmem>>, vector<32x128xbf16>,
    %c0_41 = arith.constant 0 : index
    %c1_42 = arith.constant 1 : index
    %c4_43 = arith.constant 4 : index
    %c0_44 = arith.constant 0 : index
    %27 = vector.load %arg2[%c0_41, %c1_42, %c4_43, %c0_44] : memref<2x8x16x128xbf16, #tpu.memory_space<vmem>>, vector<2x4x4x128xbf16>
    %28 = vector.shape_cast %27 : vector<2x4x4x128xbf16> to vector<32x128xbf16>
    %c0_45 = arith.constant 0 : index
    %c1152 = arith.constant 1152 : index
    %29 = vector.load %arg7[%c0_45, %c1152] : memref<32x3200xbf16, #tpu.memory_space<vmem>>, vector<32x128xbf16>
    tpu.vector_store %arg7[%c0_45, %c1152], %28 {strides = array<i32>} : memref<32x3200xbf16, #tpu.memory_space<vmem>>, vector<32x128xbf16>,
    %c0_46 = arith.constant 0 : index
    %c2_47 = arith.constant 2 : index
    %c0_48 = arith.constant 0 : index
    %c0_49 = arith.constant 0 : index
    %30 = vector.load %arg2[%c0_46, %c2_47, %c0_48, %c0_49] : memref<2x8x16x128xbf16, #tpu.memory_space<vmem>>, vector<2x4x4x128xbf16>
    %31 = vector.shape_cast %30 : vector<2x4x4x128xbf16> to vector<32x128xbf16>
    %c0_50 = arith.constant 0 : index
    %c1280 = arith.constant 1280 : index
    %32 = vector.load %arg7[%c0_50, %c1280] : memref<32x3200xbf16, #tpu.memory_space<vmem>>, vector<32x128xbf16>
    tpu.vector_store %arg7[%c0_50, %c1280], %31 {strides = array<i32>} : memref<32x3200xbf16, #tpu.memory_space<vmem>>, vector<32x128xbf16>,
    %c0_51 = arith.constant 0 : index
    %c2_52 = arith.constant 2 : index
    %c1_53 = arith.constant 1 : index
    %c0_54 = arith.constant 0 : index
    %33 = vector.load %arg2[%c0_51, %c2_52, %c1_53, %c0_54] : memref<2x8x16x128xbf16, #tpu.memory_space<vmem>>, vector<2x4x4x128xbf16>
    %34 = vector.shape_cast %33 : vector<2x4x4x128xbf16> to vector<32x128xbf16>
    %c0_55 = arith.constant 0 : index
    %c1408 = arith.constant 1408 : index
    %35 = vector.load %arg7[%c0_55, %c1408] : memref<32x3200xbf16, #tpu.memory_space<vmem>>, vector<32x128xbf16>
    tpu.vector_store %arg7[%c0_55, %c1408], %34 {strides = array<i32>} : memref<32x3200xbf16, #tpu.memory_space<vmem>>, vector<32x128xbf16>,
    %c0_56 = arith.constant 0 : index
    %c2_57 = arith.constant 2 : index
    %c2_58 = arith.constant 2 : index
    %c0_59 = arith.constant 0 : index
    %36 = vector.load %arg2[%c0_56, %c2_57, %c2_58, %c0_59] : memref<2x8x16x128xbf16, #tpu.memory_space<vmem>>, vector<2x4x4x128xbf16>
    %37 = vector.shape_cast %36 : vector<2x4x4x128xbf16> to vector<32x128xbf16>
    %c0_60 = arith.constant 0 : index
    %c1536 = arith.constant 1536 : index
    %38 = vector.load %arg7[%c0_60, %c1536] : memref<32x3200xbf16, #tpu.memory_space<vmem>>, vector<32x128xbf16>
    tpu.vector_store %arg7[%c0_60, %c1536], %37 {strides = array<i32>} : memref<32x3200xbf16, #tpu.memory_space<vmem>>, vector<32x128xbf16>,
    %c0_61 = arith.constant 0 : index
    %c2_62 = arith.constant 2 : index
    %c3_63 = arith.constant 3 : index
    %c0_64 = arith.constant 0 : index
    %39 = vector.load %arg2[%c0_61, %c2_62, %c3_63, %c0_64] : memref<2x8x16x128xbf16, #tpu.memory_space<vmem>>, vector<2x4x4x128xbf16>
    %40 = vector.shape_cast %39 : vector<2x4x4x128xbf16> to vector<32x128xbf16>
    %c0_65 = arith.constant 0 : index
    %c1664 = arith.constant 1664 : index
    %41 = vector.load %arg7[%c0_65, %c1664] : memref<32x3200xbf16, #tpu.memory_space<vmem>>, vector<32x128xbf16>
    tpu.vector_store %arg7[%c0_65, %c1664], %40 {strides = array<i32>} : memref<32x3200xbf16, #tpu.memory_space<vmem>>, vector<32x128xbf16>,
    %c0_66 = arith.constant 0 : index
    %c2_67 = arith.constant 2 : index
    %c4_68 = arith.constant 4 : index
    %c0_69 = arith.constant 0 : index
    %42 = vector.load %arg2[%c0_66, %c2_67, %c4_68, %c0_69] : memref<2x8x16x128xbf16, #tpu.memory_space<vmem>>, vector<2x4x4x128xbf16>
    %43 = vector.shape_cast %42 : vector<2x4x4x128xbf16> to vector<32x128xbf16>
    %c0_70 = arith.constant 0 : index
    %c1792 = arith.constant 1792 : index
    %44 = vector.load %arg7[%c0_70, %c1792] : memref<32x3200xbf16, #tpu.memory_space<vmem>>, vector<32x128xbf16>
    tpu.vector_store %arg7[%c0_70, %c1792], %43 {strides = array<i32>} : memref<32x3200xbf16, #tpu.memory_space<vmem>>, vector<32x128xbf16>,
    %c0_71 = arith.constant 0 : index
    %c3_72 = arith.constant 3 : index
    %c0_73 = arith.constant 0 : index
    %c0_74 = arith.constant 0 : index
    %45 = vector.load %arg2[%c0_71, %c3_72, %c0_73, %c0_74] : memref<2x8x16x128xbf16, #tpu.memory_space<vmem>>, vector<2x4x4x128xbf16>
    %46 = vector.shape_cast %45 : vector<2x4x4x128xbf16> to vector<32x128xbf16>
    %c0_75 = arith.constant 0 : index
    %c1920 = arith.constant 1920 : index
    %47 = vector.load %arg7[%c0_75, %c1920] : memref<32x3200xbf16, #tpu.memory_space<vmem>>, vector<32x128xbf16>
    tpu.vector_store %arg7[%c0_75, %c1920], %46 {strides = array<i32>} : memref<32x3200xbf16, #tpu.memory_space<vmem>>, vector<32x128xbf16>,
    %c0_76 = arith.constant 0 : index
    %c3_77 = arith.constant 3 : index
    %c1_78 = arith.constant 1 : index
    %c0_79 = arith.constant 0 : index
    %48 = vector.load %arg2[%c0_76, %c3_77, %c1_78, %c0_79] : memref<2x8x16x128xbf16, #tpu.memory_space<vmem>>, vector<2x4x4x128xbf16>
    %49 = vector.shape_cast %48 : vector<2x4x4x128xbf16> to vector<32x128xbf16>
    %c0_80 = arith.constant 0 : index
    %c2048 = arith.constant 2048 : index
    %50 = vector.load %arg7[%c0_80, %c2048] : memref<32x3200xbf16, #tpu.memory_space<vmem>>, vector<32x128xbf16>
    tpu.vector_store %arg7[%c0_80, %c2048], %49 {strides = array<i32>} : memref<32x3200xbf16, #tpu.memory_space<vmem>>, vector<32x128xbf16>,
    %c0_81 = arith.constant 0 : index
    %c3_82 = arith.constant 3 : index
    %c2_83 = arith.constant 2 : index
    %c0_84 = arith.constant 0 : index
    %51 = vector.load %arg2[%c0_81, %c3_82, %c2_83, %c0_84] : memref<2x8x16x128xbf16, #tpu.memory_space<vmem>>, vector<2x4x4x128xbf16>
    %52 = vector.shape_cast %51 : vector<2x4x4x128xbf16> to vector<32x128xbf16>
    %c0_85 = arith.constant 0 : index
    %c2176 = arith.constant 2176 : index
    %53 = vector.load %arg7[%c0_85, %c2176] : memref<32x3200xbf16, #tpu.memory_space<vmem>>, vector<32x128xbf16>
    tpu.vector_store %arg7[%c0_85, %c2176], %52 {strides = array<i32>} : memref<32x3200xbf16, #tpu.memory_space<vmem>>, vector<32x128xbf16>,
    %c0_86 = arith.constant 0 : index
    %c3_87 = arith.constant 3 : index
    %c3_88 = arith.constant 3 : index
    %c0_89 = arith.constant 0 : index
    %54 = vector.load %arg2[%c0_86, %c3_87, %c3_88, %c0_89] : memref<2x8x16x128xbf16, #tpu.memory_space<vmem>>, vector<2x4x4x128xbf16>
    %55 = vector.shape_cast %54 : vector<2x4x4x128xbf16> to vector<32x128xbf16>
    %c0_90 = arith.constant 0 : index
    %c2304 = arith.constant 2304 : index
    %56 = vector.load %arg7[%c0_90, %c2304] : memref<32x3200xbf16, #tpu.memory_space<vmem>>, vector<32x128xbf16>
    tpu.vector_store %arg7[%c0_90, %c2304], %55 {strides = array<i32>} : memref<32x3200xbf16, #tpu.memory_space<vmem>>, vector<32x128xbf16>,
    %c0_91 = arith.constant 0 : index
    %c3_92 = arith.constant 3 : index
    %c4_93 = arith.constant 4 : index
    %c0_94 = arith.constant 0 : index
    %57 = vector.load %arg2[%c0_91, %c3_92, %c4_93, %c0_94] : memref<2x8x16x128xbf16, #tpu.memory_space<vmem>>, vector<2x4x4x128xbf16>
    %58 = vector.shape_cast %57 : vector<2x4x4x128xbf16> to vector<32x128xbf16>
    %c0_95 = arith.constant 0 : index
    %c2432 = arith.constant 2432 : index
    %59 = vector.load %arg7[%c0_95, %c2432] : memref<32x3200xbf16, #tpu.memory_space<vmem>>, vector<32x128xbf16>
    tpu.vector_store %arg7[%c0_95, %c2432], %58 {strides = array<i32>} : memref<32x3200xbf16, #tpu.memory_space<vmem>>, vector<32x128xbf16>,
    %c0_96 = arith.constant 0 : index
    %c4_97 = arith.constant 4 : index
    %c0_98 = arith.constant 0 : index
    %c0_99 = arith.constant 0 : index
    %60 = vector.load %arg2[%c0_96, %c4_97, %c0_98, %c0_99] : memref<2x8x16x128xbf16, #tpu.memory_space<vmem>>, vector<2x4x4x128xbf16>
    %61 = vector.shape_cast %60 : vector<2x4x4x128xbf16> to vector<32x128xbf16>
    %c0_100 = arith.constant 0 : index
    %c2560 = arith.constant 2560 : index
    %62 = vector.load %arg7[%c0_100, %c2560] : memref<32x3200xbf16, #tpu.memory_space<vmem>>, vector<32x128xbf16>
    tpu.vector_store %arg7[%c0_100, %c2560], %61 {strides = array<i32>} : memref<32x3200xbf16, #tpu.memory_space<vmem>>, vector<32x128xbf16>,
    %c0_101 = arith.constant 0 : index
    %c4_102 = arith.constant 4 : index
    %c1_103 = arith.constant 1 : index
    %c0_104 = arith.constant 0 : index
    %63 = vector.load %arg2[%c0_101, %c4_102, %c1_103, %c0_104] : memref<2x8x16x128xbf16, #tpu.memory_space<vmem>>, vector<2x4x4x128xbf16>
    %64 = vector.shape_cast %63 : vector<2x4x4x128xbf16> to vector<32x128xbf16>
    %c0_105 = arith.constant 0 : index
    %c2688 = arith.constant 2688 : index
    %65 = vector.load %arg7[%c0_105, %c2688] : memref<32x3200xbf16, #tpu.memory_space<vmem>>, vector<32x128xbf16>
    tpu.vector_store %arg7[%c0_105, %c2688], %64 {strides = array<i32>} : memref<32x3200xbf16, #tpu.memory_space<vmem>>, vector<32x128xbf16>,
    %c0_106 = arith.constant 0 : index
    %c4_107 = arith.constant 4 : index
    %c2_108 = arith.constant 2 : index
    %c0_109 = arith.constant 0 : index
    %66 = vector.load %arg2[%c0_106, %c4_107, %c2_108, %c0_109] : memref<2x8x16x128xbf16, #tpu.memory_space<vmem>>, vector<2x4x4x128xbf16>
    %67 = vector.shape_cast %66 : vector<2x4x4x128xbf16> to vector<32x128xbf16>
    %c0_110 = arith.constant 0 : index
    %c2816 = arith.constant 2816 : index
    %68 = vector.load %arg7[%c0_110, %c2816] : memref<32x3200xbf16, #tpu.memory_space<vmem>>, vector<32x128xbf16>
    tpu.vector_store %arg7[%c0_110, %c2816], %67 {strides = array<i32>} : memref<32x3200xbf16, #tpu.memory_space<vmem>>, vector<32x128xbf16>,
    %c0_111 = arith.constant 0 : index
    %c4_112 = arith.constant 4 : index
    %c3_113 = arith.constant 3 : index
    %c0_114 = arith.constant 0 : index
    %69 = vector.load %arg2[%c0_111, %c4_112, %c3_113, %c0_114] : memref<2x8x16x128xbf16, #tpu.memory_space<vmem>>, vector<2x4x4x128xbf16>
    %70 = vector.shape_cast %69 : vector<2x4x4x128xbf16> to vector<32x128xbf16>
    %c0_115 = arith.constant 0 : index
    %c2944 = arith.constant 2944 : index
    %71 = vector.load %arg7[%c0_115, %c2944] : memref<32x3200xbf16, #tpu.memory_space<vmem>>, vector<32x128xbf16>
    tpu.vector_store %arg7[%c0_115, %c2944], %70 {strides = array<i32>} : memref<32x3200xbf16, #tpu.memory_space<vmem>>, vector<32x128xbf16>,
    %c0_116 = arith.constant 0 : index
    %c4_117 = arith.constant 4 : index
    %c4_118 = arith.constant 4 : index
    %c0_119 = arith.constant 0 : index
    %72 = vector.load %arg2[%c0_116, %c4_117, %c4_118, %c0_119] : memref<2x8x16x128xbf16, #tpu.memory_space<vmem>>, vector<2x4x4x128xbf16>
    %73 = vector.shape_cast %72 : vector<2x4x4x128xbf16> to vector<32x128xbf16>
    %c0_120 = arith.constant 0 : index
    %c3072 = arith.constant 3072 : index
    %74 = vector.load %arg7[%c0_120, %c3072] : memref<32x3200xbf16, #tpu.memory_space<vmem>>, vector<32x128xbf16>
    tpu.vector_store %arg7[%c0_120, %c3072], %73 {strides = array<i32>} : memref<32x3200xbf16, #tpu.memory_space<vmem>>, vector<32x128xbf16>,
    %c0_121 = arith.constant 0 : index
    %c0_122 = arith.constant 0 : index
    %75 = vector.load %arg7[%c0_121, %c0_122] : memref<32x3200xbf16, #tpu.memory_space<vmem>>, vector<32x3200xbf16>
    %c0_123 = arith.constant 0 : index
    %c0_124 = arith.constant 0 : index
    %76 = vector.load %arg3[%c0_123, %c0_124] : memref<3200x256xbf16, #tpu.memory_space<vmem>>, vector<3200x256xbf16>
    %cst = arith.constant dense<0.000000e+00> : vector<32x256xf32>
    %77 = tpu.matmul %75, %76, %cst {dimension_numbers = #tpu.dot_dimension_numbers<[1], [0], [0], [1], [0, 0, 1, 1], [], []>} : vector<32x3200xbf16>, vector<3200x256xbf16>, vector<32x256xf32> -> vector<32x256xf32>
    %c0_125 = arith.constant 0 : index
    %c0_126 = arith.constant 0 : index
    %78 = vector.load %arg4[%c0_125, %c0_126] : memref<1x256xf32, #tpu.memory_space<vmem>>, vector<1x256xf32>
    %79 = vector.broadcast %78 : vector<1x256xf32> to vector<32x256xf32>
    %80 = arith.addf %77, %79 : vector<32x256xf32>
    %cst_127 = arith.constant 0.000000e+00 : f32
    %81 = vector.broadcast %cst_127 : f32 to vector<32x256xf32>
    %82 = arith.maximumf %80, %81 : vector<32x256xf32>
    %83 = vector.shape_cast %82 : vector<32x256xf32> to vector<2x16x256xf32>
    %cst_128 = arith.constant dense<0.000000e+00> : vector<2x256xf32>
    %84 = vector.multi_reduction <add>, %83, %cst_128 [1] : vector<2x16x256xf32> to vector<2x256xf32>
    %cst_129 = arith.constant 1.600000e+01 : f32
    %85 = vector.broadcast %cst_129 : f32 to vector<2x256xf32>
    %86 = arith.divf %84, %85 : vector<2x256xf32>
    %c0_130 = arith.constant 0 : index
    %c0_131 = arith.constant 0 : index
    %87 = vector.load %arg5[%c0_130, %c0_131] : memref<256x10xf32, #tpu.memory_space<vmem>>, vector<256x10xf32>
    %cst_132 = arith.constant dense<0.000000e+00> : vector<2x10xf32>
    %88 = tpu.matmul %86, %87, %cst_132 {dimension_numbers = #tpu.dot_dimension_numbers<[1], [0], [0], [1], [0, 0, 1, 1], [], []>} : vector<2x256xf32>, vector<256x10xf32>, vector<2x10xf32> -> vector<2x10xf32>
    %c0_133 = arith.constant 0 : index
    %c0_134 = arith.constant 0 : index
    %c0_135 = arith.constant 0 : index
    %89 = vector.load %arg6[%c0_133, %c0_134, %c0_135] : memref<1x2x10xf32, #tpu.memory_space<vmem>>, vector<1x2x10xf32>
    %90 = vector.shape_cast %89 : vector<1x2x10xf32> to vector<2x10xf32>
    %91 = vector.shape_cast %88 : vector<2x10xf32> to vector<1x2x10xf32>
    tpu.vector_store %arg6[%c0_133, %c0_134, %c0_135], %91 {strides = array<i32>} : memref<1x2x10xf32, #tpu.memory_space<vmem>>, vector<1x2x10xf32>,
    return
  }
  func.func @transform_0(%arg0: i32, %arg1: i32) -> (i32, i32, i32, i32) {
    %c0_i32 = arith.constant 0 : i32
    %c0_i32_0 = arith.constant 0 : i32
    %c0_i32_1 = arith.constant 0 : i32
    %c0_i32_2 = arith.constant 0 : i32
    return %arg1, %c0_i32, %c0_i32_0, %c0_i32_1 : i32, i32, i32, i32
  }
  func.func @transform_1(%arg0: i32, %arg1: i32) -> (i32, i32) {
    %c0_i32 = arith.constant 0 : i32
    %c0_i32_0 = arith.constant 0 : i32
    return %c0_i32, %arg0 : i32, i32
  }
  func.func @transform_2(%arg0: i32, %arg1: i32) -> (i32, i32) {
    %c0_i32 = arith.constant 0 : i32
    %c0_i32_0 = arith.constant 0 : i32
    return %c0_i32, %arg0 : i32, i32
  }
  func.func @transform_3(%arg0: i32, %arg1: i32) -> (i32, i32) {
    %c0_i32 = arith.constant 0 : i32
    %c0_i32_0 = arith.constant 0 : i32
    return %arg0, %c0_i32 : i32, i32
  }
  func.func @transform_4(%arg0: i32, %arg1: i32) -> (i32, i32, i32) {
    %c0_i32 = arith.constant 0 : i32
    %c0_i32_0 = arith.constant 0 : i32
    return %arg0, %arg1, %c0_i32 : i32, i32, i32
  }
}

</mosaic_0001>

<bundles_post_ra>
// kernel: aux_classifier_forward.2
= control target key start
LH: loop header
LB: loop body
LE: loop exit
PB: predicated region body
PF: predicated region fallthrough
CT: control target
= control target key end

     0   :  { %8 = vsyncpa [#allocation5], 0  ;;  %s1020_s12 = smov [#allocation4]   ;;  %s1369_s0 = inlined_call_operand.vmem [shape: f32[2,16,16,4], index: 0, kind: input, shape index: {}]   ;;  %s1370_s1 = inlined_call_operand.vmem [shape: f32[4,128], index: 1, kind: input, shape index: {}]   ;;  %s1371_s2 = inlined_call_operand.hbm [shape: f32[1,128], index: 2, kind: input, shape index: {}]   ;;  %s1372_s3 = inlined_call_operand.vmem [shape: bf16[2,8,16,128], index: 3, kind: output, shape index: {}]  }
   0x1   :  { %s19_s13 = sshll.u32 %s1020_s12, 4  ;;  %s20_s13 = int_to_ptr.vmem [resolvable:$true] %s19_s13 }
   0x2   :  { %s1006_s14 = scalar_lea.vmem %s20_s13, 16  ;;  %s1010_s15 = scalar_lea.vmem %s20_s13, 32 }
   0x3   :  { %p1007_p0 = scmp.ne.s32.totalorder %s20_s13, %s1006_s14  ;;  %p1011_p1 = scmp.lt.s32.totalorder %s20_s13, %s20_s13 }
   0x4   :  { %p1012_p2 = scmp.lt.s32.totalorder %s1010_s15, %s1006_s14 }
   0x6   :  { %p1013_p3 = por %p1012_p2, %p1011_p1 }
   0x8   :  { %p1014_p4 = pnand %p1013_p3, %p1007_p0 }
   0xa   :  { %1017 = shalt.err (!%p1014_p4)
}
   0xb   :  { %22 = dma.hbm_to_vmem [thread:$0]  %s1371_s2, 16, %s20_s13, [#allocation5]  }
   0xc   :  { %1018 = dma.done.wait [#allocation5], 16  }
   0xd   :  { %1019 = vsyncadd [#allocation5], 4294967280  ;;  %v1021_v0 = vmov 0.0|0.0   ;;  %vm568_vm0 = vcmask 1043456   ;;  %v541_v3 = vld [vmem:[%s1370_s1] sm:$0xf] }
   0xe   :  { %v890_v1 = vcombine.low %v1021_v0, %v1021_v0  ;;  %v891_v2 = vcombine.high %v1021_v0, %v1021_v0  ;;  %v26_v4 = vld [vmem:[%s1369_s0] sm:$0xff]  ;;  %v27_v5 = vld [vmem:[%s1369_s0 + $0x8] sm:$0xff]  ;;  %985 = vmatprep.subr.msk.mxu0 %vm568_vm0, %v541_v3  ;;  %993 = vmatprep.subr.msk.mxu1 %vm568_vm0, %v541_v3  ;;  %v809_v6 = vld [vmem:[%s1369_s0 + $0x10] sm:$0xff]  ;;  %vm66_vm1 = vcmask 31744   ;;  %vm275_vm2 = vcmask 24576  }
   0xf   :  { %v810_v7 = vld [vmem:[%s1369_s0 + $0x18] sm:$0xff]  ;;  %v813_v8 = vld [vmem:[%s1369_s0 + $0x20] sm:$0xff]  ;;  %986 = vmatpush3.msk.msra.mxu0 %vm568_vm0, %v541_v3  ;;  %994 = vmatpush3.msk.msra.mxu1 %vm568_vm0, %v541_v3  ;;  %v35_v9 = vadd.f32 %v809_v6, %v26_v4  ;;  %v814_v11 = vld [vmem:[%s1369_s0 + $0x28] sm:$0xff] }
  0x10   :  { %703 = vst [vmem:[%s1372_s3] sm:$0xf] %v890_v1  ;;  %704 = vst [vmem:[%s1372_s3 + $0x4] sm:$0xf] %v891_v2  ;;  %v36_v10 = vadd.f32 %v810_v7, %v27_v5  ;;  %v817_v12 = vld [vmem:[%s1369_s0 + $0x30] sm:$0xff]  ;;  %v818_v13 = vld [vmem:[%s1369_s0 + $0x38] sm:$0xff] }
  0x11   :  { %717 = vst [vmem:[%s1372_s3 + $0x38] sm:$0xf] %v890_v1  ;;  %718 = vst [vmem:[%s1372_s3 + $0x3c] sm:$0xf] %v891_v2  ;;  %v821_v14 = vld [vmem:[%s1369_s0 + $0x40] sm:$0xff]  ;;  %v822_v15 = vld [vmem:[%s1369_s0 + $0x48] sm:$0xff]  ;;  %v44_v17 = vadd.f32 %v813_v8, %v35_v9 }
  0x12   :  { %719 = vst [vmem:[%s1372_s3 + $0x40] sm:$0xf] %v890_v1  ;;  %720 = vst [vmem:[%s1372_s3 + $0x44] sm:$0xf] %v891_v2  ;;  %v833_v16 = vld [vmem:[%s1369_s0 + $0x50] sm:$0xff]  ;;  %v45_v18 = vadd.f32 %v814_v11, %v36_v10  ;;  %v79_v19 = vadd.f32 %v821_v14, %v817_v12  ;;  %v80_v20 = vadd.f32 %v822_v15, %v818_v13  ;;  %v834_v21 = vld [vmem:[%s1369_s0 + $0x58] sm:$0xff] }
  0x13   :  { %733 = vst [vmem:[%s1372_s3 + $0x78] sm:$0xf] %v890_v1  ;;  %734 = vst [vmem:[%s1372_s3 + $0x7c] sm:$0xf] %v891_v2  ;;  %v837_v22 = vld [vmem:[%s1369_s0 + $0x60] sm:$0xff]  ;;  %v838_v23 = vld [vmem:[%s1369_s0 + $0x68] sm:$0xff]  ;;  %v53_v27 = vadd.f32 %v817_v12, %v44_v17 }
  0x14   :  { %v841_v24 = vld [vmem:[%s1369_s0 + $0x70] sm:$0xff]  ;;  %v842_v25 = vld [vmem:[%s1369_s0 + $0x78] sm:$0xff]  ;;  %v28_v26 = vld [vmem:[%s1369_s0 + $0x100] sm:$0xff]  ;;  %v54_v28 = vadd.f32 %v818_v13, %v45_v18  ;;  %v88_v29 = vadd.f32 %v833_v16, %v79_v19  ;;  %v89_v30 = vadd.f32 %v834_v21, %v80_v20 }
  0x15   :  { %v29_v31 = vld [vmem:[%s1369_s0 + $0x108] sm:$0xff]  ;;  %v811_v32 = vld [vmem:[%s1369_s0 + $0x110] sm:$0xff]  ;;  %v812_v33 = vld [vmem:[%s1369_s0 + $0x118] sm:$0xff]  ;;  %v123_v39 = vadd.f32 %v841_v24, %v837_v22  ;;  %v124_v40 = vadd.f32 %v842_v25, %v838_v23  ;;  %v62_v41 = vadd.f32 %v821_v14, %v53_v27 }
  0x16   :  { %v37_v34 = vadd.f32 %v811_v32, %v28_v26  ;;  %v38_v35 = vadd.f32 %v812_v33, %v29_v31  ;;  %v815_v36 = vld [vmem:[%s1369_s0 + $0x120] sm:$0xff]  ;;  %v816_v37 = vld [vmem:[%s1369_s0 + $0x128] sm:$0xff]  ;;  %v819_v38 = vld [vmem:[%s1369_s0 + $0x130] sm:$0xff]  ;;  %v63_v42 = vadd.f32 %v822_v15, %v54_v28  ;;  %v97_v43 = vadd.f32 %v837_v22, %v88_v29 }
  0x17   :  { %v98_v44 = vadd.f32 %v838_v23, %v89_v30  ;;  %v820_v45 = vld [vmem:[%s1369_s0 + $0x138] sm:$0xff]  ;;  %v823_v46 = vld [vmem:[%s1369_s0 + $0x140] sm:$0xff]  ;;  %v824_v47 = vld [vmem:[%s1369_s0 + $0x148] sm:$0xff]  ;;  %67 = vst.msk [vmem:[#allocation2] sm:$0xff] %vm66_vm1, %v62_v41 }
  0x18   :  { %v46_v48 = vadd.f32 %v815_v36, %v37_v34  ;;  %v47_v49 = vadd.f32 %v816_v37, %v38_v35  ;;  %v81_v50 = vadd.f32 %v823_v46, %v819_v38  ;;  %v82_v51 = vadd.f32 %v824_v47, %v820_v45  ;;  %v835_v52 = vld [vmem:[%s1369_s0 + $0x150] sm:$0xff]  ;;  %v836_v53 = vld [vmem:[%s1369_s0 + $0x158] sm:$0xff]  ;;  %v839_v54 = vld [vmem:[%s1369_s0 + $0x160] sm:$0xff]  ;;  %68 = vst.msk [vmem:[#allocation2 + $0x8] sm:$0xff] %vm66_vm1, %v63_v42 }
  0x19   :  { %v106_v55 = vadd.f32 %v841_v24, %v97_v43  ;;  %v107_v56 = vadd.f32 %v842_v25, %v98_v44  ;;  %v840_v57 = vld [vmem:[%s1369_s0 + $0x168] sm:$0xff]  ;;  %v843_v58 = vld [vmem:[%s1369_s0 + $0x170] sm:$0xff]  ;;  %v844_v59 = vld [vmem:[%s1369_s0 + $0x178] sm:$0xff] }
  0x1a   :  { %v55_v60 = vadd.f32 %v819_v38, %v46_v48  ;;  %v56_v61 = vadd.f32 %v820_v45, %v47_v49  ;;  %v90_v62 = vadd.f32 %v835_v52, %v81_v50  ;;  %v91_v63 = vadd.f32 %v836_v53, %v82_v51  ;;  %v853_v0 = vld [vmem:[%s1369_s0 + $0x80] sm:$0xff]  ;;  %v854_v1 = vld [vmem:[%s1369_s0 + $0x88] sm:$0xff]  ;;  %v857_v2 = vld [vmem:[%s1369_s0 + $0x90] sm:$0xff] }
  0x1b   :  { %111 = vst.msk [vmem:[#allocation2 + $0x10] sm:$0xff] %vm66_vm1, %v106_v55  ;;  %112 = vst.msk [vmem:[#allocation2 + $0x18] sm:$0xff] %vm66_vm1, %v107_v56  ;;  %v132_v3 = vadd.f32 %v853_v0, %v123_v39  ;;  %v133_v4 = vadd.f32 %v854_v1, %v124_v40  ;;  %v858_v5 = vld [vmem:[%s1369_s0 + $0x98] sm:$0xff]  ;;  %v861_v6 = vld [vmem:[%s1369_s0 + $0xa0] sm:$0xff]  ;;  %v125_v8 = vadd.f32 %v843_v58, %v839_v54 }
  0x1c   :  { %v862_v7 = vld [vmem:[%s1369_s0 + $0xa8] sm:$0xff]  ;;  %v126_v9 = vadd.f32 %v844_v59, %v840_v57  ;;  %v64_v10 = vadd.f32 %v823_v46, %v55_v60  ;;  %v65_v11 = vadd.f32 %v824_v47, %v56_v61  ;;  %v99_v12 = vadd.f32 %v839_v54, %v90_v62  ;;  %v873_v14 = vld [vmem:[%s1369_s0 + $0xb0] sm:$0xff]  ;;  %v874_v15 = vld [vmem:[%s1369_s0 + $0xb8] sm:$0xff] }
  0x1d   :  { %v100_v13 = vadd.f32 %v840_v57, %v91_v63  ;;  %v141_v16 = vadd.f32 %v857_v2, %v132_v3  ;;  %v142_v17 = vadd.f32 %v858_v5, %v133_v4  ;;  %v167_v18 = vadd.f32 %v861_v6, %v857_v2  ;;  %v877_v20 = vld [vmem:[%s1369_s0 + $0xc0] sm:$0xff]  ;;  %v878_v21 = vld [vmem:[%s1369_s0 + $0xc8] sm:$0xff]  ;;  %v881_v24 = vld [vmem:[%s1369_s0 + $0xd0] sm:$0xff] }
  0x1e   :  { %v168_v19 = vadd.f32 %v862_v7, %v858_v5  ;;  %69 = vst.msk [vmem:[#allocation2 + $0x40] sm:$0xff] %vm66_vm1, %v64_v10  ;;  %70 = vst.msk [vmem:[#allocation2 + $0x48] sm:$0xff] %vm66_vm1, %v65_v11  ;;  %v108_v22 = vadd.f32 %v843_v58, %v99_v12  ;;  %v855_v25 = vld [vmem:[%s1369_s0 + $0x180] sm:$0xff]  ;;  %v856_v26 = vld [vmem:[%s1369_s0 + $0x188] sm:$0xff] }
  0x1f   :  { %v109_v23 = vadd.f32 %v844_v59, %v100_v13  ;;  %v150_v27 = vadd.f32 %v861_v6, %v141_v16  ;;  %v151_v28 = vadd.f32 %v862_v7, %v142_v17  ;;  %v176_v29 = vadd.f32 %v873_v14, %v167_v18  ;;  %v882_v31 = vld [vmem:[%s1369_s0 + $0xd8] sm:$0xff]  ;;  %v1220_v32 = vld [vmem:[%s1369_s0 + $0x190] sm:$0xff]  ;;  %v203_v34 = vld [vmem:[#allocation2] sm:$0x1] }
  0x20   :  { %v177_v30 = vadd.f32 %v874_v15, %v168_v19  ;;  %v1225_v33 = vld [vmem:[%s1369_s0 + $0x198] sm:$0xff]  ;;  %v211_v35 = vld [vmem:[#allocation2 + $0x1] sm:$0x1]  ;;  %v227_v36 = vld [vmem:[#allocation2 + $0x2] sm:$0x1]  ;;  %113 = vst.msk [vmem:[#allocation2 + $0x50] sm:$0xff] %vm66_vm1, %v108_v22  ;;  %v134_v37 = vadd.f32 %v855_v25, %v125_v8  ;;  %v135_v38 = vadd.f32 %v856_v26, %v126_v9 }
  0x21   :  { %114 = vst.msk [vmem:[#allocation2 + $0x58] sm:$0xff] %vm66_vm1, %v109_v23  ;;  %v219_v39 = vadd.f32 %v211_v35, %v203_v34  ;;  %v243_v40 = vld [vmem:[#allocation2 + $0x3] sm:$0x1]  ;;  %155 = vst.msk [vmem:[#allocation2 + $0x20] sm:$0xff] %vm66_vm1, %v150_v27  ;;  %v185_v42 = vadd.f32 %v877_v20, %v176_v29  ;;  %v1239_v45 = vld [vmem:[%s1369_s0 + $0x1a8] sm:$0xff] }
  0x22   :  { %v284_v41 = vld [vmem:[#allocation2 + $0x3] sm:$0x1]  ;;  %156 = vst.msk [vmem:[#allocation2 + $0x28] sm:$0xff] %vm66_vm1, %v151_v28  ;;  %v186_v43 = vadd.f32 %v878_v21, %v177_v30  ;;  %v204_v46 = vld [vmem:[#allocation2 + $0x10] sm:$0x1]  ;;  %v143_v49 = vadd.f32 %v1220_v32, %v134_v37  ;;  %v144_v50 = vadd.f32 %v1225_v33, %v135_v38 }
  0x23   :  { %v1234_v44 = vld [vmem:[%s1369_s0 + $0x1a0] sm:$0xff]  ;;  %v212_v47 = vld [vmem:[#allocation2 + $0x11] sm:$0x1]  ;;  %v228_v48 = vld [vmem:[#allocation2 + $0x12] sm:$0x1]  ;;  %v235_v52 = vadd.f32 %v227_v36, %v219_v39  ;;  %v194_v56 = vadd.f32 %v881_v24, %v185_v42 }
  0x24   :  { %v220_v51 = vadd.f32 %v212_v47, %v204_v46  ;;  %v244_v53 = vld [vmem:[#allocation2 + $0x13] sm:$0x1]  ;;  %v259_v54 = vld [vmem:[#allocation2 + $0x4] sm:$0x1]  ;;  %v195_v57 = vadd.f32 %v882_v31, %v186_v43  ;;  %v260_v58 = vld [vmem:[#allocation2 + $0x14] sm:$0x1]  ;;  %v152_v62 = vadd.f32 %v1234_v44, %v143_v49  ;;  %v153_v63 = vadd.f32 %v1239_v45, %v144_v50 }
  0x25   :  { %v285_v55 = vld [vmem:[#allocation2 + $0x13] sm:$0x1]  ;;  %v292_v59 = vld [vmem:[#allocation2 + $0x4] sm:$0x1]  ;;  %v293_v60 = vld [vmem:[#allocation2 + $0x14] sm:$0x1]  ;;  %v251_v1 = vadd.f32 %v243_v40, %v235_v52 }
  0x26   :  { %v308_v61 = vld [vmem:[#allocation2 + $0x5] sm:$0x1]  ;;  %v236_v0 = vadd.f32 %v228_v48, %v220_v51  ;;  %v300_v2 = vadd.f32 %v292_v59, %v284_v41  ;;  %v301_v3 = vadd.f32 %v293_v60, %v285_v55  ;;  %v309_v4 = vld [vmem:[#allocation2 + $0x15] sm:$0x1]  ;;  %v324_v5 = vld [vmem:[#allocation2 + $0x6] sm:$0x1] }
  0x27   :  { %v325_v6 = vld [vmem:[#allocation2 + $0x16] sm:$0x1]  ;;  %199 = vst.msk [vmem:[#allocation2 + $0x30] sm:$0xff] %vm66_vm1, %v194_v56  ;;  %200 = vst.msk [vmem:[#allocation2 + $0x38] sm:$0xff] %vm66_vm1, %v195_v57  ;;  %v340_v7 = vld [vmem:[#allocation2 + $0x7] sm:$0x1]  ;;  %v267_v11 = vadd.f32 %v259_v54, %v251_v1 }
  0x28   :  { %v341_v8 = vld [vmem:[#allocation2 + $0x17] sm:$0x1]  ;;  %v364_v9 = vld [vmem:[#allocation2 + $0x6] sm:$0x1]  ;;  %157 = vst.msk [vmem:[#allocation2 + $0x60] sm:$0xff] %vm66_vm1, %v152_v62  ;;  %158 = vst.msk [vmem:[#allocation2 + $0x68] sm:$0xff] %vm66_vm1, %v153_v63  ;;  %v252_v10 = vadd.f32 %v244_v53, %v236_v0  ;;  %v316_v12 = vadd.f32 %v308_v61, %v300_v2  ;;  %v317_v13 = vadd.f32 %v309_v4, %v301_v3 }
  0x29   :  { %v365_v14 = vld [vmem:[#allocation2 + $0x16] sm:$0x1]  ;;  %v372_v15 = vld [vmem:[#allocation2 + $0x7] sm:$0x1]  ;;  %v373_v16 = vld [vmem:[#allocation2 + $0x17] sm:$0x1] }
  0x2a   :  { %v380_v17 = vadd.f32 %v372_v15, %v364_v9  ;;  %v381_v18 = vadd.f32 %v373_v16, %v365_v14  ;;  %v388_v19 = vld [vmem:[#allocation2 + $0x8] sm:$0x1]  ;;  %v389_v20 = vld [vmem:[#allocation2 + $0x18] sm:$0x1]  ;;  %v404_v21 = vld [vmem:[#allocation2 + $0x9] sm:$0x1]  ;;  %v268_v22 = vadd.f32 %v260_v58, %v252_v10  ;;  %v332_v23 = vadd.f32 %v324_v5, %v316_v12 }
  0x2b   :  { %276 = vst.msk [vmem:[#allocation3] sm:$0x1] %vm275_vm2, %v267_v11  ;;  %v333_v24 = vadd.f32 %v325_v6, %v317_v13  ;;  %v405_v25 = vld [vmem:[#allocation2 + $0x19] sm:$0x1]  ;;  %v420_v26 = vld [vmem:[#allocation2 + $0xa] sm:$0x1] }
  0x2c   :  { %v421_v27 = vld [vmem:[#allocation2 + $0x1a] sm:$0x1]  ;;  %v396_v28 = vadd.f32 %v388_v19, %v380_v17  ;;  %v397_v29 = vadd.f32 %v389_v20, %v381_v18  ;;  %v444_v30 = vld [vmem:[#allocation2 + $0x9] sm:$0x1]  ;;  %v445_v31 = vld [vmem:[#allocation2 + $0x19] sm:$0x1]  ;;  %v348_v35 = vadd.f32 %v340_v7, %v332_v23 }
  0x2d   :  { %v452_v34 = vld [vmem:[#allocation2 + $0xa] sm:$0x1]  ;;  %277 = vst.msk [vmem:[#allocation3 + $0x4] sm:$0x1] %vm275_vm2, %v268_v22  ;;  %v349_v36 = vadd.f32 %v341_v8, %v333_v24  ;;  %v453_v37 = vld [vmem:[#allocation2 + $0x1a] sm:$0x1] }
  0x2e   :  { %v460_v38 = vadd.f32 %v452_v34, %v444_v30  ;;  %v468_v39 = vld [vmem:[#allocation2 + $0xb] sm:$0x1]  ;;  %v469_v40 = vld [vmem:[#allocation2 + $0x1b] sm:$0x1]  ;;  %v412_v41 = vadd.f32 %v404_v21, %v396_v28  ;;  %v413_v42 = vadd.f32 %v405_v25, %v397_v29  ;;  %v461_v43 = vadd.f32 %v453_v37, %v445_v31  ;;  %v484_v46 = vld [vmem:[#allocation2 + $0xc] sm:$0x1] }
  0x2f   :  { %v485_v47 = vld [vmem:[#allocation2 + $0x1c] sm:$0x1]  ;;  %v500_v48 = vld [vmem:[#allocation2 + $0xd] sm:$0x1]  ;;  %356 = vst.msk [vmem:[#allocation3 + $0x1] sm:$0x1] %vm275_vm2, %v348_v35 }
  0x30   :  { %357 = vst.msk [vmem:[#allocation3 + $0x5] sm:$0x1] %vm275_vm2, %v349_v36  ;;  %v476_v49 = vadd.f32 %v468_v39, %v460_v38  ;;  %v501_v50 = vld [vmem:[#allocation2 + $0x1d] sm:$0x1]  ;;  %v207_v51 = vld [vmem:[#allocation2 + $0x40] sm:$0x1]  ;;  %v428_v53 = vadd.f32 %v420_v26, %v412_v41  ;;  %v429_v54 = vadd.f32 %v421_v27, %v413_v42  ;;  %v477_v55 = vadd.f32 %v469_v40, %v461_v43 }
  0x31   :  { %v208_v52 = vld [vmem:[#allocation2 + $0x50] sm:$0x1]  ;;  %v215_v56 = vld [vmem:[#allocation2 + $0x41] sm:$0x1]  ;;  %v216_v57 = vld [vmem:[#allocation2 + $0x51] sm:$0x1] }
  0x32   :  { %v231_v58 = vld [vmem:[#allocation2 + $0x42] sm:$0x1]  ;;  %v492_v59 = vadd.f32 %v484_v46, %v476_v49  ;;  %v223_v60 = vadd.f32 %v215_v56, %v207_v51  ;;  %v224_v61 = vadd.f32 %v216_v57, %v208_v52  ;;  %v232_v62 = vld [vmem:[#allocation2 + $0x52] sm:$0x1]  ;;  %v247_v63 = vld [vmem:[#allocation2 + $0x43] sm:$0x1]  ;;  %v493_v1 = vadd.f32 %v485_v47, %v477_v55 }
  0x33   :  { %v248_v0 = vld [vmem:[#allocation2 + $0x53] sm:$0x1]  ;;  %436 = vst.msk [vmem:[#allocation3 + $0x2] sm:$0x1] %vm275_vm2, %v428_v53  ;;  %437 = vst.msk [vmem:[#allocation3 + $0x6] sm:$0x1] %vm275_vm2, %v429_v54 }
  0x34   :  { %v263_v2 = vld [vmem:[#allocation2 + $0x44] sm:$0x1]  ;;  %v264_v3 = vld [vmem:[#allocation2 + $0x54] sm:$0x1]  ;;  %v288_v4 = vld [vmem:[#allocation2 + $0x43] sm:$0x1]  ;;  %v508_v5 = vadd.f32 %v500_v48, %v492_v59  ;;  %v239_v6 = vadd.f32 %v231_v58, %v223_v60  ;;  %v240_v7 = vadd.f32 %v232_v62, %v224_v61  ;;  %v509_v11 = vadd.f32 %v501_v50, %v493_v1 }
  0x35   :  { %v289_v8 = vld [vmem:[#allocation2 + $0x53] sm:$0x1]  ;;  %v296_v9 = vld [vmem:[#allocation2 + $0x44] sm:$0x1]  ;;  %v297_v10 = vld [vmem:[#allocation2 + $0x54] sm:$0x1] }
  0x36   :  { %v304_v12 = vadd.f32 %v296_v9, %v288_v4  ;;  %v305_v13 = vadd.f32 %v297_v10, %v289_v8  ;;  %v312_v14 = vld [vmem:[#allocation2 + $0x45] sm:$0x1]  ;;  %v313_v15 = vld [vmem:[#allocation2 + $0x55] sm:$0x1]  ;;  %v328_v16 = vld [vmem:[#allocation2 + $0x46] sm:$0x1]  ;;  %v255_v17 = vadd.f32 %v247_v63, %v239_v6  ;;  %v256_v18 = vadd.f32 %v248_v0, %v240_v7 }
  0x37   :  { %516 = vst.msk [vmem:[#allocation3 + $0x3] sm:$0x1] %vm275_vm2, %v508_v5  ;;  %v329_v19 = vld [vmem:[#allocation2 + $0x56] sm:$0x1]  ;;  %v344_v20 = vld [vmem:[#allocation2 + $0x47] sm:$0x1] }
  0x38   :  { %v345_v21 = vld [vmem:[#allocation2 + $0x57] sm:$0x1]  ;;  %517 = vst.msk [vmem:[#allocation3 + $0x7] sm:$0x1] %vm275_vm2, %v509_v11  ;;  %v320_v22 = vadd.f32 %v312_v14, %v304_v12  ;;  %v321_v23 = vadd.f32 %v313_v15, %v305_v13  ;;  %v368_v24 = vld [vmem:[#allocation2 + $0x46] sm:$0x1]  ;;  %v271_v27 = vadd.f32 %v263_v2, %v255_v17  ;;  %v272_v28 = vadd.f32 %v264_v3, %v256_v18 }
  0x39   :  { %v369_v25 = vld [vmem:[#allocation2 + $0x56] sm:$0x1]  ;;  %v376_v26 = vld [vmem:[#allocation2 + $0x47] sm:$0x1]  ;;  %v377_v29 = vld [vmem:[#allocation2 + $0x57] sm:$0x1] }
  0x3a   :  { %v384_v30 = vadd.f32 %v376_v26, %v368_v24  ;;  %v392_v31 = vld [vmem:[#allocation2 + $0x48] sm:$0x1]  ;;  %v393_v34 = vld [vmem:[#allocation2 + $0x58] sm:$0x1]  ;;  %v336_v35 = vadd.f32 %v328_v16, %v320_v22  ;;  %v337_v36 = vadd.f32 %v329_v19, %v321_v23  ;;  %v385_v37 = vadd.f32 %v377_v29, %v369_v25  ;;  %v408_v38 = vld [vmem:[#allocation2 + $0x49] sm:$0x1] }
  0x3b   :  { %v409_v39 = vld [vmem:[#allocation2 + $0x59] sm:$0x1]  ;;  %v424_v40 = vld [vmem:[#allocation2 + $0x4a] sm:$0x1]  ;;  %280 = vst.msk [vmem:[#allocation3 + $0x10] sm:$0x1] %vm275_vm2, %v271_v27 }
  0x3c   :  { %281 = vst.msk [vmem:[#allocation3 + $0x14] sm:$0x1] %vm275_vm2, %v272_v28  ;;  %v400_v41 = vadd.f32 %v392_v31, %v384_v30  ;;  %v425_v42 = vld [vmem:[#allocation2 + $0x5a] sm:$0x1]  ;;  %v448_v43 = vld [vmem:[#allocation2 + $0x49] sm:$0x1]  ;;  %v352_v47 = vadd.f32 %v344_v20, %v336_v35  ;;  %v353_v48 = vadd.f32 %v345_v21, %v337_v36  ;;  %v401_v49 = vadd.f32 %v393_v34, %v385_v37 }
  0x3d   :  { %v449_v46 = vld [vmem:[#allocation2 + $0x59] sm:$0x1]  ;;  %v456_v50 = vld [vmem:[#allocation2 + $0x4a] sm:$0x1]  ;;  %v457_v51 = vld [vmem:[#allocation2 + $0x5a] sm:$0x1] }
  0x3e   :  { %v472_v52 = vld [vmem:[#allocation2 + $0x4b] sm:$0x1]  ;;  %v416_v53 = vadd.f32 %v408_v38, %v400_v41  ;;  %v464_v54 = vadd.f32 %v456_v50, %v448_v43  ;;  %v465_v55 = vadd.f32 %v457_v51, %v449_v46  ;;  %v473_v56 = vld [vmem:[#allocation2 + $0x5b] sm:$0x1]  ;;  %v488_v57 = vld [vmem:[#allocation2 + $0x4c] sm:$0x1]  ;;  %v417_v60 = vadd.f32 %v409_v39, %v401_v49 }
  0x3f   :  { %v489_v58 = vld [vmem:[#allocation2 + $0x5c] sm:$0x1]  ;;  %v524_v59 = vld [vmem:[#allocation3] sm:$0xf]  ;;  %360 = vst.msk [vmem:[#allocation3 + $0x11] sm:$0x1] %vm275_vm2, %v352_v47 }
  0x40   :  { %361 = vst.msk [vmem:[#allocation3 + $0x15] sm:$0x1] %vm275_vm2, %v353_v48  ;;  %v504_v61 = vld [vmem:[#allocation2 + $0x4d] sm:$0x1]  ;;  %v505_v62 = vld [vmem:[#allocation2 + $0x5d] sm:$0x1]  ;;  %v432_v1 = vadd.f32 %v424_v40, %v416_v53  ;;  %v480_v2 = vadd.f32 %v472_v52, %v464_v54  ;;  %v481_v3 = vadd.f32 %v473_v56, %v465_v55  ;;  %v433_v6 = vadd.f32 %v425_v42, %v417_v60 }
  0x41   :  { %v525_v63 = vld [vmem:[#allocation3 + $0x4] sm:$0xf]  ;;  %v532_v0 = vmul.f32 0.04, %v524_v59  ;;  %v205_v4 = vld [vmem:[#allocation2 + $0x20] sm:$0x1] }
  0x42   :  { %v533_v5 = vmul.f32 0.04, %v525_v63  ;;  %v206_v7 = vld [vmem:[#allocation2 + $0x30] sm:$0x1]  ;;  %v213_v8 = vld [vmem:[#allocation2 + $0x21] sm:$0x1]  ;;  %v496_v9 = vadd.f32 %v488_v57, %v480_v2  ;;  %v497_v10 = vadd.f32 %v489_v58, %v481_v3 }
  0x43   :  { %440 = vst.msk [vmem:[#allocation3 + $0x12] sm:$0x1] %vm275_vm2, %v432_v1  ;;  %v214_v11 = vld [vmem:[#allocation2 + $0x31] sm:$0x1]  ;;  %v221_v12 = vadd.f32 %v213_v8, %v205_v4  ;;  %v229_v13 = vld [vmem:[#allocation2 + $0x22] sm:$0x1]  ;;  %v169_v8 = vadd.f32 %v1234_v44, %v1220_v32 }
  0x44   :  { %v230_v14 = vld [vmem:[#allocation2 + $0x32] sm:$0x1]  ;;  %v556_v15 = vcombine.low %v532_v0, %v533_v5  ;;  %441 = vst.msk [vmem:[#allocation3 + $0x16] sm:$0x1] %vm275_vm2, %v433_v6  ;;  %v222_v16 = vadd.f32 %v214_v11, %v206_v7  ;;  %v245_v17 = vld [vmem:[#allocation2 + $0x23] sm:$0x1]  ;;  %v512_v20 = vadd.f32 %v504_v61, %v496_v9  ;;  %v513_v21 = vadd.f32 %v505_v62, %v497_v10 }
  0x45   :  { %v246_v18 = vld [vmem:[#allocation2 + $0x33] sm:$0x1]  ;;  %v261_v19 = vld [vmem:[#allocation2 + $0x24] sm:$0x1]  ;;  %v237_v22 = vadd.f32 %v229_v13, %v221_v12  ;;  %v262_v23 = vld [vmem:[#allocation2 + $0x34] sm:$0x1] }
  0x46   :  { %v286_v24 = vld [vmem:[#allocation2 + $0x23] sm:$0x1]  ;;  %v287_v25 = vld [vmem:[#allocation2 + $0x33] sm:$0x1]  ;;  %987 = vmatprep.mubr.msk.f32.mxu0 %vm66_vm1, %v556_v15  ;;  %v238_v26 = vadd.f32 %v230_v14, %v222_v16  ;;  %v294_v27 = vld [vmem:[#allocation2 + $0x24] sm:$0x1]  ;;  %v170_v15 = vadd.f32 %v1239_v45, %v1225_v33 }
  0x47   :  { %v295_v28 = vld [vmem:[#allocation2 + $0x34] sm:$0x1]  ;;  %v310_v29 = vld [vmem:[#allocation2 + $0x25] sm:$0x1]  ;;  %520 = vst.msk [vmem:[#allocation3 + $0x13] sm:$0x1] %vm275_vm2, %v512_v20  ;;  %v253_v30 = vadd.f32 %v245_v17, %v237_v22  ;;  %v302_v31 = vadd.f32 %v294_v27, %v286_v24 }
  0x48   :  { %521 = vst.msk [vmem:[#allocation3 + $0x17] sm:$0x1] %vm275_vm2, %v513_v21  ;;  %v303_v34 = vadd.f32 %v295_v28, %v287_v25  ;;  %v311_v35 = vld [vmem:[#allocation2 + $0x35] sm:$0x1]  ;;  %v326_v36 = vld [vmem:[#allocation2 + $0x26] sm:$0x1]  ;;  %v254_v38 = vadd.f32 %v246_v18, %v238_v26 }
  0x49   :  { %v327_v37 = vld [vmem:[#allocation2 + $0x36] sm:$0x1]  ;;  %v342_v39 = vld [vmem:[#allocation2 + $0x27] sm:$0x1]  ;;  %v343_v40 = vld [vmem:[#allocation2 + $0x37] sm:$0x1]  ;;  %v269_v42 = vadd.f32 %v261_v19, %v253_v30  ;;  %v318_v43 = vadd.f32 %v310_v29, %v302_v31 }
  0x4a   :  { %v366_v41 = vld [vmem:[#allocation2 + $0x26] sm:$0x1]  ;;  %v319_v46 = vadd.f32 %v311_v35, %v303_v34  ;;  %v367_v47 = vld [vmem:[#allocation2 + $0x36] sm:$0x1]  ;;  %v374_v48 = vld [vmem:[#allocation2 + $0x27] sm:$0x1]  ;;  %v270_v50 = vadd.f32 %v262_v23, %v254_v38 }
  0x4b   :  { %v375_v49 = vld [vmem:[#allocation2 + $0x37] sm:$0x1]  ;;  %v382_v51 = vadd.f32 %v374_v48, %v366_v41  ;;  %v390_v53 = vld [vmem:[#allocation2 + $0x28] sm:$0x1]  ;;  %v391_v54 = vld [vmem:[#allocation2 + $0x38] sm:$0x1]  ;;  %v334_v56 = vadd.f32 %v326_v36, %v318_v43 }
  0x4c   :  { %v383_v52 = vadd.f32 %v375_v49, %v367_v47  ;;  %v406_v55 = vld [vmem:[#allocation2 + $0x29] sm:$0x1]  ;;  %278 = vst.msk [vmem:[#allocation3 + $0x8] sm:$0x1] %vm275_vm2, %v269_v42  ;;  %v335_v57 = vadd.f32 %v327_v37, %v319_v46  ;;  %v407_v58 = vld [vmem:[#allocation2 + $0x39] sm:$0x1] }
  0x4d   :  { %v422_v59 = vld [vmem:[#allocation2 + $0x2a] sm:$0x1]  ;;  %v423_v60 = vld [vmem:[#allocation2 + $0x3a] sm:$0x1]  ;;  %279 = vst.msk [vmem:[#allocation3 + $0xc] sm:$0x1] %vm275_vm2, %v270_v50  ;;  %v398_v61 = vadd.f32 %v390_v53, %v382_v51  ;;  %v350_v2 = vadd.f32 %v342_v39, %v334_v56 }
  0x4e   :  { %v399_v62 = vadd.f32 %v391_v54, %v383_v52  ;;  %v446_v63 = vld [vmem:[#allocation2 + $0x29] sm:$0x1]  ;;  %v447_v0 = vld [vmem:[#allocation2 + $0x39] sm:$0x1]  ;;  %v454_v1 = vld [vmem:[#allocation2 + $0x2a] sm:$0x1]  ;;  %v351_v3 = vadd.f32 %v343_v40, %v335_v57 }
  0x4f   :  { %v455_v4 = vld [vmem:[#allocation2 + $0x3a] sm:$0x1]  ;;  %v462_v5 = vadd.f32 %v454_v1, %v446_v63  ;;  %v470_v6 = vld [vmem:[#allocation2 + $0x2b] sm:$0x1]  ;;  %v471_v7 = vld [vmem:[#allocation2 + $0x3b] sm:$0x1]  ;;  %v414_v11 = vadd.f32 %v406_v55, %v398_v61 }
  0x50   :  { %v528_v9 = vld [vmem:[#allocation3 + $0x10] sm:$0xf]  ;;  %v529_v10 = vld [vmem:[#allocation3 + $0x14] sm:$0xf]  ;;  %v415_v12 = vadd.f32 %v407_v58, %v399_v62  ;;  %v463_v13 = vadd.f32 %v455_v4, %v447_v0  ;;  %v486_v14 = vld [vmem:[#allocation2 + $0x2c] sm:$0x1] }
  0x51   :  { %v536_v16 = vmul.f32 0.04, %v528_v9  ;;  %v537_v17 = vmul.f32 0.04, %v529_v10  ;;  %358 = vst.msk [vmem:[#allocation3 + $0x9] sm:$0x1] %vm275_vm2, %v350_v2  ;;  %v478_v18 = vadd.f32 %v470_v6, %v462_v5  ;;  %v430_v20 = vadd.f32 %v422_v59, %v414_v11 }
  0x52   :  { %359 = vst.msk [vmem:[#allocation3 + $0xd] sm:$0x1] %vm275_vm2, %v351_v3  ;;  %v487_v19 = vld [vmem:[#allocation2 + $0x3c] sm:$0x1]  ;;  %v431_v21 = vadd.f32 %v423_v60, %v415_v12  ;;  %v479_v32 = vadd.f32 %v471_v7, %v463_v13  ;;  %v502_v44 = vld [vmem:[#allocation2 + $0x2d] sm:$0x1] }
  0x53   :  { %v503_v22 = vld [vmem:[#allocation2 + $0x3d] sm:$0x1]  ;;  %v875_v23 = vld [vmem:[%s1369_s0 + $0x1b0] sm:$0xff]  ;;  %v558_v24 = vcombine.low %v536_v16, %v537_v17  ;;  %v494_v25 = vadd.f32 %v486_v14, %v478_v18  ;;  %v879_v26 = vld [vmem:[%s1369_s0 + $0x1c0] sm:$0xff]  ;;  %438 = vst.msk [vmem:[#allocation3 + $0xa] sm:$0x1] %vm275_vm2, %v430_v20 }
  0x54   :  { %v876_v33 = vld [vmem:[%s1369_s0 + $0x1b8] sm:$0xff]  ;;  %v178_v45 = vadd.f32 %v875_v23, %v169_v8  ;;  %v880_v27 = vld [vmem:[%s1369_s0 + $0x1c8] sm:$0xff]  ;;  %439 = vst.msk [vmem:[#allocation3 + $0xe] sm:$0x1] %vm275_vm2, %v431_v21  ;;  %v495_v28 = vadd.f32 %v487_v19, %v479_v32  ;;  %v883_v30 = vld [vmem:[%s1369_s0 + $0x1d0] sm:$0xff] }
  0x55   :  { %v179_v29 = vadd.f32 %v876_v33, %v170_v15  ;;  %v209_v31 = vld [vmem:[#allocation2 + $0x60] sm:$0x1]  ;;  %990 = vmatprep.mubr.msk.f32.mxu1 %vm66_vm1, %v558_v24  ;;  %v510_v34 = vadd.f32 %v502_v44, %v494_v25  ;;  %v884_v36 = vld [vmem:[%s1369_s0 + $0x1d8] sm:$0xff]  ;;  %v217_v37 = vld [vmem:[#allocation2 + $0x61] sm:$0x1] }
  0x56   :  { %v187_v35 = vadd.f32 %v879_v26, %v178_v45  ;;  %v233_v38 = vld [vmem:[#allocation2 + $0x62] sm:$0x1]  ;;  %v511_v39 = vadd.f32 %v503_v22, %v495_v28  ;;  %v225_v41 = vadd.f32 %v217_v37, %v209_v31  ;;  %v290_v42 = vld [vmem:[#allocation2 + $0x63] sm:$0x1]  ;;  %v298_v43 = vld [vmem:[#allocation2 + $0x64] sm:$0x1] }
  0x57   :  { %v188_v40 = vadd.f32 %v880_v27, %v179_v29  ;;  %518 = vst.msk [vmem:[#allocation3 + $0xb] sm:$0x1] %vm275_vm2, %v510_v34  ;;  %v249_v47 = vld [vmem:[#allocation2 + $0x63] sm:$0x1]  ;;  %v306_v48 = vadd.f32 %v298_v43, %v290_v42  ;;  %v314_v49 = vld [vmem:[#allocation2 + $0x65] sm:$0x1] }
  0x58   :  { %v196_v46 = vadd.f32 %v883_v30, %v187_v35  ;;  %v330_v50 = vld [vmem:[#allocation2 + $0x66] sm:$0x1]  ;;  %519 = vst.msk [vmem:[#allocation3 + $0xf] sm:$0x1] %vm275_vm2, %v511_v39  ;;  %v241_v52 = vadd.f32 %v233_v38, %v225_v41  ;;  %v378_v54 = vld [vmem:[#allocation2 + $0x67] sm:$0x1] }
  0x59   :  { %v197_v51 = vadd.f32 %v884_v36, %v188_v40  ;;  %v370_v53 = vld [vmem:[#allocation2 + $0x66] sm:$0x1]  ;;  %v394_v55 = vld [vmem:[#allocation2 + $0x68] sm:$0x1]  ;;  %v265_v56 = vld [vmem:[#allocation2 + $0x64] sm:$0x1]  ;;  %v322_v57 = vadd.f32 %v314_v49, %v306_v48 }
  0x5a   :  { %201 = vst.msk [vmem:[#allocation2 + $0x70] sm:$0xff] %vm66_vm1, %v196_v46  ;;  %v346_v58 = vld [vmem:[#allocation2 + $0x67] sm:$0x1]  ;;  %v386_v59 = vadd.f32 %v378_v54, %v370_v53  ;;  %v450_v60 = vld [vmem:[#allocation2 + $0x69] sm:$0x1]  ;;  %v257_v61 = vadd.f32 %v249_v47, %v241_v52 }
  0x5b   :  { %202 = vst.msk [vmem:[#allocation2 + $0x78] sm:$0xff] %vm66_vm1, %v197_v51  ;;  %v410_v62 = vld [vmem:[#allocation2 + $0x69] sm:$0x1]  ;;  %v458_v63 = vld [vmem:[#allocation2 + $0x6a] sm:$0x1]  ;;  %v338_v1 = vadd.f32 %v330_v50, %v322_v57 }
  0x5c   :  { %v474_v0 = vld [vmem:[#allocation2 + $0x6b] sm:$0x1]  ;;  %v402_v2 = vadd.f32 %v394_v55, %v386_v59  ;;  %v466_v3 = vadd.f32 %v458_v63, %v450_v60  ;;  %v273_v4 = vadd.f32 %v265_v56, %v257_v61  ;;  %v426_v5 = vld [vmem:[#allocation2 + $0x6a] sm:$0x1]  ;;  %v490_v6 = vld [vmem:[#allocation2 + $0x6c] sm:$0x1]  ;;  %v543_v60 = vlaneseq }
  0x5d   :  { %v354_v7 = vadd.f32 %v346_v58, %v338_v1  ;;  %v506_v11 = vld [vmem:[#allocation2 + $0x6d] sm:$0x1] }
  0x5e   :  { %v418_v8 = vadd.f32 %v410_v62, %v402_v2  ;;  %v482_v9 = vadd.f32 %v474_v0, %v466_v3  ;;  %v526_v10 = vld [vmem:[#allocation3 + $0x8] sm:$0xf]  ;;  %282 = vst.msk [vmem:[#allocation3 + $0x18] sm:$0x1] %vm275_vm2, %v273_v4  ;;  %v544_v61 = vshrl.u32 %v543_v60, 7  ;;  %v1022_v3 = vmov 0.0  }
  0x5f   :  { %v527_v12 = vld [vmem:[#allocation3 + $0xc] sm:$0xf]  ;;  %v534_v13 = vmul.f32 0.04, %v526_v10  ;;  %362 = vst.msk [vmem:[#allocation3 + $0x19] sm:$0x1] %vm275_vm2, %v354_v7 }
  0x60   :  { %v434_v14 = vadd.f32 %v426_v5, %v418_v8  ;;  %v498_v15 = vadd.f32 %v490_v6, %v482_v9  ;;  %v535_v16 = vmul.f32 0.04, %v527_v12  ;;  %v540_v62 = vld [vmem:[#allocation4] sm:$0x1]  ;;  %v545_v63 = vsub.s32 0, %v544_v61 }
  0x61   :  { %v210_v17 = vld [vmem:[#allocation2 + $0x70] sm:$0x1]  ;;  %v218_v18 = vld [vmem:[#allocation2 + $0x71] sm:$0x1]  ;;  %v234_v20 = vld [vmem:[#allocation2 + $0x72] sm:$0x1] }
  0x62   :  { %v226_v19 = vadd.f32 %v218_v18, %v210_v17  ;;  %v250_v21 = vld [vmem:[#allocation2 + $0x73] sm:$0x1]  ;;  %442 = vst.msk [vmem:[#allocation3 + $0x1a] sm:$0x1] %vm275_vm2, %v434_v14  ;;  %v514_v32 = vadd.f32 %v506_v11, %v498_v15  ;;  %v557_v44 = vcombine.low %v534_v13, %v535_v16  ;;  %v299_v23 = vld [vmem:[#allocation2 + $0x74] sm:$0x1]  ;;  %v546_v5 = vrot.slane %v540_v62, %v545_v63 }
  0x63   :  { %v291_v22 = vld [vmem:[#allocation2 + $0x73] sm:$0x1]  ;;  %v315_v24 = vld [vmem:[#allocation2 + $0x75] sm:$0x1]  ;;  %v266_v33 = vld [vmem:[#allocation2 + $0x74] sm:$0x1] }
  0x64   :  { %v242_v25 = vadd.f32 %v234_v20, %v226_v19  ;;  %v307_v45 = vadd.f32 %v299_v23, %v291_v22  ;;  %v371_v26 = vld [vmem:[#allocation2 + $0x76] sm:$0x1]  ;;  %522 = vst.msk [vmem:[#allocation3 + $0x1b] sm:$0x1] %vm275_vm2, %v514_v32  ;;  %988 = vmatmul.mubr.msk.f32.vlgmr.msra.gmra.mxu0 %vm66_vm1, %v557_v44  ;;  %v379_v28 = vld [vmem:[#allocation2 + $0x77] sm:$0x1] }
  0x65   :  { %v331_v27 = vld [vmem:[#allocation2 + $0x76] sm:$0x1]  ;;  %v395_v29 = vld [vmem:[#allocation2 + $0x78] sm:$0x1]  ;;  %v387_v34 = vadd.f32 %v379_v28, %v371_v26  ;;  %v451_v35 = vld [vmem:[#allocation2 + $0x79] sm:$0x1] }
  0x66   :  { %v258_v30 = vadd.f32 %v250_v21, %v242_v25  ;;  %v323_v31 = vadd.f32 %v315_v24, %v307_v45  ;;  %v459_v36 = vld [vmem:[#allocation2 + $0x7a] sm:$0x1]  ;;  %v347_v37 = vld [vmem:[#allocation2 + $0x77] sm:$0x1]  ;;  %v411_v38 = vld [vmem:[#allocation2 + $0x79] sm:$0x1] }
  0x67   :  { %v467_v39 = vadd.f32 %v459_v36, %v451_v35  ;;  %v475_v40 = vld [vmem:[#allocation2 + $0x7b] sm:$0x1]  ;;  %v403_v43 = vadd.f32 %v395_v29, %v387_v34  ;;  %v491_v46 = vld [vmem:[#allocation2 + $0x7c] sm:$0x1]  ;;  %v427_v47 = vld [vmem:[#allocation2 + $0x7a] sm:$0x1] }
  0x68   :  { %v274_v41 = vadd.f32 %v266_v33, %v258_v30  ;;  %v339_v42 = vadd.f32 %v331_v27, %v323_v31  ;;  %v507_v51 = vld [vmem:[#allocation2 + $0x7d] sm:$0x1]  ;;  %v661_v0 = vmax.f32 %v540_v62, 0.0  ;;  %vm665_vm3 = vcmp.ge.s32.totalorder %v544_v61, 1 }
  0x69   :  { %v483_v48 = vadd.f32 %v475_v40, %v467_v39  ;;  %v419_v50 = vadd.f32 %v411_v38, %v403_v43  ;;  %vm671_vm4 = vcmp.le.s32.totalorder %v544_v61, 6 }
  0x6a   :  { %283 = vst.msk [vmem:[#allocation3 + $0x1c] sm:$0x1] %vm275_vm2, %v274_v41  ;;  %v355_v49 = vadd.f32 %v347_v37, %v339_v42  ;;  %vm675_vm5 = vmand %vm665_vm3, %vm671_vm4  ;;  %v681_v1 = vrot.slane %v661_v0, %v545_v63 }
  0x6b   :  { %v499_v52 = vadd.f32 %v491_v46, %v483_v48  ;;  %v435_v53 = vadd.f32 %v427_v47, %v419_v50  ;;  %v530_v55 = vld [vmem:[#allocation3 + $0x18] sm:$0xf] }
  0x6c   :  { %363 = vst.msk [vmem:[#allocation3 + $0x1d] sm:$0x1] %vm275_vm2, %v355_v49  ;;  %v538_v56 = vmul.f32 0.04, %v530_v55  ;;  %v685_v2 = vsel %vm675_vm5, %v681_v1, 0.0 }
  0x6d   :  { %v515_v54 = vadd.f32 %v507_v51, %v499_v52  ;;  %443 = vst.msk [vmem:[#allocation3 + $0x1e] sm:$0x1] %vm275_vm2, %v435_v53  ;;  %v922_v4 = vpack.c.bf16 %v1022_v3, %v685_v2 }
  0x6f   :  { %523 = vst.msk [vmem:[#allocation3 + $0x1f] sm:$0x1] %vm275_vm2, %v515_v54  ;;  %968 = vst [vmem:[%s1372_s3 + $0x8] sm:$0xff] %v922_v4  }
  0x70   :  { %971 = vst [vmem:[%s1372_s3 + $0x20] sm:$0xff] %v922_v4   ;;  %972 = vst [vmem:[%s1372_s3 + $0x28] sm:$0xff] %v922_v4  }
  0x71   :  { %973 = vst [vmem:[%s1372_s3 + $0x30] sm:$0xff] %v922_v4   ;;  %974 = vst [vmem:[%s1372_s3 + $0x48] sm:$0xff] %v922_v4  }
  0x72   :  { %979 = vst [vmem:[%s1372_s3 + $0x70] sm:$0xff] %v922_v4   ;;  %969 = vst [vmem:[%s1372_s3 + $0x10] sm:$0xff] %v922_v4  }
  0x73   :  { %970 = vst [vmem:[%s1372_s3 + $0x18] sm:$0xff] %v922_v4   ;;  %975 = vst [vmem:[%s1372_s3 + $0x50] sm:$0xff] %v922_v4  }
  0x74   :  { %976 = vst [vmem:[%s1372_s3 + $0x58] sm:$0xff] %v922_v4   ;;  %977 = vst [vmem:[%s1372_s3 + $0x60] sm:$0xff] %v922_v4  }
  0x75   :  { %978 = vst [vmem:[%s1372_s3 + $0x68] sm:$0xff] %v922_v4  }
  0x76   :  { %v531_v57 = vld [vmem:[#allocation3 + $0x1c] sm:$0xf] }
  0x77   :  { %v539_v58 = vmul.f32 0.04, %v531_v57 }
  0x79   :  { %v559_v59 = vcombine.low %v538_v56, %v539_v58 }
  0x7b   :  { %991 = vmatmul.mubr.msk.f32.vlgmr.msra.gmra.mxu1 %vm66_vm1, %v559_v59 }
 0x124   :  { %v989_v6 = vpop.f32.mrf.mxu0 }
 0x125   :  { %v644_v7 = vadd.f32 %v989_v6, %v546_v5 }
 0x126   :  { %v638_v8 = vpop.f32.mrf.mxu0 }
 0x127   :  { %v658_v9 = vmax.f32 %v644_v7, 0.0  ;;  %v639_v10 = vadd.f32 %v638_v8, %v546_v5 }
 0x129   :  { %v740_v11 = vcombine.high %v658_v9, %v658_v9  ;;  %v914_v12 = vpack.c.bf16 %v658_v9, %v658_v9  ;;  %v657_v13 = vmax.f32 %v639_v10, 0.0 }
 0x12b   :  { %v915_v14 = vpack.c.bf16 %v740_v11, %v740_v11  ;;  %v781_v15 = vrot.slane %v914_v12, 7  ;;  %v739_v16 = vcombine.high %v657_v13, %v657_v13  ;;  %v912_v17 = vpack.c.bf16 %v657_v13, %v657_v13 }
 0x12d   :  { %v782_v18 = vrot.slane %v915_v14, 7  ;;  %904 = vst [vmem:[%s1372_s3 + $0x20] sm:$0x6] %v781_v15  ;;  %v913_v19 = vpack.c.bf16 %v739_v16, %v739_v16  ;;  %v779_v20 = vrot.slane %v912_v17, 7 }
 0x12f   :  { %905 = vst [vmem:[%s1372_s3 + $0x28] sm:$0x6] %v782_v18  ;;  %v780_v21 = vrot.slane %v913_v19, 7  ;;  %902 = vst [vmem:[%s1372_s3 + $0x10] sm:$0x6] %v779_v20 }
 0x131   :  { %903 = vst [vmem:[%s1372_s3 + $0x18] sm:$0x6] %v780_v21 }
 0x13b   :  { %v992_v32 = vpop.f32.mrf.mxu1 }
 0x13c   :  { %v654_v44 = vadd.f32 %v992_v32, %v546_v5 }
 0x13d   :  { %v648_v22 = vpop.f32.mrf.mxu1 }
 0x13e   :  { %v660_v23 = vmax.f32 %v654_v44, 0.0  ;;  %v649_v24 = vadd.f32 %v648_v22, %v546_v5 }
 0x140   :  { %v742_v25 = vcombine.high %v660_v23, %v660_v23  ;;  %v918_v33 = vpack.c.bf16 %v660_v23, %v660_v23  ;;  %v659_v45 = vmax.f32 %v649_v24, 0.0 }
 0x142   :  { %v919_v26 = vpack.c.bf16 %v742_v25, %v742_v25  ;;  %v785_v27 = vrot.slane %v918_v33, 7  ;;  %v741_v28 = vcombine.high %v659_v45, %v659_v45  ;;  %v916_v29 = vpack.c.bf16 %v659_v45, %v659_v45 }
 0x144   :  { %v786_v30 = vrot.slane %v919_v26, 7  ;;  %908 = vst [vmem:[%s1372_s3 + $0x60] sm:$0x6] %v785_v27  ;;  %v917_v31 = vpack.c.bf16 %v741_v28, %v741_v28  ;;  %v783_v34 = vrot.slane %v916_v29, 7 }
 0x146   :  { %909 = vst [vmem:[%s1372_s3 + $0x68] sm:$0x6] %v786_v30  ;;  %v784_v35 = vrot.slane %v917_v31, 7  ;;  %906 = vst [vmem:[%s1372_s3 + $0x50] sm:$0x6] %v783_v34 }
 0x148   :  { %907 = vst [vmem:[%s1372_s3 + $0x58] sm:$0x6] %v784_v35 }
 0x149   :  { %808 = vsyncpa [#allocation5], 1 }

// kernel: aux_classifier_forward.3
= control target key start
LH: loop header
LB: loop body
LE: loop exit
PB: predicated region body
PF: predicated region fallthrough
CT: control target
= control target key end

     0   :  { %s11356_s15 = smov 0   ;;  %s11358_s16 = smov 0   ;;  %s13671_s0 = inlined_call_operand.vmem [shape: bf16[2,8,16,128], index: 0, kind: input, shape index: {}]   ;;  %s13672_s1 = inlined_call_operand.vmem [shape: bf16[3200,768], index: 1, kind: input, shape index: {}]   ;;  %s13673_s2 = inlined_call_operand.vmem [shape: f32[1,768], index: 2, kind: input, shape index: {}]   ;;  %s13674_s3 = inlined_call_operand.vmem [shape: f32[768,10], index: 3, kind: input, shape index: {}]   ;;  %s13675_s4 = inlined_call_operand.vmem [shape: f32[3,2,10], index: 4, kind: output, shape index: {}]  }
   0x1   :  { %s11360_s17 = smov 0   ;;  %s11362_s18 = smov 0  }
   0x2   :  { %s11364_s19 = smov 0  }
   0x3 LB: > { %s26_s20 = sadd.s32 1, %s11324_s18  ;;  %p66_p1 = scmp.ne.s32.totalorder %s11316_s16, %s11312_s15  ;;  %s11328_s19 = sphi %s11364_s19, %s14_s19   ;;  %s11324_s18 = sphi %s11362_s18, %s13723_s18   ;;  %s11320_s17 = sphi %s11360_s17, %s13722_s17   ;;  %s11316_s16 = sphi %s11358_s16, %s13721_s16   ;;  %s11312_s15 = sphi %s11356_s15, %s13720_s15  }
   0x4   : > { %p28_p0 = scmp.ge.s32.totalorder %s26_s20, 3  ;;  %p67_p2 = scmp.eq.s32.totalorder %s11328_s19, 0 }
   0x5   : > { %s59_s22 = sadd.s32 1, %s11316_s16  ;;  %p9538_p5 = scmp.ge.s32.totalorder %s11328_s19, 3 }
   0x6   : > { %s13725_s20 = smov (%p28_p0, %s26_s20), 0  ;;  %p68_p3 = por %p67_p2, %p66_p1 }
   0x7   : > { %s56_s21 = ssub.s32 %s11324_s18, %s13725_s20  ;;  %182 = sbr.rel (%p9538_p5) target bundleno = 217 (0xd9), region = 20 }
   0x8   : > { %p57_p4 = scmp.eq.s32.totalorder %s56_s21, 0 }
   0xa   : > { %s11391_s23 = scalar_select %p57_p4, %s11316_s16, %s59_s22  }
   0xc   : > { %185 = sbr.rel (!%p68_p3) target bundleno = 217 (0xd9), region = 24  ;;  %s187_s24 = sand.u32 (%p68_p3), 1, %s11316_s16  }
   0xd   : > { %s10518_s25 = sshll.u32 (%p68_p3), %s11324_s18, 3  ;;  %s10554_s26 = smul.u32 (%p68_p3), 3200, %s187_s24 }
   0xe   : > { %s11399_s29 = scalar_lea.vmem (%p68_p3), %s13672_s1, %s10518_s25 }
   0xf   : > { %v1019_v0 = vld [vmem:[%s11399_s29] sm:$0xff] (%p68_p3)  ;;  %v1021_v1 = vld [vmem:[%s11399_s29 + $0x18] sm:$0xff] (%p68_p3)  ;;  %v1023_v2 = vld [vmem:[%s11399_s29 + $0x30] sm:$0xff] (%p68_p3)  ;;  %s11407_s30 = scalar_lea.vmem (%p68_p3), [#allocation3], %s10554_s26 }
  0x10   : > { %v1025_v3 = vld [vmem:[%s11399_s29 + $0x48] sm:$0xff] (%p68_p3)  ;;  %v1027_v4 = vld [vmem:[%s11399_s29 + $0x60] sm:$0xff] (%p68_p3)  ;;  %v1029_v5 = vld [vmem:[%s11399_s29 + $0x78] sm:$0xff] (%p68_p3)  ;;  %1020 = vst [vmem:[%s11407_s30] sm:$0xff] (%p68_p3), %v1019_v0 }
  0x11   : > { %1022 = vst [vmem:[%s11407_s30 + $0x8] sm:$0xff] %v1021_v1  ;;  %1024 = vst [vmem:[%s11407_s30 + $0x10] sm:$0xff] %v1023_v2  ;;  %v1031_v6 = vld [vmem:[%s11399_s29 + $0x90] sm:$0xff]  ;;  %v1033_v7 = vld [vmem:[%s11399_s29 + $0xa8] sm:$0xff] }
  0x12   : > { %1026 = vst [vmem:[%s11407_s30 + $0x18] sm:$0xff] %v1025_v3  ;;  %1028 = vst [vmem:[%s11407_s30 + $0x20] sm:$0xff] %v1027_v4  ;;  %v1035_v8 = vld [vmem:[%s11399_s29 + $0xc0] sm:$0xff]  ;;  %v1037_v9 = vld [vmem:[%s11399_s29 + $0xd8] sm:$0xff] }
  0x13   : > { %1030 = vst [vmem:[%s11407_s30 + $0x28] sm:$0xff] %v1029_v5  ;;  %1032 = vst [vmem:[%s11407_s30 + $0x30] sm:$0xff] %v1031_v6  ;;  %v1039_v10 = vld [vmem:[%s11399_s29 + $0xf0] sm:$0xff]  ;;  %v1041_v11 = vld [vmem:[%s11399_s29 + $0x108] sm:$0xff] }
  0x14   : > { %1034 = vst [vmem:[%s11407_s30 + $0x38] sm:$0xff] %v1033_v7  ;;  %1036 = vst [vmem:[%s11407_s30 + $0x40] sm:$0xff] %v1035_v8  ;;  %v1043_v12 = vld [vmem:[%s11399_s29 + $0x120] sm:$0xff]  ;;  %v1045_v13 = vld [vmem:[%s11399_s29 + $0x138] sm:$0xff] }
  0x15   : > { %1038 = vst [vmem:[%s11407_s30 + $0x48] sm:$0xff] %v1037_v9  ;;  %1040 = vst [vmem:[%s11407_s30 + $0x50] sm:$0xff] %v1039_v10  ;;  %v1047_v14 = vld [vmem:[%s11399_s29 + $0x150] sm:$0xff]  ;;  %v1049_v15 = vld [vmem:[%s11399_s29 + $0x168] sm:$0xff] }
  0x16   : > { %1042 = vst [vmem:[%s11407_s30 + $0x58] sm:$0xff] %v1041_v11  ;;  %1044 = vst [vmem:[%s11407_s30 + $0x60] sm:$0xff] %v1043_v12  ;;  %v1051_v16 = vld [vmem:[%s11399_s29 + $0x180] sm:$0xff]  ;;  %v1053_v17 = vld [vmem:[%s11399_s29 + $0x198] sm:$0xff] }
  0x17   : > { %1046 = vst [vmem:[%s11407_s30 + $0x68] sm:$0xff] %v1045_v13  ;;  %1048 = vst [vmem:[%s11407_s30 + $0x70] sm:$0xff] %v1047_v14  ;;  %v1055_v18 = vld [vmem:[%s11399_s29 + $0x1b0] sm:$0xff]  ;;  %v1057_v19 = vld [vmem:[%s11399_s29 + $0x1c8] sm:$0xff] }
  0x18   : > { %1050 = vst [vmem:[%s11407_s30 + $0x78] sm:$0xff] %v1049_v15  ;;  %1052 = vst [vmem:[%s11407_s30 + $0x80] sm:$0xff] %v1051_v16  ;;  %v1059_v20 = vld [vmem:[%s11399_s29 + $0x1e0] sm:$0xff]  ;;  %v1061_v21 = vld [vmem:[%s11399_s29 + $0x1f8] sm:$0xff] }
  0x19   : > { %1054 = vst [vmem:[%s11407_s30 + $0x88] sm:$0xff] %v1053_v17  ;;  %1056 = vst [vmem:[%s11407_s30 + $0x90] sm:$0xff] %v1055_v18  ;;  %v1063_v22 = vld [vmem:[%s11399_s29 + $0x210] sm:$0xff]  ;;  %v1065_v23 = vld [vmem:[%s11399_s29 + $0x228] sm:$0xff] }
  0x1a   : > { %1058 = vst [vmem:[%s11407_s30 + $0x98] sm:$0xff] %v1057_v19  ;;  %1060 = vst [vmem:[%s11407_s30 + $0xa0] sm:$0xff] %v1059_v20  ;;  %v1067_v24 = vld [vmem:[%s11399_s29 + $0x240] sm:$0xff]  ;;  %v1069_v25 = vld [vmem:[%s11399_s29 + $0x258] sm:$0xff] }
  0x1b   : > { %1062 = vst [vmem:[%s11407_s30 + $0xa8] sm:$0xff] %v1061_v21  ;;  %1064 = vst [vmem:[%s11407_s30 + $0xb0] sm:$0xff] %v1063_v22  ;;  %v1071_v26 = vld [vmem:[%s11399_s29 + $0x270] sm:$0xff]  ;;  %v1073_v27 = vld [vmem:[%s11399_s29 + $0x288] sm:$0xff] }
  0x1c   : > { %1066 = vst [vmem:[%s11407_s30 + $0xb8] sm:$0xff] %v1065_v23  ;;  %1068 = vst [vmem:[%s11407_s30 + $0xc0] sm:$0xff] %v1067_v24  ;;  %v1075_v28 = vld [vmem:[%s11399_s29 + $0x2a0] sm:$0xff]  ;;  %v1077_v29 = vld [vmem:[%s11399_s29 + $0x2b8] sm:$0xff] }
  0x1d   : > { %1070 = vst [vmem:[%s11407_s30 + $0xc8] sm:$0xff] %v1069_v25  ;;  %1072 = vst [vmem:[%s11407_s30 + $0xd0] sm:$0xff] %v1071_v26  ;;  %v1079_v30 = vld [vmem:[%s11399_s29 + $0x2d0] sm:$0xff]  ;;  %v1081_v31 = vld [vmem:[%s11399_s29 + $0x2e8] sm:$0xff] }
  0x1e   : > { %1074 = vst [vmem:[%s11407_s30 + $0xd8] sm:$0xff] %v1073_v27  ;;  %1076 = vst [vmem:[%s11407_s30 + $0xe0] sm:$0xff] %v1075_v28  ;;  %v1083_v32 = vld [vmem:[%s11399_s29 + $0x300] sm:$0xff]  ;;  %v1085_v33 = vld [vmem:[%s11399_s29 + $0x318] sm:$0xff] }
  0x1f   : > { %1078 = vst [vmem:[%s11407_s30 + $0xe8] sm:$0xff] %v1077_v29  ;;  %1080 = vst [vmem:[%s11407_s30 + $0xf0] sm:$0xff] %v1079_v30  ;;  %v1087_v34 = vld [vmem:[%s11399_s29 + $0x330] sm:$0xff]  ;;  %v1089_v35 = vld [vmem:[%s11399_s29 + $0x348] sm:$0xff] }
  0x20   : > { %1082 = vst [vmem:[%s11407_s30 + $0xf8] sm:$0xff] %v1081_v31  ;;  %1084 = vst [vmem:[%s11407_s30 + $0x100] sm:$0xff] %v1083_v32  ;;  %v1091_v36 = vld [vmem:[%s11399_s29 + $0x360] sm:$0xff]  ;;  %v1093_v37 = vld [vmem:[%s11399_s29 + $0x378] sm:$0xff] }
  0x21   : > { %1086 = vst [vmem:[%s11407_s30 + $0x108] sm:$0xff] %v1085_v33  ;;  %1088 = vst [vmem:[%s11407_s30 + $0x110] sm:$0xff] %v1087_v34  ;;  %v1095_v38 = vld [vmem:[%s11399_s29 + $0x390] sm:$0xff]  ;;  %v1097_v39 = vld [vmem:[%s11399_s29 + $0x3a8] sm:$0xff] }
  0x22   : > { %1090 = vst [vmem:[%s11407_s30 + $0x118] sm:$0xff] %v1089_v35  ;;  %1092 = vst [vmem:[%s11407_s30 + $0x120] sm:$0xff] %v1091_v36  ;;  %v1099_v40 = vld [vmem:[%s11399_s29 + $0x3c0] sm:$0xff]  ;;  %v1101_v41 = vld [vmem:[%s11399_s29 + $0x3d8] sm:$0xff] }
  0x23   : > { %1094 = vst [vmem:[%s11407_s30 + $0x128] sm:$0xff] %v1093_v37  ;;  %1096 = vst [vmem:[%s11407_s30 + $0x130] sm:$0xff] %v1095_v38  ;;  %v1103_v42 = vld [vmem:[%s11399_s29 + $0x3f0] sm:$0xff]  ;;  %v1105_v43 = vld [vmem:[%s11399_s29 + $0x408] sm:$0xff] }
  0x24   : > { %1098 = vst [vmem:[%s11407_s30 + $0x138] sm:$0xff] %v1097_v39  ;;  %1100 = vst [vmem:[%s11407_s30 + $0x140] sm:$0xff] %v1099_v40  ;;  %v1107_v44 = vld [vmem:[%s11399_s29 + $0x420] sm:$0xff]  ;;  %v1109_v45 = vld [vmem:[%s11399_s29 + $0x438] sm:$0xff] }
  0x25   : > { %1102 = vst [vmem:[%s11407_s30 + $0x148] sm:$0xff] %v1101_v41  ;;  %1104 = vst [vmem:[%s11407_s30 + $0x150] sm:$0xff] %v1103_v42  ;;  %v1111_v46 = vld [vmem:[%s11399_s29 + $0x450] sm:$0xff]  ;;  %v1113_v47 = vld [vmem:[%s11399_s29 + $0x468] sm:$0xff] }
  0x26   : > { %1106 = vst [vmem:[%s11407_s30 + $0x158] sm:$0xff] %v1105_v43  ;;  %1108 = vst [vmem:[%s11407_s30 + $0x160] sm:$0xff] %v1107_v44  ;;  %v1115_v48 = vld [vmem:[%s11399_s29 + $0x480] sm:$0xff]  ;;  %v1117_v49 = vld [vmem:[%s11399_s29 + $0x498] sm:$0xff] }
  0x27   : > { %1110 = vst [vmem:[%s11407_s30 + $0x168] sm:$0xff] %v1109_v45  ;;  %1112 = vst [vmem:[%s11407_s30 + $0x170] sm:$0xff] %v1111_v46  ;;  %v1119_v50 = vld [vmem:[%s11399_s29 + $0x4b0] sm:$0xff]  ;;  %v1121_v51 = vld [vmem:[%s11399_s29 + $0x4c8] sm:$0xff] }
  0x28   : > { %1114 = vst [vmem:[%s11407_s30 + $0x178] sm:$0xff] %v1113_v47  ;;  %1116 = vst [vmem:[%s11407_s30 + $0x180] sm:$0xff] %v1115_v48  ;;  %v1123_v52 = vld [vmem:[%s11399_s29 + $0x4e0] sm:$0xff]  ;;  %v1125_v53 = vld [vmem:[%s11399_s29 + $0x4f8] sm:$0xff] }
  0x29   : > { %1118 = vst [vmem:[%s11407_s30 + $0x188] sm:$0xff] %v1117_v49  ;;  %1120 = vst [vmem:[%s11407_s30 + $0x190] sm:$0xff] %v1119_v50  ;;  %v1127_v54 = vld [vmem:[%s11399_s29 + $0x510] sm:$0xff]  ;;  %v1129_v55 = vld [vmem:[%s11399_s29 + $0x528] sm:$0xff] }
  0x2a   : > { %1122 = vst [vmem:[%s11407_s30 + $0x198] sm:$0xff] %v1121_v51  ;;  %1124 = vst [vmem:[%s11407_s30 + $0x1a0] sm:$0xff] %v1123_v52  ;;  %v1131_v56 = vld [vmem:[%s11399_s29 + $0x540] sm:$0xff]  ;;  %v1133_v57 = vld [vmem:[%s11399_s29 + $0x558] sm:$0xff] }
  0x2b   : > { %1126 = vst [vmem:[%s11407_s30 + $0x1a8] sm:$0xff] %v1125_v53  ;;  %1128 = vst [vmem:[%s11407_s30 + $0x1b0] sm:$0xff] %v1127_v54  ;;  %v1135_v58 = vld [vmem:[%s11399_s29 + $0x570] sm:$0xff]  ;;  %v1137_v59 = vld [vmem:[%s11399_s29 + $0x588] sm:$0xff] }
  0x2c   : > { %1130 = vst [vmem:[%s11407_s30 + $0x1b8] sm:$0xff] %v1129_v55  ;;  %1132 = vst [vmem:[%s11407_s30 + $0x1c0] sm:$0xff] %v1131_v56  ;;  %v1139_v60 = vld [vmem:[%s11399_s29 + $0x5a0] sm:$0xff]  ;;  %v1141_v61 = vld [vmem:[%s11399_s29 + $0x5b8] sm:$0xff] }
  0x2d   : > { %1134 = vst [vmem:[%s11407_s30 + $0x1c8] sm:$0xff] %v1133_v57  ;;  %1136 = vst [vmem:[%s11407_s30 + $0x1d0] sm:$0xff] %v1135_v58  ;;  %v1143_v62 = vld [vmem:[%s11399_s29 + $0x5d0] sm:$0xff]  ;;  %v1145_v63 = vld [vmem:[%s11399_s29 + $0x5e8] sm:$0xff] }
  0x2e   : > { %1138 = vst [vmem:[%s11407_s30 + $0x1d8] sm:$0xff] %v1137_v59  ;;  %1140 = vst [vmem:[%s11407_s30 + $0x1e0] sm:$0xff] %v1139_v60  ;;  %v1147_v0 = vld [vmem:[%s11399_s29 + $0x600] sm:$0xff]  ;;  %v1149_v1 = vld [vmem:[%s11399_s29 + $0x618] sm:$0xff] }
  0x2f   : > { %1142 = vst [vmem:[%s11407_s30 + $0x1e8] sm:$0xff] %v1141_v61  ;;  %1144 = vst [vmem:[%s11407_s30 + $0x1f0] sm:$0xff] %v1143_v62  ;;  %v1151_v2 = vld [vmem:[%s11399_s29 + $0x630] sm:$0xff]  ;;  %v1153_v3 = vld [vmem:[%s11399_s29 + $0x648] sm:$0xff] }
  0x30   : > { %1146 = vst [vmem:[%s11407_s30 + $0x1f8] sm:$0xff] %v1145_v63  ;;  %1148 = vst [vmem:[%s11407_s30 + $0x200] sm:$0xff] %v1147_v0  ;;  %v1155_v4 = vld [vmem:[%s11399_s29 + $0x660] sm:$0xff]  ;;  %v1157_v5 = vld [vmem:[%s11399_s29 + $0x678] sm:$0xff] }
  0x31   : > { %1150 = vst [vmem:[%s11407_s30 + $0x208] sm:$0xff] %v1149_v1  ;;  %1152 = vst [vmem:[%s11407_s30 + $0x210] sm:$0xff] %v1151_v2  ;;  %v1159_v6 = vld [vmem:[%s11399_s29 + $0x690] sm:$0xff]  ;;  %v1161_v7 = vld [vmem:[%s11399_s29 + $0x6a8] sm:$0xff] }
  0x32   : > { %1154 = vst [vmem:[%s11407_s30 + $0x218] sm:$0xff] %v1153_v3  ;;  %1156 = vst [vmem:[%s11407_s30 + $0x220] sm:$0xff] %v1155_v4  ;;  %v1163_v8 = vld [vmem:[%s11399_s29 + $0x6c0] sm:$0xff]  ;;  %v1165_v9 = vld [vmem:[%s11399_s29 + $0x6d8] sm:$0xff] }
  0x33   : > { %1158 = vst [vmem:[%s11407_s30 + $0x228] sm:$0xff] %v1157_v5  ;;  %1160 = vst [vmem:[%s11407_s30 + $0x230] sm:$0xff] %v1159_v6  ;;  %v1167_v10 = vld [vmem:[%s11399_s29 + $0x6f0] sm:$0xff]  ;;  %v1169_v11 = vld [vmem:[%s11399_s29 + $0x708] sm:$0xff] }
  0x34   : > { %1162 = vst [vmem:[%s11407_s30 + $0x238] sm:$0xff] %v1161_v7  ;;  %1164 = vst [vmem:[%s11407_s30 + $0x240] sm:$0xff] %v1163_v8  ;;  %v1171_v12 = vld [vmem:[%s11399_s29 + $0x720] sm:$0xff]  ;;  %v1173_v13 = vld [vmem:[%s11399_s29 + $0x738] sm:$0xff] }
  0x35   : > { %1166 = vst [vmem:[%s11407_s30 + $0x248] sm:$0xff] %v1165_v9  ;;  %1168 = vst [vmem:[%s11407_s30 + $0x250] sm:$0xff] %v1167_v10  ;;  %v1175_v14 = vld [vmem:[%s11399_s29 + $0x750] sm:$0xff]  ;;  %v1177_v15 = vld [vmem:[%s11399_s29 + $0x768] sm:$0xff] }
  0x36   : > { %1170 = vst [vmem:[%s11407_s30 + $0x258] sm:$0xff] %v1169_v11  ;;  %1172 = vst [vmem:[%s11407_s30 + $0x260] sm:$0xff] %v1171_v12  ;;  %v1179_v16 = vld [vmem:[%s11399_s29 + $0x780] sm:$0xff]  ;;  %v1181_v17 = vld [vmem:[%s11399_s29 + $0x798] sm:$0xff] }
  0x37   : > { %1174 = vst [vmem:[%s11407_s30 + $0x268] sm:$0xff] %v1173_v13  ;;  %1176 = vst [vmem:[%s11407_s30 + $0x270] sm:$0xff] %v1175_v14  ;;  %v1183_v18 = vld [vmem:[%s11399_s29 + $0x7b0] sm:$0xff]  ;;  %v1185_v19 = vld [vmem:[%s11399_s29 + $0x7c8] sm:$0xff] }
  0x38   : > { %1178 = vst [vmem:[%s11407_s30 + $0x278] sm:$0xff] %v1177_v15  ;;  %1180 = vst [vmem:[%s11407_s30 + $0x280] sm:$0xff] %v1179_v16  ;;  %v1187_v20 = vld [vmem:[%s11399_s29 + $0x7e0] sm:$0xff]  ;;  %v1189_v21 = vld [vmem:[%s11399_s29 + $0x7f8] sm:$0xff] }
  0x39   : > { %1182 = vst [vmem:[%s11407_s30 + $0x288] sm:$0xff] %v1181_v17  ;;  %1184 = vst [vmem:[%s11407_s30 + $0x290] sm:$0xff] %v1183_v18  ;;  %v1191_v22 = vld [vmem:[%s11399_s29 + $0x810] sm:$0xff]  ;;  %v1193_v23 = vld [vmem:[%s11399_s29 + $0x828] sm:$0xff] }
  0x3a   : > { %1186 = vst [vmem:[%s11407_s30 + $0x298] sm:$0xff] %v1185_v19  ;;  %1188 = vst [vmem:[%s11407_s30 + $0x2a0] sm:$0xff] %v1187_v20  ;;  %v1195_v24 = vld [vmem:[%s11399_s29 + $0x840] sm:$0xff]  ;;  %v1197_v25 = vld [vmem:[%s11399_s29 + $0x858] sm:$0xff] }
  0x3b   : > { %1190 = vst [vmem:[%s11407_s30 + $0x2a8] sm:$0xff] %v1189_v21  ;;  %1192 = vst [vmem:[%s11407_s30 + $0x2b0] sm:$0xff] %v1191_v22  ;;  %v1199_v26 = vld [vmem:[%s11399_s29 + $0x870] sm:$0xff]  ;;  %v1201_v27 = vld [vmem:[%s11399_s29 + $0x888] sm:$0xff] }
  0x3c   : > { %1194 = vst [vmem:[%s11407_s30 + $0x2b8] sm:$0xff] %v1193_v23  ;;  %1196 = vst [vmem:[%s11407_s30 + $0x2c0] sm:$0xff] %v1195_v24  ;;  %v1203_v28 = vld [vmem:[%s11399_s29 + $0x8a0] sm:$0xff]  ;;  %v1205_v29 = vld [vmem:[%s11399_s29 + $0x8b8] sm:$0xff] }
  0x3d   : > { %1198 = vst [vmem:[%s11407_s30 + $0x2c8] sm:$0xff] %v1197_v25  ;;  %1200 = vst [vmem:[%s11407_s30 + $0x2d0] sm:$0xff] %v1199_v26  ;;  %v1207_v30 = vld [vmem:[%s11399_s29 + $0x8d0] sm:$0xff]  ;;  %v1209_v31 = vld [vmem:[%s11399_s29 + $0x8e8] sm:$0xff] }
  0x3e   : > { %1202 = vst [vmem:[%s11407_s30 + $0x2d8] sm:$0xff] %v1201_v27  ;;  %1204 = vst [vmem:[%s11407_s30 + $0x2e0] sm:$0xff] %v1203_v28  ;;  %v1211_v32 = vld [vmem:[%s11399_s29 + $0x900] sm:$0xff]  ;;  %v1213_v33 = vld [vmem:[%s11399_s29 + $0x918] sm:$0xff] }
  0x3f   : > { %1206 = vst [vmem:[%s11407_s30 + $0x2e8] sm:$0xff] %v1205_v29  ;;  %1208 = vst [vmem:[%s11407_s30 + $0x2f0] sm:$0xff] %v1207_v30  ;;  %v1215_v34 = vld [vmem:[%s11399_s29 + $0x930] sm:$0xff]  ;;  %v1217_v35 = vld [vmem:[%s11399_s29 + $0x948] sm:$0xff] }
  0x40   : > { %1210 = vst [vmem:[%s11407_s30 + $0x2f8] sm:$0xff] %v1209_v31  ;;  %1212 = vst [vmem:[%s11407_s30 + $0x300] sm:$0xff] %v1211_v32  ;;  %v1219_v36 = vld [vmem:[%s11399_s29 + $0x960] sm:$0xff]  ;;  %v1221_v37 = vld [vmem:[%s11399_s29 + $0x978] sm:$0xff] }
  0x41   : > { %1214 = vst [vmem:[%s11407_s30 + $0x308] sm:$0xff] %v1213_v33  ;;  %1216 = vst [vmem:[%s11407_s30 + $0x310] sm:$0xff] %v1215_v34  ;;  %v1223_v38 = vld [vmem:[%s11399_s29 + $0x990] sm:$0xff]  ;;  %v1225_v39 = vld [vmem:[%s11399_s29 + $0x9a8] sm:$0xff] }
  0x42   : > { %1218 = vst [vmem:[%s11407_s30 + $0x318] sm:$0xff] %v1217_v35  ;;  %1220 = vst [vmem:[%s11407_s30 + $0x320] sm:$0xff] %v1219_v36  ;;  %v1227_v40 = vld [vmem:[%s11399_s29 + $0x9c0] sm:$0xff]  ;;  %v1229_v41 = vld [vmem:[%s11399_s29 + $0x9d8] sm:$0xff] }
  0x43   : > { %1222 = vst [vmem:[%s11407_s30 + $0x328] sm:$0xff] %v1221_v37  ;;  %1224 = vst [vmem:[%s11407_s30 + $0x330] sm:$0xff] %v1223_v38  ;;  %v1231_v42 = vld [vmem:[%s11399_s29 + $0x9f0] sm:$0xff]  ;;  %v1233_v43 = vld [vmem:[%s11399_s29 + $0xa08] sm:$0xff] }
  0x44   : > { %1226 = vst [vmem:[%s11407_s30 + $0x338] sm:$0xff] %v1225_v39  ;;  %1228 = vst [vmem:[%s11407_s30 + $0x340] sm:$0xff] %v1227_v40  ;;  %v1235_v44 = vld [vmem:[%s11399_s29 + $0xa20] sm:$0xff]  ;;  %v1237_v45 = vld [vmem:[%s11399_s29 + $0xa38] sm:$0xff] }
  0x45   : > { %1230 = vst [vmem:[%s11407_s30 + $0x348] sm:$0xff] %v1229_v41  ;;  %1232 = vst [vmem:[%s11407_s30 + $0x350] sm:$0xff] %v1231_v42  ;;  %v1239_v46 = vld [vmem:[%s11399_s29 + $0xa50] sm:$0xff]  ;;  %v1241_v47 = vld [vmem:[%s11399_s29 + $0xa68] sm:$0xff] }
  0x46   : > { %1234 = vst [vmem:[%s11407_s30 + $0x358] sm:$0xff] %v1233_v43  ;;  %1236 = vst [vmem:[%s11407_s30 + $0x360] sm:$0xff] %v1235_v44  ;;  %v1243_v48 = vld [vmem:[%s11399_s29 + $0xa80] sm:$0xff]  ;;  %v1245_v49 = vld [vmem:[%s11399_s29 + $0xa98] sm:$0xff] }
  0x47   : > { %1238 = vst [vmem:[%s11407_s30 + $0x368] sm:$0xff] %v1237_v45  ;;  %1240 = vst [vmem:[%s11407_s30 + $0x370] sm:$0xff] %v1239_v46  ;;  %v1247_v50 = vld [vmem:[%s11399_s29 + $0xab0] sm:$0xff]  ;;  %v1249_v51 = vld [vmem:[%s11399_s29 + $0xac8] sm:$0xff] }
  0x48   : > { %1242 = vst [vmem:[%s11407_s30 + $0x378] sm:$0xff] %v1241_v47  ;;  %1244 = vst [vmem:[%s11407_s30 + $0x380] sm:$0xff] %v1243_v48  ;;  %v1251_v52 = vld [vmem:[%s11399_s29 + $0xae0] sm:$0xff]  ;;  %v1253_v53 = vld [vmem:[%s11399_s29 + $0xaf8] sm:$0xff] }
  0x49   : > { %1246 = vst [vmem:[%s11407_s30 + $0x388] sm:$0xff] %v1245_v49  ;;  %1248 = vst [vmem:[%s11407_s30 + $0x390] sm:$0xff] %v1247_v50  ;;  %v1255_v54 = vld [vmem:[%s11399_s29 + $0xb10] sm:$0xff]  ;;  %v1257_v55 = vld [vmem:[%s11399_s29 + $0xb28] sm:$0xff] }
  0x4a   : > { %1250 = vst [vmem:[%s11407_s30 + $0x398] sm:$0xff] %v1249_v51  ;;  %1252 = vst [vmem:[%s11407_s30 + $0x3a0] sm:$0xff] %v1251_v52  ;;  %v1259_v56 = vld [vmem:[%s11399_s29 + $0xb40] sm:$0xff]  ;;  %v1261_v57 = vld [vmem:[%s11399_s29 + $0xb58] sm:$0xff] }
  0x4b   : > { %1254 = vst [vmem:[%s11407_s30 + $0x3a8] sm:$0xff] %v1253_v53  ;;  %1256 = vst [vmem:[%s11407_s30 + $0x3b0] sm:$0xff] %v1255_v54  ;;  %v1263_v58 = vld [vmem:[%s11399_s29 + $0xb70] sm:$0xff]  ;;  %v1265_v59 = vld [vmem:[%s11399_s29 + $0xb88] sm:$0xff] }
  0x4c   : > { %1258 = vst [vmem:[%s11407_s30 + $0x3b8] sm:$0xff] %v1257_v55  ;;  %1260 = vst [vmem:[%s11407_s30 + $0x3c0] sm:$0xff] %v1259_v56  ;;  %v1267_v60 = vld [vmem:[%s11399_s29 + $0xba0] sm:$0xff]  ;;  %v1269_v61 = vld [vmem:[%s11399_s29 + $0xbb8] sm:$0xff] }
  0x4d   : > { %1262 = vst [vmem:[%s11407_s30 + $0x3c8] sm:$0xff] %v1261_v57  ;;  %1264 = vst [vmem:[%s11407_s30 + $0x3d0] sm:$0xff] %v1263_v58  ;;  %v1271_v62 = vld [vmem:[%s11399_s29 + $0xbd0] sm:$0xff]  ;;  %v1273_v63 = vld [vmem:[%s11399_s29 + $0xbe8] sm:$0xff] }
  0x4e   : > { %1266 = vst [vmem:[%s11407_s30 + $0x3d8] sm:$0xff] %v1265_v59  ;;  %1268 = vst [vmem:[%s11407_s30 + $0x3e0] sm:$0xff] %v1267_v60  ;;  %v1275_v0 = vld [vmem:[%s11399_s29 + $0xc00] sm:$0xff]  ;;  %v1277_v1 = vld [vmem:[%s11399_s29 + $0xc18] sm:$0xff] }
  0x4f   : > { %1270 = vst [vmem:[%s11407_s30 + $0x3e8] sm:$0xff] %v1269_v61  ;;  %1272 = vst [vmem:[%s11407_s30 + $0x3f0] sm:$0xff] %v1271_v62  ;;  %v1279_v2 = vld [vmem:[%s11399_s29 + $0xc30] sm:$0xff]  ;;  %v1281_v3 = vld [vmem:[%s11399_s29 + $0xc48] sm:$0xff] }
  0x50   : > { %1274 = vst [vmem:[%s11407_s30 + $0x3f8] sm:$0xff] %v1273_v63  ;;  %1276 = vst [vmem:[%s11407_s30 + $0x400] sm:$0xff] %v1275_v0  ;;  %v1283_v4 = vld [vmem:[%s11399_s29 + $0xc60] sm:$0xff]  ;;  %v1285_v5 = vld [vmem:[%s11399_s29 + $0xc78] sm:$0xff] }
  0x51   : > { %1278 = vst [vmem:[%s11407_s30 + $0x408] sm:$0xff] %v1277_v1  ;;  %1280 = vst [vmem:[%s11407_s30 + $0x410] sm:$0xff] %v1279_v2  ;;  %v1287_v6 = vld [vmem:[%s11399_s29 + $0xc90] sm:$0xff]  ;;  %v1289_v7 = vld [vmem:[%s11399_s29 + $0xca8] sm:$0xff] }
  0x52   : > { %1282 = vst [vmem:[%s11407_s30 + $0x418] sm:$0xff] %v1281_v3  ;;  %1284 = vst [vmem:[%s11407_s30 + $0x420] sm:$0xff] %v1283_v4  ;;  %v1291_v8 = vld [vmem:[%s11399_s29 + $0xcc0] sm:$0xff]  ;;  %v1293_v9 = vld [vmem:[%s11399_s29 + $0xcd8] sm:$0xff] }
  0x53   : > { %1286 = vst [vmem:[%s11407_s30 + $0x428] sm:$0xff] %v1285_v5  ;;  %1288 = vst [vmem:[%s11407_s30 + $0x430] sm:$0xff] %v1287_v6  ;;  %v1295_v10 = vld [vmem:[%s11399_s29 + $0xcf0] sm:$0xff]  ;;  %v1297_v11 = vld [vmem:[%s11399_s29 + $0xd08] sm:$0xff] }
  0x54   : > { %1290 = vst [vmem:[%s11407_s30 + $0x438] sm:$0xff] %v1289_v7  ;;  %1292 = vst [vmem:[%s11407_s30 + $0x440] sm:$0xff] %v1291_v8  ;;  %v1299_v12 = vld [vmem:[%s11399_s29 + $0xd20] sm:$0xff]  ;;  %v1301_v13 = vld [vmem:[%s11399_s29 + $0xd38] sm:$0xff] }
  0x55   : > { %1294 = vst [vmem:[%s11407_s30 + $0x448] sm:$0xff] %v1293_v9  ;;  %1296 = vst [vmem:[%s11407_s30 + $0x450] sm:$0xff] %v1295_v10  ;;  %v1303_v14 = vld [vmem:[%s11399_s29 + $0xd50] sm:$0xff]  ;;  %v1305_v15 = vld [vmem:[%s11399_s29 + $0xd68] sm:$0xff] }
  0x56   : > { %1298 = vst [vmem:[%s11407_s30 + $0x458] sm:$0xff] %v1297_v11  ;;  %1300 = vst [vmem:[%s11407_s30 + $0x460] sm:$0xff] %v1299_v12  ;;  %v1307_v16 = vld [vmem:[%s11399_s29 + $0xd80] sm:$0xff]  ;;  %v1309_v17 = vld [vmem:[%s11399_s29 + $0xd98] sm:$0xff] }
  0x57   : > { %1302 = vst [vmem:[%s11407_s30 + $0x468] sm:$0xff] %v1301_v13  ;;  %1304 = vst [vmem:[%s11407_s30 + $0x470] sm:$0xff] %v1303_v14  ;;  %v1311_v18 = vld [vmem:[%s11399_s29 + $0xdb0] sm:$0xff]  ;;  %v1313_v19 = vld [vmem:[%s11399_s29 + $0xdc8] sm:$0xff] }
  0x58   : > { %1306 = vst [vmem:[%s11407_s30 + $0x478] sm:$0xff] %v1305_v15  ;;  %1308 = vst [vmem:[%s11407_s30 + $0x480] sm:$0xff] %v1307_v16  ;;  %v1315_v20 = vld [vmem:[%s11399_s29 + $0xde0] sm:$0xff]  ;;  %v1317_v21 = vld [vmem:[%s11399_s29 + $0xdf8] sm:$0xff] }
  0x59   : > { %1310 = vst [vmem:[%s11407_s30 + $0x488] sm:$0xff] %v1309_v17  ;;  %1312 = vst [vmem:[%s11407_s30 + $0x490] sm:$0xff] %v1311_v18  ;;  %v1319_v22 = vld [vmem:[%s11399_s29 + $0xe10] sm:$0xff]  ;;  %v1321_v23 = vld [vmem:[%s11399_s29 + $0xe28] sm:$0xff] }
  0x5a   : > { %1314 = vst [vmem:[%s11407_s30 + $0x498] sm:$0xff] %v1313_v19  ;;  %1316 = vst [vmem:[%s11407_s30 + $0x4a0] sm:$0xff] %v1315_v20  ;;  %v1323_v24 = vld [vmem:[%s11399_s29 + $0xe40] sm:$0xff]  ;;  %v1325_v25 = vld [vmem:[%s11399_s29 + $0xe58] sm:$0xff] }
  0x5b   : > { %1318 = vst [vmem:[%s11407_s30 + $0x4a8] sm:$0xff] %v1317_v21  ;;  %1320 = vst [vmem:[%s11407_s30 + $0x4b0] sm:$0xff] %v1319_v22  ;;  %v1327_v26 = vld [vmem:[%s11399_s29 + $0xe70] sm:$0xff]  ;;  %v1329_v27 = vld [vmem:[%s11399_s29 + $0xe88] sm:$0xff] }
  0x5c   : > { %1322 = vst [vmem:[%s11407_s30 + $0x4b8] sm:$0xff] %v1321_v23  ;;  %1324 = vst [vmem:[%s11407_s30 + $0x4c0] sm:$0xff] %v1323_v24  ;;  %v1331_v28 = vld [vmem:[%s11399_s29 + $0xea0] sm:$0xff]  ;;  %v1333_v29 = vld [vmem:[%s11399_s29 + $0xeb8] sm:$0xff] }
  0x5d   : > { %1326 = vst [vmem:[%s11407_s30 + $0x4c8] sm:$0xff] %v1325_v25  ;;  %1328 = vst [vmem:[%s11407_s30 + $0x4d0] sm:$0xff] %v1327_v26  ;;  %v1335_v30 = vld [vmem:[%s11399_s29 + $0xed0] sm:$0xff]  ;;  %v1337_v31 = vld [vmem:[%s11399_s29 + $0xee8] sm:$0xff] }
  0x5e   : > { %1330 = vst [vmem:[%s11407_s30 + $0x4d8] sm:$0xff] %v1329_v27  ;;  %1332 = vst [vmem:[%s11407_s30 + $0x4e0] sm:$0xff] %v1331_v28  ;;  %v1339_v32 = vld [vmem:[%s11399_s29 + $0xf00] sm:$0xff]  ;;  %v1341_v33 = vld [vmem:[%s11399_s29 + $0xf18] sm:$0xff] }
  0x5f   : > { %1334 = vst [vmem:[%s11407_s30 + $0x4e8] sm:$0xff] %v1333_v29  ;;  %1336 = vst [vmem:[%s11407_s30 + $0x4f0] sm:$0xff] %v1335_v30  ;;  %v1343_v34 = vld [vmem:[%s11399_s29 + $0xf30] sm:$0xff]  ;;  %v1345_v35 = vld [vmem:[%s11399_s29 + $0xf48] sm:$0xff] }
  0x60   : > { %1338 = vst [vmem:[%s11407_s30 + $0x4f8] sm:$0xff] %v1337_v31  ;;  %1340 = vst [vmem:[%s11407_s30 + $0x500] sm:$0xff] %v1339_v32  ;;  %v1347_v36 = vld [vmem:[%s11399_s29 + $0xf60] sm:$0xff]  ;;  %v1349_v37 = vld [vmem:[%s11399_s29 + $0xf78] sm:$0xff] }
  0x61   : > { %1342 = vst [vmem:[%s11407_s30 + $0x508] sm:$0xff] %v1341_v33  ;;  %1344 = vst [vmem:[%s11407_s30 + $0x510] sm:$0xff] %v1343_v34  ;;  %v1351_v38 = vld [vmem:[%s11399_s29 + $0xf90] sm:$0xff]  ;;  %v1353_v39 = vld [vmem:[%s11399_s29 + $0xfa8] sm:$0xff] }
  0x62   : > { %1346 = vst [vmem:[%s11407_s30 + $0x518] sm:$0xff] %v1345_v35  ;;  %1348 = vst [vmem:[%s11407_s30 + $0x520] sm:$0xff] %v1347_v36  ;;  %v1355_v40 = vld [vmem:[%s11399_s29 + $0xfc0] sm:$0xff]  ;;  %v1357_v41 = vld [vmem:[%s11399_s29 + $0xfd8] sm:$0xff] }
  0x63   : > { %1350 = vst [vmem:[%s11407_s30 + $0x528] sm:$0xff] %v1349_v37  ;;  %1352 = vst [vmem:[%s11407_s30 + $0x530] sm:$0xff] %v1351_v38  ;;  %v1359_v42 = vld [vmem:[%s11399_s29 + $0xff0] sm:$0xff]  ;;  %v1361_v43 = vld [vmem:[%s11399_s29 + $0x1008] sm:$0xff] }
  0x64   : > { %1354 = vst [vmem:[%s11407_s30 + $0x538] sm:$0xff] %v1353_v39  ;;  %1356 = vst [vmem:[%s11407_s30 + $0x540] sm:$0xff] %v1355_v40  ;;  %v1363_v44 = vld [vmem:[%s11399_s29 + $0x1020] sm:$0xff]  ;;  %v1365_v45 = vld [vmem:[%s11399_s29 + $0x1038] sm:$0xff] }
  0x65   : > { %1358 = vst [vmem:[%s11407_s30 + $0x548] sm:$0xff] %v1357_v41  ;;  %1360 = vst [vmem:[%s11407_s30 + $0x550] sm:$0xff] %v1359_v42  ;;  %v1367_v46 = vld [vmem:[%s11399_s29 + $0x1050] sm:$0xff]  ;;  %v1369_v47 = vld [vmem:[%s11399_s29 + $0x1068] sm:$0xff] }
  0x66   : > { %1362 = vst [vmem:[%s11407_s30 + $0x558] sm:$0xff] %v1361_v43  ;;  %1364 = vst [vmem:[%s11407_s30 + $0x560] sm:$0xff] %v1363_v44  ;;  %v1371_v48 = vld [vmem:[%s11399_s29 + $0x1080] sm:$0xff]  ;;  %v1373_v49 = vld [vmem:[%s11399_s29 + $0x1098] sm:$0xff] }
  0x67   : > { %1366 = vst [vmem:[%s11407_s30 + $0x568] sm:$0xff] %v1365_v45  ;;  %1368 = vst [vmem:[%s11407_s30 + $0x570] sm:$0xff] %v1367_v46  ;;  %v1375_v50 = vld [vmem:[%s11399_s29 + $0x10b0] sm:$0xff]  ;;  %v1377_v51 = vld [vmem:[%s11399_s29 + $0x10c8] sm:$0xff] }
  0x68   : > { %1370 = vst [vmem:[%s11407_s30 + $0x578] sm:$0xff] %v1369_v47  ;;  %1372 = vst [vmem:[%s11407_s30 + $0x580] sm:$0xff] %v1371_v48  ;;  %v1379_v52 = vld [vmem:[%s11399_s29 + $0x10e0] sm:$0xff]  ;;  %v1381_v53 = vld [vmem:[%s11399_s29 + $0x10f8] sm:$0xff] }
  0x69   : > { %1374 = vst [vmem:[%s11407_s30 + $0x588] sm:$0xff] %v1373_v49  ;;  %1376 = vst [vmem:[%s11407_s30 + $0x590] sm:$0xff] %v1375_v50  ;;  %v1383_v54 = vld [vmem:[%s11399_s29 + $0x1110] sm:$0xff]  ;;  %v1385_v55 = vld [vmem:[%s11399_s29 + $0x1128] sm:$0xff] }
  0x6a   : > { %1378 = vst [vmem:[%s11407_s30 + $0x598] sm:$0xff] %v1377_v51  ;;  %1380 = vst [vmem:[%s11407_s30 + $0x5a0] sm:$0xff] %v1379_v52  ;;  %v1387_v56 = vld [vmem:[%s11399_s29 + $0x1140] sm:$0xff]  ;;  %v1389_v57 = vld [vmem:[%s11399_s29 + $0x1158] sm:$0xff] }
  0x6b   : > { %1382 = vst [vmem:[%s11407_s30 + $0x5a8] sm:$0xff] %v1381_v53  ;;  %1384 = vst [vmem:[%s11407_s30 + $0x5b0] sm:$0xff] %v1383_v54  ;;  %v1391_v58 = vld [vmem:[%s11399_s29 + $0x1170] sm:$0xff]  ;;  %v1393_v59 = vld [vmem:[%s11399_s29 + $0x1188] sm:$0xff] }
  0x6c   : > { %1386 = vst [vmem:[%s11407_s30 + $0x5b8] sm:$0xff] %v1385_v55  ;;  %1388 = vst [vmem:[%s11407_s30 + $0x5c0] sm:$0xff] %v1387_v56  ;;  %v1395_v60 = vld [vmem:[%s11399_s29 + $0x11a0] sm:$0xff]  ;;  %v1397_v61 = vld [vmem:[%s11399_s29 + $0x11b8] sm:$0xff] }
  0x6d   : > { %1390 = vst [vmem:[%s11407_s30 + $0x5c8] sm:$0xff] %v1389_v57  ;;  %1392 = vst [vmem:[%s11407_s30 + $0x5d0] sm:$0xff] %v1391_v58  ;;  %v1399_v62 = vld [vmem:[%s11399_s29 + $0x11d0] sm:$0xff]  ;;  %v1401_v63 = vld [vmem:[%s11399_s29 + $0x11e8] sm:$0xff] }
  0x6e   : > { %1394 = vst [vmem:[%s11407_s30 + $0x5d8] sm:$0xff] %v1393_v59  ;;  %1396 = vst [vmem:[%s11407_s30 + $0x5e0] sm:$0xff] %v1395_v60  ;;  %v1403_v0 = vld [vmem:[%s11399_s29 + $0x1200] sm:$0xff]  ;;  %v1405_v1 = vld [vmem:[%s11399_s29 + $0x1218] sm:$0xff] }
  0x6f   : > { %1398 = vst [vmem:[%s11407_s30 + $0x5e8] sm:$0xff] %v1397_v61  ;;  %1400 = vst [vmem:[%s11407_s30 + $0x5f0] sm:$0xff] %v1399_v62  ;;  %v1407_v2 = vld [vmem:[%s11399_s29 + $0x1230] sm:$0xff]  ;;  %v1409_v3 = vld [vmem:[%s11399_s29 + $0x1248] sm:$0xff] }
  0x70   : > { %1402 = vst [vmem:[%s11407_s30 + $0x5f8] sm:$0xff] %v1401_v63  ;;  %1404 = vst [vmem:[%s11407_s30 + $0x600] sm:$0xff] %v1403_v0  ;;  %v1411_v4 = vld [vmem:[%s11399_s29 + $0x1260] sm:$0xff]  ;;  %v1413_v5 = vld [vmem:[%s11399_s29 + $0x1278] sm:$0xff] }
  0x71   : > { %1406 = vst [vmem:[%s11407_s30 + $0x608] sm:$0xff] %v1405_v1  ;;  %1408 = vst [vmem:[%s11407_s30 + $0x610] sm:$0xff] %v1407_v2  ;;  %v1415_v6 = vld [vmem:[%s11399_s29 + $0x1290] sm:$0xff]  ;;  %v1417_v7 = vld [vmem:[%s11399_s29 + $0x12a8] sm:$0xff] }
  0x72   : > { %1410 = vst [vmem:[%s11407_s30 + $0x618] sm:$0xff] %v1409_v3  ;;  %1412 = vst [vmem:[%s11407_s30 + $0x620] sm:$0xff] %v1411_v4  ;;  %v1419_v8 = vld [vmem:[%s11399_s29 + $0x12c0] sm:$0xff]  ;;  %v1421_v9 = vld [vmem:[%s11399_s29 + $0x12d8] sm:$0xff] }
  0x73   : > { %1414 = vst [vmem:[%s11407_s30 + $0x628] sm:$0xff] %v1413_v5  ;;  %1416 = vst [vmem:[%s11407_s30 + $0x630] sm:$0xff] %v1415_v6  ;;  %v1423_v10 = vld [vmem:[%s11399_s29 + $0x12f0] sm:$0xff]  ;;  %v1425_v11 = vld [vmem:[%s11399_s29 + $0x1308] sm:$0xff] }
  0x74   : > { %1418 = vst [vmem:[%s11407_s30 + $0x638] sm:$0xff] %v1417_v7  ;;  %1420 = vst [vmem:[%s11407_s30 + $0x640] sm:$0xff] %v1419_v8  ;;  %v1427_v12 = vld [vmem:[%s11399_s29 + $0x1320] sm:$0xff]  ;;  %v1429_v13 = vld [vmem:[%s11399_s29 + $0x1338] sm:$0xff] }
  0x75   : > { %1422 = vst [vmem:[%s11407_s30 + $0x648] sm:$0xff] %v1421_v9  ;;  %1424 = vst [vmem:[%s11407_s30 + $0x650] sm:$0xff] %v1423_v10  ;;  %v1431_v14 = vld [vmem:[%s11399_s29 + $0x1350] sm:$0xff]  ;;  %v1433_v15 = vld [vmem:[%s11399_s29 + $0x1368] sm:$0xff] }
  0x76   : > { %1426 = vst [vmem:[%s11407_s30 + $0x658] sm:$0xff] %v1425_v11  ;;  %1428 = vst [vmem:[%s11407_s30 + $0x660] sm:$0xff] %v1427_v12  ;;  %v1435_v16 = vld [vmem:[%s11399_s29 + $0x1380] sm:$0xff]  ;;  %v1437_v17 = vld [vmem:[%s11399_s29 + $0x1398] sm:$0xff] }
  0x77   : > { %1430 = vst [vmem:[%s11407_s30 + $0x668] sm:$0xff] %v1429_v13  ;;  %1432 = vst [vmem:[%s11407_s30 + $0x670] sm:$0xff] %v1431_v14  ;;  %v1439_v18 = vld [vmem:[%s11399_s29 + $0x13b0] sm:$0xff]  ;;  %v1441_v19 = vld [vmem:[%s11399_s29 + $0x13c8] sm:$0xff] }
  0x78   : > { %1434 = vst [vmem:[%s11407_s30 + $0x678] sm:$0xff] %v1433_v15  ;;  %1436 = vst [vmem:[%s11407_s30 + $0x680] sm:$0xff] %v1435_v16  ;;  %v1443_v20 = vld [vmem:[%s11399_s29 + $0x13e0] sm:$0xff]  ;;  %v1445_v21 = vld [vmem:[%s11399_s29 + $0x13f8] sm:$0xff] }
  0x79   : > { %1438 = vst [vmem:[%s11407_s30 + $0x688] sm:$0xff] %v1437_v17  ;;  %1440 = vst [vmem:[%s11407_s30 + $0x690] sm:$0xff] %v1439_v18  ;;  %v1447_v22 = vld [vmem:[%s11399_s29 + $0x1410] sm:$0xff]  ;;  %v1449_v23 = vld [vmem:[%s11399_s29 + $0x1428] sm:$0xff] }
  0x7a   : > { %1442 = vst [vmem:[%s11407_s30 + $0x698] sm:$0xff] %v1441_v19  ;;  %1444 = vst [vmem:[%s11407_s30 + $0x6a0] sm:$0xff] %v1443_v20  ;;  %v1451_v24 = vld [vmem:[%s11399_s29 + $0x1440] sm:$0xff]  ;;  %v1453_v25 = vld [vmem:[%s11399_s29 + $0x1458] sm:$0xff] }
  0x7b   : > { %1446 = vst [vmem:[%s11407_s30 + $0x6a8] sm:$0xff] %v1445_v21  ;;  %1448 = vst [vmem:[%s11407_s30 + $0x6b0] sm:$0xff] %v1447_v22  ;;  %v1455_v26 = vld [vmem:[%s11399_s29 + $0x1470] sm:$0xff]  ;;  %v1457_v27 = vld [vmem:[%s11399_s29 + $0x1488] sm:$0xff] }
  0x7c   : > { %1450 = vst [vmem:[%s11407_s30 + $0x6b8] sm:$0xff] %v1449_v23  ;;  %1452 = vst [vmem:[%s11407_s30 + $0x6c0] sm:$0xff] %v1451_v24  ;;  %v1459_v28 = vld [vmem:[%s11399_s29 + $0x14a0] sm:$0xff]  ;;  %v1461_v29 = vld [vmem:[%s11399_s29 + $0x14b8] sm:$0xff] }
  0x7d   : > { %1454 = vst [vmem:[%s11407_s30 + $0x6c8] sm:$0xff] %v1453_v25  ;;  %1456 = vst [vmem:[%s11407_s30 + $0x6d0] sm:$0xff] %v1455_v26  ;;  %v1463_v30 = vld [vmem:[%s11399_s29 + $0x14d0] sm:$0xff]  ;;  %v1465_v31 = vld [vmem:[%s11399_s29 + $0x14e8] sm:$0xff] }
  0x7e   : > { %1458 = vst [vmem:[%s11407_s30 + $0x6d8] sm:$0xff] %v1457_v27  ;;  %1460 = vst [vmem:[%s11407_s30 + $0x6e0] sm:$0xff] %v1459_v28  ;;  %v1467_v32 = vld [vmem:[%s11399_s29 + $0x1500] sm:$0xff]  ;;  %v1469_v33 = vld [vmem:[%s11399_s29 + $0x1518] sm:$0xff] }
  0x7f   : > { %1462 = vst [vmem:[%s11407_s30 + $0x6e8] sm:$0xff] %v1461_v29  ;;  %1464 = vst [vmem:[%s11407_s30 + $0x6f0] sm:$0xff] %v1463_v30  ;;  %v1471_v34 = vld [vmem:[%s11399_s29 + $0x1530] sm:$0xff]  ;;  %v1473_v35 = vld [vmem:[%s11399_s29 + $0x1548] sm:$0xff] }
  0x80   : > { %1466 = vst [vmem:[%s11407_s30 + $0x6f8] sm:$0xff] %v1465_v31  ;;  %1468 = vst [vmem:[%s11407_s30 + $0x700] sm:$0xff] %v1467_v32  ;;  %v1475_v36 = vld [vmem:[%s11399_s29 + $0x1560] sm:$0xff]  ;;  %v1477_v37 = vld [vmem:[%s11399_s29 + $0x1578] sm:$0xff] }
  0x81   : > { %1470 = vst [vmem:[%s11407_s30 + $0x708] sm:$0xff] %v1469_v33  ;;  %1472 = vst [vmem:[%s11407_s30 + $0x710] sm:$0xff] %v1471_v34  ;;  %v1479_v38 = vld [vmem:[%s11399_s29 + $0x1590] sm:$0xff]  ;;  %v1481_v39 = vld [vmem:[%s11399_s29 + $0x15a8] sm:$0xff] }
  0x82   : > { %1474 = vst [vmem:[%s11407_s30 + $0x718] sm:$0xff] %v1473_v35  ;;  %1476 = vst [vmem:[%s11407_s30 + $0x720] sm:$0xff] %v1475_v36  ;;  %v1483_v40 = vld [vmem:[%s11399_s29 + $0x15c0] sm:$0xff]  ;;  %v1485_v41 = vld [vmem:[%s11399_s29 + $0x15d8] sm:$0xff] }
  0x83   : > { %1478 = vst [vmem:[%s11407_s30 + $0x728] sm:$0xff] %v1477_v37  ;;  %1480 = vst [vmem:[%s11407_s30 + $0x730] sm:$0xff] %v1479_v38  ;;  %v1487_v42 = vld [vmem:[%s11399_s29 + $0x15f0] sm:$0xff]  ;;  %v1489_v43 = vld [vmem:[%s11399_s29 + $0x1608] sm:$0xff] }
  0x84   : > { %1482 = vst [vmem:[%s11407_s30 + $0x738] sm:$0xff] %v1481_v39  ;;  %1484 = vst [vmem:[%s11407_s30 + $0x740] sm:$0xff] %v1483_v40  ;;  %v1491_v44 = vld [vmem:[%s11399_s29 + $0x1620] sm:$0xff]  ;;  %v1493_v45 = vld [vmem:[%s11399_s29 + $0x1638] sm:$0xff] }
  0x85   : > { %1486 = vst [vmem:[%s11407_s30 + $0x748] sm:$0xff] %v1485_v41  ;;  %1488 = vst [vmem:[%s11407_s30 + $0x750] sm:$0xff] %v1487_v42  ;;  %v1495_v46 = vld [vmem:[%s11399_s29 + $0x1650] sm:$0xff]  ;;  %v1497_v47 = vld [vmem:[%s11399_s29 + $0x1668] sm:$0xff] }
  0x86   : > { %1490 = vst [vmem:[%s11407_s30 + $0x758] sm:$0xff] %v1489_v43  ;;  %1492 = vst [vmem:[%s11407_s30 + $0x760] sm:$0xff] %v1491_v44  ;;  %v1499_v48 = vld [vmem:[%s11399_s29 + $0x1680] sm:$0xff]  ;;  %v1501_v49 = vld [vmem:[%s11399_s29 + $0x1698] sm:$0xff] }
  0x87   : > { %1494 = vst [vmem:[%s11407_s30 + $0x768] sm:$0xff] %v1493_v45  ;;  %1496 = vst [vmem:[%s11407_s30 + $0x770] sm:$0xff] %v1495_v46  ;;  %v1503_v50 = vld [vmem:[%s11399_s29 + $0x16b0] sm:$0xff]  ;;  %v1505_v51 = vld [vmem:[%s11399_s29 + $0x16c8] sm:$0xff] }
  0x88   : > { %1498 = vst [vmem:[%s11407_s30 + $0x778] sm:$0xff] %v1497_v47  ;;  %1500 = vst [vmem:[%s11407_s30 + $0x780] sm:$0xff] %v1499_v48  ;;  %v1507_v52 = vld [vmem:[%s11399_s29 + $0x16e0] sm:$0xff]  ;;  %v1509_v53 = vld [vmem:[%s11399_s29 + $0x16f8] sm:$0xff] }
  0x89   : > { %1502 = vst [vmem:[%s11407_s30 + $0x788] sm:$0xff] %v1501_v49  ;;  %1504 = vst [vmem:[%s11407_s30 + $0x790] sm:$0xff] %v1503_v50  ;;  %v1511_v54 = vld [vmem:[%s11399_s29 + $0x1710] sm:$0xff]  ;;  %v1513_v55 = vld [vmem:[%s11399_s29 + $0x1728] sm:$0xff] }
  0x8a   : > { %1506 = vst [vmem:[%s11407_s30 + $0x798] sm:$0xff] %v1505_v51  ;;  %1508 = vst [vmem:[%s11407_s30 + $0x7a0] sm:$0xff] %v1507_v52  ;;  %v1515_v56 = vld [vmem:[%s11399_s29 + $0x1740] sm:$0xff]  ;;  %v1517_v57 = vld [vmem:[%s11399_s29 + $0x1758] sm:$0xff] }
  0x8b   : > { %1510 = vst [vmem:[%s11407_s30 + $0x7a8] sm:$0xff] %v1509_v53  ;;  %1512 = vst [vmem:[%s11407_s30 + $0x7b0] sm:$0xff] %v1511_v54  ;;  %v1519_v58 = vld [vmem:[%s11399_s29 + $0x1770] sm:$0xff]  ;;  %v1521_v59 = vld [vmem:[%s11399_s29 + $0x1788] sm:$0xff] }
  0x8c   : > { %1514 = vst [vmem:[%s11407_s30 + $0x7b8] sm:$0xff] %v1513_v55  ;;  %1516 = vst [vmem:[%s11407_s30 + $0x7c0] sm:$0xff] %v1515_v56  ;;  %v1523_v60 = vld [vmem:[%s11399_s29 + $0x17a0] sm:$0xff]  ;;  %v1525_v61 = vld [vmem:[%s11399_s29 + $0x17b8] sm:$0xff] }
  0x8d   : > { %1518 = vst [vmem:[%s11407_s30 + $0x7c8] sm:$0xff] %v1517_v57  ;;  %1520 = vst [vmem:[%s11407_s30 + $0x7d0] sm:$0xff] %v1519_v58  ;;  %v1527_v62 = vld [vmem:[%s11399_s29 + $0x17d0] sm:$0xff]  ;;  %v1529_v63 = vld [vmem:[%s11399_s29 + $0x17e8] sm:$0xff] }
  0x8e   : > { %1522 = vst [vmem:[%s11407_s30 + $0x7d8] sm:$0xff] %v1521_v59  ;;  %1524 = vst [vmem:[%s11407_s30 + $0x7e0] sm:$0xff] %v1523_v60  ;;  %v1531_v0 = vld [vmem:[%s11399_s29 + $0x1800] sm:$0xff]  ;;  %v1533_v1 = vld [vmem:[%s11399_s29 + $0x1818] sm:$0xff] }
  0x8f   : > { %1526 = vst [vmem:[%s11407_s30 + $0x7e8] sm:$0xff] %v1525_v61  ;;  %1528 = vst [vmem:[%s11407_s30 + $0x7f0] sm:$0xff] %v1527_v62  ;;  %v1535_v2 = vld [vmem:[%s11399_s29 + $0x1830] sm:$0xff]  ;;  %v1537_v3 = vld [vmem:[%s11399_s29 + $0x1848] sm:$0xff] }
  0x90   : > { %1530 = vst [vmem:[%s11407_s30 + $0x7f8] sm:$0xff] %v1529_v63  ;;  %1532 = vst [vmem:[%s11407_s30 + $0x800] sm:$0xff] %v1531_v0  ;;  %v1539_v4 = vld [vmem:[%s11399_s29 + $0x1860] sm:$0xff]  ;;  %v1541_v5 = vld [vmem:[%s11399_s29 + $0x1878] sm:$0xff] }
  0x91   : > { %1534 = vst [vmem:[%s11407_s30 + $0x808] sm:$0xff] %v1533_v1  ;;  %1536 = vst [vmem:[%s11407_s30 + $0x810] sm:$0xff] %v1535_v2  ;;  %v1543_v6 = vld [vmem:[%s11399_s29 + $0x1890] sm:$0xff]  ;;  %v1545_v7 = vld [vmem:[%s11399_s29 + $0x18a8] sm:$0xff] }
  0x92   : > { %1538 = vst [vmem:[%s11407_s30 + $0x818] sm:$0xff] %v1537_v3  ;;  %1540 = vst [vmem:[%s11407_s30 + $0x820] sm:$0xff] %v1539_v4  ;;  %v1547_v8 = vld [vmem:[%s11399_s29 + $0x18c0] sm:$0xff]  ;;  %v1549_v9 = vld [vmem:[%s11399_s29 + $0x18d8] sm:$0xff] }
  0x93   : > { %1542 = vst [vmem:[%s11407_s30 + $0x828] sm:$0xff] %v1541_v5  ;;  %1544 = vst [vmem:[%s11407_s30 + $0x830] sm:$0xff] %v1543_v6  ;;  %v1551_v10 = vld [vmem:[%s11399_s29 + $0x18f0] sm:$0xff]  ;;  %v1553_v11 = vld [vmem:[%s11399_s29 + $0x1908] sm:$0xff] }
  0x94   : > { %1546 = vst [vmem:[%s11407_s30 + $0x838] sm:$0xff] %v1545_v7  ;;  %1548 = vst [vmem:[%s11407_s30 + $0x840] sm:$0xff] %v1547_v8  ;;  %v1555_v12 = vld [vmem:[%s11399_s29 + $0x1920] sm:$0xff]  ;;  %v1557_v13 = vld [vmem:[%s11399_s29 + $0x1938] sm:$0xff] }
  0x95   : > { %1550 = vst [vmem:[%s11407_s30 + $0x848] sm:$0xff] %v1549_v9  ;;  %1552 = vst [vmem:[%s11407_s30 + $0x850] sm:$0xff] %v1551_v10  ;;  %v1559_v14 = vld [vmem:[%s11399_s29 + $0x1950] sm:$0xff]  ;;  %v1561_v15 = vld [vmem:[%s11399_s29 + $0x1968] sm:$0xff] }
  0x96   : > { %1554 = vst [vmem:[%s11407_s30 + $0x858] sm:$0xff] %v1553_v11  ;;  %1556 = vst [vmem:[%s11407_s30 + $0x860] sm:$0xff] %v1555_v12  ;;  %v1563_v16 = vld [vmem:[%s11399_s29 + $0x1980] sm:$0xff]  ;;  %v1565_v17 = vld [vmem:[%s11399_s29 + $0x1998] sm:$0xff] }
  0x97   : > { %1558 = vst [vmem:[%s11407_s30 + $0x868] sm:$0xff] %v1557_v13  ;;  %1560 = vst [vmem:[%s11407_s30 + $0x870] sm:$0xff] %v1559_v14  ;;  %v1567_v18 = vld [vmem:[%s11399_s29 + $0x19b0] sm:$0xff]  ;;  %v1569_v19 = vld [vmem:[%s11399_s29 + $0x19c8] sm:$0xff] }
  0x98   : > { %1562 = vst [vmem:[%s11407_s30 + $0x878] sm:$0xff] %v1561_v15  ;;  %1564 = vst [vmem:[%s11407_s30 + $0x880] sm:$0xff] %v1563_v16  ;;  %v1571_v20 = vld [vmem:[%s11399_s29 + $0x19e0] sm:$0xff]  ;;  %v1573_v21 = vld [vmem:[%s11399_s29 + $0x19f8] sm:$0xff] }
  0x99   : > { %1566 = vst [vmem:[%s11407_s30 + $0x888] sm:$0xff] %v1565_v17  ;;  %1568 = vst [vmem:[%s11407_s30 + $0x890] sm:$0xff] %v1567_v18  ;;  %v1575_v22 = vld [vmem:[%s11399_s29 + $0x1a10] sm:$0xff]  ;;  %v1577_v23 = vld [vmem:[%s11399_s29 + $0x1a28] sm:$0xff] }
  0x9a   : > { %1570 = vst [vmem:[%s11407_s30 + $0x898] sm:$0xff] %v1569_v19  ;;  %1572 = vst [vmem:[%s11407_s30 + $0x8a0] sm:$0xff] %v1571_v20  ;;  %v1579_v24 = vld [vmem:[%s11399_s29 + $0x1a40] sm:$0xff]  ;;  %v1581_v25 = vld [vmem:[%s11399_s29 + $0x1a58] sm:$0xff] }
  0x9b   : > { %1574 = vst [vmem:[%s11407_s30 + $0x8a8] sm:$0xff] %v1573_v21  ;;  %1576 = vst [vmem:[%s11407_s30 + $0x8b0] sm:$0xff] %v1575_v22  ;;  %v1583_v26 = vld [vmem:[%s11399_s29 + $0x1a70] sm:$0xff]  ;;  %v1585_v27 = vld [vmem:[%s11399_s29 + $0x1a88] sm:$0xff] }
  0x9c   : > { %1578 = vst [vmem:[%s11407_s30 + $0x8b8] sm:$0xff] %v1577_v23  ;;  %1580 = vst [vmem:[%s11407_s30 + $0x8c0] sm:$0xff] %v1579_v24  ;;  %v1587_v28 = vld [vmem:[%s11399_s29 + $0x1aa0] sm:$0xff]  ;;  %v1589_v29 = vld [vmem:[%s11399_s29 + $0x1ab8] sm:$0xff] }
  0x9d   : > { %1582 = vst [vmem:[%s11407_s30 + $0x8c8] sm:$0xff] %v1581_v25  ;;  %1584 = vst [vmem:[%s11407_s30 + $0x8d0] sm:$0xff] %v1583_v26  ;;  %v1591_v30 = vld [vmem:[%s11399_s29 + $0x1ad0] sm:$0xff]  ;;  %v1593_v31 = vld [vmem:[%s11399_s29 + $0x1ae8] sm:$0xff] }
  0x9e   : > { %1586 = vst [vmem:[%s11407_s30 + $0x8d8] sm:$0xff] %v1585_v27  ;;  %1588 = vst [vmem:[%s11407_s30 + $0x8e0] sm:$0xff] %v1587_v28  ;;  %v1595_v32 = vld [vmem:[%s11399_s29 + $0x1b00] sm:$0xff]  ;;  %v1597_v33 = vld [vmem:[%s11399_s29 + $0x1b18] sm:$0xff] }
  0x9f   : > { %1590 = vst [vmem:[%s11407_s30 + $0x8e8] sm:$0xff] %v1589_v29  ;;  %1592 = vst [vmem:[%s11407_s30 + $0x8f0] sm:$0xff] %v1591_v30  ;;  %v1599_v34 = vld [vmem:[%s11399_s29 + $0x1b30] sm:$0xff]  ;;  %v1601_v35 = vld [vmem:[%s11399_s29 + $0x1b48] sm:$0xff] }
  0xa0   : > { %1594 = vst [vmem:[%s11407_s30 + $0x8f8] sm:$0xff] %v1593_v31  ;;  %1596 = vst [vmem:[%s11407_s30 + $0x900] sm:$0xff] %v1595_v32  ;;  %v1603_v36 = vld [vmem:[%s11399_s29 + $0x1b60] sm:$0xff]  ;;  %v1605_v37 = vld [vmem:[%s11399_s29 + $0x1b78] sm:$0xff] }
  0xa1   : > { %1598 = vst [vmem:[%s11407_s30 + $0x908] sm:$0xff] %v1597_v33  ;;  %1600 = vst [vmem:[%s11407_s30 + $0x910] sm:$0xff] %v1599_v34  ;;  %v1607_v38 = vld [vmem:[%s11399_s29 + $0x1b90] sm:$0xff]  ;;  %v1609_v39 = vld [vmem:[%s11399_s29 + $0x1ba8] sm:$0xff] }
  0xa2   : > { %1602 = vst [vmem:[%s11407_s30 + $0x918] sm:$0xff] %v1601_v35  ;;  %1604 = vst [vmem:[%s11407_s30 + $0x920] sm:$0xff] %v1603_v36  ;;  %v1611_v40 = vld [vmem:[%s11399_s29 + $0x1bc0] sm:$0xff]  ;;  %v1613_v41 = vld [vmem:[%s11399_s29 + $0x1bd8] sm:$0xff] }
  0xa3   : > { %1606 = vst [vmem:[%s11407_s30 + $0x928] sm:$0xff] %v1605_v37  ;;  %1608 = vst [vmem:[%s11407_s30 + $0x930] sm:$0xff] %v1607_v38  ;;  %v1615_v42 = vld [vmem:[%s11399_s29 + $0x1bf0] sm:$0xff]  ;;  %v1617_v43 = vld [vmem:[%s11399_s29 + $0x1c08] sm:$0xff] }
  0xa4   : > { %1610 = vst [vmem:[%s11407_s30 + $0x938] sm:$0xff] %v1609_v39  ;;  %1612 = vst [vmem:[%s11407_s30 + $0x940] sm:$0xff] %v1611_v40  ;;  %v1619_v44 = vld [vmem:[%s11399_s29 + $0x1c20] sm:$0xff]  ;;  %v1621_v45 = vld [vmem:[%s11399_s29 + $0x1c38] sm:$0xff] }
  0xa5   : > { %1614 = vst [vmem:[%s11407_s30 + $0x948] sm:$0xff] %v1613_v41  ;;  %1616 = vst [vmem:[%s11407_s30 + $0x950] sm:$0xff] %v1615_v42  ;;  %v1623_v46 = vld [vmem:[%s11399_s29 + $0x1c50] sm:$0xff]  ;;  %v1625_v47 = vld [vmem:[%s11399_s29 + $0x1c68] sm:$0xff] }
  0xa6   : > { %1618 = vst [vmem:[%s11407_s30 + $0x958] sm:$0xff] %v1617_v43  ;;  %1620 = vst [vmem:[%s11407_s30 + $0x960] sm:$0xff] %v1619_v44  ;;  %v1627_v48 = vld [vmem:[%s11399_s29 + $0x1c80] sm:$0xff]  ;;  %v1629_v49 = vld [vmem:[%s11399_s29 + $0x1c98] sm:$0xff] }
  0xa7   : > { %1622 = vst [vmem:[%s11407_s30 + $0x968] sm:$0xff] %v1621_v45  ;;  %1624 = vst [vmem:[%s11407_s30 + $0x970] sm:$0xff] %v1623_v46  ;;  %v1631_v50 = vld [vmem:[%s11399_s29 + $0x1cb0] sm:$0xff]  ;;  %v1633_v51 = vld [vmem:[%s11399_s29 + $0x1cc8] sm:$0xff] }
  0xa8   : > { %1626 = vst [vmem:[%s11407_s30 + $0x978] sm:$0xff] %v1625_v47  ;;  %1628 = vst [vmem:[%s11407_s30 + $0x980] sm:$0xff] %v1627_v48  ;;  %v1635_v52 = vld [vmem:[%s11399_s29 + $0x1ce0] sm:$0xff]  ;;  %v1637_v53 = vld [vmem:[%s11399_s29 + $0x1cf8] sm:$0xff] }
  0xa9   : > { %1630 = vst [vmem:[%s11407_s30 + $0x988] sm:$0xff] %v1629_v49  ;;  %1632 = vst [vmem:[%s11407_s30 + $0x990] sm:$0xff] %v1631_v50  ;;  %v1639_v54 = vld [vmem:[%s11399_s29 + $0x1d10] sm:$0xff]  ;;  %v1641_v55 = vld [vmem:[%s11399_s29 + $0x1d28] sm:$0xff] }
  0xaa   : > { %1634 = vst [vmem:[%s11407_s30 + $0x998] sm:$0xff] %v1633_v51  ;;  %1636 = vst [vmem:[%s11407_s30 + $0x9a0] sm:$0xff] %v1635_v52  ;;  %v1643_v56 = vld [vmem:[%s11399_s29 + $0x1d40] sm:$0xff]  ;;  %v1645_v57 = vld [vmem:[%s11399_s29 + $0x1d58] sm:$0xff] }
  0xab   : > { %1638 = vst [vmem:[%s11407_s30 + $0x9a8] sm:$0xff] %v1637_v53  ;;  %1640 = vst [vmem:[%s11407_s30 + $0x9b0] sm:$0xff] %v1639_v54  ;;  %v1647_v58 = vld [vmem:[%s11399_s29 + $0x1d70] sm:$0xff]  ;;  %v1649_v59 = vld [vmem:[%s11399_s29 + $0x1d88] sm:$0xff] }
  0xac   : > { %1642 = vst [vmem:[%s11407_s30 + $0x9b8] sm:$0xff] %v1641_v55  ;;  %1644 = vst [vmem:[%s11407_s30 + $0x9c0] sm:$0xff] %v1643_v56  ;;  %v1651_v60 = vld [vmem:[%s11399_s29 + $0x1da0] sm:$0xff]  ;;  %v1653_v61 = vld [vmem:[%s11399_s29 + $0x1db8] sm:$0xff] }
  0xad   : > { %1646 = vst [vmem:[%s11407_s30 + $0x9c8] sm:$0xff] %v1645_v57  ;;  %1648 = vst [vmem:[%s11407_s30 + $0x9d0] sm:$0xff] %v1647_v58  ;;  %v1655_v62 = vld [vmem:[%s11399_s29 + $0x1dd0] sm:$0xff]  ;;  %v1657_v63 = vld [vmem:[%s11399_s29 + $0x1de8] sm:$0xff] }
  0xae   : > { %1650 = vst [vmem:[%s11407_s30 + $0x9d8] sm:$0xff] %v1649_v59  ;;  %1652 = vst [vmem:[%s11407_s30 + $0x9e0] sm:$0xff] %v1651_v60  ;;  %v1659_v0 = vld [vmem:[%s11399_s29 + $0x1e00] sm:$0xff]  ;;  %v1661_v1 = vld [vmem:[%s11399_s29 + $0x1e18] sm:$0xff] }
  0xaf   : > { %1654 = vst [vmem:[%s11407_s30 + $0x9e8] sm:$0xff] %v1653_v61  ;;  %1656 = vst [vmem:[%s11407_s30 + $0x9f0] sm:$0xff] %v1655_v62  ;;  %v1663_v2 = vld [vmem:[%s11399_s29 + $0x1e30] sm:$0xff]  ;;  %v1665_v3 = vld [vmem:[%s11399_s29 + $0x1e48] sm:$0xff] }
  0xb0   : > { %1658 = vst [vmem:[%s11407_s30 + $0x9f8] sm:$0xff] %v1657_v63  ;;  %1660 = vst [vmem:[%s11407_s30 + $0xa00] sm:$0xff] %v1659_v0  ;;  %v1667_v4 = vld [vmem:[%s11399_s29 + $0x1e60] sm:$0xff]  ;;  %v1669_v5 = vld [vmem:[%s11399_s29 + $0x1e78] sm:$0xff] }
  0xb1   : > { %1662 = vst [vmem:[%s11407_s30 + $0xa08] sm:$0xff] %v1661_v1  ;;  %1664 = vst [vmem:[%s11407_s30 + $0xa10] sm:$0xff] %v1663_v2  ;;  %v1671_v6 = vld [vmem:[%s11399_s29 + $0x1e90] sm:$0xff]  ;;  %v1673_v7 = vld [vmem:[%s11399_s29 + $0x1ea8] sm:$0xff] }
  0xb2   : > { %1666 = vst [vmem:[%s11407_s30 + $0xa18] sm:$0xff] %v1665_v3  ;;  %1668 = vst [vmem:[%s11407_s30 + $0xa20] sm:$0xff] %v1667_v4  ;;  %v1675_v8 = vld [vmem:[%s11399_s29 + $0x1ec0] sm:$0xff]  ;;  %v1677_v9 = vld [vmem:[%s11399_s29 + $0x1ed8] sm:$0xff] }
  0xb3   : > { %1670 = vst [vmem:[%s11407_s30 + $0xa28] sm:$0xff] %v1669_v5  ;;  %1672 = vst [vmem:[%s11407_s30 + $0xa30] sm:$0xff] %v1671_v6  ;;  %v1679_v10 = vld [vmem:[%s11399_s29 + $0x1ef0] sm:$0xff]  ;;  %v1681_v11 = vld [vmem:[%s11399_s29 + $0x1f08] sm:$0xff] }
  0xb4   : > { %1674 = vst [vmem:[%s11407_s30 + $0xa38] sm:$0xff] %v1673_v7  ;;  %1676 = vst [vmem:[%s11407_s30 + $0xa40] sm:$0xff] %v1675_v8  ;;  %v1683_v12 = vld [vmem:[%s11399_s29 + $0x1f20] sm:$0xff]  ;;  %v1685_v13 = vld [vmem:[%s11399_s29 + $0x1f38] sm:$0xff] }
  0xb5   : > { %1678 = vst [vmem:[%s11407_s30 + $0xa48] sm:$0xff] %v1677_v9  ;;  %1680 = vst [vmem:[%s11407_s30 + $0xa50] sm:$0xff] %v1679_v10  ;;  %v1687_v14 = vld [vmem:[%s11399_s29 + $0x1f50] sm:$0xff]  ;;  %v1689_v15 = vld [vmem:[%s11399_s29 + $0x1f68] sm:$0xff] }
  0xb6   : > { %1682 = vst [vmem:[%s11407_s30 + $0xa58] sm:$0xff] %v1681_v11  ;;  %1684 = vst [vmem:[%s11407_s30 + $0xa60] sm:$0xff] %v1683_v12  ;;  %v1691_v16 = vld [vmem:[%s11399_s29 + $0x1f80] sm:$0xff]  ;;  %v1693_v17 = vld [vmem:[%s11399_s29 + $0x1f98] sm:$0xff] }
  0xb7   : > { %1686 = vst [vmem:[%s11407_s30 + $0xa68] sm:$0xff] %v1685_v13  ;;  %1688 = vst [vmem:[%s11407_s30 + $0xa70] sm:$0xff] %v1687_v14  ;;  %v1695_v18 = vld [vmem:[%s11399_s29 + $0x1fb0] sm:$0xff]  ;;  %v1697_v19 = vld [vmem:[%s11399_s29 + $0x1fc8] sm:$0xff] }
  0xb8   : > { %1690 = vst [vmem:[%s11407_s30 + $0xa78] sm:$0xff] %v1689_v15  ;;  %1692 = vst [vmem:[%s11407_s30 + $0xa80] sm:$0xff] %v1691_v16  ;;  %v1699_v20 = vld [vmem:[%s11399_s29 + $0x1fe0] sm:$0xff]  ;;  %v1701_v21 = vld [vmem:[%s11399_s29 + $0x1ff8] sm:$0xff] }
  0xb9   : > { %1694 = vst [vmem:[%s11407_s30 + $0xa88] sm:$0xff] %v1693_v17  ;;  %1696 = vst [vmem:[%s11407_s30 + $0xa90] sm:$0xff] %v1695_v18  ;;  %v1703_v22 = vld [vmem:[%s11399_s29 + $0x2010] sm:$0xff]  ;;  %v1705_v23 = vld [vmem:[%s11399_s29 + $0x2028] sm:$0xff] }
  0xba   : > { %1698 = vst [vmem:[%s11407_s30 + $0xa98] sm:$0xff] %v1697_v19  ;;  %1700 = vst [vmem:[%s11407_s30 + $0xaa0] sm:$0xff] %v1699_v20  ;;  %v1707_v24 = vld [vmem:[%s11399_s29 + $0x2040] sm:$0xff]  ;;  %v1709_v25 = vld [vmem:[%s11399_s29 + $0x2058] sm:$0xff] }
  0xbb   : > { %1702 = vst [vmem:[%s11407_s30 + $0xaa8] sm:$0xff] %v1701_v21  ;;  %1704 = vst [vmem:[%s11407_s30 + $0xab0] sm:$0xff] %v1703_v22  ;;  %v1711_v26 = vld [vmem:[%s11399_s29 + $0x2070] sm:$0xff]  ;;  %v1713_v27 = vld [vmem:[%s11399_s29 + $0x2088] sm:$0xff] }
  0xbc   : > { %1706 = vst [vmem:[%s11407_s30 + $0xab8] sm:$0xff] %v1705_v23  ;;  %1708 = vst [vmem:[%s11407_s30 + $0xac0] sm:$0xff] %v1707_v24  ;;  %v1715_v28 = vld [vmem:[%s11399_s29 + $0x20a0] sm:$0xff]  ;;  %v1717_v29 = vld [vmem:[%s11399_s29 + $0x20b8] sm:$0xff] }
  0xbd   : > { %1710 = vst [vmem:[%s11407_s30 + $0xac8] sm:$0xff] %v1709_v25  ;;  %1712 = vst [vmem:[%s11407_s30 + $0xad0] sm:$0xff] %v1711_v26  ;;  %v1719_v30 = vld [vmem:[%s11399_s29 + $0x20d0] sm:$0xff]  ;;  %v1721_v31 = vld [vmem:[%s11399_s29 + $0x20e8] sm:$0xff] }
  0xbe   : > { %1714 = vst [vmem:[%s11407_s30 + $0xad8] sm:$0xff] %v1713_v27  ;;  %1716 = vst [vmem:[%s11407_s30 + $0xae0] sm:$0xff] %v1715_v28  ;;  %v1723_v32 = vld [vmem:[%s11399_s29 + $0x2100] sm:$0xff]  ;;  %v1725_v33 = vld [vmem:[%s11399_s29 + $0x2118] sm:$0xff] }
  0xbf   : > { %1718 = vst [vmem:[%s11407_s30 + $0xae8] sm:$0xff] %v1717_v29  ;;  %1720 = vst [vmem:[%s11407_s30 + $0xaf0] sm:$0xff] %v1719_v30  ;;  %v1727_v34 = vld [vmem:[%s11399_s29 + $0x2130] sm:$0xff]  ;;  %v1729_v35 = vld [vmem:[%s11399_s29 + $0x2148] sm:$0xff] }
  0xc0   : > { %1722 = vst [vmem:[%s11407_s30 + $0xaf8] sm:$0xff] %v1721_v31  ;;  %1724 = vst [vmem:[%s11407_s30 + $0xb00] sm:$0xff] %v1723_v32  ;;  %v1731_v36 = vld [vmem:[%s11399_s29 + $0x2160] sm:$0xff]  ;;  %v1733_v37 = vld [vmem:[%s11399_s29 + $0x2178] sm:$0xff] }
  0xc1   : > { %1726 = vst [vmem:[%s11407_s30 + $0xb08] sm:$0xff] %v1725_v33  ;;  %1728 = vst [vmem:[%s11407_s30 + $0xb10] sm:$0xff] %v1727_v34  ;;  %v1735_v38 = vld [vmem:[%s11399_s29 + $0x2190] sm:$0xff]  ;;  %v1737_v39 = vld [vmem:[%s11399_s29 + $0x21a8] sm:$0xff] }
  0xc2   : > { %1730 = vst [vmem:[%s11407_s30 + $0xb18] sm:$0xff] %v1729_v35  ;;  %1732 = vst [vmem:[%s11407_s30 + $0xb20] sm:$0xff] %v1731_v36  ;;  %v1739_v40 = vld [vmem:[%s11399_s29 + $0x21c0] sm:$0xff]  ;;  %v1741_v41 = vld [vmem:[%s11399_s29 + $0x21d8] sm:$0xff] }
  0xc3   : > { %1734 = vst [vmem:[%s11407_s30 + $0xb28] sm:$0xff] %v1733_v37  ;;  %1736 = vst [vmem:[%s11407_s30 + $0xb30] sm:$0xff] %v1735_v38  ;;  %v1743_v42 = vld [vmem:[%s11399_s29 + $0x21f0] sm:$0xff]  ;;  %v1745_v43 = vld [vmem:[%s11399_s29 + $0x2208] sm:$0xff] }
  0xc4   : > { %1738 = vst [vmem:[%s11407_s30 + $0xb38] sm:$0xff] %v1737_v39  ;;  %1740 = vst [vmem:[%s11407_s30 + $0xb40] sm:$0xff] %v1739_v40  ;;  %v1747_v44 = vld [vmem:[%s11399_s29 + $0x2220] sm:$0xff]  ;;  %v1749_v45 = vld [vmem:[%s11399_s29 + $0x2238] sm:$0xff] }
  0xc5   : > { %1742 = vst [vmem:[%s11407_s30 + $0xb48] sm:$0xff] %v1741_v41  ;;  %1744 = vst [vmem:[%s11407_s30 + $0xb50] sm:$0xff] %v1743_v42  ;;  %v1751_v46 = vld [vmem:[%s11399_s29 + $0x2250] sm:$0xff]  ;;  %v1753_v47 = vld [vmem:[%s11399_s29 + $0x2268] sm:$0xff] }
  0xc6   : > { %1746 = vst [vmem:[%s11407_s30 + $0xb58] sm:$0xff] %v1745_v43  ;;  %1748 = vst [vmem:[%s11407_s30 + $0xb60] sm:$0xff] %v1747_v44  ;;  %v1755_v48 = vld [vmem:[%s11399_s29 + $0x2280] sm:$0xff]  ;;  %v1757_v49 = vld [vmem:[%s11399_s29 + $0x2298] sm:$0xff] }
  0xc7   : > { %1750 = vst [vmem:[%s11407_s30 + $0xb68] sm:$0xff] %v1749_v45  ;;  %1752 = vst [vmem:[%s11407_s30 + $0xb70] sm:$0xff] %v1751_v46  ;;  %v1759_v50 = vld [vmem:[%s11399_s29 + $0x22b0] sm:$0xff]  ;;  %v1761_v51 = vld [vmem:[%s11399_s29 + $0x22c8] sm:$0xff] }
  0xc8   : > { %1754 = vst [vmem:[%s11407_s30 + $0xb78] sm:$0xff] %v1753_v47  ;;  %1756 = vst [vmem:[%s11407_s30 + $0xb80] sm:$0xff] %v1755_v48  ;;  %v1763_v52 = vld [vmem:[%s11399_s29 + $0x22e0] sm:$0xff]  ;;  %v1765_v53 = vld [vmem:[%s11399_s29 + $0x22f8] sm:$0xff] }
  0xc9   : > { %1758 = vst [vmem:[%s11407_s30 + $0xb88] sm:$0xff] %v1757_v49  ;;  %1760 = vst [vmem:[%s11407_s30 + $0xb90] sm:$0xff] %v1759_v50  ;;  %v1767_v54 = vld [vmem:[%s11399_s29 + $0x2310] sm:$0xff]  ;;  %v1769_v55 = vld [vmem:[%s11399_s29 + $0x2328] sm:$0xff] }
  0xca   : > { %1762 = vst [vmem:[%s11407_s30 + $0xb98] sm:$0xff] %v1761_v51  ;;  %1764 = vst [vmem:[%s11407_s30 + $0xba0] sm:$0xff] %v1763_v52  ;;  %v1771_v56 = vld [vmem:[%s11399_s29 + $0x2340] sm:$0xff]  ;;  %v1773_v57 = vld [vmem:[%s11399_s29 + $0x2358] sm:$0xff] }
  0xcb   : > { %1766 = vst [vmem:[%s11407_s30 + $0xba8] sm:$0xff] %v1765_v53  ;;  %1768 = vst [vmem:[%s11407_s30 + $0xbb0] sm:$0xff] %v1767_v54  ;;  %v1775_v58 = vld [vmem:[%s11399_s29 + $0x2370] sm:$0xff]  ;;  %v1777_v59 = vld [vmem:[%s11399_s29 + $0x2388] sm:$0xff] }
  0xcc   : > { %1770 = vst [vmem:[%s11407_s30 + $0xbb8] sm:$0xff] %v1769_v55  ;;  %1772 = vst [vmem:[%s11407_s30 + $0xbc0] sm:$0xff] %v1771_v56  ;;  %v1779_v60 = vld [vmem:[%s11399_s29 + $0x23a0] sm:$0xff]  ;;  %v1781_v61 = vld [vmem:[%s11399_s29 + $0x23b8] sm:$0xff] }
  0xcd   : > { %1774 = vst [vmem:[%s11407_s30 + $0xbc8] sm:$0xff] %v1773_v57  ;;  %1776 = vst [vmem:[%s11407_s30 + $0xbd0] sm:$0xff] %v1775_v58  ;;  %v1783_v62 = vld [vmem:[%s11399_s29 + $0x23d0] sm:$0xff]  ;;  %v1785_v63 = vld [vmem:[%s11399_s29 + $0x23e8] sm:$0xff] }
  0xce   : > { %1778 = vst [vmem:[%s11407_s30 + $0xbd8] sm:$0xff] %v1777_v59  ;;  %1780 = vst [vmem:[%s11407_s30 + $0xbe0] sm:$0xff] %v1779_v60  ;;  %v1787_v0 = vld [vmem:[%s11399_s29 + $0x2400] sm:$0xff]  ;;  %v1789_v1 = vld [vmem:[%s11399_s29 + $0x2418] sm:$0xff] }
  0xcf   : > { %1782 = vst [vmem:[%s11407_s30 + $0xbe8] sm:$0xff] %v1781_v61  ;;  %1784 = vst [vmem:[%s11407_s30 + $0xbf0] sm:$0xff] %v1783_v62  ;;  %v1791_v2 = vld [vmem:[%s11399_s29 + $0x2430] sm:$0xff]  ;;  %v1793_v3 = vld [vmem:[%s11399_s29 + $0x2448] sm:$0xff] }
  0xd0   : > { %1786 = vst [vmem:[%s11407_s30 + $0xbf8] sm:$0xff] %v1785_v63  ;;  %1788 = vst [vmem:[%s11407_s30 + $0xc00] sm:$0xff] %v1787_v0  ;;  %v1795_v4 = vld [vmem:[%s11399_s29 + $0x2460] sm:$0xff]  ;;  %v1797_v5 = vld [vmem:[%s11399_s29 + $0x2478] sm:$0xff] }
  0xd1   : > { %1790 = vst [vmem:[%s11407_s30 + $0xc08] sm:$0xff] %v1789_v1  ;;  %1792 = vst [vmem:[%s11407_s30 + $0xc10] sm:$0xff] %v1791_v2  ;;  %v1799_v6 = vld [vmem:[%s11399_s29 + $0x2490] sm:$0xff]  ;;  %v1801_v7 = vld [vmem:[%s11399_s29 + $0x24a8] sm:$0xff] }
  0xd2   : > { %1794 = vst [vmem:[%s11407_s30 + $0xc18] sm:$0xff] %v1793_v3  ;;  %1796 = vst [vmem:[%s11407_s30 + $0xc20] sm:$0xff] %v1795_v4  ;;  %v1803_v8 = vld [vmem:[%s11399_s29 + $0x24c0] sm:$0xff]  ;;  %v1805_v9 = vld [vmem:[%s11399_s29 + $0x24d8] sm:$0xff] }
  0xd3   : > { %1798 = vst [vmem:[%s11407_s30 + $0xc28] sm:$0xff] %v1797_v5  ;;  %1800 = vst [vmem:[%s11407_s30 + $0xc30] sm:$0xff] %v1799_v6  ;;  %v1807_v10 = vld [vmem:[%s11399_s29 + $0x24f0] sm:$0xff]  ;;  %v1809_v11 = vld [vmem:[%s11399_s29 + $0x2508] sm:$0xff] }
  0xd4   : > { %1802 = vst [vmem:[%s11407_s30 + $0xc38] sm:$0xff] %v1801_v7  ;;  %1804 = vst [vmem:[%s11407_s30 + $0xc40] sm:$0xff] %v1803_v8  ;;  %v1811_v12 = vld [vmem:[%s11399_s29 + $0x2520] sm:$0xff]  ;;  %v1813_v13 = vld [vmem:[%s11399_s29 + $0x2538] sm:$0xff] }
  0xd5   : > { %1806 = vst [vmem:[%s11407_s30 + $0xc48] sm:$0xff] %v1805_v9  ;;  %1808 = vst [vmem:[%s11407_s30 + $0xc50] sm:$0xff] %v1807_v10  ;;  %v1815_v14 = vld [vmem:[%s11399_s29 + $0x2550] sm:$0xff]  ;;  %v1817_v15 = vld [vmem:[%s11399_s29 + $0x2568] sm:$0xff] }
  0xd6   : > { %1810 = vst [vmem:[%s11407_s30 + $0xc58] sm:$0xff] %v1809_v11  ;;  %1812 = vst [vmem:[%s11407_s30 + $0xc60] sm:$0xff] %v1811_v12 }
  0xd7   : > { %1814 = vst [vmem:[%s11407_s30 + $0xc68] sm:$0xff] %v1813_v13  ;;  %1816 = vst [vmem:[%s11407_s30 + $0xc70] sm:$0xff] %v1815_v14 }
  0xd8   : > { %1818 = vst [vmem:[%s11407_s30 + $0xc78] sm:$0xff] %v1817_v15 }
  0xd9 PF: > { %p9541_p6 = scmp.ge.s32.totalorder %s11328_s19, 1  ;;  %p1840_p7 = scmp.lt.s32.totalorder %s11328_s19, 4 }
  0xdb   : > { %p1841_p8 = pnand %p9541_p6, %p1840_p7 }
  0xdd   : > { %1844 = sbr.rel (%p1841_p8) target bundleno = 1090 (0x442), region = 70 }
  0xe2   : > { %s1847_s5 = sand.u32 1, %s11312_s15   ;;  %v10692_v16 = vld [vmem:[%s13671_s0] ss:$8 sps:$4 sm:$0x33]   ;;  %vm2052_vm0 = vsmask.f32 1280 }
  0xe3   : > { %s10555_s6 = smul.u32 3200, %s1847_s5  ;;  %v10693_v17 = vld [vmem:[%s13671_s0 + $0x10] ss:$8 sps:$4 sm:$0x33]   ;;  %vm2291_vm1 = vcmask 1040384   ;;  %vm2292_vm4 = vcmask 1042434  }
  0xe4   : > { %9546 = vst.sshfl [vmem:[#allocation2] sm:$0x33 pattern:$0x76325410] %v10692_v16  ;;  %vm2053_vm2 = vsmask.f32 3336  ;;  %vm12284_vm11 = vmor %vm2291_vm1, %vm2292_vm4 }
  0xe5   : > { %s12212_s11 = scalar_lea.vmem [#allocation3], %s10555_s6  ;;  %9547 = vst.sshfl [vmem:[#allocation2 + $0x64] sm:$0x33 pattern:$0x76325410] %v10693_v17  ;;  %vm2294_vm6 = vcmask 1044484   ;;  %vm2054_vm8 = vmor %vm2052_vm0, %vm2053_vm2 }
  0xe6   : > { %v10597_v18 = vld [vmem:[%s12212_s11 + $0x74] ss:$8 sps:$4 sm:$0xff]   ;;  %v10599_v19 = vld [vmem:[%s12212_s11 + $0x70] ss:$8 sps:$4 sm:$0xff]   ;;  %v10603_v22 = vld [vmem:[%s12212_s11 + $0x64] ss:$8 sps:$4 sm:$0xff]  }
  0xe7   : > { %8577 = vmatprep.subr.bf16.mxu0 %v10597_v18  ;;  %v10600_v20 = vld [vmem:[%s12212_s11 + $0x174] ss:$8 sps:$4 sm:$0xff]   ;;  %v10602_v21 = vld [vmem:[%s12212_s11 + $0x170] ss:$8 sps:$4 sm:$0xff]   ;;  %v10605_v23 = vld [vmem:[%s12212_s11 + $0x60] ss:$8 sps:$4 sm:$0xff]  }
  0xe8   : > { %8578 = vmatpush1.bf16.msra.mxu0 %v10599_v19  ;;  %8630 = vmatprep.subr.bf16.mxu1 %v10600_v20  ;;  %v10606_v24 = vld [vmem:[%s12212_s11 + $0x164] ss:$8 sps:$4 sm:$0xff]   ;;  %v10608_v25 = vld [vmem:[%s12212_s11 + $0x160] ss:$8 sps:$4 sm:$0xff]   ;;  %v10609_v26 = vld [vmem:[%s12212_s11 + $0x54] ss:$8 sps:$4 sm:$0xff]  }
  0xe9   : > { %8631 = vmatpush1.bf16.msra.mxu1 %v10602_v21  ;;  %8579 = vmatprep.subr.bf16.mxu0 %v10603_v22  ;;  %v10611_v27 = vld [vmem:[%s12212_s11 + $0x50] ss:$8 sps:$4 sm:$0xff]   ;;  %v10612_v28 = vld [vmem:[%s12212_s11 + $0x154] ss:$8 sps:$4 sm:$0xff]   ;;  %v10615_v29 = vld [vmem:[%s12212_s11 + $0x44] ss:$8 sps:$4 sm:$0xff]  }
  0xea   : > { %8632 = vmatprep.subr.bf16.mxu1 %v10606_v24  ;;  %v10614_v30 = vld [vmem:[%s12212_s11 + $0x150] ss:$8 sps:$4 sm:$0xff]   ;;  %v10618_v31 = vld [vmem:[%s12212_s11 + $0x144] ss:$8 sps:$4 sm:$0xff]   ;;  %v10617_v32 = vld [vmem:[%s12212_s11 + $0x40] ss:$8 sps:$4 sm:$0xff]  }
  0xeb   : > { %v10621_v33 = vld [vmem:[%s12212_s11 + $0x34] ss:$8 sps:$4 sm:$0xff]   ;;  %v10620_v34 = vld [vmem:[%s12212_s11 + $0x140] ss:$8 sps:$4 sm:$0xff]   ;;  %v10623_v36 = vld [vmem:[%s12212_s11 + $0x30] ss:$8 sps:$4 sm:$0xff]  }
  0xec   : > { %8580 = vmatpush1.bf16.msra.mxu0 %v10605_v23  ;;  %v10624_v35 = vld [vmem:[%s12212_s11 + $0x134] ss:$8 sps:$4 sm:$0xff]   ;;  %v10627_v37 = vld [vmem:[%s12212_s11 + $0x24] ss:$8 sps:$4 sm:$0xff]   ;;  %v10626_v38 = vld [vmem:[%s12212_s11 + $0x130] ss:$8 sps:$4 sm:$0xff]  }
  0xed   : > { %8581 = vmatprep.subr.bf16.mxu0 %v10609_v26  ;;  %8633 = vmatpush1.bf16.msra.mxu1 %v10608_v25  ;;  %v10630_v39 = vld [vmem:[%s12212_s11 + $0x124] ss:$8 sps:$4 sm:$0xff]   ;;  %v10629_v40 = vld [vmem:[%s12212_s11 + $0x20] ss:$8 sps:$4 sm:$0xff]   ;;  %v10633_v41 = vld [vmem:[%s12212_s11 + $0x14] ss:$8 sps:$4 sm:$0xff]  }
  0xee   : > { %8634 = vmatprep.subr.bf16.mxu1 %v10612_v28  ;;  %v10632_v42 = vld [vmem:[%s12212_s11 + $0x120] ss:$8 sps:$4 sm:$0xff]   ;;  %v10636_v43 = vld [vmem:[%s12212_s11 + $0x114] ss:$8 sps:$4 sm:$0xff]   ;;  %v10635_v44 = vld [vmem:[%s12212_s11 + $0x10] ss:$8 sps:$4 sm:$0xff]  }
  0xef   : > { %v9550_v45 = vld.sshfl [vmem:[%s13671_s0] sm:$0x13 pattern:$0x76325410]  ;;  %v10639_v46 = vld [vmem:[%s12212_s11 + $0x4] ss:$8 sps:$4 sm:$0xff]   ;;  %vm12310_vm15 = vmor %vm12284_vm11, %vm2294_vm6 }
  0xf0   : > { %8582 = vmatpush1.bf16.msra.mxu0 %v10611_v27  ;;  %v10638_v47 = vld [vmem:[%s12212_s11 + $0x110] ss:$8 sps:$4 sm:$0xff]   ;;  %v10642_v48 = vld [vmem:[%s12212_s11 + $0x104] ss:$8 sps:$4 sm:$0xff]   ;;  %v10641_v49 = vld [vmem:[%s12212_s11] ss:$8 sps:$4 sm:$0xff]   ;;  %v1995_v57 = vcombine.high %v9550_v45, %v9550_v45 }
  0xf1   : > { %8583 = vmatprep.subr.bf16.mxu0 %v10615_v29  ;;  %8635 = vmatpush1.bf16.msra.mxu1 %v10614_v30  ;;  %v10645_v50 = vld [vmem:[%s12212_s11 + $0xf4] ss:$8 sps:$4 sm:$0xff]   ;;  %v2060_v51 = vshrl.u32 %v9550_v45, 16  ;;  %v2063_v52 = vshll.u32 %v9550_v45, 16  ;;  %v10644_v53 = vld [vmem:[%s12212_s11 + $0x100] ss:$8 sps:$4 sm:$0xff]  }
  0xf2   : > { %8636 = vmatprep.subr.bf16.mxu1 %v10618_v31  ;;  %v10648_v54 = vld [vmem:[%s12212_s11 + $0x1f4] ss:$8 sps:$4 sm:$0xff]   ;;  %v10647_v55 = vld [vmem:[%s12212_s11 + $0xf0] ss:$8 sps:$4 sm:$0xff]   ;;  %v10651_v56 = vld [vmem:[%s12212_s11 + $0xe4] ss:$8 sps:$4 sm:$0xff]  }
  0xf3   : > { %v2062_v58 = vrot.slane %v2060_v51, 6  ;;  %v2065_v59 = vrot.slane %v2063_v52, 7  ;;  %v10650_v60 = vld [vmem:[%s12212_s11 + $0x1f0] ss:$8 sps:$4 sm:$0xff]   ;;  %v10654_v61 = vld [vmem:[%s12212_s11 + $0x1e4] ss:$8 sps:$4 sm:$0xff]  }
  0xf4   : > { %8584 = vmatpush1.bf16.msra.mxu0 %v10617_v32  ;;  %v10653_v62 = vld [vmem:[%s12212_s11 + $0xe0] ss:$8 sps:$4 sm:$0xff]   ;;  %v10657_v63 = vld [vmem:[%s12212_s11 + $0xd4] ss:$8 sps:$4 sm:$0xff]   ;;  %v12257_v1 = vshll.u32 %v1995_v57, 16  ;;  %vm2296_vm7 = vcmask 1046534  }
  0xf5   : > { %8585 = vmatprep.subr.bf16.mxu0 %v10621_v33  ;;  %8637 = vmatpush1.bf16.msra.mxu1 %v10620_v34  ;;  %v2066_v0 = vor.u32 %v2065_v59, %v2062_v58  ;;  %v10656_v2 = vld [vmem:[%s12212_s11 + $0x1e0] ss:$8 sps:$4 sm:$0xff]   ;;  %v10660_v3 = vld [vmem:[%s12212_s11 + $0x1d4] ss:$8 sps:$4 sm:$0xff]   ;;  %vm2055_vm3 = vsmask.f32 5392  ;;  %vm12331_vm1 = vmor %vm12310_vm15, %vm2296_vm7 }
  0xf6   : > { %8638 = vmatprep.subr.bf16.mxu1 %v10624_v35  ;;  %v10659_v4 = vld [vmem:[%s12212_s11 + $0xd0] ss:$8 sps:$4 sm:$0xff]   ;;  %vm2057_vm5 = vsmask.f32 7448  ;;  %v10663_v5 = vld [vmem:[%s12212_s11 + $0xc4] ss:$8 sps:$4 sm:$0xff]   ;;  %vm2056_vm9 = vmor %vm2054_vm8, %vm2055_vm3 }
  0xf7   : > { %v2067_v6 = vrot.slane %v2066_v0, 2  ;;  %v2071_v7 = vrot.slane %v12257_v1, 7  ;;  %v10662_v8 = vld [vmem:[%s12212_s11 + $0x1d0] ss:$8 sps:$4 sm:$0xff]   ;;  %v10665_v9 = vld [vmem:[%s12212_s11 + $0xc0] ss:$8 sps:$4 sm:$0xff]   ;;  %vm12290_vm12 = vmor %vm2056_vm9, %vm2057_vm5 }
  0xf8   : > { %8586 = vmatpush1.bf16.msra.mxu0 %v10623_v36  ;;  %v10666_v10 = vld [vmem:[%s12212_s11 + $0x1c4] ss:$8 sps:$4 sm:$0xff]   ;;  %v10669_v11 = vld [vmem:[%s12212_s11 + $0xb4] ss:$8 sps:$4 sm:$0xff]   ;;  %v10668_v13 = vld [vmem:[%s12212_s11 + $0x1c0] ss:$8 sps:$4 sm:$0xff]  }
  0xf9   : > { %8587 = vmatprep.subr.bf16.mxu0 %v10627_v37  ;;  %8639 = vmatpush1.bf16.msra.mxu1 %v10626_v38  ;;  %v9551_v12 = vld.sshfl [vmem:[%s13671_s0 + $0x8] sm:$0x13 pattern:$0x76325410]  ;;  %vm2450_vm10 = vsmask.f32 256 }
  0xfa   : > { %8640 = vmatprep.subr.bf16.mxu1 %v10630_v39  ;;  %v9552_v14 = vld.sshfl [vmem:[%s13671_s0 + $0x10] sm:$0x13 pattern:$0x76325410]  ;;  %v2003_v15 = vcombine.high %v9551_v12, %v9551_v12  ;;  %v2074_v16 = vshrl.u32 %v9551_v12, 16  ;;  %v2077_v17 = vshll.u32 %v9551_v12, 16 }
  0xfb   : > { %v10672_v18 = vld [vmem:[%s12212_s11 + $0x1b4] ss:$8 sps:$4 sm:$0xff]   ;;  %v9553_v19 = vld.sshfl [vmem:[%s13671_s0 + $0x18] sm:$0x13 pattern:$0x76325410]  ;;  %v2011_v20 = vcombine.high %v9552_v14, %v9552_v14 }
  0xfc   : > { %8588 = vmatpush1.bf16.msra.mxu0 %v10629_v40  ;;  %v2088_v21 = vshrl.u32 %v9552_v14, 16  ;;  %v2091_v22 = vshll.u32 %v9552_v14, 16  ;;  %v10671_v24 = vld [vmem:[%s12212_s11 + $0xb0] ss:$8 sps:$4 sm:$0xff]   ;;  %v2019_v25 = vcombine.high %v9553_v19, %v9553_v19  ;;  %v2076_v27 = vrot.slane %v2074_v16, 6  ;;  %v12296_v30 = vld [vmem:[%s12212_s11 + $0x180] sm:$0xff] }
  0xfd   : > { %8589 = vmatprep.subr.bf16.mxu0 %v10633_v41  ;;  %8641 = vmatpush1.bf16.msra.mxu1 %v10632_v42  ;;  %v2079_v28 = vrot.slane %v2077_v17, 7  ;;  %vm2451_vm13 = vsmask.f32 2312  ;;  %v10675_v29 = vld [vmem:[%s12212_s11 + $0xa4] ss:$8 sps:$4 sm:$0xff]   ;;  %v2083_v31 = vshll.u32 %v2003_v15, 16  ;;  %v2072_v41 = vsel %vm12290_vm12, %v2067_v6, %v2071_v7 }
  0xfe   : > { %8642 = vmatprep.subr.bf16.mxu1 %v10636_v43  ;;  %v2090_v32 = vrot.slane %v2088_v21, 6  ;;  %v2093_v33 = vrot.slane %v2091_v22, 7  ;;  %v2097_v34 = vshll.u32 %v2011_v20, 16  ;;  %vm2453_vm14 = vsmask.f32 4368  ;;  %v12300_v36 = vld [vmem:[%s12212_s11 + $0x188] sm:$0xff]  ;;  %vm12349_vm2 = vmor %vm2450_vm10, %vm2451_vm13 }
  0xff   : > { %v10674_v35 = vld [vmem:[%s12212_s11 + $0x1b0] ss:$8 sps:$4 sm:$0xff]   ;;  %v2080_v37 = vor.u32 %v2079_v28, %v2076_v27  ;;  %v2102_v38 = vshrl.u32 %v9553_v19, 16  ;;  %v2105_v39 = vshll.u32 %v9553_v19, 16  ;;  %v2111_v40 = vshll.u32 %v2019_v25, 16  ;;  %vm12380_vm3 = vmor %vm12349_vm2, %vm2453_vm14  ;;  %s9542_s28 = sshll.u32 %s11320_s17, 1 }
 0x100   : > { %8590 = vmatpush1.bf16.msra.mxu0 %v10635_v44  ;;  %v2085_v42 = vrot.slane %v2083_v31, 7  ;;  %v2094_v43 = vor.u32 %v2093_v33, %v2090_v32  ;;  %v2099_v44 = vrot.slane %v2097_v34, 7  ;;  %v9562_v45 = vld.sshfl [vmem:[%s13671_s0] sm:$0x12 pattern:$0x76325410] }
 0x101   : > { %8591 = vmatprep.subr.bf16.mxu0 %v10639_v46  ;;  %8643 = vmatpush1.bf16.msra.mxu1 %v10638_v47  ;;  %v10677_v47 = vld [vmem:[%s12212_s11 + $0xa0] ss:$8 sps:$4 sm:$0xff]   ;;  %v2107_v51 = vrot.slane %v2105_v39, 7  ;;  %v2113_v52 = vrot.slane %v2111_v40, 7  ;;  %vm2455_vm0 = vsmask.f32 6424  ;;  %v2234_v57 = vcombine.high %v9562_v45, %v9562_v45 }
 0x102   : > { %8644 = vmatprep.subr.bf16.mxu1 %v10642_v48  ;;  %v10678_v48 = vld [vmem:[%s12212_s11 + $0x1a4] ss:$8 sps:$4 sm:$0xff]   ;;  %v9570_v58 = vrot.slane %v9562_v45, 9  ;;  %v10680_v59 = vld [vmem:[%s12212_s11 + $0x1a0] ss:$8 sps:$4 sm:$0xff]   ;;  %vm12391_vm4 = vmor %vm12380_vm3, %vm2455_vm0  ;;  %p1898_p9 = scmp.lt.s32.totalorder %s9542_s28, 5 }
 0x103   : > { %v2300_v6 = vrot.slane %v2234_v57, 7  ;;  %v10683_v7 = vld [vmem:[%s12212_s11 + $0x90] ss:$8 sps:$4 sm:$0xff]   ;;  %v10687_v25 = vld [vmem:[%s12212_s11 + $0x84] ss:$8 sps:$4 sm:$0xff]   ;;  %vm9343_vm5 = vcmask 1041409  }
 0x104   : > { %8592 = vmatpush1.bf16.msra.mxu0 %v10641_v49  ;;  %v2081_v49 = vrot.slane %v2080_v37, 2  ;;  %v9582_v16 = vld.sshfl [vmem:[%s13671_s0] sm:$0x32 pattern:$0x76325410]  ;;  %s13727_s28 = smov (!%p1898_p9, %s9542_s28), 5 }
 0x105   : > { %8593 = vmatprep.subr.bf16.mxu0 %v10645_v50  ;;  %8645 = vmatpush1.bf16.msra.mxu1 %v10644_v53  ;;  %v2104_v50 = vrot.slane %v2102_v38, 6  ;;  %v10681_v53 = vld [vmem:[%s12212_s11 + $0x94] ss:$8 sps:$4 sm:$0xff]   ;;  %v10686_v19 = vld [vmem:[%s12212_s11 + $0x190] ss:$8 sps:$4 sm:$0xff]   ;;  %v2458_v38 = vshrl.u32 %v9582_v16, 16  ;;  %s1900_s12 = scalar_lea.vmem %s13673_s2, %s13727_s28 }
 0x106   : > { %8646 = vmatprep.subr.bf16.mxu1 %v10648_v54  ;;  %v2095_v54 = vrot.slane %v2094_v43, 2  ;;  %v9583_v23 = vld.sshfl [vmem:[%s13671_s0 + $0x8] sm:$0x32 pattern:$0x76325410]  ;;  %p1908_p11 = scmp.lt.s32.totalorder %s11320_s17, 2 }
 0x107   : > { %v9584_v31 = vld.sshfl [vmem:[%s13671_s0 + $0x10] sm:$0x32 pattern:$0x76325410]  ;;  %v2401_v32 = vcombine.high %v9583_v23, %v9583_v23  ;;  %v2471_v45 = vshrl.u32 %v9583_v23, 16  ;;  %vm9418_vm6 = vcmask 74752  }
 0x108   : > { %8594 = vmatpush2.bf16.msra.mxu0 %v10647_v55  ;;  %v10164_v55 = vcombine.low %v12296_v30, %v12300_v36  ;;  %v9585_v34 = vld.sshfl [vmem:[%s13671_s0 + $0x18] sm:$0x32 pattern:$0x76325410]  ;;  %v10699_v46 = vld [vmem:[%s12212_s11 + $0x274] ss:$8 sps:$4 sm:$0xff]  }
 0x109   : > { %8595 = vmatprep.subr.bf16.mxu0 %v10651_v56  ;;  %8647 = vmatpush2.bf16.msra.mxu1 %v10650_v60  ;;  %v9563_v56 = vld.sshfl [vmem:[%s13671_s0 + $0x8] sm:$0x12 pattern:$0x76325410]  ;;  %v2086_v60 = vsel %vm12290_vm12, %v2081_v49, %v2085_v42  ;;  %v10689_v40 = vld [vmem:[%s12212_s11 + $0x80] ss:$8 sps:$4 sm:$0xff]   ;;  %v2417_v43 = vcombine.high %v9585_v34, %v9585_v34 }
 0x10a   : > { %8648 = vmatprep.subr.bf16.mxu1 %v10654_v61  ;;  %v2108_v61 = vor.u32 %v2107_v51, %v2104_v50  ;;  %v9571_v1 = vrot.slane %v9563_v56, 9  ;;  %v2476_v49 = vshrl.u32 %v2401_v32, 16  ;;  %v2479_v50 = vshll.u32 %v2401_v32, 16  ;;  %v10712_v17 = vld [vmem:[%s12212_s11 + $0x250] ss:$8 sps:$4 sm:$0xff]  }
 0x10b   : > { %v10715_v32 = vld [vmem:[%s12212_s11 + $0x350] ss:$8 sps:$4 sm:$0xff]   ;;  %v10738_v37 = vld [vmem:[%s12212_s11 + $0x214] ss:$8 sps:$4 sm:$0xff]  }
 0x10c   : > { %8596 = vmatpush2.bf16.msra.mxu0 %v10653_v62  ;;  %v9564_v62 = vld.sshfl [vmem:[%s13671_s0 + $0x10] sm:$0x12 pattern:$0x76325410] }
 0x10d   : > { %8597 = vmatprep.subr.bf16.mxu0 %v10657_v63  ;;  %8649 = vmatpush2.bf16.msra.mxu1 %v10656_v2  ;;  %v2242_v63 = vcombine.high %v9563_v56, %v9563_v56  ;;  %v2100_v2 = vsel %vm12290_vm12, %v2095_v54, %v2099_v44  ;;  %v9572_v12 = vrot.slane %v9564_v62, 9 }
 0x10e   : > { %8650 = vmatprep.subr.bf16.mxu1 %v10660_v3  ;;  %v2171_v3 = vcombine.low %v2072_v41, %v2086_v60  ;;  %v10690_v41 = vld [vmem:[%s12212_s11 + $0x184] ss:$8 sps:$4 sm:$0xff]  }
 0x110   : > { %8598 = vmatpush2.bf16.msra.mxu0 %v10659_v4  ;;  %v9565_v4 = vld.sshfl [vmem:[%s13671_s0 + $0x18] sm:$0x12 pattern:$0x76325410] }
 0x111   : > { %8599 = vmatprep.subr.bf16.mxu0 %v10663_v5  ;;  %8651 = vmatpush2.bf16.msra.mxu1 %v10662_v8  ;;  %v2250_v5 = vcombine.high %v9564_v62, %v9564_v62  ;;  %v10684_v8 = vld [vmem:[%s12212_s11 + $0x194] ss:$8 sps:$4 sm:$0xff]   ;;  %9558 = vst.sshfl [vmem:[#allocation2 + $0x4] sm:$0x33 pattern:$0x76325410] %v2171_v3 }
 0x112   : > { %8652 = vmatprep.subr.bf16.mxu1 %v10666_v10  ;;  %v2258_v10 = vcombine.high %v9565_v4, %v9565_v4  ;;  %v9573_v15 = vrot.slane %v9565_v4, 9 }
 0x113   : > { %v2308_v14 = vrot.slane %v2250_v5, 7 }
 0x114   : > { %8600 = vmatpush2.bf16.msra.mxu0 %v10665_v9  ;;  %v2109_v9 = vrot.slane %v2108_v61, 2  ;;  %v2312_v22 = vrot.slane %v2258_v10, 7 }
 0x115   : > { %8601 = vmatprep.subr.bf16.mxu0 %v10669_v11  ;;  %8653 = vmatpush2.bf16.msra.mxu1 %v10668_v13  ;;  %v2304_v11 = vrot.slane %v2242_v63, 7  ;;  %v2301_v13 = vsel %vm12331_vm1, %v9570_v58, %v2300_v6  ;;  %v2309_v28 = vsel %vm12331_vm1, %v9572_v12, %v2308_v14  ;;  %v2478_v58 = vrot.slane %v2476_v49, 7  ;;  %v10733_v49 = vld [vmem:[%s12212_s11 + $0x320] ss:$8 sps:$4 sm:$0xff]  }
 0x116   : > { %8654 = vmatprep.subr.bf16.mxu1 %v10672_v18  ;;  %v2970_v18 = vcombine.low %v2086_v60, %v2100_v2  ;;  %v12356_v20 = vsel %vm12290_vm12, %v2109_v9, %v2113_v52  ;;  %v12372_v33 = vsel %vm12331_vm1, %v9573_v15, %v2312_v22  ;;  %v9591_v52 = vrot.slane %v2471_v45, 9  ;;  %v10694_v9 = vld [vmem:[#allocation2] ss:$100 sps:$4 sm:$0xff]   ;;  %v10708_v15 = vld [vmem:[%s12212_s11 + $0x264] ss:$8 sps:$4 sm:$0xff]  }
 0x117   : > { %v2305_v21 = vsel %vm12331_vm1, %v9571_v1, %v2304_v11  ;;  %v2179_v27 = vcombine.low %v2100_v2, %v12356_v20  ;;  %v2338_v42 = vcombine.low %v2309_v28, %v12372_v33  ;;  %v2502_v60 = vshrl.u32 %v2417_v43, 16  ;;  %v10705_v1 = vld [vmem:[%s12212_s11 + $0x374] ss:$8 sps:$4 sm:$0xff]   ;;  %v10718_v22 = vld [vmem:[%s12212_s11 + $0x240] ss:$8 sps:$4 sm:$0xff]  }
 0x118   : > { %8602 = vmatpush2.bf16.msra.mxu0 %v10671_v24  ;;  %v2393_v24 = vcombine.high %v9582_v16, %v9582_v16  ;;  %9646 = vst.sshfl [vmem:[#allocation2 + $0x18] sm:$0x33 pattern:$0x76325410] %v2970_v18  ;;  %v2505_v63 = vshll.u32 %v2417_v43, 16  ;;  %v3122_v2 = vcombine.low %v2305_v21, %v2309_v28  ;;  %v2481_v4 = vor.u32 %v2479_v50, %v2478_v58 }
 0x119   : > { %8603 = vmatprep.subr.bf16.mxu0 %v10675_v29  ;;  %8655 = vmatpush2.bf16.msra.mxu1 %v10674_v35  ;;  %v2330_v29 = vcombine.low %v2301_v13, %v2305_v21  ;;  %v2409_v35 = vcombine.high %v9584_v31, %v9584_v31  ;;  %9559 = vst.sshfl [vmem:[#allocation2 + $0x68] sm:$0x33 pattern:$0x76325410] %v2179_v27  ;;  %v2504_v6 = vrot.slane %v2502_v60, 7 }
 0x11a   : > { %8656 = vmatprep.subr.bf16.mxu1 %v10678_v48  ;;  %v2463_v39 = vshrl.u32 %v2393_v24, 16  ;;  %v2466_v44 = vshll.u32 %v2393_v24, 16  ;;  %9579 = vst.sshfl [vmem:[#allocation2 + $0x6c] sm:$0x33 pattern:$0x76325410] %v2338_v42  ;;  %v2482_v11 = vsel %vm12391_vm4, %v9591_v52, %v2481_v4 }
 0x11b   : > { %9578 = vst.sshfl [vmem:[#allocation2 + $0x8] sm:$0x33 pattern:$0x76325410] %v2330_v29  ;;  %v2489_v54 = vshrl.u32 %v2409_v35, 16  ;;  %v2492_v56 = vshll.u32 %v2409_v35, 16  ;;  %v2507_v12 = vor.u32 %v2505_v63, %v2504_v6 }
 0x11c   : > { %8604 = vmatpush2.bf16.msra.mxu0 %v10677_v47  ;;  %v9590_v47 = vrot.slane %v2458_v38, 9  ;;  %v2465_v48 = vrot.slane %v2463_v39, 7  ;;  %9674 = vst.sshfl [vmem:[#allocation2 + $0x1c] sm:$0x33 pattern:$0x76325410] %v3122_v2 }
 0x11d   : > { %8605 = vmatprep.subr.bf16.mxu0 %v10681_v53  ;;  %8657 = vmatpush2.bf16.msra.mxu1 %v10680_v59  ;;  %v2484_v53 = vshrl.u32 %v9584_v31, 16  ;;  %v2497_v59 = vshrl.u32 %v9585_v34, 16  ;;  %v2491_v62 = vrot.slane %v2489_v54, 7  ;;  %v10714_v16 = vld [vmem:[%s12212_s11 + $0x254] ss:$8 sps:$4 sm:$0xff]  }
 0x11e   : > { %8658 = vmatprep.subr.bf16.mxu1 %v10684_v8  ;;  %v2468_v57 = vor.u32 %v2466_v44, %v2465_v48  ;;  %v10720_v18 = vld [vmem:[%s12212_s11 + $0x244] ss:$8 sps:$4 sm:$0xff]   ;;  %v10709_v27 = vld [vmem:[%s12212_s11 + $0x360] ss:$8 sps:$4 sm:$0xff]   ;;  %v10717_v28 = vld [vmem:[%s12212_s11 + $0x354] ss:$8 sps:$4 sm:$0xff]  }
 0x11f   : > { %v9592_v61 = vrot.slane %v2484_v53, 9  ;;  %v9593_v5 = vrot.slane %v2497_v59, 9  ;;  %v2494_v8 = vor.u32 %v2492_v56, %v2491_v62  ;;  %v10711_v21 = vld [vmem:[%s12212_s11 + $0x364] ss:$8 sps:$4 sm:$0xff]   ;;  %v10724_v29 = vld [vmem:[%s12212_s11 + $0x230] ss:$8 sps:$4 sm:$0xff]  }
 0x120   : > { %8606 = vmatpush2.bf16.msra.mxu0 %v10683_v7  ;;  %v2469_v3 = vsel %vm12391_vm4, %v9590_v47, %v2468_v57  ;;  %v10697_v7 = vld [vmem:[%s12212_s11 + $0x270] ss:$8 sps:$4 sm:$0xff]   ;;  %v10732_v31 = vld [vmem:[%s12212_s11 + $0x224] ss:$8 sps:$4 sm:$0xff]   ;;  %v10730_v35 = vld [vmem:[%s12212_s11 + $0x220] ss:$8 sps:$4 sm:$0xff]  }
 0x121   : > { %8607 = vmatprep.subr.bf16.mxu0 %v10687_v25  ;;  %8659 = vmatpush2.bf16.msra.mxu1 %v10686_v19  ;;  %v10696_v10 = vld [vmem:[#allocation2 + $0x4] ss:$100 sps:$4 sm:$0xff]   ;;  %v2495_v13 = vsel %vm12391_vm4, %v9592_v61, %v2494_v8  ;;  %v2561_v14 = vcombine.low %v2469_v3, %v2482_v11  ;;  %v2508_v30 = vsel %vm12391_vm4, %v9593_v5, %v2507_v12  ;;  %v10723_v34 = vld [vmem:[%s12212_s11 + $0x344] ss:$8 sps:$4 sm:$0xff]   ;;  %v10721_v38 = vld [vmem:[%s12212_s11 + $0x340] ss:$8 sps:$4 sm:$0xff]  }
 0x122   : > { %8660 = vmatprep.subr.bf16.mxu1 %v10690_v41  ;;  %8609 = vmatprep.mubr.bf16.mxu0 %v10696_v10  ;;  %v2569_v36 = vcombine.low %v2495_v13, %v2508_v30  ;;  %v10703_v19 = vld [vmem:[%s12212_s11 + $0x370] ss:$8 sps:$4 sm:$0xff]   ;;  %v10726_v25 = vld [vmem:[%s12212_s11 + $0x234] ss:$8 sps:$4 sm:$0xff]   ;;  %v10744_v41 = vld [vmem:[%s12212_s11 + $0x204] ss:$8 sps:$4 sm:$0xff]  }
 0x123   : > { %9598 = vst.sshfl [vmem:[#allocation2 + $0xc] sm:$0x33 pattern:$0x76325410] %v2561_v14  ;;  %v10700_v23 = vld [vmem:[#allocation2 + $0x8] ss:$100 sps:$4 sm:$0xff]  }
 0x124   : > { %8608 = vmatpush2.bf16.msra.mxu0 %v10689_v40  ;;  %9599 = vst.sshfl [vmem:[#allocation2 + $0x70] sm:$0x33 pattern:$0x76325410] %v2569_v36  ;;  %v10729_v39 = vld [vmem:[%s12212_s11 + $0x334] ss:$8 sps:$4 sm:$0xff]  }
 0x125   : > { %8683 = vmatprep.subr.bf16.mxu0 %v10699_v46  ;;  %8661 = vmatpush2.bf16.msra.mxu1 %v10164_v55  ;;  %v10706_v55 = vld [vmem:[%s12212_s11 + $0x260] ss:$8 sps:$4 sm:$0xff]   ;;  %v10736_v40 = vld [vmem:[%s12212_s11 + $0x210] ss:$8 sps:$4 sm:$0xff]   ;;  %v10735_v44 = vld [vmem:[%s12212_s11 + $0x324] ss:$8 sps:$4 sm:$0xff]  }
 0x126   : > { %8736 = vmatprep.subr.bf16.mxu1 %v10705_v1  ;;  %v10727_v42 = vld [vmem:[%s12212_s11 + $0x330] ss:$8 sps:$4 sm:$0xff]   ;;  %v10742_v43 = vld [vmem:[%s12212_s11 + $0x200] ss:$8 sps:$4 sm:$0xff]   ;;  %v10750_v45 = vld [vmem:[%s12212_s11 + $0x2f4] ss:$8 sps:$4 sm:$0xff]  }
 0x127   : > { %8610 = vmatmul.mubr.bf16.vlgmr.msra.gmra.mxu0 %v10694_v9  ;;  %v10775_v46 = vld [vmem:[%s13671_s0 + $0x40] ss:$8 sps:$4 sm:$0x33]   ;;  %v10776_v47 = vld [vmem:[%s13671_s0 + $0x50] ss:$8 sps:$4 sm:$0x33]  }
 0x128   : > { %8684 = vmatpush1.bf16.msra.mxu0 %v10697_v7  ;;  %v9554_v48 = vld.sshfl [vmem:[%s13671_s0 + $0x40] sm:$0x13 pattern:$0x76325410]  ;;  %v10741_v57 = vld [vmem:[%s12212_s11 + $0x314] ss:$8 sps:$4 sm:$0xff]  }
 0x129   : > { %8685 = vmatprep.subr.bf16.mxu0 %v10708_v15  ;;  %v10748_v50 = vld [vmem:[%s12212_s11 + $0x2f0] ss:$8 sps:$4 sm:$0xff]   ;;  %9548 = vst.sshfl [vmem:[#allocation2 + $0xc8] sm:$0x33 pattern:$0x76325410] %v10775_v46  ;;  %v2027_v53 = vcombine.high %v9554_v48, %v9554_v48 }
 0x12a   : > { %9549 = vst.sshfl [vmem:[#allocation2 + $0x12c] sm:$0x33 pattern:$0x76325410] %v10776_v47  ;;  %v2116_v54 = vshrl.u32 %v9554_v48, 16  ;;  %v2119_v56 = vshll.u32 %v9554_v48, 16 }
 0x12b   : > { %v10702_v24 = vld [vmem:[#allocation2 + $0xc] ss:$100 sps:$4 sm:$0xff]   ;;  %v9555_v52 = vld.sshfl [vmem:[%s13671_s0 + $0x48] sm:$0x13 pattern:$0x76325410] }
 0x12c   : > { %8686 = vmatpush1.bf16.msra.mxu0 %v10706_v55  ;;  %8662 = vmatprep.mubr.bf16.mxu1 %v10702_v24  ;;  %v9556_v58 = vld.sshfl [vmem:[%s13671_s0 + $0x50] sm:$0x13 pattern:$0x76325410]  ;;  %v2035_v59 = vcombine.high %v9555_v52, %v9555_v52  ;;  %v2130_v60 = vshrl.u32 %v9555_v52, 16  ;;  %v2133_v61 = vshll.u32 %v9555_v52, 16 }
 0x12d   : > { %8687 = vmatprep.subr.bf16.mxu0 %v10714_v16  ;;  %8663 = vmatmul.mubr.bf16.vlgmr.msra.gmra.mxu1 %v10700_v23  ;;  %v9557_v62 = vld.sshfl [vmem:[%s13671_s0 + $0x58] sm:$0x13 pattern:$0x76325410]  ;;  %v2043_v63 = vcombine.high %v9556_v58, %v9556_v58  ;;  %v2118_v1 = vrot.slane %v2116_v54, 6  ;;  %v2121_v2 = vrot.slane %v2119_v56, 7 }
 0x12e   : > { %8737 = vmatpush1.bf16.msra.mxu1 %v10703_v19  ;;  %v10756_v3 = vld [vmem:[%s12212_s11 + $0x2e4] ss:$8 sps:$4 sm:$0xff]   ;;  %v2051_v4 = vcombine.high %v9557_v62, %v9557_v62  ;;  %v2125_v5 = vshll.u32 %v2027_v53, 16  ;;  %v2132_v6 = vrot.slane %v2130_v60, 6  ;;  %v2135_v7 = vrot.slane %v2133_v61, 7 }
 0x12f   : > { %8738 = vmatprep.subr.bf16.mxu1 %v10711_v21  ;;  %v10739_v8 = vld [vmem:[%s12212_s11 + $0x310] ss:$8 sps:$4 sm:$0xff]   ;;  %v2122_v9 = vor.u32 %v2121_v2, %v2118_v1  ;;  %v2139_v10 = vshll.u32 %v2035_v59, 16  ;;  %v2144_v11 = vshrl.u32 %v9556_v58, 16  ;;  %v2147_v12 = vshll.u32 %v9556_v58, 16 }
 0x130   : > { %8688 = vmatpush1.bf16.msra.mxu0 %v10712_v17  ;;  %v10747_v13 = vld [vmem:[%s12212_s11 + $0x304] ss:$8 sps:$4 sm:$0xff]   ;;  %v10754_v14 = vld [vmem:[%s12212_s11 + $0x2e0] ss:$8 sps:$4 sm:$0xff]   ;;  %v2127_v15 = vrot.slane %v2125_v5, 7  ;;  %v2136_v30 = vor.u32 %v2135_v7, %v2132_v6  ;;  %v2153_v36 = vshll.u32 %v2043_v63, 16 }
 0x131   : > { %8689 = vmatprep.subr.bf16.mxu0 %v10720_v18  ;;  %v2158_v55 = vshrl.u32 %v9557_v62, 16  ;;  %v10762_v16 = vld [vmem:[%s12212_s11 + $0x2d4] ss:$8 sps:$4 sm:$0xff]   ;;  %v2123_v17 = vrot.slane %v2122_v9, 2  ;;  %v2141_v18 = vrot.slane %v2139_v10, 7  ;;  %v2146_v19 = vrot.slane %v2144_v11, 6 }
 0x132   : > { %8739 = vmatpush1.bf16.msra.mxu1 %v10709_v27  ;;  %v2149_v21 = vrot.slane %v2147_v12, 7  ;;  %v2155_v23 = vrot.slane %v2153_v36, 7  ;;  %v10745_v27 = vld [vmem:[%s12212_s11 + $0x300] ss:$8 sps:$4 sm:$0xff]   ;;  %v10751_v54 = vld [vmem:[%s12212_s11 + $0x3f0] ss:$8 sps:$4 sm:$0xff]  }
 0x133   : > { %8740 = vmatprep.subr.bf16.mxu1 %v10717_v28  ;;  %v2160_v24 = vrot.slane %v2158_v55, 6  ;;  %v10760_v28 = vld [vmem:[%s12212_s11 + $0x2d0] ss:$8 sps:$4 sm:$0xff]   ;;  %v10766_v56 = vld [vmem:[%s12212_s11 + $0x2c0] ss:$8 sps:$4 sm:$0xff]  }
 0x134   : > { %8690 = vmatpush1.bf16.msra.mxu0 %v10718_v22  ;;  %v2137_v22 = vrot.slane %v2136_v30, 2  ;;  %v9568_v46 = vld.sshfl [vmem:[%s13671_s0 + $0x50] sm:$0x12 pattern:$0x76325410] }
 0x135   : > { %8691 = vmatprep.subr.bf16.mxu0 %v10726_v25  ;;  %v2161_v25 = vshll.u32 %v9557_v62, 16  ;;  %v9576_v60 = vrot.slane %v9568_v46, 9  ;;  %v9586_v61 = vld.sshfl [vmem:[%s13671_s0 + $0x40] sm:$0x32 pattern:$0x76325410] }
 0x136   : > { %8741 = vmatpush1.bf16.msra.mxu1 %v10715_v32  ;;  %v2167_v32 = vshll.u32 %v2051_v4, 16  ;;  %v10759_v62 = vld [vmem:[%s12212_s11 + $0x3e4] ss:$8 sps:$4 sm:$0xff]   ;;  %v10774_v63 = vld [vmem:[%s12212_s11 + $0x2b4] ss:$8 sps:$4 sm:$0xff]   ;;  %v2510_v9 = vshrl.u32 %v9586_v61, 16 }
 0x137   : > { %8742 = vmatprep.subr.bf16.mxu1 %v10723_v34  ;;  %v9566_v34 = vld.sshfl [vmem:[%s13671_s0 + $0x40] sm:$0x12 pattern:$0x76325410] }
 0x138   : > { %8692 = vmatpush1.bf16.msra.mxu0 %v10724_v29  ;;  %v2128_v29 = vsel %vm12290_vm12, %v2123_v17, %v2127_v15  ;;  %v9587_v7 = vld.sshfl [vmem:[%s13671_s0 + $0x48] sm:$0x32 pattern:$0x76325410]  ;;  %v10757_v15 = vld [vmem:[%s12212_s11 + $0x3e0] ss:$8 sps:$4 sm:$0xff]  }
 0x139   : > { %8693 = vmatprep.subr.bf16.mxu0 %v10732_v31  ;;  %v2150_v31 = vor.u32 %v2149_v21, %v2146_v19  ;;  %v9589_v55 = vld.sshfl [vmem:[%s13671_s0 + $0x58] sm:$0x32 pattern:$0x76325410]  ;;  %v10772_v19 = vld [vmem:[%s12212_s11 + $0x2b0] ss:$8 sps:$4 sm:$0xff]  }
 0x13a   : > { %8743 = vmatpush1.bf16.msra.mxu1 %v10721_v38  ;;  %v12470_v38 = vsel %vm12290_vm12, %v2137_v22, %v2141_v18  ;;  %v10765_v18 = vld [vmem:[%s12212_s11 + $0x3d4] ss:$8 sps:$4 sm:$0xff]   ;;  %v2449_v22 = vcombine.high %v9589_v55, %v9589_v55 }
 0x13b   : > { %8744 = vmatprep.subr.bf16.mxu1 %v10729_v39  ;;  %v2163_v39 = vrot.slane %v2161_v25, 7 }
 0x13c   : > { %8694 = vmatpush1.bf16.msra.mxu0 %v10730_v35  ;;  %v10753_v35 = vld [vmem:[%s12212_s11 + $0x3f4] ss:$8 sps:$4 sm:$0xff]  }
 0x13d   : > { %8695 = vmatprep.subr.bf16.mxu0 %v10738_v37  ;;  %v10768_v37 = vld [vmem:[%s12212_s11 + $0x2c4] ss:$8 sps:$4 sm:$0xff]   ;;  %v2164_v48 = vor.u32 %v2163_v39, %v2160_v24 }
 0x13e   : > { %8745 = vmatpush1.bf16.msra.mxu1 %v10727_v42  ;;  %v9574_v42 = vrot.slane %v9566_v34, 9 }
 0x13f   : > { %8746 = vmatprep.subr.bf16.mxu1 %v10735_v44  ;;  %v2169_v44 = vrot.slane %v2167_v32, 7  ;;  %v2165_v1 = vrot.slane %v2164_v48, 2 }
 0x140   : > { %8696 = vmatpush1.bf16.msra.mxu0 %v10736_v40  ;;  %v9567_v40 = vld.sshfl [vmem:[%s13671_s0 + $0x48] sm:$0x12 pattern:$0x76325410] }
 0x141   : > { %8697 = vmatprep.subr.bf16.mxu0 %v10744_v41  ;;  %v2266_v41 = vcombine.high %v9566_v34, %v9566_v34  ;;  %v2274_v47 = vcombine.high %v9567_v40, %v9567_v40  ;;  %v9575_v53 = vrot.slane %v9567_v40, 9  ;;  %v12504_v10 = vsel %vm12290_vm12, %v2165_v1, %v2169_v44  ;;  %v10781_v1 = vld [vmem:[%s12212_s11 + $0x3b4] ss:$8 sps:$4 sm:$0xff]  }
 0x142   : > { %8747 = vmatpush1.bf16.msra.mxu1 %v10733_v49  ;;  %v9569_v49 = vld.sshfl [vmem:[%s13671_s0 + $0x58] sm:$0x12 pattern:$0x76325410]  ;;  %v2549_v40 = vshrl.u32 %v9589_v55, 16 }
 0x143   : > { %8748 = vmatprep.subr.bf16.mxu1 %v10741_v57  ;;  %v2316_v52 = vrot.slane %v2266_v41, 7  ;;  %v2290_v58 = vcombine.high %v9569_v49, %v9569_v49  ;;  %v2320_v59 = vrot.slane %v2274_v47, 7  ;;  %v9577_v4 = vrot.slane %v9569_v49, 9  ;;  %v10804_v55 = vld [vmem:[%s13671_s0 + $0x8] ss:$8 sps:$4 sm:$0x33]  }
 0x144   : > { %8698 = vmatpush1.bf16.msra.mxu0 %v10742_v43  ;;  %v2151_v43 = vrot.slane %v2150_v31, 2  ;;  %v10787_v31 = vld [vmem:[%s12212_s11 + $0x2a4] ss:$8 sps:$4 sm:$0xff]   ;;  %v2554_v41 = vshrl.u32 %v2449_v22, 16  ;;  %v9597_v49 = vrot.slane %v2549_v40, 9 }
 0x145   : > { %8699 = vmatprep.subr.bf16.mxu0 %v10750_v45  ;;  %v2187_v45 = vcombine.low %v2128_v29, %v12470_v38  ;;  %v2317_v2 = vsel %vm12331_vm1, %v9574_v42, %v2316_v52  ;;  %v12497_v5 = vsel %vm12331_vm1, %v9575_v53, %v2320_v59  ;;  %v2328_v6 = vrot.slane %v2290_v58, 7  ;;  %v10785_v52 = vld [vmem:[%s12212_s11 + $0x2a0] ss:$8 sps:$4 sm:$0xff]   ;;  %v10794_v59 = vld [vmem:[%s12212_s11 + $0x294] ss:$8 sps:$4 sm:$0xff]  }
 0x146   : > { %8749 = vmatpush1.bf16.msra.mxu1 %v10739_v8  ;;  %v12486_v57 = vsel %vm12290_vm12, %v2151_v43, %v2155_v23  ;;  %v2425_v8 = vcombine.high %v9586_v61, %v9586_v61  ;;  %v2346_v12 = vcombine.low %v2317_v2, %v12497_v5  ;;  %v9594_v23 = vrot.slane %v2510_v9, 9  ;;  %v10763_v43 = vld [vmem:[%s12212_s11 + $0x3d0] ss:$8 sps:$4 sm:$0xff]  }
 0x147   : > { %8750 = vmatprep.subr.bf16.mxu1 %v10747_v13  ;;  %9560 = vst.sshfl [vmem:[#allocation2 + $0xcc] sm:$0x33 pattern:$0x76325410] %v2187_v45  ;;  %v2195_v30 = vcombine.low %v12486_v57, %v12504_v10  ;;  %v12517_v36 = vsel %vm12331_vm1, %v9577_v4, %v2328_v6  ;;  %v2557_v42 = vshll.u32 %v2449_v22, 16  ;;  %v2986_v47 = vcombine.low %v12470_v38, %v12486_v57 }
 0x148   : > { %8700 = vmatpush2.bf16.msra.mxu0 %v10748_v50  ;;  %v2282_v50 = vcombine.high %v9568_v46, %v9568_v46  ;;  %v9588_v13 = vld.sshfl [vmem:[%s13671_s0 + $0x50] sm:$0x32 pattern:$0x76325410]  ;;  %v2515_v24 = vshrl.u32 %v2425_v8, 16  ;;  %v2518_v25 = vshll.u32 %v2425_v8, 16 }
 0x149   : > { %8701 = vmatprep.subr.bf16.mxu0 %v10756_v3  ;;  %v2441_v17 = vcombine.high %v9588_v13, %v9588_v13  ;;  %9580 = vst.sshfl [vmem:[#allocation2 + $0xd0] sm:$0x33 pattern:$0x76325410] %v2346_v12  ;;  %v2536_v34 = vshrl.u32 %v9588_v13, 16 }
 0x14a   : > { %v2324_v3 = vrot.slane %v2282_v50, 7  ;;  %8751 = vmatpush1.bf16.msra.mxu1 %v10745_v27  ;;  %9561 = vst.sshfl [vmem:[#allocation2 + $0x130] sm:$0x33 pattern:$0x76325410] %v2195_v30  ;;  %v2517_v32 = vrot.slane %v2515_v24, 7 }
 0x14b   : > { %8752 = vmatprep.subr.bf16.mxu1 %v10753_v35  ;;  %v2541_v35 = vshrl.u32 %v2441_v17, 16  ;;  %v9596_v45 = vrot.slane %v2536_v34, 9  ;;  %v2556_v50 = vrot.slane %v2554_v41, 7  ;;  %v10769_v38 = vld [vmem:[%s12212_s11 + $0x3c0] ss:$8 sps:$4 sm:$0xff]  }
 0x14c   : > { %8702 = vmatpush2.bf16.msra.mxu0 %v10754_v14  ;;  %v2325_v11 = vsel %vm12331_vm1, %v9576_v60, %v2324_v3  ;;  %v2523_v14 = vshrl.u32 %v9587_v7, 16  ;;  %v2520_v44 = vor.u32 %v2518_v25, %v2517_v32  ;;  %9648 = vst.sshfl [vmem:[#allocation2 + $0xe0] sm:$0x33 pattern:$0x76325410] %v2986_v47 }
 0x14d   : > { %8703 = vmatprep.subr.bf16.mxu0 %v10762_v16  ;;  %v2433_v16 = vcombine.high %v9587_v7, %v9587_v7  ;;  %v2354_v21 = vcombine.low %v2325_v11, %v12517_v36  ;;  %v2543_v46 = vrot.slane %v2541_v35, 7  ;;  %v3138_v53 = vcombine.low %v12497_v5, %v2325_v11  ;;  %v10792_v61 = vld [vmem:[%s12212_s11 + $0x290] ss:$8 sps:$4 sm:$0xff]   ;;  %v10800_v5 = vld [vmem:[%s12212_s11 + $0x284] ss:$8 sps:$4 sm:$0xff]  }
 0x14e   : > { %8753 = vmatpush2.bf16.msra.mxu1 %v10751_v54  ;;  %v9595_v27 = vrot.slane %v2523_v14, 9  ;;  %v10771_v54 = vld [vmem:[%s12212_s11 + $0x3c4] ss:$8 sps:$4 sm:$0xff]   ;;  %v2559_v60 = vor.u32 %v2557_v42, %v2556_v50  ;;  %v10782_v2 = vld [vmem:[#allocation2 + $0xc8] ss:$100 sps:$4 sm:$0xff]  }
 0x14f   : > { %v2531_v29 = vshll.u32 %v2433_v16, 16  ;;  %8754 = vmatprep.subr.bf16.mxu1 %v10759_v62  ;;  %9581 = vst.sshfl [vmem:[#allocation2 + $0x134] sm:$0x33 pattern:$0x76325410] %v2354_v21 }
 0x150   : > { %8704 = vmatpush2.bf16.msra.mxu0 %v10760_v28  ;;  %v2528_v28 = vshrl.u32 %v2433_v16, 16  ;;  %v9602_v62 = vld.sshfl [vmem:[%s13671_s0] sm:$0x30 pattern:$0x76325410]  ;;  %v2560_v6 = vsel %vm12391_vm4, %v9597_v49, %v2559_v60 }
 0x151   : > { %8705 = vmatprep.subr.bf16.mxu0 %v10768_v37  ;;  %v2544_v37 = vshll.u32 %v2441_v17, 16  ;;  %9676 = vst.sshfl [vmem:[#allocation2 + $0xe4] sm:$0x33 pattern:$0x76325410] %v3138_v53 }
 0x152   : > { %v2530_v39 = vrot.slane %v2528_v28, 7  ;;  %8755 = vmatpush2.bf16.msra.mxu1 %v10757_v15  ;;  %v9603_v7 = vld.sshfl [vmem:[%s13671_s0 + $0x8] sm:$0x30 pattern:$0x76325410] }
 0x153   : > { %8756 = vmatprep.subr.bf16.mxu1 %v10765_v18  ;;  %v2546_v58 = vor.u32 %v2544_v37, %v2543_v46  ;;  %v9604_v9 = vld.sshfl [vmem:[%s13671_s0 + $0x10] sm:$0x30 pattern:$0x76325410]  ;;  %v9610_v11 = vcombine.high %v9602_v62, %v9603_v7  ;;  %v10779_v12 = vld [vmem:[%s12212_s11 + $0x3b0] ss:$8 sps:$4 sm:$0xff]  }
 0x154   : > { %8706 = vmatpush2.bf16.msra.mxu0 %v10766_v56  ;;  %v2533_v48 = vor.u32 %v2531_v29, %v2530_v39  ;;  %v2521_v56 = vsel %vm12391_vm4, %v9594_v23, %v2520_v44  ;;  %v12558_v13 = vld.sshfl [vmem:[%s13671_s0 + $0x18] sm:$0x30 pattern:$0x76325410]  ;;  %v9722_v14 = vcombine.high %v9603_v7, %v9604_v9  ;;  %v10791_v15 = vld [vmem:[%s12212_s11 + $0x3a4] ss:$8 sps:$4 sm:$0xff]  }
 0x155   : > { %8707 = vmatprep.subr.bf16.mxu0 %v10774_v63  ;;  %v10777_v63 = vld [vmem:[#allocation2 + $0xcc] ss:$100 sps:$4 sm:$0xff]   ;;  %v2547_v3 = vsel %vm12391_vm4, %v9596_v45, %v2546_v58  ;;  %v9611_v30 = vcombine.high %v9604_v9, %v12558_v13  ;;  %9614 = vst.sshfl [vmem:[#allocation2 + $0x10] sm:$0x33 pattern:$0x76325410] %v9610_v11 }
 0x156   : > { %v2534_v57 = vsel %vm12391_vm4, %v9595_v27, %v2533_v48  ;;  %8757 = vmatpush2.bf16.msra.mxu1 %v10763_v43  ;;  %8619 = vmatprep.mubr.bf16.mxu0 %v10777_v63  ;;  %v2585_v8 = vcombine.low %v2547_v3, %v2560_v6  ;;  %v10805_v16 = vld [vmem:[%s13671_s0 + $0x18] ss:$8 sps:$4 sm:$0x33]   ;;  %v10811_v18 = vld [vmem:[%s12212_s11 + $0x474] ss:$8 sps:$4 sm:$0xff]  }
 0x157   : > { %v2577_v4 = vcombine.low %v2521_v56, %v2534_v57  ;;  %8758 = vmatprep.subr.bf16.mxu1 %v10771_v54  ;;  %8620 = vmatmul.mubr.bf16.gmra.mxu0 %v10782_v2  ;;  %v10798_v17 = vld [vmem:[%s12212_s11 + $0x280] ss:$8 sps:$4 sm:$0xff]   ;;  %9726 = vst.sshfl [vmem:[#allocation2 + $0x24] sm:$0x33 pattern:$0x76325410] %v9722_v14 }
 0x158   : > { %8708 = vmatpush2.bf16.msra.mxu0 %v10772_v19  ;;  %9601 = vst.sshfl [vmem:[#allocation2 + $0x138] sm:$0x33 pattern:$0x76325410] %v2585_v8  ;;  %v10789_v28 = vld [vmem:[%s12212_s11 + $0x3a0] ss:$8 sps:$4 sm:$0xff]  }
 0x159   : > { %8709 = vmatprep.subr.bf16.mxu0 %v10787_v31  ;;  %9600 = vst.sshfl [vmem:[#allocation2 + $0xd4] sm:$0x33 pattern:$0x76325410] %v2577_v4  ;;  %v10797_v34 = vld [vmem:[%s12212_s11 + $0x394] ss:$8 sps:$4 sm:$0xff]  }
 0x15a   : > { %8759 = vmatpush2.bf16.msra.mxu1 %v10769_v38  ;;  %9615 = vst.sshfl [vmem:[#allocation2 + $0x74] sm:$0x33 pattern:$0x76325410] %v9611_v30  ;;  %v10788_v39 = vld [vmem:[#allocation2 + $0xd0] ss:$100 sps:$4 sm:$0xff]  }
 0x15b   : > { %8760 = vmatprep.subr.bf16.mxu1 %v10781_v1  ;;  %9626 = vst.sshfl [vmem:[#allocation2 + $0x14] sm:$0x33 pattern:$0x76325410] %v10804_v55  ;;  %v10795_v40 = vld [vmem:[%s12212_s11 + $0x390] ss:$8 sps:$4 sm:$0xff]  }
 0x15c   : > { %8710 = vmatpush2.bf16.msra.mxu0 %v10785_v52  ;;  %9627 = vst.sshfl [vmem:[#allocation2 + $0x78] sm:$0x33 pattern:$0x76325410] %v10805_v16  ;;  %v10803_v43 = vld [vmem:[%s12212_s11 + $0x384] ss:$8 sps:$4 sm:$0xff]  }
 0x15d   : > { %8711 = vmatprep.subr.bf16.mxu0 %v10794_v59  ;;  %v9641_v19 = vld.sshfl [vmem:[%s13671_s0 + $0x20] sm:$0x13 pattern:$0x76325410]  ;;  %v10820_v49 = vld [vmem:[%s12212_s11 + $0x464] ss:$8 sps:$4 sm:$0xff]  }
 0x15e   : > { %v2825_v21 = vcombine.high %v9641_v19, %v9641_v19  ;;  %v2901_v22 = vshrl.u32 %v9641_v19, 16  ;;  %v2904_v23 = vshll.u32 %v9641_v19, 16  ;;  %v9661_v24 = vld.sshfl [vmem:[%s13671_s0 + $0x20] sm:$0x12 pattern:$0x76325410]  ;;  %8761 = vmatpush2.bf16.msra.mxu1 %v10779_v12 }
 0x15f   : > { %v3057_v25 = vcombine.high %v9661_v24, %v9661_v24  ;;  %v9669_v27 = vrot.slane %v9661_v24, 9  ;;  %8762 = vmatprep.subr.bf16.mxu1 %v10791_v15  ;;  %v10809_v44 = vld [vmem:[%s12212_s11 + $0x470] ss:$8 sps:$4 sm:$0xff]   ;;  %v10801_v53 = vld [vmem:[%s12212_s11 + $0x380] ss:$8 sps:$4 sm:$0xff]  }
 0x160   : > { %8712 = vmatpush2.bf16.msra.mxu0 %v10792_v61  ;;  %v2903_v29 = vrot.slane %v2901_v22, 6  ;;  %v2906_v31 = vrot.slane %v2904_v23, 7  ;;  %v2910_v32 = vshll.u32 %v2825_v21, 16  ;;  %v10783_v37 = vld [vmem:[#allocation2 + $0xd4] ss:$100 sps:$4 sm:$0xff]  }
 0x161   : > { %8713 = vmatprep.subr.bf16.mxu0 %v10800_v5  ;;  %v3104_v35 = vrot.slane %v3057_v25, 7  ;;  %8672 = vmatprep.mubr.bf16.mxu1 %v10783_v37  ;;  %v10806_v46 = vld [vmem:[#allocation2 + $0x10] ss:$100 sps:$4 sm:$0xff]   ;;  %v10817_v58 = vld [vmem:[%s12212_s11 + $0x574] ss:$8 sps:$4 sm:$0xff]  }
 0x162   : > { %v2907_v41 = vor.u32 %v2906_v31, %v2903_v29  ;;  %v2912_v42 = vrot.slane %v2910_v32, 7  ;;  %8763 = vmatpush2.bf16.msra.mxu1 %v10789_v28  ;;  %v9606_v52 = vld.sshfl [vmem:[%s13671_s0 + $0x40] sm:$0x30 pattern:$0x76325410] }
 0x163   : > { %v3105_v45 = vsel %vm12331_vm1, %v9669_v27, %v3104_v35  ;;  %8673 = vmatmul.mubr.bf16.gmra.mxu1 %v10788_v39  ;;  %8764 = vmatprep.subr.bf16.mxu1 %v10797_v34  ;;  %v10808_v50 = vld [vmem:[#allocation2 + $0x14] ss:$100 sps:$4 sm:$0xff]   ;;  %v9607_v56 = vld.sshfl [vmem:[%s13671_s0 + $0x48] sm:$0x30 pattern:$0x76325410] }
 0x164   : > { %8714 = vmatpush2.bf16.msra.mxu0 %v10798_v17  ;;  %v2908_v47 = vrot.slane %v2907_v41, 2  ;;  %v3130_v48 = vcombine.low %v12372_v33, %v3105_v45  ;;  %8715 = vmatprep.mubr.bf16.mxu0 %v10808_v50  ;;  %v10818_v59 = vld [vmem:[%s12212_s11 + $0x460] ss:$8 sps:$4 sm:$0xff]   ;;  %v9612_v57 = vcombine.high %v9606_v52, %v9607_v56  ;;  %v10829_v1 = vld [vmem:[%s12212_s11 + $0x450] ss:$8 sps:$4 sm:$0xff]  }
 0x165   : > { %8789 = vmatprep.subr.bf16.mxu0 %v10811_v18  ;;  %v9608_v38 = vld.sshfl [vmem:[%s13671_s0 + $0x50] sm:$0x30 pattern:$0x76325410]  ;;  %v10831_v2 = vld [vmem:[%s12212_s11 + $0x454] ss:$8 sps:$4 sm:$0xff]  }
 0x166   : > { %v12591_v54 = vsel %vm12290_vm12, %v2908_v47, %v2912_v42  ;;  %9675 = vst.sshfl [vmem:[#allocation2 + $0x80] sm:$0x33 pattern:$0x76325410] %v3130_v48  ;;  %8765 = vmatpush2.bf16.msra.mxu1 %v10795_v40  ;;  %v9724_v61 = vcombine.high %v9607_v56, %v9608_v38  ;;  %v10815_v15 = vld [vmem:[%s12212_s11 + $0x570] ss:$8 sps:$4 sm:$0xff]  }
 0x167   : > { %v2978_v33 = vcombine.low %v12356_v20, %v12591_v54  ;;  %8716 = vmatmul.mubr.bf16.vlgmr.msra.gmra.mxu0 %v10806_v46  ;;  %v12606_v60 = vld.sshfl [vmem:[%s13671_s0 + $0x58] sm:$0x30 pattern:$0x76325410]  ;;  %8766 = vmatprep.subr.bf16.mxu1 %v10803_v43  ;;  %v10823_v30 = vld [vmem:[%s12212_s11 + $0x564] ss:$8 sps:$4 sm:$0xff]  }
 0x168   : > { %8790 = vmatpush1.bf16.msra.mxu0 %v10809_v44  ;;  %v9613_v20 = vcombine.high %v9608_v38, %v12606_v60  ;;  %9616 = vst.sshfl [vmem:[#allocation2 + $0xd8] sm:$0x33 pattern:$0x76325410] %v9612_v57  ;;  %v10838_v21 = vld [vmem:[%s12212_s11 + $0x440] ss:$8 sps:$4 sm:$0xff]  }
 0x169   : > { %9647 = vst.sshfl [vmem:[#allocation2 + $0x7c] sm:$0x33 pattern:$0x76325410] %v2978_v33  ;;  %8791 = vmatprep.subr.bf16.mxu0 %v10820_v49  ;;  %v10840_v23 = vld [vmem:[%s12212_s11 + $0x444] ss:$8 sps:$4 sm:$0xff]  }
 0x16a   : > { %v10824_v62 = vld [vmem:[%s13671_s0 + $0x48] ss:$8 sps:$4 sm:$0x33]   ;;  %v10825_v63 = vld [vmem:[%s13671_s0 + $0x58] ss:$8 sps:$4 sm:$0x33]   ;;  %8767 = vmatpush2.bf16.msra.mxu1 %v10801_v53 }
 0x16b   : > { %9728 = vst.sshfl [vmem:[#allocation2 + $0xec] sm:$0x33 pattern:$0x76325410] %v9724_v61  ;;  %8842 = vmatprep.subr.bf16.mxu1 %v10817_v58  ;;  %v10821_v28 = vld [vmem:[%s12212_s11 + $0x560] ss:$8 sps:$4 sm:$0xff]  }
 0x16c   : > { %9617 = vst.sshfl [vmem:[#allocation2 + $0x13c] sm:$0x33 pattern:$0x76325410] %v9613_v20  ;;  %8792 = vmatpush1.bf16.msra.mxu0 %v10818_v59  ;;  %v10837_v32 = vld [vmem:[%s12212_s11 + $0x554] ss:$8 sps:$4 sm:$0xff]  }
 0x16d   : > { %9628 = vst.sshfl [vmem:[#allocation2 + $0xdc] sm:$0x33 pattern:$0x76325410] %v10824_v62  ;;  %8793 = vmatprep.subr.bf16.mxu0 %v10831_v2  ;;  %v10814_v17 = vld [vmem:[#allocation2 + $0x1c] ss:$100 sps:$4 sm:$0xff]  }
 0x16e   : > { %9629 = vst.sshfl [vmem:[#allocation2 + $0x140] sm:$0x33 pattern:$0x76325410] %v10825_v63  ;;  %8768 = vmatprep.mubr.bf16.mxu1 %v10814_v17  ;;  %v10846_v34 = vld [vmem:[%s12212_s11 + $0x434] ss:$8 sps:$4 sm:$0xff]  }
 0x16f   : > { %v9645_v3 = vld.sshfl [vmem:[%s13671_s0 + $0x60] sm:$0x13 pattern:$0x76325410]  ;;  %v10852_v37 = vld [vmem:[%s12212_s11 + $0x424] ss:$8 sps:$4 sm:$0xff]  }
 0x170   : > { %v2857_v4 = vcombine.high %v9645_v3, %v9645_v3  ;;  %v2957_v5 = vshrl.u32 %v9645_v3, 16  ;;  %v2960_v6 = vshll.u32 %v9645_v3, 16  ;;  %v9665_v7 = vld.sshfl [vmem:[%s13671_s0 + $0x60] sm:$0x12 pattern:$0x76325410]  ;;  %8794 = vmatpush1.bf16.msra.mxu0 %v10829_v1 }
 0x171   : > { %v3089_v8 = vcombine.high %v9665_v7, %v9665_v7  ;;  %v9673_v9 = vrot.slane %v9665_v7, 9  ;;  %v10812_v16 = vld [vmem:[#allocation2 + $0x18] ss:$100 sps:$4 sm:$0xff]   ;;  %8795 = vmatprep.subr.bf16.mxu0 %v10840_v23  ;;  %v10844_v35 = vld [vmem:[%s12212_s11 + $0x430] ss:$8 sps:$4 sm:$0xff]  }
 0x172   : > { %v2959_v11 = vrot.slane %v2957_v5, 6  ;;  %v2962_v12 = vrot.slane %v2960_v6, 7  ;;  %v2966_v14 = vshll.u32 %v2857_v4, 16  ;;  %8769 = vmatmul.mubr.bf16.vlgmr.msra.gmra.mxu1 %v10812_v16  ;;  %v10835_v39 = vld [vmem:[%s12212_s11 + $0x550] ss:$8 sps:$4 sm:$0xff]  }
 0x173   : > { %v3120_v55 = vrot.slane %v3089_v8, 7  ;;  %v10828_v29 = vld [vmem:[#allocation2 + $0xd8] ss:$100 sps:$4 sm:$0xff]   ;;  %8843 = vmatpush1.bf16.msra.mxu1 %v10815_v15  ;;  %v10849_v43 = vld [vmem:[%s12212_s11 + $0x534] ss:$8 sps:$4 sm:$0xff]  }
 0x174   : > { %v2963_v18 = vor.u32 %v2962_v12, %v2959_v11  ;;  %v2968_v19 = vrot.slane %v2966_v14, 7  ;;  %8844 = vmatprep.subr.bf16.mxu1 %v10823_v30  ;;  %8796 = vmatpush1.bf16.msra.mxu0 %v10838_v21  ;;  %v10843_v40 = vld [vmem:[%s12212_s11 + $0x544] ss:$8 sps:$4 sm:$0xff]   ;;  %v10850_v41 = vld [vmem:[%s12212_s11 + $0x420] ss:$8 sps:$4 sm:$0xff]  }
 0x175   : > { %v3121_v22 = vsel %vm12331_vm1, %v9673_v9, %v3120_v55  ;;  %v10826_v24 = vld [vmem:[#allocation2 + $0xdc] ss:$100 sps:$4 sm:$0xff]   ;;  %8797 = vmatprep.subr.bf16.mxu0 %v10846_v34  ;;  %v10841_v42 = vld [vmem:[%s12212_s11 + $0x540] ss:$8 sps:$4 sm:$0xff]   ;;  %v10870_v52 = vld [vmem:[%s12212_s11 + $0x4f4] ss:$8 sps:$4 sm:$0xff]  }
 0x176   : > { %v2964_v25 = vrot.slane %v2963_v18, 2  ;;  %v3146_v27 = vcombine.low %v12517_v36, %v3121_v22  ;;  %8725 = vmatprep.mubr.bf16.mxu0 %v10826_v24  ;;  %v10856_v44 = vld [vmem:[%s12212_s11 + $0x410] ss:$8 sps:$4 sm:$0xff]   ;;  %v10864_v47 = vld [vmem:[%s12212_s11 + $0x404] ss:$8 sps:$4 sm:$0xff]  }
 0x177   : > { %8726 = vmatmul.mubr.bf16.gmra.mxu0 %v10828_v29  ;;  %8845 = vmatpush1.bf16.msra.mxu1 %v10821_v28  ;;  %v10847_v48 = vld [vmem:[%s12212_s11 + $0x530] ss:$8 sps:$4 sm:$0xff]   ;;  %v10855_v49 = vld [vmem:[%s12212_s11 + $0x524] ss:$8 sps:$4 sm:$0xff]   ;;  %v10862_v50 = vld [vmem:[%s12212_s11 + $0x400] ss:$8 sps:$4 sm:$0xff]  }
 0x178   : > { %v12633_v31 = vsel %vm12290_vm12, %v2964_v25, %v2968_v19  ;;  %9677 = vst.sshfl [vmem:[#allocation2 + $0x148] sm:$0x33 pattern:$0x76325410] %v3146_v27  ;;  %8846 = vmatprep.subr.bf16.mxu1 %v10837_v32  ;;  %8798 = vmatpush1.bf16.msra.mxu0 %v10844_v35  ;;  %v10853_v53 = vld [vmem:[%s12212_s11 + $0x520] ss:$8 sps:$4 sm:$0xff]  }
 0x179   : > { %v2994_v36 = vcombine.low %v12504_v10, %v12633_v31  ;;  %8799 = vmatprep.subr.bf16.mxu0 %v10852_v37  ;;  %v10858_v10 = vld [vmem:[%s12212_s11 + $0x414] ss:$8 sps:$4 sm:$0xff]   ;;  %v10868_v33 = vld [vmem:[%s12212_s11 + $0x4f0] ss:$8 sps:$4 sm:$0xff]   ;;  %v10876_v58 = vld [vmem:[%s12212_s11 + $0x4e4] ss:$8 sps:$4 sm:$0xff]  }
 0x17a   : > { %v10861_v56 = vld [vmem:[%s12212_s11 + $0x514] ss:$8 sps:$4 sm:$0xff]   ;;  %v10859_v59 = vld [vmem:[%s12212_s11 + $0x510] ss:$8 sps:$4 sm:$0xff]   ;;  %v10867_v38 = vld [vmem:[%s12212_s11 + $0x504] ss:$8 sps:$4 sm:$0xff]  }
 0x17b   : > { %9649 = vst.sshfl [vmem:[#allocation2 + $0x144] sm:$0x33 pattern:$0x76325410] %v2994_v36  ;;  %8847 = vmatpush1.bf16.msra.mxu1 %v10835_v39  ;;  %v10874_v57 = vld [vmem:[%s12212_s11 + $0x4e0] ss:$8 sps:$4 sm:$0xff]  }
 0x17c   : > { %8848 = vmatprep.subr.bf16.mxu1 %v10843_v40  ;;  %8800 = vmatpush1.bf16.msra.mxu0 %v10850_v41  ;;  %v10882_v61 = vld [vmem:[%s12212_s11 + $0x4d4] ss:$8 sps:$4 sm:$0xff]   ;;  %v10865_v20 = vld [vmem:[%s12212_s11 + $0x500] ss:$8 sps:$4 sm:$0xff]   ;;  %v10880_v63 = vld [vmem:[%s12212_s11 + $0x4d0] ss:$8 sps:$4 sm:$0xff]  }
 0x17d   : > { %8801 = vmatprep.subr.bf16.mxu0 %v10858_v10  ;;  %v10873_v62 = vld [vmem:[%s12212_s11 + $0x5f4] ss:$8 sps:$4 sm:$0xff]   ;;  %v10888_v1 = vld [vmem:[%s12212_s11 + $0x4c4] ss:$8 sps:$4 sm:$0xff]   ;;  %v10871_v2 = vld [vmem:[%s12212_s11 + $0x5f0] ss:$8 sps:$4 sm:$0xff]  }
 0x17e   : > { %v10879_v3 = vld [vmem:[%s12212_s11 + $0x5e4] ss:$8 sps:$4 sm:$0xff]   ;;  %v10886_v4 = vld [vmem:[%s12212_s11 + $0x4c0] ss:$8 sps:$4 sm:$0xff]   ;;  %v10894_v6 = vld [vmem:[%s12212_s11 + $0x4b4] ss:$8 sps:$4 sm:$0xff]  }
 0x17f   : > { %v10832_v45 = vld [vmem:[#allocation2 + $0xe4] ss:$100 sps:$4 sm:$0xff]   ;;  %8849 = vmatpush1.bf16.msra.mxu1 %v10841_v42  ;;  %v10877_v5 = vld [vmem:[%s12212_s11 + $0x5e0] ss:$8 sps:$4 sm:$0xff]   ;;  %v10900_v9 = vld [vmem:[%s12212_s11 + $0x4a4] ss:$8 sps:$4 sm:$0xff]  }
 0x180   : > { %8778 = vmatprep.mubr.bf16.mxu1 %v10832_v45  ;;  %8850 = vmatprep.subr.bf16.mxu1 %v10849_v43  ;;  %v10885_v7 = vld [vmem:[%s12212_s11 + $0x5d4] ss:$8 sps:$4 sm:$0xff]   ;;  %v10892_v8 = vld [vmem:[%s12212_s11 + $0x4b0] ss:$8 sps:$4 sm:$0xff]   ;;  %v10891_v55 = vld [vmem:[%s12212_s11 + $0x5c4] ss:$8 sps:$4 sm:$0xff]  }
 0x181   : > { %8802 = vmatpush1.bf16.msra.mxu0 %v10856_v44  ;;  %v9686_v11 = vld.sshfl [vmem:[%s13671_s0 + $0x8] sm:$0x32 pattern:$0x76325410]  ;;  %v10898_v24 = vld [vmem:[%s12212_s11 + $0x4a0] ss:$8 sps:$4 sm:$0xff]  }
 0x182   : > { %v10834_v46 = vld [vmem:[#allocation2 + $0xe0] ss:$100 sps:$4 sm:$0xff]   ;;  %8803 = vmatprep.subr.bf16.mxu0 %v10864_v47  ;;  %v9687_v14 = vld.sshfl [vmem:[%s13671_s0 + $0x10] sm:$0x32 pattern:$0x76325410]  ;;  %v3185_v15 = vcombine.high %v9686_v11, %v9686_v11 }
 0x183   : > { %8779 = vmatmul.mubr.bf16.gmra.mxu1 %v10834_v46  ;;  %v10883_v12 = vld [vmem:[%s12212_s11 + $0x5d0] ss:$8 sps:$4 sm:$0xff]   ;;  %v3243_v30 = vshrl.u32 %v9686_v11, 16  ;;  %v3193_v17 = vcombine.high %v9687_v14, %v9687_v14  ;;  %v3256_v18 = vshrl.u32 %v9687_v14, 16  ;;  %v10889_v32 = vld [vmem:[%s12212_s11 + $0x5c0] ss:$8 sps:$4 sm:$0xff]  }
 0x184   : > { %8851 = vmatpush1.bf16.msra.mxu1 %v10847_v48  ;;  %v9688_v16 = vld.sshfl [vmem:[%s13671_s0 + $0x18] sm:$0x32 pattern:$0x76325410]  ;;  %v3248_v23 = vshrl.u32 %v3185_v15, 16  ;;  %v3251_v27 = vshll.u32 %v3185_v15, 16 }
 0x185   : > { %8852 = vmatprep.subr.bf16.mxu1 %v10855_v49  ;;  %8804 = vmatpush1.bf16.msra.mxu0 %v10862_v50  ;;  %v9689_v19 = vld.sshfl [vmem:[%s13671_s0 + $0x20] sm:$0x32 pattern:$0x76325410]  ;;  %v3201_v21 = vcombine.high %v9688_v16, %v9688_v16  ;;  %v9694_v22 = vrot.slane %v3243_v30, 9  ;;  %v9695_v28 = vrot.slane %v3256_v18, 9 }
 0x186   : > { %8805 = vmatprep.subr.bf16.mxu0 %v10870_v52  ;;  %v3209_v25 = vcombine.high %v9689_v19, %v9689_v19  ;;  %v3261_v29 = vshrl.u32 %v3193_v17, 16  ;;  %v10906_v36 = vld [vmem:[%s12212_s11 + $0x494] ss:$8 sps:$4 sm:$0xff]   ;;  %v3250_v34 = vrot.slane %v3248_v23, 7  ;;  %v3264_v35 = vshll.u32 %v3193_v17, 16 }
 0x187   : > { %v3269_v37 = vshrl.u32 %v9688_v16, 16  ;;  %v3274_v39 = vshrl.u32 %v3201_v21, 16  ;;  %v10897_v40 = vld [vmem:[%s12212_s11 + $0x5b4] ss:$8 sps:$4 sm:$0xff]   ;;  %v3277_v42 = vshll.u32 %v3201_v21, 16  ;;  %v3282_v10 = vshrl.u32 %v9689_v19, 16 }
 0x188   : > { %8853 = vmatpush1.bf16.msra.mxu1 %v10853_v53  ;;  %v3263_v41 = vrot.slane %v3261_v29, 7  ;;  %v3287_v43 = vshrl.u32 %v3209_v25, 16  ;;  %v10904_v44 = vld [vmem:[%s12212_s11 + $0x490] ss:$8 sps:$4 sm:$0xff]   ;;  %v3253_v45 = vor.u32 %v3251_v27, %v3250_v34  ;;  %v3290_v48 = vshll.u32 %v3209_v25, 16 }
 0x189   : > { %8854 = vmatprep.subr.bf16.mxu1 %v10861_v56  ;;  %8806 = vmatpush2.bf16.msra.mxu0 %v10868_v33  ;;  %v9696_v46 = vrot.slane %v3269_v37, 9  ;;  %v3276_v47 = vrot.slane %v3274_v39, 7  ;;  %v9697_v50 = vrot.slane %v3282_v10, 9  ;;  %v10895_v56 = vld [vmem:[%s12212_s11 + $0x5b0] ss:$8 sps:$4 sm:$0xff]  }
 0x18a   : > { %8807 = vmatprep.subr.bf16.mxu0 %v10876_v58  ;;  %v3266_v49 = vor.u32 %v3264_v35, %v3263_v41  ;;  %v3289_v52 = vrot.slane %v3287_v43, 7  ;;  %v12695_v53 = vld.sshfl [vmem:[%s13671_s0 + $0x20] sm:$0x30 pattern:$0x76325410]  ;;  %v3254_v58 = vsel %vm12391_vm4, %v9694_v22, %v3253_v45 }
 0x18b   : > { %v10912_v33 = vld [vmem:[%s12212_s11 + $0x484] ss:$8 sps:$4 sm:$0xff]   ;;  %v9753_v11 = vld.sshfl [vmem:[%s13671_s0 + $0x28] sm:$0x13 pattern:$0x76325410] }
 0x18c   : > { %8855 = vmatpush1.bf16.msra.mxu1 %v10859_v59  ;;  %v3279_v59 = vor.u32 %v3277_v42, %v3276_v47  ;;  %v10921_v30 = vld [vmem:[%s12212_s11 + $0x674] ss:$8 sps:$4 sm:$0xff]   ;;  %v10901_v19 = vld [vmem:[%s12212_s11 + $0x5a0] ss:$8 sps:$4 sm:$0xff]   ;;  %v3689_v29 = vshll.u32 %v9753_v11, 16 }
 0x18d   : > { %8856 = vmatprep.subr.bf16.mxu1 %v10867_v38  ;;  %8808 = vmatpush2.bf16.msra.mxu0 %v10874_v57  ;;  %v9723_v38 = vcombine.high %v12558_v13, %v12695_v53  ;;  %v10903_v57 = vld [vmem:[%s12212_s11 + $0x5a4] ss:$8 sps:$4 sm:$0xff]   ;;  %v10909_v25 = vld [vmem:[%s12212_s11 + $0x594] ss:$8 sps:$4 sm:$0xff]   ;;  %v10919_v45 = vld [vmem:[%s12212_s11 + $0x670] ss:$8 sps:$4 sm:$0xff]  }
 0x18e   : > { %8809 = vmatprep.subr.bf16.mxu0 %v10882_v61  ;;  %v3267_v61 = vsel %vm12391_vm4, %v9695_v28, %v3266_v49  ;;  %v3691_v42 = vrot.slane %v3689_v29, 7 }
 0x18f   : > { %v3346_v13 = vcombine.low %v3254_v58, %v3267_v61  ;;  %9727 = vst.sshfl [vmem:[#allocation2 + $0x88] sm:$0x33 pattern:$0x76325410] %v9723_v38 }
 0x190   : > { %8857 = vmatpush1.bf16.msra.mxu1 %v10865_v20  ;;  %v3292_v20 = vor.u32 %v3290_v48, %v3289_v52  ;;  %v9691_v48 = vld.sshfl [vmem:[%s13671_s0 + $0x50] sm:$0x32 pattern:$0x76325410] }
 0x191   : > { %8858 = vmatprep.subr.bf16.mxu1 %v10873_v62  ;;  %8810 = vmatpush2.bf16.msra.mxu0 %v10880_v63  ;;  %v10922_v62 = vld [vmem:[%s13671_s0 + $0x10] ss:$8 sps:$4 sm:$0x33]   ;;  %v10923_v63 = vld [vmem:[%s13671_s0 + $0x20] ss:$8 sps:$4 sm:$0x33]  }
 0x192   : > { %8811 = vmatprep.subr.bf16.mxu0 %v10888_v1  ;;  %v10910_v1 = vld [vmem:[%s12212_s11 + $0x480] ss:$8 sps:$4 sm:$0xff]   ;;  %9738 = vst.sshfl [vmem:[#allocation2 + $0x28] sm:$0x33 pattern:$0x76325410] %v10922_v62 }
 0x193   : > { %9739 = vst.sshfl [vmem:[#allocation2 + $0x8c] sm:$0x33 pattern:$0x76325410] %v10923_v63  ;;  %v10913_v52 = vld [vmem:[%s12212_s11 + $0x580] ss:$8 sps:$4 sm:$0xff]  }
 0x194   : > { %8859 = vmatpush2.bf16.msra.mxu1 %v10871_v2  ;;  %v3280_v2 = vsel %vm12391_vm4, %v9696_v46, %v3279_v59  ;;  %9702 = vst.sshfl [vmem:[#allocation2 + $0x20] sm:$0x33 pattern:$0x76325410] %v3346_v13  ;;  %v3225_v59 = vcombine.high %v9691_v48, %v9691_v48  ;;  %v3308_v38 = vshrl.u32 %v9691_v48, 16 }
 0x195   : > { %8860 = vmatprep.subr.bf16.mxu1 %v10879_v3  ;;  %8812 = vmatpush2.bf16.msra.mxu0 %v10886_v4  ;;  %v9750_v3 = vld.sshfl [vmem:[%s13671_s0 + $0x10] sm:$0x13 pattern:$0x76325410]  ;;  %v12720_v4 = vsel %vm12391_vm4, %v9697_v50, %v3292_v20  ;;  %v4131_v39 = vcombine.low %v3267_v61, %v3280_v2  ;;  %v10929_v63 = vld [vmem:[%s12212_s11 + $0x774] ss:$8 sps:$4 sm:$0xff]  }
 0x196   : > { %8813 = vmatprep.subr.bf16.mxu0 %v10894_v6  ;;  %v3586_v6 = vcombine.high %v9750_v3, %v9750_v3  ;;  %v9692_v58 = vld.sshfl [vmem:[%s13671_s0 + $0x58] sm:$0x32 pattern:$0x76325410]  ;;  %v10918_v61 = vld [vmem:[#allocation2 + $0x24] ss:$100 sps:$4 sm:$0xff]  }
 0x197   : > { %9814 = vst.sshfl [vmem:[#allocation2 + $0x34] sm:$0x33 pattern:$0x76325410] %v4131_v39  ;;  %8821 = vmatprep.mubr.bf16.mxu0 %v10918_v61  ;;  %v10935_v61 = vld [vmem:[%s12212_s11 + $0x764] ss:$8 sps:$4 sm:$0xff]  }
 0x198   : > { %8861 = vmatpush2.bf16.msra.mxu1 %v10877_v5  ;;  %v9751_v5 = vld.sshfl [vmem:[%s13671_s0 + $0x18] sm:$0x13 pattern:$0x76325410]  ;;  %v3653_v18 = vshll.u32 %v3586_v6, 16 }
 0x199   : > { %8862 = vmatprep.subr.bf16.mxu1 %v10885_v7  ;;  %8814 = vmatpush2.bf16.msra.mxu0 %v10892_v8  ;;  %v3644_v7 = vshrl.u32 %v9750_v3, 16  ;;  %v3647_v8 = vshll.u32 %v9750_v3, 16  ;;  %v3658_v14 = vshrl.u32 %v9751_v5, 16  ;;  %v3661_v15 = vshll.u32 %v9751_v5, 16  ;;  %v10930_v6 = vld [vmem:[%s12212_s11 + $0x660] ss:$8 sps:$4 sm:$0xff]  }
 0x19a   : > { %8815 = vmatprep.subr.bf16.mxu0 %v10900_v9  ;;  %v3354_v9 = vcombine.low %v3280_v2, %v12720_v4  ;;  %v3655_v28 = vrot.slane %v3653_v18, 7  ;;  %v9693_v2 = vld.sshfl [vmem:[%s13671_s0 + $0x60] sm:$0x32 pattern:$0x76325410] }
 0x19b   : > { %v3646_v16 = vrot.slane %v3644_v7, 6  ;;  %v3649_v17 = vrot.slane %v3647_v8, 7  ;;  %v3660_v21 = vrot.slane %v3658_v14, 6  ;;  %v3663_v22 = vrot.slane %v3661_v15, 7 }
 0x19c   : > { %8863 = vmatpush2.bf16.msra.mxu1 %v10883_v12  ;;  %v3594_v12 = vcombine.high %v9751_v5, %v9751_v5  ;;  %9703 = vst.sshfl [vmem:[#allocation2 + $0x84] sm:$0x33 pattern:$0x76325410] %v3354_v9  ;;  %v3241_v7 = vcombine.high %v9693_v2, %v9693_v2  ;;  %v9699_v9 = vrot.slane %v3308_v38, 9  ;;  %v3313_v15 = vshrl.u32 %v3225_v59, 16 }
 0x19d   : > { %8864 = vmatprep.subr.bf16.mxu1 %v10891_v55  ;;  %8816 = vmatpush2.bf16.msra.mxu0 %v10898_v24  ;;  %v3610_v55 = vcombine.high %v9753_v11, %v9753_v11  ;;  %v3686_v24 = vshrl.u32 %v9753_v11, 16  ;;  %v3650_v27 = vor.u32 %v3649_v17, %v3646_v16  ;;  %v3664_v34 = vor.u32 %v3663_v22, %v3660_v21  ;;  %v12760_v11 = vld.sshfl [vmem:[%s13671_s0 + $0x60] sm:$0x30 pattern:$0x76325410] }
 0x19e   : > { %8817 = vmatprep.subr.bf16.mxu0 %v10906_v36  ;;  %v3667_v23 = vshll.u32 %v3594_v12, 16  ;;  %v10907_v36 = vld [vmem:[%s12212_s11 + $0x590] ss:$8 sps:$4 sm:$0xff]   ;;  %v3321_v16 = vshrl.u32 %v9692_v58, 16  ;;  %v3315_v22 = vrot.slane %v3313_v15, 7 }
 0x19f   : > { %v3688_v37 = vrot.slane %v3686_v24, 6  ;;  %v3651_v41 = vrot.slane %v3650_v27, 2  ;;  %v3665_v43 = vrot.slane %v3664_v34, 2  ;;  %v3342_v24 = vshll.u32 %v3241_v7, 16 }
 0x1a0   : > { %8865 = vmatpush2.bf16.msra.mxu1 %v10889_v32  ;;  %v3695_v32 = vshll.u32 %v3610_v55, 16  ;;  %v3669_v35 = vrot.slane %v3667_v23, 7  ;;  %v10941_v55 = vld [vmem:[%s12212_s11 + $0x654] ss:$8 sps:$4 sm:$0xff]   ;;  %v3339_v23 = vshrl.u32 %v3241_v7, 16 }
 0x1a1   : > { %8866 = vmatprep.subr.bf16.mxu1 %v10897_v40  ;;  %8818 = vmatpush2.bf16.msra.mxu0 %v10904_v44  ;;  %v10915_v40 = vld [vmem:[%s12212_s11 + $0x584] ss:$8 sps:$4 sm:$0xff]   ;;  %v9690_v44 = vld.sshfl [vmem:[%s13671_s0 + $0x48] sm:$0x32 pattern:$0x76325410]  ;;  %v3656_v46 = vsel %vm12290_vm12, %v3651_v41, %v3655_v28  ;;  %v3692_v47 = vor.u32 %v3691_v42, %v3688_v37  ;;  %v9725_v28 = vcombine.high %v12606_v60, %v12760_v11 }
 0x1a2   : > { %8819 = vmatprep.subr.bf16.mxu0 %v10912_v33  ;;  %v3697_v10 = vrot.slane %v3695_v32, 7  ;;  %v3217_v49 = vcombine.high %v9690_v44, %v9690_v44  ;;  %v3295_v50 = vshrl.u32 %v9690_v44, 16  ;;  %v10932_v33 = vld [vmem:[%s12212_s11 + $0x664] ss:$8 sps:$4 sm:$0xff]   ;;  %v10939_v37 = vld [vmem:[%s12212_s11 + $0x650] ss:$8 sps:$4 sm:$0xff]  }
 0x1a3   : > { %v3693_v20 = vrot.slane %v3692_v47, 2  ;;  %v10942_v34 = vld [vmem:[%s13671_s0 + $0x50] ss:$8 sps:$4 sm:$0x33]   ;;  %v10927_v42 = vld [vmem:[%s12212_s11 + $0x770] ss:$8 sps:$4 sm:$0xff]  }
 0x1a4   : > { %8867 = vmatpush2.bf16.msra.mxu1 %v10895_v56  ;;  %v3670_v56 = vsel %vm12290_vm12, %v3665_v43, %v3669_v35  ;;  %v9698_v13 = vrot.slane %v3295_v50, 9  ;;  %v3300_v3 = vshrl.u32 %v3217_v49, 16  ;;  %v3303_v8 = vshll.u32 %v3217_v49, 16  ;;  %v10943_v39 = vld [vmem:[%s13671_s0 + $0x60] ss:$8 sps:$4 sm:$0x33]  }
 0x1a5   : > { %8868 = vmatprep.subr.bf16.mxu1 %v10903_v57  ;;  %8820 = vmatpush2.bf16.msra.mxu0 %v10910_v1  ;;  %v10916_v57 = vld [vmem:[#allocation2 + $0x20] ss:$100 sps:$4 sm:$0xff]   ;;  %v3755_v62 = vcombine.low %v3656_v46, %v3670_v56  ;;  %v3233_v1 = vcombine.high %v9692_v58, %v9692_v58  ;;  %v3698_v5 = vsel %vm12290_vm12, %v3693_v20, %v3697_v10  ;;  %v9754_v41 = vld.sshfl [vmem:[%s13671_s0 + $0x50] sm:$0x13 pattern:$0x76325410] }
 0x1a6   : > { %8895 = vmatprep.subr.bf16.mxu0 %v10921_v30  ;;  %v3763_v12 = vcombine.low %v12591_v54, %v3698_v5  ;;  %v3302_v14 = vrot.slane %v3300_v3, 7  ;;  %v3316_v30 = vshll.u32 %v3225_v59, 16  ;;  %9729 = vst.sshfl [vmem:[#allocation2 + $0x150] sm:$0x33 pattern:$0x76325410] %v9725_v28 }
 0x1a7   : > { %9758 = vst.sshfl [vmem:[#allocation2 + $0x2c] sm:$0x33 pattern:$0x76325410] %v3755_v62  ;;  %v3326_v17 = vshrl.u32 %v3233_v1, 16  ;;  %v3329_v18 = vshll.u32 %v3233_v1, 16 }
 0x1a8   : > { %8869 = vmatpush2.bf16.msra.mxu1 %v10901_v19  ;;  %8822 = vmatmul.mubr.bf16.vlgmr.msra.gmra.mxu0 %v10916_v57  ;;  %v3334_v19 = vshrl.u32 %v9693_v2, 16  ;;  %9759 = vst.sshfl [vmem:[#allocation2 + $0x90] sm:$0x33 pattern:$0x76325410] %v3763_v12  ;;  %v3305_v21 = vor.u32 %v3303_v8, %v3302_v14  ;;  %v3318_v32 = vor.u32 %v3316_v30, %v3315_v22  ;;  %v3700_v46 = vshrl.u32 %v9754_v41, 16 }
 0x1a9   : > { %8870 = vmatprep.subr.bf16.mxu1 %v10909_v25  ;;  %8896 = vmatpush1.bf16.msra.mxu0 %v10919_v45  ;;  %v9700_v25 = vrot.slane %v3321_v16, 9  ;;  %v3328_v54 = vrot.slane %v3326_v17, 7  ;;  %9740 = vst.sshfl [vmem:[#allocation2 + $0xf0] sm:$0x33 pattern:$0x76325410] %v10942_v34  ;;  %v3618_v45 = vcombine.high %v9754_v41, %v9754_v41 }
 0x1aa   : > { %8897 = vmatprep.subr.bf16.mxu0 %v10932_v33  ;;  %v9701_v27 = vrot.slane %v3334_v19, 9  ;;  %v3306_v29 = vsel %vm12391_vm4, %v9698_v13, %v3305_v21  ;;  %v3319_v60 = vsel %vm12391_vm4, %v9699_v9, %v3318_v32  ;;  %9741 = vst.sshfl [vmem:[#allocation2 + $0x154] sm:$0x33 pattern:$0x76325410] %v10943_v39  ;;  %v3703_v50 = vshll.u32 %v9754_v41, 16 }
 0x1ab   : > { %v3331_v35 = vor.u32 %v3329_v18, %v3328_v54  ;;  %v3362_v43 = vcombine.low %v3306_v29, %v3319_v60  ;;  %v9755_v44 = vld.sshfl [vmem:[%s13671_s0 + $0x58] sm:$0x13 pattern:$0x76325410]  ;;  %v10924_v56 = vld [vmem:[#allocation2 + $0x28] ss:$100 sps:$4 sm:$0xff]  }
 0x1ac   : > { %8871 = vmatpush2.bf16.msra.mxu1 %v10907_v36  ;;  %v3341_v36 = vrot.slane %v3339_v23, 7  ;;  %v9757_v48 = vld.sshfl [vmem:[%s13671_s0 + $0x68] sm:$0x13 pattern:$0x76325410]  ;;  %v3626_v49 = vcombine.high %v9755_v44, %v9755_v44  ;;  %v3702_v38 = vrot.slane %v3700_v46, 6 }
 0x1ad   : > { %8872 = vmatprep.subr.bf16.mxu1 %v10915_v40  ;;  %8898 = vmatpush1.bf16.msra.mxu0 %v10930_v6  ;;  %v3332_v10 = vsel %vm12391_vm4, %v9700_v25, %v3331_v35  ;;  %9704 = vst.sshfl [vmem:[#allocation2 + $0xe8] sm:$0x33 pattern:$0x76325410] %v3362_v43  ;;  %v3642_v59 = vcombine.high %v9757_v48, %v9757_v48  ;;  %v3705_v20 = vrot.slane %v3703_v50, 7  ;;  %v3709_v62 = vshll.u32 %v3618_v45, 16 }
 0x1ae   : > { %v3344_v40 = vor.u32 %v3342_v24, %v3341_v36  ;;  %8899 = vmatprep.subr.bf16.mxu0 %v10941_v55  ;;  %v4147_v57 = vcombine.low %v3319_v60, %v3332_v10  ;;  %v3717_v1 = vshll.u32 %v9755_v44, 16  ;;  %v3723_v2 = vshll.u32 %v3626_v49, 16  ;;  %v10950_v6 = vld [vmem:[%s12212_s11 + $0x640] ss:$8 sps:$4 sm:$0xff]   ;;  %v10952_v12 = vld [vmem:[%s12212_s11 + $0x644] ss:$8 sps:$4 sm:$0xff]  }
 0x1af   : > { %v10926_v33 = vld [vmem:[#allocation2 + $0x2c] ss:$100 sps:$4 sm:$0xff]   ;;  %v3742_v13 = vshrl.u32 %v9757_v48, 16  ;;  %v3745_v3 = vshll.u32 %v9757_v48, 16  ;;  %v3751_v5 = vshll.u32 %v3642_v59, 16  ;;  %v3706_v7 = vor.u32 %v3705_v20, %v3702_v38 }
 0x1b0   : > { %8873 = vmatpush2.bf16.msra.mxu1 %v10913_v52  ;;  %v12788_v47 = vsel %vm12391_vm4, %v9701_v27, %v3344_v40  ;;  %v3714_v52 = vshrl.u32 %v9755_v44, 16  ;;  %8874 = vmatprep.mubr.bf16.mxu1 %v10926_v33  ;;  %9816 = vst.sshfl [vmem:[#allocation2 + $0xfc] sm:$0x33 pattern:$0x76325410] %v4147_v57  ;;  %v3711_v8 = vrot.slane %v3709_v62, 7  ;;  %v6315_v62 = vlaneseq }
 0x1b1   : > { %8948 = vmatprep.subr.bf16.mxu1 %v10929_v63  ;;  %v3370_v58 = vcombine.low %v3332_v10, %v12788_v47  ;;  %8900 = vmatpush1.bf16.msra.mxu0 %v10939_v37  ;;  %v3719_v9 = vrot.slane %v3717_v1, 7  ;;  %v10933_v14 = vld [vmem:[%s12212_s11 + $0x760] ss:$8 sps:$4 sm:$0xff]   ;;  %v3744_v15 = vrot.slane %v3742_v13, 6  ;;  %v3747_v30 = vrot.slane %v3745_v3, 7 }
 0x1b2   : > { %v3716_v63 = vrot.slane %v3714_v52, 6  ;;  %v10949_v55 = vld [vmem:[%s12212_s11 + $0x754] ss:$8 sps:$4 sm:$0xff]   ;;  %v3707_v16 = vrot.slane %v3706_v7, 2  ;;  %v3725_v18 = vrot.slane %v3723_v2, 7  ;;  %8901 = vmatprep.subr.bf16.mxu0 %v10952_v12  ;;  %v3753_v22 = vrot.slane %v3751_v5, 7 }
 0x1b3   : > { %9705 = vst.sshfl [vmem:[#allocation2 + $0x14c] sm:$0x33 pattern:$0x76325410] %v3370_v58  ;;  %8875 = vmatmul.mubr.bf16.vlgmr.msra.gmra.mxu1 %v10924_v56  ;;  %v10958_v19 = vld [vmem:[%s12212_s11 + $0x634] ss:$8 sps:$4 sm:$0xff]   ;;  %v3748_v21 = vor.u32 %v3747_v30, %v3744_v15 }
 0x1b4   : > { %8949 = vmatpush1.bf16.msra.mxu1 %v10927_v42  ;;  %v3720_v17 = vor.u32 %v3719_v9, %v3716_v63  ;;  %v10947_v23 = vld [vmem:[%s12212_s11 + $0x750] ss:$8 sps:$4 sm:$0xff]   ;;  %v3712_v25 = vsel %vm12290_vm12, %v3707_v16, %v3711_v8  ;;  %v10955_v27 = vld [vmem:[%s12212_s11 + $0x744] ss:$8 sps:$4 sm:$0xff]   ;;  %v10936_v32 = vld [vmem:[#allocation2 + $0xec] ss:$100 sps:$4 sm:$0xff]  }
 0x1b5   : > { %8950 = vmatprep.subr.bf16.mxu1 %v10935_v61  ;;  %8902 = vmatpush1.bf16.msra.mxu0 %v10950_v6  ;;  %v10956_v24 = vld [vmem:[%s12212_s11 + $0x630] ss:$8 sps:$4 sm:$0xff]   ;;  %v3749_v28 = vrot.slane %v3748_v21, 2  ;;  %v10964_v29 = vld [vmem:[%s12212_s11 + $0x624] ss:$8 sps:$4 sm:$0xff]   ;;  %v12836_v3 = vshrl.u32 %v6315_v62, 7 }
 0x1b6   : > { %v3721_v54 = vrot.slane %v3720_v17, 2  ;;  %8903 = vmatprep.subr.bf16.mxu0 %v10958_v19  ;;  %v10962_v39 = vld [vmem:[%s12212_s11 + $0x620] ss:$8 sps:$4 sm:$0xff]   ;;  %8831 = vmatprep.mubr.bf16.mxu0 %v10936_v32  ;;  %v10970_v40 = vld [vmem:[%s12212_s11 + $0x614] ss:$8 sps:$4 sm:$0xff]  }
 0x1b7   : > { %v3754_v35 = vsel %vm12290_vm12, %v3749_v28, %v3753_v22  ;;  %v10953_v41 = vld [vmem:[%s12212_s11 + $0x740] ss:$8 sps:$4 sm:$0xff]   ;;  %v10961_v42 = vld [vmem:[%s12212_s11 + $0x734] ss:$8 sps:$4 sm:$0xff]   ;;  %v10968_v10 = vld [vmem:[%s12212_s11 + $0x610] ss:$8 sps:$4 sm:$0xff]  }
 0x1b8   : > { %8951 = vmatpush1.bf16.msra.mxu1 %v10933_v14  ;;  %v3726_v34 = vsel %vm12290_vm12, %v3721_v54, %v3725_v18  ;;  %v3779_v60 = vcombine.low %v12633_v31, %v3754_v35  ;;  %v10976_v43 = vld [vmem:[%s12212_s11 + $0x604] ss:$8 sps:$4 sm:$0xff]   ;;  %v10959_v31 = vld [vmem:[%s12212_s11 + $0x730] ss:$8 sps:$4 sm:$0xff]   ;;  %v10965_v45 = vld [vmem:[%s12212_s11 + $0x720] ss:$8 sps:$4 sm:$0xff]  }
 0x1b9   : > { %8952 = vmatprep.subr.bf16.mxu1 %v10949_v55  ;;  %v3771_v37 = vcombine.low %v3712_v25, %v3726_v34  ;;  %8904 = vmatpush1.bf16.msra.mxu0 %v10956_v24  ;;  %v10967_v44 = vld [vmem:[%s12212_s11 + $0x724] ss:$8 sps:$4 sm:$0xff]   ;;  %v10974_v46 = vld [vmem:[%s12212_s11 + $0x600] ss:$8 sps:$4 sm:$0xff]   ;;  %v10982_v48 = vld [vmem:[%s12212_s11 + $0x6f4] ss:$8 sps:$4 sm:$0xff]  }
 0x1ba   : > { %v10938_v36 = vld [vmem:[#allocation2 + $0xe8] ss:$100 sps:$4 sm:$0xff]   ;;  %8905 = vmatprep.subr.bf16.mxu0 %v10964_v29  ;;  %9761 = vst.sshfl [vmem:[#allocation2 + $0x158] sm:$0x33 pattern:$0x76325410] %v3779_v60 }
 0x1bb   : > { %8832 = vmatmul.mubr.bf16.gmra.mxu0 %v10938_v36  ;;  %9760 = vst.sshfl [vmem:[#allocation2 + $0xf4] sm:$0x33 pattern:$0x76325410] %v3771_v37  ;;  %v10946_v50 = vld [vmem:[#allocation2 + $0xf0] ss:$100 sps:$4 sm:$0xff]  }
 0x1bc   : > { %8953 = vmatpush1.bf16.msra.mxu1 %v10947_v23  ;;  %v10973_v52 = vld [vmem:[%s12212_s11 + $0x714] ss:$8 sps:$4 sm:$0xff]   ;;  %v10980_v56 = vld [vmem:[%s12212_s11 + $0x6f0] ss:$8 sps:$4 sm:$0xff]   ;;  %v10988_v33 = vld [vmem:[%s12212_s11 + $0x6e4] ss:$8 sps:$4 sm:$0xff]  }
 0x1bd   : > { %8954 = vmatprep.subr.bf16.mxu1 %v10955_v27  ;;  %8906 = vmatpush1.bf16.msra.mxu0 %v10962_v39  ;;  %v10971_v58 = vld [vmem:[%s12212_s11 + $0x710] ss:$8 sps:$4 sm:$0xff]   ;;  %v10979_v59 = vld [vmem:[%s12212_s11 + $0x704] ss:$8 sps:$4 sm:$0xff]   ;;  %v10986_v38 = vld [vmem:[%s12212_s11 + $0x6e0] ss:$8 sps:$4 sm:$0xff]  }
 0x1be   : > { %8907 = vmatprep.subr.bf16.mxu0 %v10970_v40  ;;  %v10994_v57 = vld [vmem:[%s12212_s11 + $0x6d4] ss:$8 sps:$4 sm:$0xff]   ;;  %v10977_v61 = vld [vmem:[%s12212_s11 + $0x700] ss:$8 sps:$4 sm:$0xff]   ;;  %v10992_v63 = vld [vmem:[%s12212_s11 + $0x6d0] ss:$8 sps:$4 sm:$0xff]  }
 0x1bf   : > { %v10985_v20 = vld [vmem:[%s12212_s11 + $0x7f4] ss:$8 sps:$4 sm:$0xff]   ;;  %v11000_v1 = vld [vmem:[%s12212_s11 + $0x6c4] ss:$8 sps:$4 sm:$0xff]   ;;  %v10983_v2 = vld [vmem:[%s12212_s11 + $0x7f0] ss:$8 sps:$4 sm:$0xff]  }
 0x1c0   : > { %8955 = vmatpush1.bf16.msra.mxu1 %v10953_v41  ;;  %v10991_v13 = vld [vmem:[%s12212_s11 + $0x7e4] ss:$8 sps:$4 sm:$0xff]   ;;  %v10998_v5 = vld [vmem:[%s12212_s11 + $0x6c0] ss:$8 sps:$4 sm:$0xff]   ;;  %v11006_v6 = vld [vmem:[%s12212_s11 + $0x6b4] ss:$8 sps:$4 sm:$0xff]  }
 0x1c1   : > { %8956 = vmatprep.subr.bf16.mxu1 %v10961_v42  ;;  %8908 = vmatpush1.bf16.msra.mxu0 %v10968_v10  ;;  %v10989_v7 = vld [vmem:[%s12212_s11 + $0x7e0] ss:$8 sps:$4 sm:$0xff]   ;;  %v10997_v8 = vld [vmem:[%s12212_s11 + $0x7d4] ss:$8 sps:$4 sm:$0xff]   ;;  %v6317_v9 = vsub.s32 0, %v12836_v3  ;;  %v6321_v12 = vsub.s32 1, %v12836_v3 }
 0x1c2   : > { %8909 = vmatprep.subr.bf16.mxu0 %v10976_v43  ;;  %v10944_v49 = vld [vmem:[#allocation2 + $0xf4] ss:$100 sps:$4 sm:$0xff]   ;;  %v10995_v14 = vld [vmem:[%s12212_s11 + $0x7d0] ss:$8 sps:$4 sm:$0xff]   ;;  %v11018_v22 = vld [vmem:[%s12212_s11 + $0x694] ss:$8 sps:$4 sm:$0xff]  }
 0x1c3   : > { %8884 = vmatprep.mubr.bf16.mxu1 %v10944_v49  ;;  %v11004_v15 = vld [vmem:[%s12212_s11 + $0x6b0] ss:$8 sps:$4 sm:$0xff]   ;;  %v11012_v30 = vld [vmem:[%s12212_s11 + $0x6a4] ss:$8 sps:$4 sm:$0xff]   ;;  %v11010_v17 = vld [vmem:[%s12212_s11 + $0x6a0] ss:$8 sps:$4 sm:$0xff]  }
 0x1c4   : > { %8957 = vmatpush1.bf16.msra.mxu1 %v10959_v31  ;;  %v11003_v55 = vld [vmem:[%s12212_s11 + $0x7c4] ss:$8 sps:$4 sm:$0xff]   ;;  %v9770_v16 = vld.sshfl [vmem:[%s13671_s0 + $0x10] sm:$0x12 pattern:$0x76325410] }
 0x1c5   : > { %8958 = vmatprep.subr.bf16.mxu1 %v10967_v44  ;;  %8910 = vmatpush1.bf16.msra.mxu0 %v10974_v46  ;;  %v9771_v18 = vld.sshfl [vmem:[%s13671_s0 + $0x18] sm:$0x12 pattern:$0x76325410]  ;;  %v3818_v19 = vcombine.high %v9770_v16, %v9770_v16  ;;  %v9778_v21 = vrot.slane %v9770_v16, 9 }
 0x1c6   : > { %8885 = vmatmul.mubr.bf16.gmra.mxu1 %v10946_v50  ;;  %8911 = vmatprep.subr.bf16.mxu0 %v10982_v48  ;;  %v9772_v23 = vld.sshfl [vmem:[%s13671_s0 + $0x20] sm:$0x12 pattern:$0x76325410]  ;;  %v3826_v24 = vcombine.high %v9771_v18, %v9771_v18  ;;  %v9779_v25 = vrot.slane %v9771_v18, 9 }
 0x1c7   : > { %v11001_v54 = vld [vmem:[%s12212_s11 + $0x7c0] ss:$8 sps:$4 sm:$0xff]   ;;  %v9773_v27 = vld.sshfl [vmem:[%s13671_s0 + $0x28] sm:$0x12 pattern:$0x76325410]  ;;  %v3834_v28 = vcombine.high %v9772_v23, %v9772_v23 }
 0x1c8   : > { %8959 = vmatpush1.bf16.msra.mxu1 %v10965_v45  ;;  %v3877_v29 = vrot.slane %v3818_v19, 7  ;;  %v9780_v32 = vrot.slane %v9772_v23, 9  ;;  %v11009_v36 = vld [vmem:[%s12212_s11 + $0x7b4] ss:$8 sps:$4 sm:$0xff]   ;;  %v3842_v34 = vcombine.high %v9773_v27, %v9773_v27  ;;  %v3881_v35 = vrot.slane %v3826_v24, 7 }
 0x1c9   : > { %8960 = vmatprep.subr.bf16.mxu1 %v10973_v52  ;;  %8912 = vmatpush2.bf16.msra.mxu0 %v10980_v56  ;;  %v9781_v37 = vrot.slane %v9773_v27, 9  ;;  %v9801_v39 = vld.sshfl [vmem:[%s13671_s0 + $0x28] sm:$0x32 pattern:$0x76325410]  ;;  %v3885_v41 = vrot.slane %v3834_v28, 7 }
 0x1ca   : > { %8913 = vmatprep.subr.bf16.mxu0 %v10988_v33  ;;  %v11016_v60 = vld [vmem:[%s12212_s11 + $0x690] ss:$8 sps:$4 sm:$0xff]   ;;  %v3878_v40 = vsel %vm12331_vm1, %v9778_v21, %v3877_v29  ;;  %v3994_v42 = vcombine.high %v9801_v39, %v9801_v39  ;;  %v4067_v10 = vshrl.u32 %v9801_v39, 16  ;;  %v11024_v44 = vld [vmem:[%s12212_s11 + $0x684] ss:$8 sps:$4 sm:$0xff]   ;;  %v3882_v45 = vsel %vm12331_vm1, %v9779_v25, %v3881_v35 }
 0x1cb   : > { %v6313_v43 = vld [vmem:[%s1900_s12] sm:$0x3]  ;;  %v3889_v46 = vrot.slane %v3842_v34, 7  ;;  %v3886_v50 = vsel %vm12331_vm1, %v9780_v32, %v3885_v41  ;;  %v3907_v52 = vcombine.low %v3878_v40, %v3882_v45  ;;  %v11027_v23 = vld [vmem:[%s12212_s11 + $0x784] ss:$8 sps:$4 sm:$0xff]  }
 0x1cc   : > { %8961 = vmatpush1.bf16.msra.mxu1 %v10971_v58  ;;  %v9826_v48 = vld.sshfl [vmem:[%s13671_s0 + $0x10] sm:$0x30 pattern:$0x76325410]  ;;  %v11007_v49 = vld [vmem:[%s12212_s11 + $0x7b0] ss:$8 sps:$4 sm:$0xff]  }
 0x1cd   : > { %8962 = vmatprep.subr.bf16.mxu1 %v10979_v59  ;;  %8914 = vmatpush2.bf16.msra.mxu0 %v10986_v38  ;;  %v9809_v56 = vrot.slane %v4067_v10, 9  ;;  %v4072_v33 = vshrl.u32 %v3994_v42, 16  ;;  %v12888_v58 = vld.sshfl [vmem:[%s13671_s0 + $0x18] sm:$0x30 pattern:$0x76325410]  ;;  %v12893_v38 = vsel %vm12331_vm1, %v9781_v37, %v3889_v46 }
 0x1ce   : > { %8915 = vmatprep.subr.bf16.mxu0 %v10994_v57  ;;  %v11015_v59 = vld [vmem:[%s12212_s11 + $0x7a4] ss:$8 sps:$4 sm:$0xff]   ;;  %v4075_v57 = vshll.u32 %v3994_v42, 16  ;;  %v3915_v62 = vcombine.low %v3886_v50, %v12893_v38  ;;  %v11025_v42 = vld [vmem:[%s12212_s11 + $0x780] ss:$8 sps:$4 sm:$0xff]  }
 0x1cf   : > { %9786 = vst.sshfl [vmem:[#allocation2 + $0x30] sm:$0x33 pattern:$0x76325410] %v3907_v52  ;;  %v11041_v46 = vld [vmem:[%s12212_s11 + $0x974] ss:$8 sps:$4 sm:$0xff]  }
 0x1d0   : > { %8963 = vmatpush1.bf16.msra.mxu1 %v10977_v61  ;;  %v12898_v61 = vld.sshfl [vmem:[%s13671_s0 + $0x28] sm:$0x30 pattern:$0x76325410] }
 0x1d1   : > { %8964 = vmatprep.subr.bf16.mxu1 %v10985_v20  ;;  %8916 = vmatpush2.bf16.msra.mxu0 %v10992_v63  ;;  %v9834_v20 = vcombine.high %v9826_v48, %v12888_v58  ;;  %v4074_v63 = vrot.slane %v4072_v33, 7  ;;  %9787 = vst.sshfl [vmem:[#allocation2 + $0x94] sm:$0x33 pattern:$0x76325410] %v3915_v62 }
 0x1d2   : > { %8917 = vmatprep.subr.bf16.mxu0 %v11000_v1  ;;  %v9835_v1 = vcombine.high %v12695_v53, %v12898_v61  ;;  %v11035_v53 = vld [vmem:[%s13671_s0 + $0x28] ss:$8 sps:$4 sm:$0x33]  }
 0x1d3   : > { %9838 = vst.sshfl [vmem:[#allocation2 + $0x38] sm:$0x33 pattern:$0x76325410] %v9834_v20 }
 0x1d4   : > { %8965 = vmatpush2.bf16.msra.mxu1 %v10983_v2  ;;  %9839 = vst.sshfl [vmem:[#allocation2 + $0x9c] sm:$0x33 pattern:$0x76325410] %v9835_v1 }
 0x1d5   : > { %8966 = vmatprep.subr.bf16.mxu1 %v10991_v13  ;;  %8918 = vmatpush2.bf16.msra.mxu0 %v10998_v5  ;;  %v4692_v13 = vcombine.low %v3882_v45, %v3886_v50  ;;  %v11022_v5 = vld [vmem:[%s12212_s11 + $0x680] ss:$8 sps:$4 sm:$0xff]   ;;  %9851 = vst.sshfl [vmem:[#allocation2 + $0xa0] sm:$0x33 pattern:$0x76325410] %v11035_v53 }
 0x1d6   : > { %8919 = vmatprep.subr.bf16.mxu0 %v11006_v6  ;;  %v12907_v6 = vrot.slane %v6313_v43, %v6317_v9  ;;  %v12918_v9 = vrot.slane %v6313_v43, %v6321_v12  ;;  %v9774_v3 = vld.sshfl [vmem:[%s13671_s0 + $0x50] sm:$0x12 pattern:$0x76325410]  ;;  %v11019_v12 = vld [vmem:[%s12212_s11 + $0x790] ss:$8 sps:$4 sm:$0xff]  }
 0x1d7   : > { %9898 = vst.sshfl [vmem:[#allocation2 + $0x44] sm:$0x33 pattern:$0x76325410] %v4692_v13  ;;  %v3850_v21 = vcombine.high %v9774_v3, %v9774_v3 }
 0x1d8   : > { %8967 = vmatpush2.bf16.msra.mxu1 %v10989_v7  ;;  %v4077_v7 = vor.u32 %v4075_v57, %v4074_v63  ;;  %v9775_v19 = vld.sshfl [vmem:[%s13671_s0 + $0x58] sm:$0x12 pattern:$0x76325410] }
 0x1d9   : > { %8968 = vmatprep.subr.bf16.mxu1 %v10997_v8  ;;  %8920 = vmatpush2.bf16.msra.mxu0 %v11004_v15  ;;  %v11034_v8 = vld [vmem:[%s13671_s0 + $0x18] ss:$8 sps:$4 sm:$0x33]   ;;  %v3858_v25 = vcombine.high %v9775_v19, %v9775_v19  ;;  %v3893_v34 = vrot.slane %v3850_v21, 7 }
 0x1da   : > { %8921 = vmatprep.subr.bf16.mxu0 %v11012_v30  ;;  %v11013_v15 = vld [vmem:[%s12212_s11 + $0x7a0] ss:$8 sps:$4 sm:$0xff]   ;;  %v11021_v30 = vld [vmem:[%s12212_s11 + $0x794] ss:$8 sps:$4 sm:$0xff]  }
 0x1db   : > { %9850 = vst.sshfl [vmem:[#allocation2 + $0x3c] sm:$0x33 pattern:$0x76325410] %v11034_v8  ;;  %v11036_v1 = vld [vmem:[#allocation2 + $0x38] ss:$100 sps:$4 sm:$0xff]  }
 0x1dc   : > { %8969 = vmatpush2.bf16.msra.mxu1 %v10995_v14  ;;  %v11033_v14 = vld [vmem:[%s12212_s11 + $0x874] ss:$8 sps:$4 sm:$0xff]   ;;  %v9777_v32 = vld.sshfl [vmem:[%s13671_s0 + $0x68] sm:$0x12 pattern:$0x76325410] }
 0x1dd   : > { %8970 = vmatprep.subr.bf16.mxu1 %v11003_v55  ;;  %8922 = vmatpush2.bf16.msra.mxu0 %v11010_v17  ;;  %v12924_v55 = vsel %vm12391_vm4, %v9809_v56, %v4077_v7  ;;  %v3874_v39 = vcombine.high %v9777_v32, %v9777_v32  ;;  %v9785_v40 = vrot.slane %v9777_v32, 9  ;;  %v9805_v41 = vld.sshfl [vmem:[%s13671_s0 + $0x68] sm:$0x32 pattern:$0x76325410] }
 0x1de   : > { %8923 = vmatprep.subr.bf16.mxu0 %v11018_v22  ;;  %v4139_v17 = vcombine.low %v12720_v4, %v12924_v55  ;;  %v9782_v22 = vrot.slane %v9774_v3, 9  ;;  %v9776_v4 = vld.sshfl [vmem:[%s13671_s0 + $0x60] sm:$0x12 pattern:$0x76325410]  ;;  %v4119_v45 = vshrl.u32 %v9805_v41, 16 }
 0x1df   : > { %v9784_v35 = vrot.slane %v9776_v4, 9  ;;  %v3905_v52 = vrot.slane %v3874_v39, 7  ;;  %v11031_v56 = vld [vmem:[%s12212_s11 + $0x870] ss:$8 sps:$4 sm:$0xff]   ;;  %v11047_v3 = vld [vmem:[%s12212_s11 + $0x964] ss:$8 sps:$4 sm:$0xff]  }
 0x1e0   : > { %8971 = vmatpush2.bf16.msra.mxu1 %v11001_v54  ;;  %9815 = vst.sshfl [vmem:[#allocation2 + $0x98] sm:$0x33 pattern:$0x76325410] %v4139_v17  ;;  %v9783_v54 = vrot.slane %v9775_v19, 9  ;;  %v3894_v43 = vsel %vm12331_vm1, %v9782_v22, %v3893_v34  ;;  %v9813_v62 = vrot.slane %v4119_v45, 9 }
 0x1e1   : > { %8972 = vmatprep.subr.bf16.mxu1 %v11009_v36  ;;  %8924 = vmatpush2.bf16.msra.mxu0 %v11016_v60  ;;  %v3866_v36 = vcombine.high %v9776_v4, %v9776_v4  ;;  %v3897_v60 = vrot.slane %v3858_v25, 7  ;;  %v9830_v8 = vld.sshfl [vmem:[%s13671_s0 + $0x50] sm:$0x30 pattern:$0x76325410] }
 0x1e2   : > { %8925 = vmatprep.subr.bf16.mxu0 %v11024_v44  ;;  %v4026_v44 = vcombine.high %v9805_v41, %v9805_v41  ;;  %v11038_v33 = vld [vmem:[#allocation2 + $0x3c] ss:$100 sps:$4 sm:$0xff]   ;;  %v12980_v19 = vld.sshfl [vmem:[%s13671_s0 + $0x58] sm:$0x30 pattern:$0x76325410] }
 0x1e3   : > { %v3898_v50 = vsel %vm12331_vm1, %v9783_v54, %v3897_v60  ;;  %8980 = vmatprep.mubr.bf16.mxu1 %v11038_v33  ;;  %v12985_v22 = vld.sshfl [vmem:[%s13671_s0 + $0x68] sm:$0x30 pattern:$0x76325410]  ;;  %v11042_v25 = vld [vmem:[%s12212_s11 + $0x860] ss:$8 sps:$4 sm:$0xff]  }
 0x1e4   : > { %8973 = vmatpush2.bf16.msra.mxu1 %v11007_v49  ;;  %v3923_v20 = vcombine.low %v3894_v43, %v3898_v50  ;;  %v4124_v63 = vshrl.u32 %v4026_v44, 16  ;;  %v4127_v7 = vshll.u32 %v4026_v44, 16  ;;  %v11054_v4 = vld [vmem:[%s13671_s0 + $0x58] ss:$8 sps:$4 sm:$0x33]  }
 0x1e5   : > { %8974 = vmatprep.subr.bf16.mxu1 %v11015_v59  ;;  %8926 = vmatpush2.bf16.msra.mxu0 %v11022_v5  ;;  %v12967_v5 = vsel %vm12331_vm1, %v9785_v40, %v3905_v52  ;;  %9852 = vst.sshfl [vmem:[#allocation2 + $0x104] sm:$0x33 pattern:$0x76325410] %v11054_v4  ;;  %v11061_v32 = vld [vmem:[%s12212_s11 + $0x954] ss:$8 sps:$4 sm:$0xff]  }
 0x1e6   : > { %9001 = vmatprep.subr.bf16.mxu0 %v11033_v14  ;;  %v11028_v14 = vld [vmem:[#allocation2 + $0x30] ss:$100 sps:$4 sm:$0xff]   ;;  %9788 = vst.sshfl [vmem:[#allocation2 + $0xf8] sm:$0x33 pattern:$0x76325410] %v3923_v20 }
 0x1e7   : > { %v8611_v31 = vpop.f32.mrf.mxu0  ;;  %v4126_v17 = vrot.slane %v4124_v63, 7  ;;  %v11064_v34 = vld [vmem:[%s12212_s11 + $0x844] ss:$8 sps:$4 sm:$0xff]   ;;  %v11062_v39 = vld [vmem:[%s12212_s11 + $0x840] ss:$8 sps:$4 sm:$0xff]  }
 0x1e8   : > { %v8612_v18 = vadd.f32 %v8611_v31, %v12907_v6  ;;  %8975 = vmatpush2.bf16.msra.mxu1 %v11013_v15  ;;  %v3901_v31 = vrot.slane %v3866_v36, 7  ;;  %v11030_v15 = vld [vmem:[#allocation2 + $0x34] ss:$100 sps:$4 sm:$0xff]   ;;  %v11051_v36 = vld [vmem:[%s12212_s11 + $0x850] ss:$8 sps:$4 sm:$0xff]  }
 0x1e9   : > { %v8613_v2 = vpop.f32.mrf.mxu0  ;;  %8976 = vmatprep.subr.bf16.mxu1 %v11021_v30  ;;  %v11039_v30 = vld [vmem:[%s12212_s11 + $0x970] ss:$8 sps:$4 sm:$0xff]   ;;  %8927 = vmatprep.mubr.bf16.mxu0 %v11030_v15  ;;  %v4129_v21 = vor.u32 %v4127_v7, %v4126_v17  ;;  %v11065_v60 = vld [vmem:[%s12212_s11 + $0x940] ss:$8 sps:$4 sm:$0xff]   ;;  %v11085_v33 = vld [vmem:[%s12212_s11 + $0x914] ss:$8 sps:$4 sm:$0xff]  }
 0x1ea   : > { %v8614_v24 = vadd.f32 %v8613_v2, %v12918_v9  ;;  %v3902_v57 = vsel %vm12331_vm1, %v9784_v35, %v3901_v31  ;;  %v11044_v2 = vld [vmem:[%s12212_s11 + $0x864] ss:$8 sps:$4 sm:$0xff]   ;;  %8928 = vmatmul.mubr.bf16.vlgmr.msra.gmra.mxu0 %v11028_v14  ;;  %v11073_v31 = vld [vmem:[%s12212_s11 + $0x934] ss:$8 sps:$4 sm:$0xff]   ;;  %v11068_v44 = vld [vmem:[%s12212_s11 + $0x830] ss:$8 sps:$4 sm:$0xff]  }
 0x1eb   : > { %v8615_v16 = vpop.f32.mrf.mxu0  ;;  %v4708_v53 = vcombine.low %v3898_v50, %v3902_v57  ;;  %9002 = vmatpush1.bf16.msra.mxu0 %v11031_v56  ;;  %v12996_v54 = vsel %vm12391_vm4, %v9813_v62, %v4129_v21  ;;  %v11067_v35 = vld [vmem:[%s12212_s11 + $0x944] ss:$8 sps:$4 sm:$0xff]   ;;  %v11071_v45 = vld [vmem:[%s12212_s11 + $0x930] ss:$8 sps:$4 sm:$0xff]   ;;  %v11074_v50 = vld [vmem:[%s12212_s11 + $0x820] ss:$8 sps:$4 sm:$0xff]  }
 0x1ec   : > { %v8616_v28 = vadd.f32 %v8615_v16, %v12907_v6  ;;  %8977 = vmatpush2.bf16.msra.mxu1 %v11019_v12  ;;  %v3931_v16 = vcombine.low %v3902_v57, %v12967_v5  ;;  %9003 = vmatprep.subr.bf16.mxu0 %v11044_v2  ;;  %v11077_v52 = vld [vmem:[%s12212_s11 + $0x920] ss:$8 sps:$4 sm:$0xff]   ;;  %v11082_v56 = vld [vmem:[%s12212_s11 + $0x814] ss:$8 sps:$4 sm:$0xff]   ;;  %v11083_v57 = vld [vmem:[%s12212_s11 + $0x910] ss:$8 sps:$4 sm:$0xff]  }
 0x1ed   : > { %v8664_v27 = vpop.f32.mrf.mxu1  ;;  %v8617_v29 = vpop.f32.mrf.mxu0  ;;  %8978 = vmatprep.subr.bf16.mxu1 %v11027_v23  ;;  %9900 = vst.sshfl [vmem:[#allocation2 + $0x10c] sm:$0x33 pattern:$0x76325410] %v4708_v53  ;;  %v9836_v23 = vcombine.high %v9830_v8, %v12980_v19  ;;  %v11088_v20 = vld [vmem:[%s12212_s11 + $0x804] ss:$8 sps:$4 sm:$0xff]  }
 0x1ee   : > { %v12945_v37 = vadd.f32 %v8664_v27, %v8612_v18  ;;  %v8618_v49 = vadd.f32 %v8617_v29, %v12918_v9  ;;  %9789 = vst.sshfl [vmem:[#allocation2 + $0x15c] sm:$0x33 pattern:$0x76325410] %v3931_v16  ;;  %v11045_v29 = vld [vmem:[%s12212_s11 + $0x960] ss:$8 sps:$4 sm:$0xff]  }
 0x1ef   : > { %v8666_v10 = vpop.f32.mrf.mxu1  ;;  %9840 = vst.sshfl [vmem:[#allocation2 + $0x100] sm:$0x33 pattern:$0x76325410] %v9836_v23  ;;  %9004 = vmatpush1.bf16.msra.mxu0 %v11042_v25  ;;  %v11091_v62 = vld [vmem:[%s12212_s11 + $0x904] ss:$8 sps:$4 sm:$0xff]  }
 0x1f0   : > { %v12954_v48 = vadd.f32 %v8666_v10, %v8614_v24  ;;  %8979 = vmatpush2.bf16.msra.mxu1 %v11025_v42  ;;  %v9837_v24 = vcombine.high %v12760_v11, %v12985_v22  ;;  %v11055_v27 = vld [vmem:[%s13671_s0 + $0x68] ss:$8 sps:$4 sm:$0x33]   ;;  %v4155_v11 = vcombine.low %v12788_v47, %v12996_v54  ;;  %v11070_v42 = vld [vmem:[%s12212_s11 + $0x834] ss:$8 sps:$4 sm:$0xff]  }
 0x1f1   : > { %v8668_v59 = vpop.f32.mrf.mxu1  ;;  %9054 = vmatprep.subr.bf16.mxu1 %v11041_v46  ;;  %9853 = vst.sshfl [vmem:[#allocation2 + $0x168] sm:$0x33 pattern:$0x76325410] %v11055_v27  ;;  %v11059_v47 = vld [vmem:[%s12212_s11 + $0x950] ss:$8 sps:$4 sm:$0xff]  }
 0x1f2   : > { %v12963_v13 = vadd.f32 %v8668_v59, %v8616_v28  ;;  %v11053_v28 = vld [vmem:[%s12212_s11 + $0x854] ss:$8 sps:$4 sm:$0xff]   ;;  %9841 = vst.sshfl [vmem:[#allocation2 + $0x164] sm:$0x33 pattern:$0x76325410] %v9837_v24 }
 0x1f3   : > { %v8670_v18 = vpop.f32.mrf.mxu1  ;;  %8981 = vmatmul.mubr.bf16.vlgmr.msra.gmra.mxu1 %v11036_v1  ;;  %9817 = vst.sshfl [vmem:[#allocation2 + $0x160] sm:$0x33 pattern:$0x76325410] %v4155_v11  ;;  %9005 = vmatprep.subr.bf16.mxu0 %v11053_v28  ;;  %v11076_v46 = vld [vmem:[%s12212_s11 + $0x824] ss:$8 sps:$4 sm:$0xff]  }
 0x1f4   : > { %v12975_v12 = vadd.f32 %v8670_v18, %v8618_v49  ;;  %9055 = vmatpush1.bf16.msra.mxu1 %v11039_v30  ;;  %9006 = vmatpush1.bf16.msra.mxu0 %v11051_v36  ;;  %v11079_v49 = vld [vmem:[%s12212_s11 + $0x924] ss:$8 sps:$4 sm:$0xff]   ;;  %v11080_v59 = vld [vmem:[%s12212_s11 + $0x810] ss:$8 sps:$4 sm:$0xff]   ;;  %v11086_v63 = vld [vmem:[%s12212_s11 + $0x800] ss:$8 sps:$4 sm:$0xff]  }
 0x1f5   : > { %9056 = vmatprep.subr.bf16.mxu1 %v11047_v3  ;;  %9007 = vmatprep.subr.bf16.mxu0 %v11064_v34  ;;  %v11050_v43 = vld [vmem:[#allocation2 + $0xf8] ss:$100 sps:$4 sm:$0xff]   ;;  %v11094_v2 = vld [vmem:[%s12212_s11 + $0x8f4] ss:$8 sps:$4 sm:$0xff]   ;;  %v11092_v8 = vld [vmem:[%s12212_s11 + $0x8f0] ss:$8 sps:$4 sm:$0xff]  }
 0x1f6   : > { %v11089_v1 = vld [vmem:[%s12212_s11 + $0x900] ss:$8 sps:$4 sm:$0xff]   ;;  %v11097_v7 = vld [vmem:[%s12212_s11 + $0x9f4] ss:$8 sps:$4 sm:$0xff]   ;;  %v11095_v53 = vld [vmem:[%s12212_s11 + $0x9f0] ss:$8 sps:$4 sm:$0xff]  }
 0x1f7   : > { %v11100_v14 = vld [vmem:[%s12212_s11 + $0x8e4] ss:$8 sps:$4 sm:$0xff]   ;;  %v11098_v30 = vld [vmem:[%s12212_s11 + $0x8e0] ss:$8 sps:$4 sm:$0xff]   ;;  %v11106_v18 = vld [vmem:[%s12212_s11 + $0x8d4] ss:$8 sps:$4 sm:$0xff]  }
 0x1f8   : > { %9057 = vmatpush1.bf16.msra.mxu1 %v11045_v29  ;;  %v11056_v40 = vld [vmem:[#allocation2 + $0x104] ss:$100 sps:$4 sm:$0xff]   ;;  %9008 = vmatpush1.bf16.msra.mxu0 %v11062_v39  ;;  %v11103_v15 = vld [vmem:[%s12212_s11 + $0x9e4] ss:$8 sps:$4 sm:$0xff]   ;;  %v11101_v16 = vld [vmem:[%s12212_s11 + $0x9e0] ss:$8 sps:$4 sm:$0xff]  }
 0x1f9   : > { %9058 = vmatprep.subr.bf16.mxu1 %v11061_v32  ;;  %v11058_v41 = vld [vmem:[#allocation2 + $0x100] ss:$100 sps:$4 sm:$0xff]   ;;  %8990 = vmatprep.mubr.bf16.mxu1 %v11056_v40  ;;  %v11112_v24 = vld [vmem:[%s12212_s11 + $0x8c4] ss:$8 sps:$4 sm:$0xff]   ;;  %v11110_v36 = vld [vmem:[%s12212_s11 + $0x8c0] ss:$8 sps:$4 sm:$0xff]  }
 0x1fa   : > { %v11048_v10 = vld [vmem:[#allocation2 + $0xfc] ss:$100 sps:$4 sm:$0xff]   ;;  %9009 = vmatprep.subr.bf16.mxu0 %v11070_v42  ;;  %v11109_v3 = vld [vmem:[%s12212_s11 + $0x9d4] ss:$8 sps:$4 sm:$0xff]   ;;  %v11113_v34 = vld [vmem:[%s12212_s11 + $0x9c0] ss:$8 sps:$4 sm:$0xff]  }
 0x1fb   : > { %8937 = vmatprep.mubr.bf16.mxu0 %v11048_v10  ;;  %8991 = vmatmul.mubr.bf16.gmra.mxu1 %v11058_v41  ;;  %v11104_v21 = vld [vmem:[%s12212_s11 + $0x8d0] ss:$8 sps:$4 sm:$0xff]   ;;  %v11115_v4 = vld [vmem:[%s12212_s11 + $0x9c4] ss:$8 sps:$4 sm:$0xff]  }
 0x1fc   : > { %9059 = vmatpush1.bf16.msra.mxu1 %v11059_v47  ;;  %8938 = vmatmul.mubr.bf16.gmra.mxu0 %v11050_v43  ;;  %v11107_v23 = vld [vmem:[%s12212_s11 + $0x9d0] ss:$8 sps:$4 sm:$0xff]   ;;  %v9862_v27 = vld.sshfl [vmem:[%s13671_s0 + $0x18] sm:$0x13 pattern:$0x76325410] }
 0x1fd   : > { %9060 = vmatprep.subr.bf16.mxu1 %v11067_v35  ;;  %9010 = vmatpush1.bf16.msra.mxu0 %v11068_v44  ;;  %v9863_v11 = vld.sshfl [vmem:[%s13671_s0 + $0x20] sm:$0x13 pattern:$0x76325410]  ;;  %v4371_v28 = vcombine.high %v9862_v27, %v9862_v27  ;;  %v4429_v29 = vshrl.u32 %v9862_v27, 16  ;;  %v4432_v32 = vshll.u32 %v9862_v27, 16 }
 0x1fe   : > { %9011 = vmatprep.subr.bf16.mxu0 %v11076_v46  ;;  %v9864_v35 = vld.sshfl [vmem:[%s13671_s0 + $0x28] sm:$0x13 pattern:$0x76325410]  ;;  %v4379_v39 = vcombine.high %v9863_v11, %v9863_v11  ;;  %v4446_v40 = vshll.u32 %v9863_v11, 16 }
 0x1ff   : > { %v9865_v10 = vld.sshfl [vmem:[%s13671_s0 + $0x30] sm:$0x13 pattern:$0x76325410]  ;;  %v4387_v43 = vcombine.high %v9864_v35, %v9864_v35  ;;  %v4434_v44 = vrot.slane %v4432_v32, 7 }
 0x200   : > { %9061 = vmatpush1.bf16.msra.mxu1 %v11065_v60  ;;  %v4443_v60 = vshrl.u32 %v9863_v11, 16  ;;  %v4395_v46 = vcombine.high %v9865_v10, %v9865_v10  ;;  %v9885_v32 = vld.sshfl [vmem:[%s13671_s0 + $0x30] sm:$0x12 pattern:$0x76325410] }
 0x201   : > { %9062 = vmatprep.subr.bf16.mxu1 %v11073_v31  ;;  %9012 = vmatpush1.bf16.msra.mxu0 %v11074_v50  ;;  %v4431_v31 = vrot.slane %v4429_v29, 6 }
 0x202   : > { %9013 = vmatprep.subr.bf16.mxu0 %v11082_v56  ;;  %v4445_v50 = vrot.slane %v4443_v60, 6  ;;  %v11121_v56 = vld [vmem:[%s12212_s11 + $0x9b4] ss:$8 sps:$4 sm:$0xff]   ;;  %v4480_v29 = vshll.u32 %v4395_v46, 16  ;;  %v4627_v60 = vcombine.high %v9885_v32, %v9885_v32 }
 0x204   : > { %9063 = vmatpush1.bf16.msra.mxu1 %v11071_v45  ;;  %v11118_v45 = vld [vmem:[%s12212_s11 + $0x8b4] ss:$8 sps:$4 sm:$0xff]  }
 0x205   : > { %9064 = vmatprep.subr.bf16.mxu1 %v11079_v49  ;;  %9014 = vmatpush1.bf16.msra.mxu0 %v11080_v59  ;;  %v4438_v49 = vshll.u32 %v4371_v28, 16  ;;  %v4452_v59 = vshll.u32 %v4379_v39, 16  ;;  %v4474_v28 = vshll.u32 %v9865_v10, 16 }
 0x206   : > { %9015 = vmatprep.subr.bf16.mxu0 %v11088_v20  ;;  %v4460_v20 = vshll.u32 %v9864_v35, 16 }
 0x208   : > { %9065 = vmatpush1.bf16.msra.mxu1 %v11077_v52  ;;  %v4448_v52 = vrot.slane %v4446_v40, 7  ;;  %v9893_v40 = vrot.slane %v9885_v32, 9 }
 0x209   : > { %9066 = vmatprep.subr.bf16.mxu1 %v11085_v33  ;;  %9016 = vmatpush1.bf16.msra.mxu0 %v11086_v63  ;;  %v4435_v33 = vor.u32 %v4434_v44, %v4431_v31  ;;  %v11119_v63 = vld [vmem:[%s12212_s11 + $0x9b0] ss:$8 sps:$4 sm:$0xff]  }
 0x20a   : > { %9017 = vmatprep.subr.bf16.mxu0 %v11094_v2  ;;  %v4440_v2 = vrot.slane %v4438_v49, 7  ;;  %v9911_v44 = vld.sshfl [vmem:[%s13671_s0 + $0x20] sm:$0x32 pattern:$0x76325410]  ;;  %v4674_v49 = vrot.slane %v4627_v60, 7 }
 0x20c   : > { %9067 = vmatpush1.bf16.msra.mxu1 %v11083_v57  ;;  %v4457_v57 = vshrl.u32 %v9864_v35, 16 }
 0x20d   : > { %9068 = vmatprep.subr.bf16.mxu1 %v11091_v62  ;;  %9018 = vmatpush2.bf16.msra.mxu0 %v11092_v8  ;;  %v11116_v62 = vld [vmem:[%s12212_s11 + $0x8b0] ss:$8 sps:$4 sm:$0xff]   ;;  %v4466_v8 = vshll.u32 %v4387_v43, 16  ;;  %v4476_v43 = vrot.slane %v4474_v28, 7  ;;  %v11139_v28 = vld [vmem:[%s12212_s11 + $0x984] ss:$8 sps:$4 sm:$0xff]  }
 0x20e   : > { %9019 = vmatprep.subr.bf16.mxu0 %v11100_v14  ;;  %v11124_v14 = vld [vmem:[%s12212_s11 + $0x8a4] ss:$8 sps:$4 sm:$0xff]  }
 0x210   : > { %9069 = vmatpush1.bf16.msra.mxu1 %v11089_v1 }
 0x211   : > { %9070 = vmatprep.subr.bf16.mxu1 %v11097_v7  ;;  %9020 = vmatpush2.bf16.msra.mxu0 %v11098_v30  ;;  %v4449_v7 = vor.u32 %v4448_v52, %v4445_v50  ;;  %v9913_v52 = vld.sshfl [vmem:[%s13671_s0 + $0x30] sm:$0x32 pattern:$0x76325410] }
 0x212   : > { %9021 = vmatprep.subr.bf16.mxu0 %v11106_v18  ;;  %v4459_v18 = vrot.slane %v4457_v57, 6  ;;  %v4482_v57 = vrot.slane %v4480_v29, 7 }
 0x214   : > { %9071 = vmatpush2.bf16.msra.mxu1 %v11095_v53  ;;  %v4471_v53 = vshrl.u32 %v9865_v10, 16  ;;  %v11130_v10 = vld [vmem:[%s12212_s11 + $0x894] ss:$8 sps:$4 sm:$0xff]  }
 0x215   : > { %9072 = vmatprep.subr.bf16.mxu1 %v11103_v15  ;;  %9022 = vmatpush2.bf16.msra.mxu0 %v11104_v21 }
 0x216   : > { %9023 = vmatprep.subr.bf16.mxu0 %v11112_v24  ;;  %v4462_v24 = vrot.slane %v4460_v20, 7  ;;  %v4763_v20 = vcombine.high %v9911_v44, %v9911_v44 }
 0x217   : > { %v8621_v17 = vpop.f32.mrf.mxu0 }
 0x218   : > { %9073 = vmatpush2.bf16.msra.mxu1 %v11101_v16  ;;  %v8622_v47 = vadd.f32 %v8621_v17, %v12907_v6  ;;  %v4436_v16 = vrot.slane %v4435_v33, 2  ;;  %v4454_v17 = vrot.slane %v4452_v59, 7  ;;  %v4463_v39 = vor.u32 %v4462_v24, %v4459_v18  ;;  %v11133_v33 = vld [vmem:[%s12212_s11 + $0x994] ss:$8 sps:$4 sm:$0xff]  }
 0x219   : > { %v8623_v25 = vpop.f32.mrf.mxu0  ;;  %9074 = vmatprep.subr.bf16.mxu1 %v11109_v3  ;;  %9024 = vmatpush2.bf16.msra.mxu0 %v11110_v36  ;;  %v11127_v3 = vld [vmem:[%s12212_s11 + $0x9a4] ss:$8 sps:$4 sm:$0xff]  }
 0x21a   : > { %v8624_v41 = vadd.f32 %v8623_v25, %v12918_v9  ;;  %v4473_v25 = vrot.slane %v4471_v53, 6  ;;  %9025 = vmatprep.subr.bf16.mxu0 %v11118_v45  ;;  %v4441_v11 = vsel %vm12290_vm12, %v4436_v16, %v4440_v2  ;;  %v4464_v46 = vrot.slane %v4463_v39, 2  ;;  %v9941_v53 = vld.sshfl [vmem:[%s13671_s0 + $0x30] sm:$0x30 pattern:$0x76325410] }
 0x21b   : > { %v13055_v42 = vpop.f32.mrf.mxu0  ;;  %v4779_v2 = vcombine.high %v9913_v52, %v9913_v52 }
 0x21c   : > { %9075 = vmatpush2.bf16.msra.mxu1 %v11107_v23  ;;  %v4450_v23 = vrot.slane %v4449_v7, 2  ;;  %v4477_v59 = vor.u32 %v4476_v43, %v4473_v25  ;;  %v4831_v25 = vshrl.u32 %v4763_v20, 16 }
 0x21d   : > { %9076 = vmatprep.subr.bf16.mxu1 %v11115_v4  ;;  %v13067_v30 = vpop.f32.mrf.mxu0  ;;  %v4468_v4 = vrot.slane %v4466_v8, 7  ;;  %9026 = vmatpush2.bf16.msra.mxu0 %v11116_v62  ;;  %v9939_v8 = vld.sshfl [vmem:[%s13671_s0 + $0x20] sm:$0x30 pattern:$0x76325410]  ;;  %v4857_v32 = vshrl.u32 %v4779_v2, 16 }
 0x21e   : > { %v13081_v35 = vsel %vm12290_vm12, %v4450_v23, %v4454_v17  ;;  %9027 = vmatprep.subr.bf16.mxu0 %v11124_v14  ;;  %v11131_v14 = vld [vmem:[%s12212_s11 + $0x990] ss:$8 sps:$4 sm:$0xff]   ;;  %v4478_v16 = vrot.slane %v4477_v59, 2  ;;  %v11136_v23 = vld [vmem:[%s12212_s11 + $0x884] ss:$8 sps:$4 sm:$0xff]   ;;  %v4833_v60 = vrot.slane %v4831_v25, 7 }
 0x21f   : > { %v4540_v31 = vcombine.low %v4441_v11, %v13081_v35  ;;  %v4834_v11 = vshll.u32 %v4763_v20, 16 }
 0x220   : > { %9077 = vmatpush2.bf16.msra.mxu1 %v11113_v34  ;;  %v11122_v34 = vld [vmem:[%s12212_s11 + $0x8a0] ss:$8 sps:$4 sm:$0xff]   ;;  %v13120_v29 = vsel %vm12290_vm12, %v4478_v16, %v4482_v57  ;;  %v11151_v57 = vld [vmem:[%s12212_s11 + $0xb74] ss:$8 sps:$4 sm:$0xff]  }
 0x221   : > { %9078 = vmatprep.subr.bf16.mxu1 %v11121_v56  ;;  %9870 = vst.sshfl [vmem:[#allocation2 + $0x40] sm:$0x33 pattern:$0x76325410] %v4540_v31  ;;  %9028 = vmatpush2.bf16.msra.mxu0 %v11122_v34  ;;  %v4859_v31 = vrot.slane %v4857_v32, 7 }
 0x222   : > { %9029 = vmatprep.subr.bf16.mxu0 %v11130_v10  ;;  %v11137_v10 = vld [vmem:[%s12212_s11 + $0x980] ss:$8 sps:$4 sm:$0xff]  }
 0x223   : > { %v8674_v1 = vpop.f32.mrf.mxu1 }
 0x224   : > { %v13065_v15 = vadd.f32 %v8674_v1, %v8622_v47  ;;  %v11125_v47 = vld [vmem:[%s12212_s11 + $0x9a0] ss:$8 sps:$4 sm:$0xff]   ;;  %9079 = vmatpush2.bf16.msra.mxu1 %v11119_v63  ;;  %v11128_v63 = vld [vmem:[%s12212_s11 + $0x890] ss:$8 sps:$4 sm:$0xff]   ;;  %v13105_v1 = vsel %vm12331_vm1, %v9893_v40, %v4674_v49 }
 0x225   : > { %v8676_v21 = vpop.f32.mrf.mxu1  ;;  %9080 = vmatprep.subr.bf16.mxu1 %v11127_v3  ;;  %v4700_v17 = vcombine.low %v12893_v38, %v13105_v1  ;;  %v4852_v38 = vshrl.u32 %v9913_v52, 16  ;;  %v9866_v40 = vld.sshfl [vmem:[%s13671_s0 + $0x58] sm:$0x13 pattern:$0x76325410]  ;;  %9030 = vmatpush2.bf16.msra.mxu0 %v11128_v63 }
 0x226   : > { %v13070_v27 = vadd.f32 %v8676_v21, %v8624_v41  ;;  %v9910_v41 = vld.sshfl [vmem:[%s13671_s0 + $0x18] sm:$0x32 pattern:$0x76325410]  ;;  %v11145_v52 = vld [vmem:[%s12212_s11 + $0xa74] ss:$8 sps:$4 sm:$0xff]   ;;  %9031 = vmatprep.subr.bf16.mxu0 %v11136_v23 }
 0x227   : > { %v8717_v36 = vpop.f32.mrf.mxu0  ;;  %v4755_v56 = vcombine.high %v9910_v41, %v9910_v41  ;;  %v4813_v62 = vshrl.u32 %v9910_v41, 16  ;;  %9899 = vst.sshfl [vmem:[#allocation2 + $0xa8] sm:$0x33 pattern:$0x76325410] %v4700_v17  ;;  %v9921_v43 = vrot.slane %v4852_v38, 9 }
 0x228   : > { %v13092_v50 = vadd.f32 %v8717_v36, %v12945_v37  ;;  %v13101_v37 = vsel %vm12290_vm12, %v4464_v46, %v4468_v4  ;;  %9081 = vmatpush2.bf16.msra.mxu1 %v11125_v47  ;;  %v4826_v4 = vshrl.u32 %v9911_v44, 16  ;;  %v4860_v36 = vshll.u32 %v4779_v2, 16  ;;  %v11134_v41 = vld [vmem:[%s12212_s11 + $0x880] ss:$8 sps:$4 sm:$0xff]  }
 0x229   : > { %v8719_v45 = vpop.f32.mrf.mxu0  ;;  %v4818_v7 = vshrl.u32 %v4755_v56, 16  ;;  %v9918_v18 = vrot.slane %v4813_v62, 9  ;;  %v4821_v3 = vshll.u32 %v4755_v56, 16  ;;  %9082 = vmatprep.subr.bf16.mxu1 %v11133_v33  ;;  %v4548_v34 = vcombine.low %v13101_v37, %v13120_v29  ;;  %9032 = vmatpush2.bf16.msra.mxu0 %v11134_v41 }
 0x22a   : > { %v9919_v39 = vrot.slane %v4826_v4, 9  ;;  %v9946_v44 = vcombine.high %v12888_v58, %v9939_v8  ;;  %v9947_v46 = vcombine.high %v12898_v61, %v9941_v53  ;;  %v4836_v33 = vor.u32 %v4834_v11, %v4833_v60  ;;  %v9867_v61 = vld.sshfl [vmem:[%s13671_s0 + $0x60] sm:$0x13 pattern:$0x76325410]  ;;  %9107 = vmatprep.subr.bf16.mxu0 %v11145_v52 }
 0x22b   : > { %v8721_v21 = vpop.f32.mrf.mxu0  ;;  %v4820_v24 = vrot.slane %v4818_v7, 7  ;;  %9871 = vst.sshfl [vmem:[#allocation2 + $0xa4] sm:$0x33 pattern:$0x76325410] %v4548_v34  ;;  %v13135_v59 = vadd.f32 %v8719_v45, %v12954_v48  ;;  %v4485_v20 = vshrl.u32 %v9866_v40, 16  ;;  %v4862_v62 = vor.u32 %v4860_v36, %v4859_v31 }
 0x22c   : > { %9083 = vmatpush2.bf16.msra.mxu1 %v11131_v14  ;;  %9950 = vst.sshfl [vmem:[#allocation2 + $0x4c] sm:$0x33 pattern:$0x76325410] %v9946_v44  ;;  %v13139_v58 = vadd.f32 %v8721_v21, %v12963_v13  ;;  %v4488_v63 = vshll.u32 %v9866_v40, 16  ;;  %v13146_v2 = vsel %vm12391_vm4, %v9919_v39, %v4836_v33  ;;  %v4403_v7 = vcombine.high %v9866_v40, %v9866_v40 }
 0x22d   : > { %v4823_v47 = vor.u32 %v4821_v3, %v4820_v24  ;;  %v8723_v49 = vpop.f32.mrf.mxu0  ;;  %9084 = vmatprep.subr.bf16.mxu1 %v11139_v28  ;;  %9951 = vst.sshfl [vmem:[#allocation2 + $0xb0] sm:$0x33 pattern:$0x76325410] %v9947_v46  ;;  %v4411_v8 = vcombine.high %v9867_v61, %v9867_v61  ;;  %v13156_v13 = vsel %vm12391_vm4, %v9921_v43, %v4862_v62  ;;  %v4487_v17 = vrot.slane %v4485_v20, 6 }
 0x22e   : > { %v13149_v48 = vadd.f32 %v8723_v49, %v12975_v12  ;;  %v9868_v45 = vld.sshfl [vmem:[%s13671_s0 + $0x68] sm:$0x13 pattern:$0x76325410]  ;;  %v4924_v12 = vcombine.low %v12924_v55, %v13156_v13  ;;  %v4494_v24 = vshll.u32 %v4403_v7, 16  ;;  %v4499_v4 = vshrl.u32 %v9867_v61, 16 }
 0x22f   : > { %v4824_v56 = vsel %vm12391_vm4, %v9918_v18, %v4823_v47  ;;  %v9869_v14 = vld.sshfl [vmem:[%s13671_s0 + $0x70] sm:$0x13 pattern:$0x76325410]  ;;  %v4419_v16 = vcombine.high %v9868_v45, %v9868_v45  ;;  %v4490_v18 = vrot.slane %v4488_v63, 7  ;;  %v4502_v25 = vshll.u32 %v9867_v61, 16 }
 0x230   : > { %v4916_v53 = vcombine.low %v4824_v56, %v13146_v2  ;;  %9085 = vmatpush2.bf16.msra.mxu1 %v11137_v10  ;;  %v9889_v3 = vld.sshfl [vmem:[%s13671_s0 + $0x70] sm:$0x12 pattern:$0x76325410]  ;;  %v4427_v23 = vcombine.high %v9869_v14, %v9869_v14  ;;  %v11143_v11 = vld [vmem:[%s12212_s11 + $0xa70] ss:$8 sps:$4 sm:$0xff]  }
 0x231   : > { %9160 = vmatprep.subr.bf16.mxu1 %v11151_v57  ;;  %9927 = vst.sshfl [vmem:[#allocation2 + $0xac] sm:$0x33 pattern:$0x76325410] %v4924_v12  ;;  %v4491_v28 = vor.u32 %v4490_v18, %v4487_v17  ;;  %v4508_v55 = vshll.u32 %v4411_v8, 16  ;;  %v4513_v38 = vshrl.u32 %v9868_v45, 16  ;;  %v4659_v39 = vcombine.high %v9889_v3, %v9889_v3 }
 0x232   : > { %9926 = vst.sshfl [vmem:[#allocation2 + $0x48] sm:$0x33 pattern:$0x76325410] %v4916_v53  ;;  %v4516_v32 = vshll.u32 %v9868_v45, 16  ;;  %v4496_v47 = vrot.slane %v4494_v24, 7 }
 0x233   : > { %v11140_v36 = vld [vmem:[#allocation2 + $0x40] ss:$100 sps:$4 sm:$0xff]   ;;  %v11154_v40 = vld [vmem:[%s12212_s11 + $0xa64] ss:$8 sps:$4 sm:$0xff]   ;;  %v4492_v41 = vrot.slane %v4491_v28, 2  ;;  %v4501_v10 = vrot.slane %v4499_v4, 6 }
 0x234   : > { %v11142_v34 = vld [vmem:[#allocation2 + $0x44] ss:$100 sps:$4 sm:$0xff]   ;;  %v4504_v43 = vrot.slane %v4502_v25, 7  ;;  %v4510_v31 = vrot.slane %v4508_v55, 7  ;;  %v11152_v49 = vld [vmem:[%s12212_s11 + $0xa60] ss:$8 sps:$4 sm:$0xff]  }
 0x235   : > { %v9914_v44 = vld.sshfl [vmem:[%s13671_s0 + $0x58] sm:$0x32 pattern:$0x76325410]  ;;  %9033 = vmatprep.mubr.bf16.mxu0 %v11142_v34  ;;  %v4518_v52 = vrot.slane %v4516_v32, 7  ;;  %v4522_v56 = vshll.u32 %v4419_v16, 16  ;;  %v4497_v57 = vsel %vm12290_vm12, %v4492_v41, %v4496_v47 }
 0x236   : > { %v13178_v46 = vld.sshfl [vmem:[%s13671_s0 + $0x60] sm:$0x32 pattern:$0x76325410]  ;;  %v4527_v33 = vshrl.u32 %v9869_v14, 16  ;;  %9034 = vmatmul.mubr.bf16.vlgmr.msra.gmra.mxu0 %v11140_v36  ;;  %v4505_v20 = vor.u32 %v4504_v43, %v4501_v10  ;;  %v4530_v62 = vshll.u32 %v9869_v14, 16  ;;  %v4787_v25 = vcombine.high %v9914_v44, %v9914_v44 }
 0x237   : > { %v8727_v21 = vpop.f32.mrf.mxu0  ;;  %v4536_v61 = vshll.u32 %v4427_v23, 16  ;;  %v11163_v63 = vld [vmem:[%s12212_s11 + $0xa54] ss:$8 sps:$4 sm:$0xff]   ;;  %9108 = vmatpush1.bf16.msra.mxu0 %v11143_v11  ;;  %v11149_v7 = vld [vmem:[%s12212_s11 + $0xb70] ss:$8 sps:$4 sm:$0xff]   ;;  %v4524_v53 = vrot.slane %v4522_v56, 7  ;;  %v4795_v28 = vcombine.high %v13178_v46, %v13178_v46 }
 0x238   : > { %v13169_v60 = vadd.f32 %v8727_v21, %v13065_v15  ;;  %v4515_v15 = vrot.slane %v4513_v38, 6  ;;  %v9917_v45 = vld.sshfl [vmem:[%s13671_s0 + $0x70] sm:$0x32 pattern:$0x76325410]  ;;  %v4529_v12 = vrot.slane %v4527_v33, 6  ;;  %9109 = vmatprep.subr.bf16.mxu0 %v11154_v40 }
 0x239   : > { %v9897_v16 = vrot.slane %v9889_v3, 9  ;;  %v4506_v17 = vrot.slane %v4505_v20, 2  ;;  %v4532_v18 = vrot.slane %v4530_v62, 7  ;;  %v4538_v21 = vrot.slane %v4536_v61, 7  ;;  %v11146_v14 = vld [vmem:[#allocation2 + $0x48] ss:$100 sps:$4 sm:$0xff]   ;;  %v8729_v62 = vpop.f32.mrf.mxu0 }
 0x23a   : > { %v4519_v8 = vor.u32 %v4518_v52, %v4515_v15  ;;  %v4690_v24 = vrot.slane %v4659_v39, 7  ;;  %v11148_v23 = vld [vmem:[#allocation2 + $0x4c] ss:$100 sps:$4 sm:$0xff]   ;;  %v4811_v11 = vcombine.high %v9917_v45, %v9917_v45  ;;  %v11157_v55 = vld [vmem:[%s12212_s11 + $0xb64] ss:$8 sps:$4 sm:$0xff]   ;;  %v4865_v34 = vshrl.u32 %v9914_v44, 16 }
 0x23b   : > { %v13193_v38 = vsel %vm12290_vm12, %v4506_v17, %v4510_v31  ;;  %v4533_v3 = vor.u32 %v4532_v18, %v4529_v12  ;;  %v11161_v36 = vld [vmem:[%s12212_s11 + $0xa50] ss:$8 sps:$4 sm:$0xff]   ;;  %9086 = vmatprep.mubr.bf16.mxu1 %v11148_v23  ;;  %9110 = vmatpush1.bf16.msra.mxu0 %v11152_v49  ;;  %v4870_v41 = vshrl.u32 %v4787_v25, 16  ;;  %v4873_v49 = vshll.u32 %v4787_v25, 16  ;;  %v11172_v52 = vld [vmem:[%s12212_s11 + $0xa44] ss:$8 sps:$4 sm:$0xff]  }
 0x23c   : > { %v4520_v4 = vrot.slane %v4519_v8, 2  ;;  %v13197_v32 = vsel %vm12331_vm1, %v9897_v16, %v4690_v24  ;;  %v4556_v39 = vcombine.low %v4497_v57, %v13193_v38  ;;  %v9943_v10 = vld.sshfl [vmem:[%s13671_s0 + $0x60] sm:$0x30 pattern:$0x76325410]  ;;  %9087 = vmatmul.mubr.bf16.vlgmr.msra.gmra.mxu1 %v11146_v14  ;;  %9111 = vmatprep.subr.bf16.mxu0 %v11163_v63  ;;  %v9922_v44 = vrot.slane %v4865_v34, 9 }
 0x23d   : > { %v4716_v40 = vcombine.low %v12967_v5, %v13197_v32  ;;  %v9945_v43 = vld.sshfl [vmem:[%s13671_s0 + $0x70] sm:$0x30 pattern:$0x76325410]  ;;  %v4534_v31 = vrot.slane %v4533_v3, 2  ;;  %v4878_v15 = vshrl.u32 %v13178_v46, 16  ;;  %9161 = vmatpush1.bf16.msra.mxu1 %v11149_v7  ;;  %v9948_v24 = vcombine.high %v12980_v19, %v9943_v10 }
 0x23e   : > { %v13202_v47 = vsel %vm12290_vm12, %v4520_v4, %v4524_v53  ;;  %v11155_v5 = vld [vmem:[%s12212_s11 + $0xb60] ss:$8 sps:$4 sm:$0xff]   ;;  %9872 = vst.sshfl [vmem:[#allocation2 + $0x108] sm:$0x33 pattern:$0x76325410] %v4556_v39  ;;  %9162 = vmatprep.subr.bf16.mxu1 %v11157_v55  ;;  %v13227_v14 = vadd.f32 %v8729_v62, %v13070_v27 }
 0x23f   : > { %9901 = vst.sshfl [vmem:[#allocation2 + $0x170] sm:$0x33 pattern:$0x76325410] %v4716_v40  ;;  %v4872_v56 = vrot.slane %v4870_v41, 7  ;;  %v4883_v33 = vshrl.u32 %v4795_v28, 16  ;;  %v13218_v61 = vsel %vm12290_vm12, %v4534_v31, %v4538_v21  ;;  %9112 = vmatpush1.bf16.msra.mxu0 %v11161_v36  ;;  %v9949_v21 = vcombine.high %v12985_v22, %v9945_v43 }
 0x240   : > { %v4886_v57 = vshll.u32 %v4795_v28, 16  ;;  %v4904_v20 = vshrl.u32 %v9917_v45, 16  ;;  %v9923_v63 = vrot.slane %v4878_v15, 9  ;;  %v4909_v46 = vshrl.u32 %v4811_v11, 16  ;;  %v11169_v53 = vld [vmem:[%s12212_s11 + $0xb54] ss:$8 sps:$4 sm:$0xff]   ;;  %9113 = vmatprep.subr.bf16.mxu0 %v11172_v52 }
 0x241   : > { %v4912_v8 = vshll.u32 %v4811_v11, 16  ;;  %v4564_v7 = vcombine.low %v13202_v47, %v13218_v61  ;;  %v4875_v12 = vor.u32 %v4873_v49, %v4872_v56  ;;  %v4885_v16 = vrot.slane %v4883_v33, 7  ;;  %v11170_v45 = vld [vmem:[%s12212_s11 + $0xa40] ss:$8 sps:$4 sm:$0xff]   ;;  %v11178_v23 = vld [vmem:[%s12212_s11 + $0xa34] ss:$8 sps:$4 sm:$0xff]   ;;  %9163 = vmatpush1.bf16.msra.mxu1 %v11155_v5 }
 0x242   : > { %v9925_v17 = vrot.slane %v4904_v20, 9  ;;  %v4911_v18 = vrot.slane %v4909_v46, 7  ;;  %v11167_v28 = vld [vmem:[%s12212_s11 + $0xb50] ss:$8 sps:$4 sm:$0xff]   ;;  %9164 = vmatprep.subr.bf16.mxu1 %v11169_v53  ;;  %v11175_v19 = vld [vmem:[%s12212_s11 + $0xb44] ss:$8 sps:$4 sm:$0xff]   ;;  %v5325_v22 = vcombine.low %v13081_v35, %v13101_v37  ;;  %v5341_v36 = vcombine.low %v13193_v38, %v13202_v47 }
 0x243   : > { %9873 = vst.sshfl [vmem:[#allocation2 + $0x16c] sm:$0x33 pattern:$0x76325410] %v4564_v7  ;;  %v4876_v4 = vsel %vm12391_vm4, %v9922_v44, %v4875_v12  ;;  %v4888_v25 = vor.u32 %v4886_v57, %v4885_v16  ;;  %9114 = vmatpush1.bf16.msra.mxu0 %v11170_v45  ;;  %v11176_v55 = vld [vmem:[%s12212_s11 + $0xa30] ss:$8 sps:$4 sm:$0xff]  }
 0x244   : > { %v4914_v11 = vor.u32 %v4912_v8, %v4911_v18  ;;  %9952 = vst.sshfl [vmem:[#allocation2 + $0x114] sm:$0x33 pattern:$0x76325410] %v9948_v24  ;;  %v11184_v3 = vld [vmem:[%s12212_s11 + $0xa24] ss:$8 sps:$4 sm:$0xff]   ;;  %9115 = vmatprep.subr.bf16.mxu0 %v11178_v23 }
 0x245   : > { %9953 = vst.sshfl [vmem:[#allocation2 + $0x178] sm:$0x33 pattern:$0x76325410] %v9949_v21  ;;  %v13238_v27 = vsel %vm12391_vm4, %v9923_v63, %v4888_v25  ;;  %9165 = vmatpush1.bf16.msra.mxu1 %v11167_v28  ;;  %v11173_v37 = vld [vmem:[%s12212_s11 + $0xb40] ss:$8 sps:$4 sm:$0xff]  }
 0x246   : > { %v13246_v34 = vsel %vm12391_vm4, %v9925_v17, %v4914_v11  ;;  %v4932_v39 = vcombine.low %v4876_v4, %v13238_v27  ;;  %9982 = vst.sshfl [vmem:[#allocation2 + $0x54] sm:$0x33 pattern:$0x76325410] %v5325_v22  ;;  %9166 = vmatprep.subr.bf16.mxu1 %v11175_v19  ;;  %v11181_v38 = vld [vmem:[%s12212_s11 + $0xb34] ss:$8 sps:$4 sm:$0xff]  }
 0x247   : > { %v4940_v35 = vcombine.low %v12996_v54, %v13246_v34  ;;  %9984 = vst.sshfl [vmem:[#allocation2 + $0x11c] sm:$0x33 pattern:$0x76325410] %v5341_v36  ;;  %9116 = vmatpush1.bf16.msra.mxu0 %v11176_v55  ;;  %v11179_v47 = vld [vmem:[%s12212_s11 + $0xb30] ss:$8 sps:$4 sm:$0xff]  }
 0x248   : > { %9928 = vst.sshfl [vmem:[#allocation2 + $0x110] sm:$0x33 pattern:$0x76325410] %v4932_v39  ;;  %v11182_v40 = vld [vmem:[%s12212_s11 + $0xa20] ss:$8 sps:$4 sm:$0xff]   ;;  %9117 = vmatprep.subr.bf16.mxu0 %v11184_v3 }
 0x249   : > { %9929 = vst.sshfl [vmem:[#allocation2 + $0x174] sm:$0x33 pattern:$0x76325410] %v4940_v35  ;;  %v11158_v41 = vld [vmem:[#allocation2 + $0x10c] ss:$100 sps:$4 sm:$0xff]   ;;  %9167 = vmatpush1.bf16.msra.mxu1 %v11173_v37 }
 0x24a   : > { %v11160_v10 = vld [vmem:[#allocation2 + $0x108] ss:$100 sps:$4 sm:$0xff]   ;;  %9043 = vmatprep.mubr.bf16.mxu0 %v11158_v41  ;;  %9168 = vmatprep.subr.bf16.mxu1 %v11181_v38  ;;  %v11187_v43 = vld [vmem:[%s12212_s11 + $0xb24] ss:$8 sps:$4 sm:$0xff]   ;;  %v11185_v31 = vld [vmem:[%s12212_s11 + $0xb20] ss:$8 sps:$4 sm:$0xff]  }
 0x24b   : > { %v11190_v54 = vld [vmem:[%s12212_s11 + $0xa14] ss:$8 sps:$4 sm:$0xff]   ;;  %9044 = vmatmul.mubr.bf16.gmra.mxu0 %v11160_v10  ;;  %v11188_v44 = vld [vmem:[%s12212_s11 + $0xa10] ss:$8 sps:$4 sm:$0xff]   ;;  %v11196_v49 = vld [vmem:[%s12212_s11 + $0xa04] ss:$8 sps:$4 sm:$0xff]  }
 0x24c   : > { %9118 = vmatpush1.bf16.msra.mxu0 %v11182_v40  ;;  %v11164_v15 = vld [vmem:[#allocation2 + $0x114] ss:$100 sps:$4 sm:$0xff]   ;;  %v11193_v5 = vld [vmem:[%s12212_s11 + $0xb14] ss:$8 sps:$4 sm:$0xff]   ;;  %v11191_v57 = vld [vmem:[%s12212_s11 + $0xb10] ss:$8 sps:$4 sm:$0xff]  }
 0x24d   : > { %9169 = vmatpush1.bf16.msra.mxu1 %v11179_v47  ;;  %9119 = vmatprep.subr.bf16.mxu0 %v11190_v54  ;;  %v11194_v56 = vld [vmem:[%s12212_s11 + $0xa00] ss:$8 sps:$4 sm:$0xff]   ;;  %v11202_v33 = vld [vmem:[%s12212_s11 + $0xaf4] ss:$8 sps:$4 sm:$0xff]   ;;  %v11199_v20 = vld [vmem:[%s12212_s11 + $0xb04] ss:$8 sps:$4 sm:$0xff]  }
 0x24e   : > { %9170 = vmatprep.subr.bf16.mxu1 %v11187_v43  ;;  %9096 = vmatprep.mubr.bf16.mxu1 %v11164_v15  ;;  %v11200_v62 = vld [vmem:[%s12212_s11 + $0xaf0] ss:$8 sps:$4 sm:$0xff]   ;;  %v11208_v63 = vld [vmem:[%s12212_s11 + $0xae4] ss:$8 sps:$4 sm:$0xff]   ;;  %v11197_v46 = vld [vmem:[%s12212_s11 + $0xb00] ss:$8 sps:$4 sm:$0xff]  }
 0x24f   : > { %v11205_v8 = vld [vmem:[%s12212_s11 + $0xbf4] ss:$8 sps:$4 sm:$0xff]   ;;  %v11206_v53 = vld [vmem:[%s12212_s11 + $0xae0] ss:$8 sps:$4 sm:$0xff]   ;;  %v11203_v12 = vld [vmem:[%s12212_s11 + $0xbf0] ss:$8 sps:$4 sm:$0xff]  }
 0x250   : > { %v11166_v52 = vld [vmem:[#allocation2 + $0x110] ss:$100 sps:$4 sm:$0xff]   ;;  %9120 = vmatpush1.bf16.msra.mxu0 %v11188_v44  ;;  %v11214_v7 = vld [vmem:[%s12212_s11 + $0xad4] ss:$8 sps:$4 sm:$0xff]   ;;  %v11212_v17 = vld [vmem:[%s12212_s11 + $0xad0] ss:$8 sps:$4 sm:$0xff]  }
 0x251   : > { %9097 = vmatmul.mubr.bf16.gmra.mxu1 %v11166_v52  ;;  %9121 = vmatprep.subr.bf16.mxu0 %v11196_v49  ;;  %v11211_v16 = vld [vmem:[%s12212_s11 + $0xbe4] ss:$8 sps:$4 sm:$0xff]   ;;  %v11209_v18 = vld [vmem:[%s12212_s11 + $0xbe0] ss:$8 sps:$4 sm:$0xff]   ;;  %v11217_v24 = vld [vmem:[%s12212_s11 + $0xbd4] ss:$8 sps:$4 sm:$0xff]  }
 0x252   : > { %9171 = vmatpush1.bf16.msra.mxu1 %v11185_v31  ;;  %v11220_v45 = vld [vmem:[%s12212_s11 + $0xac4] ss:$8 sps:$4 sm:$0xff]   ;;  %v11218_v21 = vld [vmem:[%s12212_s11 + $0xac0] ss:$8 sps:$4 sm:$0xff]   ;;  %v11226_v23 = vld [vmem:[%s12212_s11 + $0xab4] ss:$8 sps:$4 sm:$0xff]  }
 0x253   : > { %9172 = vmatprep.subr.bf16.mxu1 %v11193_v5  ;;  %v11215_v4 = vld [vmem:[%s12212_s11 + $0xbd0] ss:$8 sps:$4 sm:$0xff]   ;;  %v11223_v25 = vld [vmem:[%s12212_s11 + $0xbc4] ss:$8 sps:$4 sm:$0xff]   ;;  %v11221_v3 = vld [vmem:[%s12212_s11 + $0xbc0] ss:$8 sps:$4 sm:$0xff]  }
 0x254   : > { %9122 = vmatpush1.bf16.msra.mxu0 %v11194_v56  ;;  %v11248_v28 = vld [vmem:[%s13671_s0 + $0x20] ss:$8 sps:$4 sm:$0x33]   ;;  %v11249_v19 = vld [vmem:[%s13671_s0 + $0x30] ss:$8 sps:$4 sm:$0x33]  }
 0x255   : > { %9123 = vmatprep.subr.bf16.mxu0 %v11202_v33  ;;  %v11224_v11 = vld [vmem:[%s12212_s11 + $0xab0] ss:$8 sps:$4 sm:$0xff]   ;;  %v11232_v22 = vld [vmem:[%s12212_s11 + $0xaa4] ss:$8 sps:$4 sm:$0xff]   ;;  %v11229_v38 = vld [vmem:[%s12212_s11 + $0xbb4] ss:$8 sps:$4 sm:$0xff]  }
 0x256   : > { %9173 = vmatpush1.bf16.msra.mxu1 %v11191_v57  ;;  %9962 = vst.sshfl [vmem:[#allocation2 + $0x50] sm:$0x33 pattern:$0x76325410] %v11248_v28  ;;  %v11230_v10 = vld [vmem:[%s12212_s11 + $0xaa0] ss:$8 sps:$4 sm:$0xff]  }
 0x257   : > { %9174 = vmatprep.subr.bf16.mxu1 %v11199_v20  ;;  %v9977_v55 = vld.sshfl [vmem:[%s13671_s0 + $0x38] sm:$0x13 pattern:$0x76325410]  ;;  %v11238_v49 = vld [vmem:[%s12212_s11 + $0xa94] ss:$8 sps:$4 sm:$0xff]  }
 0x258   : > { %9124 = vmatpush2.bf16.msra.mxu0 %v11200_v62  ;;  %9963 = vst.sshfl [vmem:[#allocation2 + $0xb4] sm:$0x33 pattern:$0x76325410] %v11249_v19  ;;  %v5180_v36 = vcombine.high %v9977_v55, %v9977_v55  ;;  %v5256_v39 = vshrl.u32 %v9977_v55, 16  ;;  %v5259_v35 = vshll.u32 %v9977_v55, 16 }
 0x259   : > { %9125 = vmatprep.subr.bf16.mxu0 %v11208_v63  ;;  %v9994_v37 = vld.sshfl [vmem:[%s13671_s0 + $0x20] sm:$0x12 pattern:$0x76325410]  ;;  %v11235_v63 = vld [vmem:[%s12212_s11 + $0xba4] ss:$8 sps:$4 sm:$0xff]  }
 0x25a   : > { %9175 = vmatpush1.bf16.msra.mxu1 %v11197_v46  ;;  %v9995_v47 = vld.sshfl [vmem:[%s13671_s0 + $0x28] sm:$0x12 pattern:$0x76325410]  ;;  %v5388_v40 = vcombine.high %v9994_v37, %v9994_v37  ;;  %v10002_v41 = vrot.slane %v9994_v37, 9  ;;  %v5258_v54 = vrot.slane %v5256_v39, 6 }
 0x25b   : > { %9176 = vmatprep.subr.bf16.mxu1 %v11205_v8  ;;  %v5261_v43 = vrot.slane %v5259_v35, 7  ;;  %v5265_v31 = vshll.u32 %v5180_v36, 16  ;;  %v5396_v44 = vcombine.high %v9995_v47, %v9995_v47  ;;  %v9997_v15 = vld.sshfl [vmem:[%s13671_s0 + $0x38] sm:$0x12 pattern:$0x76325410] }
 0x25c   : > { %9126 = vmatpush2.bf16.msra.mxu0 %v11206_v53  ;;  %v5447_v52 = vrot.slane %v5388_v40, 7  ;;  %v10003_v5 = vrot.slane %v9995_v47, 9  ;;  %v11227_v56 = vld [vmem:[%s12212_s11 + $0xbb0] ss:$8 sps:$4 sm:$0xff]   ;;  %v5412_v20 = vcombine.high %v9997_v15, %v9997_v15  ;;  %v10005_v53 = vrot.slane %v9997_v15, 9 }
 0x25d   : > { %9127 = vmatprep.subr.bf16.mxu0 %v11214_v7  ;;  %v5262_v33 = vor.u32 %v5261_v43, %v5258_v54  ;;  %v5267_v57 = vrot.slane %v5265_v31, 7  ;;  %v10023_v62 = vld.sshfl [vmem:[%s13671_s0 + $0x28] sm:$0x32 pattern:$0x76325410]  ;;  %v5451_v8 = vrot.slane %v5396_v44, 7 }
 0x25e   : > { %9177 = vmatpush2.bf16.msra.mxu1 %v11203_v12  ;;  %v5448_v46 = vsel %vm12331_vm1, %v10002_v41, %v5447_v52  ;;  %v10025_v7 = vld.sshfl [vmem:[%s13671_s0 + $0x38] sm:$0x32 pattern:$0x76325410]  ;;  %v5548_v12 = vcombine.high %v10023_v62, %v10023_v62  ;;  %v11241_v55 = vld [vmem:[%s12212_s11 + $0xb94] ss:$8 sps:$4 sm:$0xff]  }
 0x25f   : > { %9178 = vmatprep.subr.bf16.mxu1 %v11211_v16  ;;  %v11236_v16 = vld [vmem:[%s12212_s11 + $0xa90] ss:$8 sps:$4 sm:$0xff]   ;;  %v11233_v28 = vld [vmem:[%s12212_s11 + $0xba0] ss:$8 sps:$4 sm:$0xff]  }
 0x260   : > { %9128 = vmatpush2.bf16.msra.mxu0 %v11212_v17  ;;  %v5263_v17 = vrot.slane %v5262_v33, 2  ;;  %v11262_v41 = vld [vmem:[%s13671_s0 + $0x60] ss:$8 sps:$4 sm:$0x33]  }
 0x261   : > { %9129 = vmatprep.subr.bf16.mxu0 %v11220_v45  ;;  %v5459_v45 = vrot.slane %v5412_v20, 7  ;;  %v11239_v43 = vld [vmem:[%s12212_s11 + $0xb90] ss:$8 sps:$4 sm:$0xff]  }
 0x262   : > { %9179 = vmatpush2.bf16.msra.mxu1 %v11209_v18  ;;  %v5564_v18 = vcombine.high %v10025_v7, %v10025_v7  ;;  %9964 = vst.sshfl [vmem:[#allocation2 + $0x118] sm:$0x33 pattern:$0x76325410] %v11262_v41 }
 0x263   : > { %9180 = vmatprep.subr.bf16.mxu1 %v11217_v24  ;;  %v5611_v24 = vshrl.u32 %v10023_v62, 16  ;;  %v5460_v19 = vsel %vm12331_vm1, %v10005_v53, %v5459_v45  ;;  %v9981_v44 = vld.sshfl [vmem:[%s13671_s0 + $0x78] sm:$0x13 pattern:$0x76325410] }
 0x264   : > { %9130 = vmatpush2.bf16.msra.mxu0 %v11218_v21  ;;  %v5452_v21 = vsel %vm12331_vm1, %v10003_v5, %v5451_v8  ;;  %v5485_v39 = vcombine.low %v13105_v1, %v5460_v19  ;;  %v5642_v47 = vshrl.u32 %v5564_v18, 16  ;;  %v5645_v40 = vshll.u32 %v5564_v18, 16  ;;  %v11263_v1 = vld [vmem:[%s13671_s0 + $0x70] ss:$8 sps:$4 sm:$0x33]  }
 0x265   : > { %9131 = vmatprep.subr.bf16.mxu0 %v11226_v23  ;;  %v5616_v23 = vshrl.u32 %v5548_v12, 16  ;;  %v10031_v35 = vrot.slane %v5611_v24, 9  ;;  %9965 = vst.sshfl [vmem:[#allocation2 + $0x17c] sm:$0x33 pattern:$0x76325410] %v11263_v1  ;;  %v5212_v15 = vcombine.high %v9981_v44, %v9981_v44 }
 0x266   : > { %9181 = vmatpush2.bf16.msra.mxu1 %v11215_v4  ;;  %v5619_v4 = vshll.u32 %v5548_v12, 16  ;;  %10011 = vst.sshfl [vmem:[#allocation2 + $0xbc] sm:$0x33 pattern:$0x76325410] %v5485_v39  ;;  %v5644_v31 = vrot.slane %v5642_v47, 7 }
 0x267   : > { %9182 = vmatprep.subr.bf16.mxu1 %v11223_v25  ;;  %v5637_v25 = vshrl.u32 %v10025_v7, 16  ;;  %v5618_v37 = vrot.slane %v5616_v23, 7  ;;  %v5312_v52 = vshrl.u32 %v9981_v44, 16  ;;  %v5315_v5 = vshll.u32 %v9981_v44, 16  ;;  %v11261_v23 = vld [vmem:[%s12212_s11 + $0xc64] ss:$8 sps:$4 sm:$0xff]  }
 0x268   : > { %9132 = vmatpush2.bf16.msra.mxu0 %v11224_v11  ;;  %v5268_v11 = vsel %vm12290_vm12, %v5263_v17, %v5267_v57  ;;  %v5647_v33 = vor.u32 %v5645_v40, %v5644_v31  ;;  %v9999_v20 = vld.sshfl [vmem:[%s13671_s0 + $0x68] sm:$0x12 pattern:$0x76325410]  ;;  %v5321_v7 = vshll.u32 %v5212_v15, 16 }
 0x269   : > { %9133 = vmatprep.subr.bf16.mxu0 %v11232_v22  ;;  %v5477_v22 = vcombine.low %v5448_v46, %v5452_v21  ;;  %v5333_v36 = vcombine.low %v13120_v29, %v5268_v11  ;;  %v5621_v54 = vor.u32 %v5619_v4, %v5618_v37  ;;  %v10033_v29 = vrot.slane %v5637_v25, 9  ;;  %v11247_v46 = vld [vmem:[%s12212_s11 + $0xb84] ss:$8 sps:$4 sm:$0xff]   ;;  %v11253_v17 = vld [vmem:[%s12212_s11 + $0xc70] ss:$8 sps:$4 sm:$0xff]  }
 0x26a   : > { %9183 = vmatpush2.bf16.msra.mxu1 %v11221_v3  ;;  %v11244_v3 = vld [vmem:[%s12212_s11 + $0xa84] ss:$8 sps:$4 sm:$0xff]   ;;  %v5314_v8 = vrot.slane %v5312_v52, 6  ;;  %v5317_v53 = vrot.slane %v5315_v5, 7  ;;  %v5428_v12 = vcombine.high %v9999_v20, %v9999_v20  ;;  %v10007_v24 = vrot.slane %v9999_v20, 9 }
 0x26b   : > { %9184 = vmatprep.subr.bf16.mxu1 %v11229_v38  ;;  %v11242_v38 = vld [vmem:[%s12212_s11 + $0xa80] ss:$8 sps:$4 sm:$0xff]   ;;  %10010 = vst.sshfl [vmem:[#allocation2 + $0x58] sm:$0x33 pattern:$0x76325410] %v5477_v22  ;;  %v5648_v45 = vsel %vm12391_vm4, %v10033_v29, %v5647_v33 }
 0x26c   : > { %9134 = vmatpush2.bf16.msra.mxu0 %v11230_v10  ;;  %9983 = vst.sshfl [vmem:[#allocation2 + $0xb8] sm:$0x33 pattern:$0x76325410] %v5333_v36  ;;  %v11255_v10 = vld [vmem:[%s12212_s11 + $0xc74] ss:$8 sps:$4 sm:$0xff]   ;;  %v5709_v21 = vcombine.low %v13156_v13, %v5648_v45  ;;  %v5318_v4 = vor.u32 %v5317_v53, %v5314_v8 }
 0x26d   : > { %9135 = vmatprep.subr.bf16.mxu0 %v11238_v49  ;;  %v5622_v49 = vsel %vm12391_vm4, %v10031_v35, %v5621_v54  ;;  %v5323_v25 = vrot.slane %v5321_v7, 7  ;;  %v10027_v11 = vld.sshfl [vmem:[%s13671_s0 + $0x68] sm:$0x32 pattern:$0x76325410] }
 0x26e   : > { %9185 = vmatpush2.bf16.msra.mxu1 %v11227_v56  ;;  %v9998_v56 = vld.sshfl [vmem:[%s13671_s0 + $0x60] sm:$0x12 pattern:$0x76325410]  ;;  %v5701_v57 = vcombine.low %v13146_v2, %v5622_v49  ;;  %v11250_v19 = vld [vmem:[#allocation2 + $0x50] ss:$100 sps:$4 sm:$0xff]   ;;  %v5580_v36 = vcombine.high %v10027_v11, %v10027_v11 }
 0x26f   : > { %9186 = vmatprep.subr.bf16.mxu1 %v11235_v63  ;;  %v5420_v62 = vcombine.high %v9998_v56, %v9998_v56  ;;  %v10006_v63 = vrot.slane %v9998_v56, 9  ;;  %v10001_v2 = vld.sshfl [vmem:[%s13671_s0 + $0x78] sm:$0x12 pattern:$0x76325410]  ;;  %v5319_v39 = vrot.slane %v5318_v4, 2 }
 0x270   : > { %9136 = vmatpush2.bf16.msra.mxu0 %v11236_v16  ;;  %v11245_v16 = vld [vmem:[%s12212_s11 + $0xb80] ss:$8 sps:$4 sm:$0xff]   ;;  %10038 = vst.sshfl [vmem:[#allocation2 + $0x5c] sm:$0x33 pattern:$0x76325410] %v5701_v57 }
 0x271   : > { %9137 = vmatprep.subr.bf16.mxu0 %v11244_v3  ;;  %v5463_v18 = vrot.slane %v5420_v62, 7  ;;  %v5467_v3 = vrot.slane %v5428_v12, 7  ;;  %10039 = vst.sshfl [vmem:[#allocation2 + $0xc0] sm:$0x33 pattern:$0x76325410] %v5709_v21 }
 0x272   : > { %9187 = vmatpush2.bf16.msra.mxu1 %v11233_v28  ;;  %v5444_v28 = vcombine.high %v10001_v2, %v10001_v2  ;;  %v10009_v13 = vrot.slane %v10001_v2, 9  ;;  %v5663_v37 = vshrl.u32 %v10027_v11, 16  ;;  %v10029_v47 = vld.sshfl [vmem:[%s13671_s0 + $0x78] sm:$0x32 pattern:$0x76325410] }
 0x273   : > { %9188 = vmatprep.subr.bf16.mxu1 %v11241_v55  ;;  %v11252_v22 = vld [vmem:[#allocation2 + $0x54] ss:$100 sps:$4 sm:$0xff]   ;;  %v5464_v55 = vsel %vm12331_vm1, %v10006_v63, %v5463_v18  ;;  %v5668_v40 = vshrl.u32 %v5580_v36, 16  ;;  %v5671_v41 = vshll.u32 %v5580_v36, 16  ;;  %v5596_v1 = vcombine.high %v10029_v47, %v10029_v47  ;;  %v11269_v44 = vld [vmem:[%s12212_s11 + $0xc54] ss:$8 sps:$4 sm:$0xff]  }
 0x274   : > { %9138 = vmatpush2.bf16.msra.mxu0 %v11242_v38  ;;  %v5475_v35 = vrot.slane %v5444_v28, 7  ;;  %9139 = vmatprep.mubr.bf16.mxu0 %v11252_v22  ;;  %v5468_v38 = vsel %vm12331_vm1, %v10007_v24, %v5467_v3  ;;  %v10035_v15 = vrot.slane %v5663_v37, 9  ;;  %v5689_v26 = vshrl.u32 %v10029_v47, 16  ;;  %v11267_v56 = vld [vmem:[%s12212_s11 + $0xc50] ss:$8 sps:$4 sm:$0xff]  }
 0x275   : > { %9213 = vmatprep.subr.bf16.mxu0 %v11255_v10  ;;  %v5324_v10 = vsel %vm12290_vm12, %v5319_v39, %v5323_v25  ;;  %v5493_v29 = vcombine.low %v5464_v55, %v5468_v38  ;;  %v5670_v52 = vrot.slane %v5668_v40, 7  ;;  %v5694_v5 = vshrl.u32 %v5596_v1, 16  ;;  %v11256_v62 = vld [vmem:[#allocation2 + $0x58] ss:$100 sps:$4 sm:$0xff]   ;;  %v11278_v21 = vld [vmem:[%s12212_s11 + $0xc34] ss:$8 sps:$4 sm:$0xff]  }
 0x276   : > { %9189 = vmatpush2.bf16.msra.mxu1 %v11239_v43  ;;  %v5476_v54 = vsel %vm12331_vm1, %v10009_v13, %v5475_v35  ;;  %v11259_v43 = vld [vmem:[%s12212_s11 + $0xc60] ss:$8 sps:$4 sm:$0xff]   ;;  %v5349_v31 = vcombine.low %v13218_v61, %v5324_v10  ;;  %v5697_v0 = vshll.u32 %v5596_v1, 16  ;;  %v10037_v57 = vrot.slane %v5689_v26, 9  ;;  %v11276_v28 = vld [vmem:[%s12212_s11 + $0xc30] ss:$8 sps:$4 sm:$0xff]  }
 0x277   : > { %9190 = vmatprep.subr.bf16.mxu1 %v11247_v46  ;;  %9140 = vmatmul.mubr.bf16.vlgmr.msra.gmra.mxu0 %v11250_v19  ;;  %v5501_v49 = vcombine.low %v13197_v32, %v5476_v54  ;;  %10012 = vst.sshfl [vmem:[#allocation2 + $0x120] sm:$0x33 pattern:$0x76325410] %v5493_v29  ;;  %v5673_v33 = vor.u32 %v5671_v41, %v5670_v52  ;;  %v5696_v20 = vrot.slane %v5694_v5, 7  ;;  %v11330_v11 = vmov 0   ;;  %v13417_v41 = vpop.f32.mrf.mxu1 }
 0x278   : > { %9214 = vmatpush1.bf16.msra.mxu0 %v11253_v17  ;;  %9985 = vst.sshfl [vmem:[#allocation2 + $0x180] sm:$0x33 pattern:$0x76325410] %v5349_v31  ;;  %v11258_v63 = vld [vmem:[#allocation2 + $0x5c] ss:$100 sps:$4 sm:$0xff]   ;;  %v13429_v31 = vpop.f32.mrf.mxu0 }
 0x279   : > { %9215 = vmatprep.subr.bf16.mxu0 %v11261_v23  ;;  %10013 = vst.sshfl [vmem:[#allocation2 + $0x184] sm:$0x33 pattern:$0x76325410] %v5501_v49  ;;  %v5674_v32 = vsel %vm12391_vm4, %v10035_v15, %v5673_v33  ;;  %v5699_v61 = vor.u32 %v5697_v0, %v5696_v20  ;;  %v11275_v46 = vld [vmem:[%s12212_s11 + $0xc44] ss:$8 sps:$4 sm:$0xff]   ;;  %9192 = vmatprep.mubr.bf16.mxu1 %v11258_v63  ;;  %v13419_v10 = vpop.f32.mrf.mxu1 }
 0x27a   : > { %9191 = vmatpush2.bf16.msra.mxu1 %v11245_v16  ;;  %v10050_v8 = vld.sshfl [vmem:[%s13671_s0 + $0x20] sm:$0x30 pattern:$0x76325410]  ;;  %v5717_v53 = vcombine.low %v13238_v27, %v5674_v32  ;;  %v11273_v2 = vld [vmem:[%s12212_s11 + $0xc40] ss:$8 sps:$4 sm:$0xff]   ;;  %v13433_v49 = vpop.f32.mrf.mxu0 }
 0x27b   : > { %v10051_v7 = vld.sshfl [vmem:[%s13671_s0 + $0x28] sm:$0x30 pattern:$0x76325410]  ;;  %v5700_v12 = vsel %vm12391_vm4, %v10037_v57, %v5699_v61  ;;  %v11266_v24 = vld [vmem:[#allocation2 + $0x118] ss:$100 sps:$4 sm:$0xff]   ;;  %v13421_v54 = vpop.f32.mrf.mxu1 }
 0x27c   : > { %9216 = vmatpush1.bf16.msra.mxu0 %v11259_v43  ;;  %v10052_v16 = vld.sshfl [vmem:[%s13671_s0 + $0x30] sm:$0x30 pattern:$0x76325410]  ;;  %v10058_v17 = vcombine.high %v10050_v8, %v10051_v7  ;;  %v5725_v45 = vcombine.low %v13246_v34, %v5700_v12  ;;  %v11281_v22 = vld [vmem:[%s12212_s11 + $0xc24] ss:$8 sps:$4 sm:$0xff]   ;;  %v13435_v15 = vpop.f32.mrf.mxu0 }
 0x27d   : > { %9217 = vmatprep.subr.bf16.mxu0 %v11269_v44  ;;  %9193 = vmatmul.mubr.bf16.vlgmr.msra.gmra.mxu1 %v11256_v62  ;;  %10040 = vst.sshfl [vmem:[#allocation2 + $0x124] sm:$0x33 pattern:$0x76325410] %v5717_v53  ;;  %v11279_v3 = vld [vmem:[%s12212_s11 + $0xc20] ss:$8 sps:$4 sm:$0xff]   ;;  %v13423_v29 = vpop.f32.mrf.mxu1 }
 0x27e   : > { %v10053_v27 = vld.sshfl [vmem:[%s13671_s0 + $0x38] sm:$0x30 pattern:$0x76325410]  ;;  %v11284_v13 = vld [vmem:[%s12212_s11 + $0xc14] ss:$8 sps:$4 sm:$0xff]   ;;  %v13440_v26 = vpop.f32.mrf.mxu0 }
 0x27f   : > { %v11264_v18 = vld [vmem:[#allocation2 + $0x11c] ss:$100 sps:$4 sm:$0xff]   ;;  %v10059_v51 = vcombine.high %v10052_v16, %v10053_v27  ;;  %10062 = vst.sshfl [vmem:[#allocation2 + $0x60] sm:$0x33 pattern:$0x76325410] %v10058_v17  ;;  %v13425_v1 = vpop.f32.mrf.mxu1 }
 0x280   : > { %9218 = vmatpush1.bf16.msra.mxu0 %v11267_v56  ;;  %10041 = vst.sshfl [vmem:[#allocation2 + $0x188] sm:$0x33 pattern:$0x76325410] %v5725_v45  ;;  %9149 = vmatprep.mubr.bf16.mxu0 %v11264_v18  ;;  %v11272_v39 = vld [vmem:[#allocation2 + $0x120] ss:$100 sps:$4 sm:$0xff]   ;;  %v13444_v0 = vpop.f32.mrf.mxu0 }
 0x281   : > { %9219 = vmatprep.subr.bf16.mxu0 %v11275_v46  ;;  %v10054_v34 = vld.sshfl [vmem:[%s13671_s0 + $0x60] sm:$0x30 pattern:$0x76325410]  ;;  %9150 = vmatmul.mubr.bf16.gmra.mxu0 %v11266_v24  ;;  %v11287_v37 = vld [vmem:[%s12212_s11 + $0xc04] ss:$8 sps:$4 sm:$0xff]   ;;  %v13427_v43 = vpop.f32.mrf.mxu1 }
 0x282   : > { %10063 = vst.sshfl [vmem:[#allocation2 + $0xc4] sm:$0x33 pattern:$0x76325410] %v10059_v51  ;;  %9245 = vmatprep.mubr.bf16.mxu0 %v11330_v11  ;;  %v11282_v35 = vld [vmem:[%s12212_s11 + $0xc10] ss:$8 sps:$4 sm:$0xff]   ;;  %v13458_v63 = vpop.f32.mrf.mxu0 }
 0x283   : > { %v10055_v23 = vld.sshfl [vmem:[%s13671_s0 + $0x68] sm:$0x30 pattern:$0x76325410]  ;;  %v11285_v38 = vld [vmem:[%s12212_s11 + $0xc00] ss:$8 sps:$4 sm:$0xff]   ;;  %v13431_v44 = vpop.f32.mrf.mxu1 }
 0x284   : > { %v10056_v4 = vld.sshfl [vmem:[%s13671_s0 + $0x70] sm:$0x30 pattern:$0x76325410]  ;;  %v10060_v25 = vcombine.high %v10054_v34, %v10055_v23  ;;  %9220 = vmatpush1.bf16.msra.mxu0 %v11273_v2  ;;  %s9543_s11 = sshll.u32 %s11320_s17, 5  ;;  %v13466_v7 = vpop.f32.mrf.mxu0  ;;  %s13731_s17 = smov (!%p1908_p11, %s11320_s17), 2 }
 0x285   : > { %v10057_v19 = vld.sshfl [vmem:[%s13671_s0 + $0x78] sm:$0x30 pattern:$0x76325410]  ;;  %9221 = vmatprep.subr.bf16.mxu0 %v11278_v21  ;;  %v13437_v52 = vpop.f32.mrf.mxu1  ;;  %p1903_p10 = scmp.lt.s32.totalorder %s9543_s11, 95  ;;  %s9545_s5 = sshll.u32 %s13731_s17, 1 }
 0x286   : > { %v10061_v55 = vcombine.high %v10056_v4, %v10057_v19  ;;  %10064 = vst.sshfl [vmem:[#allocation2 + $0x128] sm:$0x33 pattern:$0x76325410] %v10060_v25  ;;  %v13474_v27 = vpop.f32.mrf.mxu0  ;;  %s1914_s8 = scalar_lea.vmem %s13675_s4, %s9545_s5 }
 0x287   : > { %v11270_v36 = vld [vmem:[#allocation2 + $0x124] ss:$100 sps:$4 sm:$0xff]   ;;  %v13442_v5 = vpop.f32.mrf.mxu1  ;;  %s13729_s11 = smov (!%p1903_p10, %s9543_s11), 95 }
 0x288   : > { %10065 = vst.sshfl [vmem:[#allocation2 + $0x18c] sm:$0x33 pattern:$0x76325410] %v10061_v55  ;;  %9222 = vmatpush1.bf16.msra.mxu0 %v11276_v28  ;;  %9202 = vmatprep.mubr.bf16.mxu1 %v11270_v36  ;;  %s9544_s27 = sshll.u32 %s13729_s11, 3  ;;  %v13484_v25 = vpop.f32.mrf.mxu0 }
 0x289   : > { %9223 = vmatprep.subr.bf16.mxu0 %v11281_v22  ;;  %9203 = vmatmul.mubr.bf16.gmra.mxu1 %v11272_v39  ;;  %v11288_v47 = vld [vmem:[#allocation2 + $0x60] ss:$100 sps:$4 sm:$0xff]   ;;  %s13449_s30 = scalar_lea.vmem %s13674_s3, %s9544_s27  ;;  %v13451_v56 = vpop.f32.mrf.mxu1 }
 0x28a   : > { %v9338_v33 = vld [vmem:[%s13449_s30 + $0xf8] sm:$0xff]  ;;  %v9337_v62 = vld [vmem:[%s13449_s30 + $0xf0] sm:$0xff]  ;;  %v9336_v61 = vld [vmem:[%s13449_s30 + $0xe8] sm:$0xff] }
 0x28b   : > { %10519 = vmatprep.subr.mxu1 %v9338_v33  ;;  %v9322_v57 = vld [vmem:[%s13449_s30 + $0x78] sm:$0xff]  ;;  %v13455_v20 = vpop.f32.mrf.mxu1  ;;  %v9321_v32 = vld [vmem:[%s13449_s30 + $0x70] sm:$0xff]  ;;  %v9320_v46 = vld [vmem:[%s13449_s30 + $0x68] sm:$0xff] }
 0x28c   : > { %9224 = vmatpush1.bf16.msra.mxu0 %v11279_v3  ;;  %10520 = vmatpush3.msra.mxu1 %v9322_v57  ;;  %v9335_v53 = vld [vmem:[%s13449_s30 + $0xe0] sm:$0xff]  ;;  %v9334_v16 = vld [vmem:[%s13449_s30 + $0xd8] sm:$0xff]  ;;  %v9333_v2 = vld [vmem:[%s13449_s30 + $0xd0] sm:$0xff]  ;;  %v13492_v3 = vpop.f32.mrf.mxu0 }
 0x28d   : > { %9225 = vmatprep.subr.bf16.mxu0 %v11284_v13  ;;  %10521 = vmatprep.subr.mxu1 %v9337_v62  ;;  %v13463_v8 = vpop.f32.mrf.mxu1  ;;  %v9319_v12 = vld [vmem:[%s13449_s30 + $0x60] sm:$0xff]  ;;  %v9318_v17 = vld [vmem:[%s13449_s30 + $0x58] sm:$0xff]  ;;  %v9317_v18 = vld [vmem:[%s13449_s30 + $0x50] sm:$0xff] }
 0x28e   : > { %10522 = vmatpush3.msra.mxu1 %v9321_v32  ;;  %v9332_v24 = vld [vmem:[%s13449_s30 + $0xc8] sm:$0xff]  ;;  %v9331_v34 = vld [vmem:[%s13449_s30 + $0xc0] sm:$0xff]  ;;  %v9330_v4 = vld [vmem:[%s13449_s30 + $0xb8] sm:$0xff] }
 0x28f   : > { %v11289_v40 = vld [vmem:[#allocation2 + $0x128] ss:$100 sps:$4 sm:$0xff]   ;;  %10523 = vmatprep.subr.mxu1 %v9336_v61  ;;  %v13471_v45 = vpop.f32.mrf.mxu1  ;;  %v9315_v23 = vld [vmem:[%s13449_s30 + $0x40] sm:$0xff]  ;;  %v9314_v28 = vld [vmem:[%s13449_s30 + $0x38] sm:$0xff] }
 0x290   : > { %9226 = vmatpush1.bf16.msra.mxu0 %v11282_v35  ;;  %10524 = vmatpush3.msra.mxu1 %v9320_v46  ;;  %v9316_v51 = vld [vmem:[%s13449_s30 + $0x48] sm:$0xff]  ;;  %v9313_v19 = vld [vmem:[%s13449_s30 + $0x30] sm:$0xff]  ;;  %v9327_v39 = vld [vmem:[%s13449_s30 + $0xa0] sm:$0xff] }
 0x291   : > { %9227 = vmatprep.subr.bf16.mxu0 %v11287_v37  ;;  %10525 = vmatprep.subr.mxu1 %v9335_v53  ;;  %v13479_v21 = vpop.f32.mrf.mxu1  ;;  %v9328_v55 = vld [vmem:[%s13449_s30 + $0xa8] sm:$0xff]  ;;  %v9311_v35 = vld [vmem:[%s13449_s30 + $0x20] sm:$0xff]  ;;  %v9309_v57 = vld [vmem:[%s13449_s30 + $0x10] sm:$0xff] }
 0x292   : > { %10526 = vmatpush3.msra.mxu1 %v9319_v12  ;;  %v9312_v36 = vld [vmem:[%s13449_s30 + $0x28] sm:$0xff]  ;;  %v9323_v46 = vld [vmem:[%s13449_s30 + $0x80] sm:$0xff] }
 0x293   : > { %10527 = vmatprep.subr.mxu1 %v9334_v16  ;;  %v13489_v22 = vpop.f32.mrf.mxu1  ;;  %v9324_v32 = vld [vmem:[%s13449_s30 + $0x88] sm:$0xff]  ;;  %v9307_v12 = vld [vmem:[%s13449_s30] sm:$0xff] }
 0x294   : > { %9228 = vmatpush1.bf16.msra.mxu0 %v11285_v38  ;;  %10528 = vmatpush3.msra.mxu1 %v9318_v17  ;;  %v9326_v38 = vld [vmem:[%s13449_s30 + $0x98] sm:$0xff]  ;;  %v9308_v61 = vld [vmem:[%s13449_s30 + $0x8] sm:$0xff] }
 0x295   : > { %10529 = vmatprep.subr.mxu1 %v9333_v2  ;;  %v13499_v37 = vpop.f32.mrf.mxu1 }
 0x296   : > { %10530 = vmatpush3.msra.mxu1 %v9317_v18 }
 0x297   : > { %9246 = vmatmul.mubr.bf16.vlgmr.msra.gmra.mxu0 %v11288_v47  ;;  %10531 = vmatprep.subr.mxu1 %v9332_v24  ;;  %v9310_v47 = vld [vmem:[%s13449_s30 + $0x18] sm:$0xff]  ;;  %v13507_v62 = vpop.f32.mrf.mxu1 }
 0x298   : > { %9255 = vmatprep.mubr.bf16.mxu0 %v11330_v11  ;;  %10532 = vmatpush3.msra.mxu1 %v9316_v51  ;;  %v9329_v11 = vld [vmem:[%s13449_s30 + $0xb0] sm:$0xff] }
 0x299   : > { %10533 = vmatprep.subr.mxu1 %v9331_v34  ;;  %v13515_v16 = vpop.f32.mrf.mxu1 }
 0x29a   : > { %10534 = vmatpush3.msra.mxu1 %v9315_v23 }
 0x29b   : > { %10535 = vmatprep.subr.mxu1 %v9330_v4 }
 0x29c   : > { %10536 = vmatpush3.msra.mxu1 %v9314_v28 }
 0x29d   : > { %10537 = vmatprep.subr.mxu1 %v9329_v11 }
 0x29e   : > { %10538 = vmatpush3.msra.mxu1 %v9313_v19 }
 0x29f   : > { %9256 = vmatmul.mubr.bf16.gmra.mxu0 %v11289_v40  ;;  %10539 = vmatprep.subr.mxu1 %v9328_v55  ;;  %v9325_v40 = vld [vmem:[%s13449_s30 + $0x90] sm:$0xff] }
 0x2a0   : > { %10540 = vmatpush3.msra.mxu1 %v9312_v36 }
 0x2a1   : > { %10541 = vmatprep.subr.mxu1 %v9327_v39 }
 0x2a2   : > { %10542 = vmatpush3.msra.mxu1 %v9311_v35 }
 0x2a3   : > { %10543 = vmatprep.subr.mxu1 %v9326_v38 }
 0x2a4   : > { %10544 = vmatpush3.msra.mxu1 %v9310_v47 }
 0x2a5   : > { %10545 = vmatprep.subr.mxu1 %v9325_v40 }
 0x2a6   : > { %10546 = vmatpush3.msra.mxu1 %v9309_v57 }
 0x2a7   : > { %10547 = vmatprep.subr.mxu1 %v9324_v32 }
 0x2a8   : > { %10548 = vmatpush3.msra.mxu1 %v9308_v61 }
 0x2a9   : > { %10549 = vmatprep.subr.mxu1 %v9323_v46 }
 0x2aa   : > { %v13496_v13 = vpop.f32.mrf.mxu0  ;;  %10550 = vmatpush3.msra.mxu1 %v9307_v12 }
 0x2ac   : > { %v13504_v33 = vpop.f32.mrf.mxu0 }
 0x2ae   : > { %v13512_v53 = vpop.f32.mrf.mxu0 }
 0x2b0   : > { %v13519_v2 = vpop.f32.mrf.mxu0 }
 0x2b3   : > { %v13517_v17 = vpop.f32.mrf.mxu1 }
 0x2b5   : > { %v13521_v18 = vpop.f32.mrf.mxu1 }
 0x2b7   : > { %v13525_v51 = vpop.f32.mrf.mxu1 }
 0x2b9   : > { %v13529_v23 = vpop.f32.mrf.mxu1 }
 0x2bb   : > { %v13533_v28 = vpop.f32.mrf.mxu1 }
 0x2bc   : > { %v13523_v24 = vpop.f32.mrf.mxu0  ;;  %13690 = vst [vmem:[#allocation4_spill] sm:$0xff] %v13533_v28 }
 0x2bd   : > { %v13537_v55 = vpop.f32.mrf.mxu1 }
 0x2be   : > { %v13527_v34 = vpop.f32.mrf.mxu0  ;;  %13692 = vst [vmem:[#allocation6_spill] sm:$0xff] %v13537_v55 }
 0x2bf   : > { %v13541_v39 = vpop.f32.mrf.mxu1 }
 0x2c0   : > { %v13531_v4 = vpop.f32.mrf.mxu0  ;;  %13693 = vst [vmem:[#allocation7_spill] sm:$0xff] %v13541_v39 }
 0x2c1   : > { %v13545_v38 = vpop.f32.mrf.mxu1 }
 0x2c2   : > { %v13535_v11 = vpop.f32.mrf.mxu0  ;;  %13694 = vst [vmem:[#allocation8_spill] sm:$0xff] %v13545_v38 }
 0x2c3   : > { %13691 = vst [vmem:[#allocation5_spill] sm:$0xff] %v13535_v11 }
 0x2f6   : > { %v9035_v19 = vpop.f32.mrf.mxu0 }
 0x2f8   : > { %v13539_v36 = vpop.f32.mrf.mxu0 }
 0x2fa   : > { %v13543_v35 = vpop.f32.mrf.mxu0 }
 0x2fc   : > { %v13547_v47 = vpop.f32.mrf.mxu1  ;;  %v13549_v40 = vpop.f32.mrf.mxu0 }
 0x2fd   : > { %13695 = vst [vmem:[#allocation9_spill] sm:$0xff] %v13549_v40 }
 0x2fe   : > { %v13551_v57 = vpop.f32.mrf.mxu1 }
 0x2ff   : > { %13696 = vst [vmem:[#allocation10_spill] sm:$0xff] %v13551_v57 }
 0x300   : > { %v13555_v61 = vpop.f32.mrf.mxu1 }
 0x302   : > { %v13559_v12 = vpop.f32.mrf.mxu1 }
 0x30b   : > { %v13553_v32 = vpop.f32.mrf.mxu0 }
 0x30c   : > { %13697 = vst [vmem:[#allocation11_spill] sm:$0xff] %v13553_v32  ;;  %v8626_v32 = vadd.f32 %v13055_v42, %v12907_v6  ;;  %v8777_v42 = vadd.f32 %v13427_v43, %v13149_v48 }
 0x30d   : > { %v13557_v46 = vpop.f32.mrf.mxu0 }
 0x30e   : > { %13698 = vst [vmem:[#allocation12_spill] sm:$0xff] %v13557_v46  ;;  %v8771_v46 = vadd.f32 %v13421_v54, %v13092_v50  ;;  %v8679_v6 = vadd.f32 %v13417_v41, %v8626_v32  ;;  %v8781_v41 = vadd.f32 %v13431_v44, %v13169_v60  ;;  %v13706_v32 = vld [vmem:[#allocation4_spill] sm:$0xff] }
 0x30f   : > { %v13561_v55 = vpop.f32.mrf.mxu0 }
 0x310   : > { %13699 = vst [vmem:[#allocation13_spill] sm:$0xff] %v13561_v55  ;;  %v8628_v55 = vadd.f32 %v13067_v30, %v12918_v9 }
 0x311   : > { %v13563_v39 = vpop.f32.mrf.mxu1  ;;  %v13565_v11 = vpop.f32.mrf.mxu0 }
 0x312   : > { %13700 = vst [vmem:[#allocation14_spill] sm:$0xff] %v13563_v39  ;;  %13701 = vst [vmem:[#allocation15_spill] sm:$0xff] %v13565_v11  ;;  %v8773_v11 = vadd.f32 %v13423_v29, %v13135_v59  ;;  %v8681_v54 = vadd.f32 %v13419_v10, %v8628_v55  ;;  %v8732_v29 = vadd.f32 %v13429_v31, %v8679_v6  ;;  %v13708_v6 = vld [vmem:[#allocation10_spill] sm:$0xff] }
 0x313   : > { %v13569_v28 = vpop.f32.mrf.mxu1  ;;  %v8783_v10 = vadd.f32 %v13437_v52, %v13227_v14  ;;  %v8834_v31 = vadd.f32 %v13466_v7, %v8781_v41 }
 0x314   : > { %13702 = vst [vmem:[#allocation16_spill] sm:$0xff] %v13569_v28  ;;  %v8775_v28 = vadd.f32 %v13425_v1, %v13139_v58  ;;  %v8826_v50 = vadd.f32 %v13440_v26, %v8773_v11  ;;  %v8830_v1 = vadd.f32 %v13458_v63, %v8777_v42  ;;  %v8785_v63 = vadd.f32 %v13442_v5, %v8732_v29  ;;  %v13711_v29 = vld [vmem:[#allocation7_spill] sm:$0xff] }
 0x315   : > { %v13573_v57 = vpop.f32.mrf.mxu1  ;;  %v8887_v7 = vadd.f32 %v13489_v22, %v8834_v31 }
 0x316   : > { %13704 = vst [vmem:[#allocation18_spill] sm:$0xff] %v13573_v57  ;;  %v8828_v9 = vadd.f32 %v13444_v0, %v8775_v28  ;;  %v8879_v48 = vadd.f32 %v13463_v8, %v8826_v50  ;;  %v8883_v28 = vadd.f32 %v13479_v21, %v8830_v1  ;;  %v8836_v8 = vadd.f32 %v13474_v27, %v8783_v10  ;;  %v13709_v50 = vld [vmem:[#allocation6_spill] sm:$0xff] }
 0x317   : > { %v13588_v57 = vpop.f32.mrf.mxu1  ;;  %v8940_v27 = vadd.f32 %v13523_v24, %v8887_v7 }
 0x318   : > { %v8881_v43 = vadd.f32 %v13471_v45, %v8828_v9  ;;  %v8932_v60 = vadd.f32 %v13504_v33, %v8879_v48  ;;  %v8838_v45 = vadd.f32 %v13484_v25, %v8785_v63  ;;  %v8936_v14 = vadd.f32 %v13519_v2, %v8883_v28  ;;  %v13710_v9 = vld [vmem:[#allocation11_spill] sm:$0xff]  ;;  %v13713_v48 = vld [vmem:[#allocation8_spill] sm:$0xff] }
 0x31a   : > { %v8934_v44 = vadd.f32 %v13512_v53, %v8881_v43  ;;  %v8985_v33 = vadd.f32 %v13521_v18, %v8932_v60  ;;  %v8891_v25 = vadd.f32 %v13507_v62, %v8838_v45  ;;  %v8993_v62 = vadd.f32 %v13706_v32, %v8940_v27 }
 0x31c   : > { %v8987_v53 = vadd.f32 %v13525_v51, %v8934_v44  ;;  %v9038_v2 = vadd.f32 %v13539_v36, %v8985_v33  ;;  %v8944_v51 = vadd.f32 %v13531_v4, %v8891_v25  ;;  %v13716_v44 = vld [vmem:[#allocation14_spill] sm:$0xff] }
 0x31e   : > { %v9040_v22 = vadd.f32 %v13543_v35, %v8987_v53  ;;  %v9091_v36 = vadd.f32 %v13708_v6, %v9038_v2 }
 0x320   : > { %v9093_v35 = vadd.f32 %v13555_v61, %v9040_v22 }
 0x337   : > { %v13567_v38 = vpop.f32.mrf.mxu0 }
 0x339   : > { %v13571_v40 = vpop.f32.mrf.mxu0 }
 0x33a   : > { %13703 = vst [vmem:[#allocation17_spill] sm:$0xff] %v13571_v40  ;;  %v8824_v40 = vadd.f32 %v13435_v15, %v8771_v46  ;;  %v8734_v15 = vadd.f32 %v13433_v49, %v8681_v54  ;;  %v13707_v46 = vld [vmem:[#allocation5_spill] sm:$0xff]  ;;  %v9046_v54 = vadd.f32 %v13710_v9, %v8993_v62 }
 0x33b   : > { %v13581_v39 = vpop.f32.mrf.mxu0 }
 0x33c   : > { %v8877_v58 = vadd.f32 %v13455_v20, %v8824_v40  ;;  %v8787_v49 = vadd.f32 %v13451_v56, %v8734_v15  ;;  %v8889_v56 = vadd.f32 %v13499_v37, %v8836_v8  ;;  %v9146_v15 = vadd.f32 %v13581_v39, %v9093_v35  ;;  %v13717_v8 = vld [vmem:[#allocation15_spill] sm:$0xff] }
 0x33d   : > { %v9194_v30 = vpop.f32.mrf.mxu1  ;;  %v9147_v59 = vpop.f32.mrf.mxu0 }
 0x33e   : > { %v8930_v26 = vadd.f32 %v13496_v13, %v8877_v58  ;;  %v8840_v5 = vadd.f32 %v13492_v3, %v8787_v49  ;;  %v8942_v18 = vadd.f32 %v13527_v34, %v8889_v56  ;;  %v9099_v49 = vadd.f32 %v13716_v44, %v9046_v54 }
 0x33f   : > { %v9196_v0 = vpop.f32.mrf.mxu1 }
 0x340   : > { %v8983_v13 = vadd.f32 %v13517_v17, %v8930_v26  ;;  %v8989_v17 = vadd.f32 %v13529_v23, %v8936_v14  ;;  %v8893_v3 = vadd.f32 %v13515_v16, %v8840_v5  ;;  %v8995_v34 = vadd.f32 %v13709_v50, %v8942_v18  ;;  %v13714_v26 = vld [vmem:[#allocation12_spill] sm:$0xff] }
 0x341   : > { %v9151_v20 = vpop.f32.mrf.mxu0  ;;  %v9198_v52 = vpop.f32.mrf.mxu1  ;;  %v13712_v1 = vld [vmem:[#allocation17_spill] sm:$0xff]  ;;  %v13718_v5 = vld [vmem:[#allocation16_spill] sm:$0xff] }
 0x342   : > { %v9036_v11 = vadd.f32 %v9035_v19, %v8983_v13  ;;  %v13705_v19 = vld [vmem:[#allocation9_spill] sm:$0xff]  ;;  %v8946_v23 = vadd.f32 %v13707_v46, %v8893_v3  ;;  %v9144_v41 = vadd.f32 %v13712_v1, %v9091_v36  ;;  %v9048_v61 = vadd.f32 %v13714_v26, %v8995_v34 }
 0x343   : > { %v9153_v21 = vpop.f32.mrf.mxu0  ;;  %v9200_v55 = vpop.f32.mrf.mxu1  ;;  %v9042_v24 = vadd.f32 %v13705_v19, %v8989_v17  ;;  %v9199_v14 = vadd.f32 %v9198_v52, %v9146_v15  ;;  %v9152_v33 = vadd.f32 %v9151_v20, %v9099_v49 }
 0x344   : > { %v9089_v37 = vadd.f32 %v13547_v47, %v9036_v11  ;;  %v8997_v47 = vadd.f32 %v13711_v29, %v8944_v51  ;;  %v8999_v43 = vadd.f32 %v13713_v48, %v8946_v23  ;;  %v9101_v39 = vadd.f32 %v13718_v5, %v9048_v61  ;;  %v13719_v11 = vld [vmem:[#allocation18_spill] sm:$0xff] }
 0x345   : > { %v9155_v40 = vpop.f32.mrf.mxu0  ;;  %v9095_v58 = vadd.f32 %v13559_v12, %v9042_v24  ;;  %v9197_v12 = vadd.f32 %v9196_v0, %v9144_v41 }
 0x346   : > { %v9142_v42 = vadd.f32 %v13567_v38, %v9089_v37  ;;  %v13715_v38 = vld [vmem:[#allocation13_spill] sm:$0xff]  ;;  %v9052_v45 = vadd.f32 %v13717_v8, %v8999_v43  ;;  %v9154_v2 = vadd.f32 %v9153_v21, %v9101_v39 }
 0x347   : > { %v9157_v4 = vpop.f32.mrf.mxu0  ;;  %v9050_v31 = vadd.f32 %v13715_v38, %v8997_v47  ;;  %v9148_v28 = vadd.f32 %v9147_v59, %v9095_v58 }
 0x348   : > { %v9195_v63 = vadd.f32 %v9194_v30, %v9142_v42  ;;  %v9105_v59 = vadd.f32 %v13588_v57, %v9052_v45 }
 0x349   : > { %v9204_v16 = vpop.f32.mrf.mxu1  ;;  %v9103_v56 = vadd.f32 %v13719_v11, %v9050_v31  ;;  %v9201_v27 = vadd.f32 %v9200_v55, %v9148_v28 }
 0x34a   : > { %v9205_v52 = vadd.f32 %v9204_v16, %v9152_v33  ;;  %v9158_v37 = vadd.f32 %v9157_v4, %v9105_v59 }
 0x34b   : > { %v9206_v60 = vpop.f32.mrf.mxu1  ;;  %v9156_v3 = vadd.f32 %v9155_v40, %v9103_v56 }
 0x34c   : > { %v9207_v23 = vadd.f32 %v9206_v60, %v9154_v2 }
 0x34d   : > { %v9208_v25 = vpop.f32.mrf.mxu1 }
 0x34e   : > { %v9209_v6 = vadd.f32 %v9208_v25, %v9156_v3 }
 0x34f   : > { %v9210_v24 = vpop.f32.mrf.mxu1 }
 0x350   : > { %v9211_v57 = vadd.f32 %v9210_v24, %v9158_v37 }
 0x357   : > { %v9247_v10 = vpop.f32.mrf.mxu0 }
 0x358   : > { %v9248_v7 = vadd.f32 %v9247_v10, %v9195_v63 }
 0x359   : > { %v9249_v13 = vpop.f32.mrf.mxu0 }
 0x35a   : > { %v9250_v17 = vadd.f32 %v9249_v13, %v9197_v12  ;;  %v9266_v18 = vmax.f32 %v9248_v7, 0.0 }
 0x35b   : > { %v9251_v53 = vpop.f32.mrf.mxu0 }
 0x35c   : > { %v9252_v30 = vadd.f32 %v9251_v53, %v9199_v14  ;;  %v9267_v20 = vmax.f32 %v9250_v17, 0.0 }
 0x35d   : > { %v9253_v22 = vpop.f32.mrf.mxu0 }
 0x35e   : > { %v9268_v51 = vmax.f32 %v9252_v30, 0.0  ;;  %v9254_v0 = vadd.f32 %v9253_v22, %v9201_v27 }
 0x35f   : > { %v9257_v19 = vpop.f32.mrf.mxu0 }
 0x360   : > { %v9274_v32 = vadd.f32 %v9268_v51, %v9266_v18  ;;  %v9269_v62 = vmax.f32 %v9254_v0, 0.0  ;;  %v9258_v46 = vadd.f32 %v9257_v19, %v9205_v52 }
 0x361   : > { %v9259_v55 = vpop.f32.mrf.mxu0 }
 0x362   : > { %v9275_v36 = vrot.slane %v9274_v32, 4  ;;  %v9281_v35 = vadd.f32 %v9269_v62, %v9267_v20  ;;  %v9260_v50 = vadd.f32 %v9259_v55, %v9207_v23  ;;  %v9270_v9 = vmax.f32 %v9258_v46, 0.0 }
 0x363   : > { %v9261_v21 = vpop.f32.mrf.mxu0 }
 0x364   : > { %v9276_v42 = vadd.f32 %v9275_v36, %v9274_v32  ;;  %v9282_v40 = vrot.slane %v9281_v35, 4  ;;  %v9262_v34 = vadd.f32 %v9261_v21, %v9209_v6  ;;  %v9271_v1 = vmax.f32 %v9260_v50, 0.0 }
 0x365   : > { %v9263_v16 = vpop.f32.mrf.mxu0 }
 0x366   : > { %v9277_v54 = vrot.slane %v9276_v42, 2  ;;  %v9283_v4 = vadd.f32 %v9282_v40, %v9281_v35  ;;  %v9272_v29 = vmax.f32 %v9262_v34, 0.0  ;;  %v9264_v47 = vadd.f32 %v9263_v16, %v9211_v57 }
 0x368   : > { %v9284_v58 = vrot.slane %v9283_v4, 2  ;;  %v9288_v41 = vadd.f32 %v9272_v29, %v9270_v9  ;;  %v9273_v15 = vmax.f32 %v9264_v47, 0.0  ;;  %v9278_v48 = vadd.f32 %v9277_v54, %v9276_v42 }
 0x36a   : > { %v9289_v43 = vrot.slane %v9288_v41, 4  ;;  %v9295_v26 = vadd.f32 %v9273_v15, %v9271_v1  ;;  %v9285_v61 = vadd.f32 %v9284_v58, %v9283_v4  ;;  %v9279_v31 = vrot.slane %v9278_v48, 1 }
 0x36c   : > { %v9290_v10 = vadd.f32 %v9289_v43, %v9288_v41  ;;  %v9296_v38 = vrot.slane %v9295_v26, 4  ;;  %v9286_v49 = vrot.slane %v9285_v61, 1  ;;  %v9280_v8 = vadd.f32 %v9279_v31, %v9278_v48 }
 0x36e   : > { %v9291_v63 = vrot.slane %v9290_v10, 2  ;;  %v9297_v28 = vadd.f32 %v9296_v38, %v9295_v26  ;;  %v9287_v14 = vadd.f32 %v9286_v49, %v9285_v61  ;;  %v9303_v5 = vmul.f32 0.0625, %v9280_v8 }
 0x370   : > { %v9292_v60 = vadd.f32 %v9291_v63, %v9290_v10  ;;  %v9298_v44 = vrot.slane %v9297_v28, 2  ;;  %v9304_v53 = vmul.f32 0.0625, %v9287_v14 }
 0x372   : > { %v9293_v45 = vrot.slane %v9292_v60, 1  ;;  %v9299_v13 = vadd.f32 %v9298_v44, %v9297_v28 }
 0x374   : > { %v9294_v12 = vadd.f32 %v9293_v45, %v9292_v60  ;;  %v9300_v7 = vrot.slane %v9299_v13, 1 }
 0x376   : > { %v9305_v39 = vmul.f32 0.0625, %v9294_v12  ;;  %v9301_v33 = vadd.f32 %v9300_v7, %v9299_v13 }
 0x378   : > { %v9306_v11 = vmul.f32 0.0625, %v9301_v33  ;;  %v9344_v56 = vsel %vm9343_vm5, %v9305_v39, %v9303_v5 }
 0x37a   : > { %v9345_v27 = vsel %vm9343_vm5, %v9306_v11, %v9304_v53 }
 0x37b   : > { %9412 = vmatprep.mubr.f32.mxu1 %v9345_v27 }
 0x37c   : > { %9413 = vmatmul.mubr.f32.vlgmr.msra.gmra.mxu1 %v9344_v56 }
 0x43c   : > { %v10551_v25 = vpop.f32.mrf.mxu1 }
 0x43e   : > { %v10552_v17 = vpop.f32.mrf.mxu1 }
 0x43f   : > { %v10553_v30 = vadd.f32 %v10552_v17, %v10551_v25 }
 0x441   : > { %9419 = vst.msk [vmem:[%s1914_s8] sm:$0x3] %vm9418_vm6, %v10553_v30 }
 0x442 PF: > { %s14_s19 = sadd.s32 1, %s11328_s19   ;;  %s13720_s15 = smov %s11316_s16 }
 0x443   : > { %p11_p12 = scmp.ge.s32.totalorder %s14_s19, 5   ;;  %s13721_s16 = smov %s11391_s23 }
 0x444   : > { %s13722_s17 = smov %s11324_s18  ;;  %s13723_s18 = smov %s13725_s20 }
 0x445   :  { %13 = sbr.rel (!%p11_p12) target bundleno = 3 (0x3), region = 122 }

</bundles_post_ra>
